<compile_context>
chip_gen: v7x
topology: tpu7x:2x2x1
jax: 0.10.0
libtpu: 0.0.40
codegen_flags: <defaults>
</compile_context>

<pallas_src>
import math

import jax
import jax.numpy as jnp
from jax import lax
from jax.experimental import pallas as pl
from jax.experimental.pallas import tpu as pltpu


# ---------------------------------------------------------------------------
# The single fused kernel.
# ---------------------------------------------------------------------------
def _mobtep_fused_kernel(xp_ref, txt_ref, pat_ref,
                         tcn_w_ref, tcn_b_ref,
                         w_fn_ref, w_pv_ref, w_ft_ref,
                         proto_ref, w_q_ref, w_kv_ref, w_out_ref,
                         bias_ref, o_ref):
    f32, bf16 = jnp.float32, jnp.bfloat16

    b, t_pad, _ = xp_ref.shape
    k_conv, _, tcn_emb = tcn_w_ref.shape
    t = t_pad - (k_conv - 1)
    d_model = w_q_ref.shape[0]
    scale = 1.0 / math.sqrt(d_model)

    biases = bias_ref[...]                                    # (5, D) f32
    tcn_b = tcn_b_ref[...]                                    # (1, E_tcn) f32

    # --- TCNEncoder: causal conv1d(k) -> ReLU -> mean pool over time --------
    # K shifted (T, C) @ (C, E) dots per batch row (im2col done in-kernel,
    # no blown-up activations in HBM).  B is a tiny static constant.
    num_rows = []
    for bi in range(b):
        acc = jnp.zeros((t, tcn_emb), f32)
        for k in range(k_conv):
            xk = xp_ref[bi, k:k + t, :].astype(bf16)          # (T, C)
            wk = tcn_w_ref[k]                                 # (C, E_tcn) bf16
            acc = acc + jnp.dot(xk, wk, preferred_element_type=f32)
        acc = jnp.maximum(acc + tcn_b, 0.0)
        num_rows.append(jnp.mean(acc, axis=0, keepdims=True))  # (1, E_tcn)
    numeric = jnp.concatenate(num_rows, axis=0)               # (B, E_tcn)

    # --- SentenceBERT / ViT pooling (pooled before their linear maps) -------
    txt_mean = jnp.mean(txt_ref[...], axis=1)                 # (B, D)
    pat_mean = jnp.mean(pat_ref[...], axis=1)                 # (B, patch_dim)

    # --- LinearFusion (ViT patch-embed and W_fv pre-folded into w_pv) -------
    fused = (jnp.dot(numeric.astype(bf16), w_fn_ref[...],
                     preferred_element_type=f32)
             + jnp.dot(pat_mean.astype(bf16), w_pv_ref[...],
                       preferred_element_type=f32)
             + jnp.dot(txt_mean.astype(bf16), w_ft_ref[...],
                       preferred_element_type=f32)
             + biases[0:1, :])                                 # (B, D)

    # --- CrossAttentionWithPrototypes (query seq-len 1 per batch) -----------
    q = jnp.dot(fused.astype(bf16), w_q_ref[...],
                preferred_element_type=f32) + biases[1:2, :]   # (B, D)
    kv = jnp.dot(proto_ref[...], w_kv_ref[...],
                 preferred_element_type=f32)                   # (P, 2D)
    key = kv[:, :d_model] + biases[2:3, :]                     # (P, D)
    val = kv[:, d_model:] + biases[3:4, :]                     # (P, D)

    scores = lax.dot_general(q.astype(bf16), key.astype(bf16),
                             dimension_numbers=(((1,), (1,)), ((), ())),
                             preferred_element_type=f32) * scale   # (B, P)
    scores = scores - jnp.max(scores, axis=-1, keepdims=True)
    p = jnp.exp(scores)
    attn = p * pl.reciprocal(jnp.sum(p, axis=-1, keepdims=True), approx=True)
    ctx = jnp.dot(attn.astype(bf16), val.astype(bf16),
                  preferred_element_type=f32)                  # (B, D)

    # --- output head (W_o @ W_proj pre-folded when use_linear_proj) ---------
    out = jnp.dot(ctx.astype(bf16), w_out_ref[...],
                  preferred_element_type=f32) + biases[4:5, :]
    o_ref[...] = out.astype(o_ref.dtype)


# ---------------------------------------------------------------------------
# Parameter construction (deterministic, synthetic -- no checkpoint loading).
# Raw params mirror the PyTorch module's layout.
# ---------------------------------------------------------------------------
def init_params(key, *, c_ts, kernel_size, tcn_emb, d_model, patch_dim, n_proto):
    ks = jax.random.split(key, 16)
    std = 0.02

    def w(k, shape):
        return jax.random.normal(k, shape, jnp.float32) * std

    xavier_lim = math.sqrt(6.0 / (d_model + d_model))
    return {
        # TCN causal conv (rows ordered [tap0 channels, tap1 channels, ...])
        "tcn_w": w(ks[0], (kernel_size * c_ts, tcn_emb)),
        "tcn_b": jnp.zeros((1, tcn_emb), jnp.float32),
        # ViT patch embedding
        "patch_w": w(ks[1], (patch_dim, d_model)),
        "patch_b": jnp.zeros((1, d_model), jnp.float32),
        # LinearFusion (split columns of the concat weight)
        "w_fn": w(ks[2], (tcn_emb, d_model)),
        "w_fv": w(ks[3], (d_model, d_model)),
        "w_ft": w(ks[4], (d_model, d_model)),
        "b_f": jnp.zeros((1, d_model), jnp.float32),
        # Prototype embeddings (stand-in for SBERT-encoded prototype_words)
        "prototypes": w(ks[5], (n_proto, d_model)),
        # Cross attention projections
        "w_q": w(ks[6], (d_model, d_model)),
        "w_k": w(ks[7], (d_model, d_model)),
        "w_v": w(ks[8], (d_model, d_model)),
        "w_o": w(ks[9], (d_model, d_model)),
        "b_q": jnp.zeros((1, d_model), jnp.float32),
        "b_k": jnp.zeros((1, d_model), jnp.float32),
        "b_v": jnp.zeros((1, d_model), jnp.float32),
        "b_o": jnp.zeros((1, d_model), jnp.float32),
        # Optional linear_proj (xavier-uniform weight, zero bias)
        "w_proj": jax.random.uniform(ks[10], (d_model, d_model), jnp.float32,
                                     -xavier_lim, xavier_lim),
        "b_proj": jnp.zeros((1, d_model), jnp.float32),
    }


# ---------------------------------------------------------------------------
# One-time algebraic pre-folding + bf16 cast of the kernel-side parameters.
#   visual: mean(patches) @ (patch_w @ w_fv) + (patch_b @ w_fv)    (exact)
#   output: ctx @ (w_o @ w_proj) + (b_o @ w_proj + b_proj)         (exact)
#   k/v   : packed into one (D, 2D) weight; 768-wide biases packed (5, D)
# ---------------------------------------------------------------------------
def fold_params(params, use_linear_proj, *, kernel_size, c_ts):
    f32, bf16 = jnp.float32, jnp.bfloat16
    d_model = params["w_q"].shape[0]

    w_pv = params["patch_w"] @ params["w_fv"]                       # (pd, D)
    b_fused = params["b_f"] + params["patch_b"] @ params["w_fv"]    # (1, D)

    if use_linear_proj:
        w_out = params["w_o"] @ params["w_proj"]
        b_out = params["b_o"] @ params["w_proj"] + params["b_proj"]
    else:
        w_out = params["w_o"]
        b_out = params["b_o"]

    w_kv = jnp.concatenate([params["w_k"], params["w_v"]], axis=1)  # (D, 2D)
    bias_pack = jnp.concatenate(
        [b_fused, params["b_q"], params["b_k"], params["b_v"], b_out],
        axis=0).astype(f32)                                         # (5, D)

    tcn_emb = params["tcn_w"].shape[1]
    tcn_w = params["tcn_w"].reshape(kernel_size, c_ts, tcn_emb)     # (K, C, E)

    return {
        "tcn_w": tcn_w.astype(bf16),
        "tcn_b": params["tcn_b"].astype(f32),
        "w_fn": params["w_fn"].astype(bf16),
        "w_pv": w_pv.astype(bf16),
        "w_ft": params["w_ft"].astype(bf16),
        "prototypes": params["prototypes"].astype(bf16),
        "w_q": params["w_q"].astype(bf16),
        "w_kv": w_kv.astype(bf16),
        "w_out": w_out.astype(bf16),
        "bias": bias_pack,
        "d_model": d_model,
    }


# ---------------------------------------------------------------------------
# Full forward pass (output_text=False path of Mobtep.forward).
# Only layout-only prep (transpose / pad / patch extraction) stays in JAX.
# ---------------------------------------------------------------------------
def mobtep_forward(kparams, ts_input, text_input, visual_input,
                   kernel_size=3, patch=8):
    b, c_ts, t = ts_input.shape
    d_model = kparams["d_model"]

    # TCN input: channels-last + causal left pad (layout only).
    x = jnp.transpose(ts_input, (0, 2, 1))                        # (B, T, C)
    xp = jnp.pad(x, ((0, 0), (kernel_size - 1, 0), (0, 0)))       # (B, T+K-1, C)

    # ViT input: extract (B, NP, C*P*P) patch rows (layout only).
    _, c_img, h_img, w_img = visual_input.shape
    gp_h, gp_w = h_img // patch, w_img // patch
    patches = visual_input.reshape(b, c_img, gp_h, patch, gp_w, patch)
    patches = jnp.transpose(patches, (0, 2, 4, 1, 3, 5)).reshape(
        b, gp_h * gp_w, c_img * patch * patch)                    # (B, NP, C*P*P)

    args = (xp, text_input, patches,
            kparams["tcn_w"], kparams["tcn_b"],
            kparams["w_fn"], kparams["w_pv"], kparams["w_ft"],
            kparams["prototypes"], kparams["w_q"], kparams["w_kv"],
            kparams["w_out"], kparams["bias"])

    # No grid: everything (≈7 MB bf16 weights + tiny activations) fits in
    # VMEM and M<=32.  For realistic batch/seq sizes, tile M into 128/256-row
    # blocks with a ("parallel", ..., "arbitrary") grid instead.
    out = pl.pallas_call(
        _mobtep_fused_kernel,
        out_shape=jax.ShapeDtypeStruct((b, d_model), jnp.float32),
        in_specs=[pl.BlockSpec(memory_space=pltpu.MemorySpace.VMEM)] * len(args),
        out_specs=pl.BlockSpec(memory_space=pltpu.MemorySpace.VMEM),
        compiler_params=pltpu.CompilerParams(vmem_limit_bytes=32 * 1024 * 1024),
    )(*args)

    # fused_embedding.unsqueeze(1): attention query had seq-len 1, restore it.
    return out[:, None, :]                                        # (B, 1, 768)

    # TODO(synk): generate_captions / GPT2LMHeadModel.generate (output_text=True
    # path) is an autoregressive beam search over a pretrained LM and has no
    # Pallas equivalent here.


if __name__ == "__main__":
    B = 2
    C_TS, T = 4, 16            # time-series channels / length
    S_TXT, D_MODEL = 8, 768    # text tokens / model dim
    IMG_C, IMG_H, IMG_W, PATCH = 3, 16, 16, 8
    TCN_EMB = 64
    N_PROTO = 8
    K_CONV = 3

    root = jax.random.PRNGKey(0)
    k_ts, k_txt, k_img, k_par = jax.random.split(root, 4)

    ts_input = jax.random.normal(k_ts, (B, C_TS, T), jnp.float32)
    # TODO(synk): pretrained SentenceBERT stack not translated; text enters as
    # pre-embedded tokens and is mean-pooled (SBERT pooling) inside the kernel.
    text_input = jax.random.normal(k_txt, (B, S_TXT, D_MODEL), jnp.float32)
    # TODO(synk): pretrained ViT transformer blocks / CLS token not translated;
    # the visual branch is patch-embedding + mean pooling (folded, exact).
    visual_input = jax.random.normal(k_img, (B, IMG_C, IMG_H, IMG_W), jnp.float32)

    params = init_params(k_par, c_ts=C_TS, kernel_size=K_CONV, tcn_emb=TCN_EMB,
                         d_model=D_MODEL, patch_dim=IMG_C * PATCH * PATCH,
                         n_proto=N_PROTO)
    kparams = fold_params(params, use_linear_proj=True,
                          kernel_size=K_CONV, c_ts=C_TS)

    out = mobtep_forward(kparams, ts_input, text_input, visual_input,
                         kernel_size=K_CONV, patch=PATCH)
    out = jax.block_until_ready(out)

    assert out.shape == (B, 1, D_MODEL), out.shape
    assert jnp.all(jnp.isfinite(out))
    print("KERNEL_OK")
</pallas_src>

<mosaic_0001>
module attributes {stable_mosaic.version = 11 : i64} {
  func.func @_mobtep_fused_kernel(%arg0: memref<2x18x4xf32, #tpu.memory_space<vmem>>, %arg1: memref<2x8x768xf32, #tpu.memory_space<vmem>>, %arg2: memref<2x4x192xf32, #tpu.memory_space<vmem>>, %arg3: memref<3x4x64xbf16, #tpu.memory_space<vmem>>, %arg4: memref<1x64xf32, #tpu.memory_space<vmem>>, %arg5: memref<64x768xbf16, #tpu.memory_space<vmem>>, %arg6: memref<192x768xbf16, #tpu.memory_space<vmem>>, %arg7: memref<768x768xbf16, #tpu.memory_space<vmem>>, %arg8: memref<8x768xbf16, #tpu.memory_space<vmem>>, %arg9: memref<768x768xbf16, #tpu.memory_space<vmem>>, %arg10: memref<768x1536xbf16, #tpu.memory_space<vmem>>, %arg11: memref<768x768xbf16, #tpu.memory_space<vmem>>, %arg12: memref<5x768xf32, #tpu.memory_space<vmem>>, %arg13: memref<2x768xf32, #tpu.memory_space<vmem>>) attributes {dimension_semantics = [], scalar_prefetch = 0 : i64, scratch_operands = 0 : i64, tpu.core_type = #tpu.core_type<tc>} {
    %c0 = arith.constant 0 : index
    %c0_0 = arith.constant 0 : index
    %0 = vector.load %arg12[%c0, %c0_0] : memref<5x768xf32, #tpu.memory_space<vmem>>, vector<5x768xf32>
    %c0_1 = arith.constant 0 : index
    %c0_2 = arith.constant 0 : index
    %1 = vector.load %arg4[%c0_1, %c0_2] : memref<1x64xf32, #tpu.memory_space<vmem>>, vector<1x64xf32>
    %cst = arith.constant 0.000000e+00 : f32
    %2 = vector.broadcast %cst : f32 to vector<16x64xf32>
    %c0_3 = arith.constant 0 : index
    %c0_4 = arith.constant 0 : index
    %c0_5 = arith.constant 0 : index
    %3 = vector.load %arg0[%c0_3, %c0_4, %c0_5] : memref<2x18x4xf32, #tpu.memory_space<vmem>>, vector<1x16x4xf32>
    %4 = vector.shape_cast %3 : vector<1x16x4xf32> to vector<16x4xf32>
    %5 = arith.truncf %4 : vector<16x4xf32> to vector<16x4xbf16>
    %c0_6 = arith.constant 0 : index
    %c0_7 = arith.constant 0 : index
    %c0_8 = arith.constant 0 : index
    %6 = vector.load %arg3[%c0_6, %c0_7, %c0_8] : memref<3x4x64xbf16, #tpu.memory_space<vmem>>, vector<1x4x64xbf16>
    %7 = vector.shape_cast %6 : vector<1x4x64xbf16> to vector<4x64xbf16>
    %cst_9 = arith.constant dense<0.000000e+00> : vector<16x64xf32>
    %8 = tpu.matmul %5, %7, %cst_9 {dimension_numbers = #tpu.dot_dimension_numbers<[1], [0], [0], [1], [0, 0, 1, 1], [], []>} : vector<16x4xbf16>, vector<4x64xbf16>, vector<16x64xf32> -> vector<16x64xf32>
    %9 = arith.addf %2, %8 : vector<16x64xf32>
    %c0_10 = arith.constant 0 : index
    %c1 = arith.constant 1 : index
    %c0_11 = arith.constant 0 : index
    %10 = vector.load %arg0[%c0_10, %c1, %c0_11] : memref<2x18x4xf32, #tpu.memory_space<vmem>>, vector<1x16x4xf32>
    %11 = vector.shape_cast %10 : vector<1x16x4xf32> to vector<16x4xf32>
    %12 = arith.truncf %11 : vector<16x4xf32> to vector<16x4xbf16>
    %c1_12 = arith.constant 1 : index
    %c0_13 = arith.constant 0 : index
    %c0_14 = arith.constant 0 : index
    %13 = vector.load %arg3[%c1_12, %c0_13, %c0_14] : memref<3x4x64xbf16, #tpu.memory_space<vmem>>, vector<1x4x64xbf16>
    %14 = vector.shape_cast %13 : vector<1x4x64xbf16> to vector<4x64xbf16>
    %cst_15 = arith.constant dense<0.000000e+00> : vector<16x64xf32>
    %15 = tpu.matmul %12, %14, %cst_15 {dimension_numbers = #tpu.dot_dimension_numbers<[1], [0], [0], [1], [0, 0, 1, 1], [], []>} : vector<16x4xbf16>, vector<4x64xbf16>, vector<16x64xf32> -> vector<16x64xf32>
    %16 = arith.addf %9, %15 : vector<16x64xf32>
    %c0_16 = arith.constant 0 : index
    %c2 = arith.constant 2 : index
    %c0_17 = arith.constant 0 : index
    %17 = vector.load %arg0[%c0_16, %c2, %c0_17] : memref<2x18x4xf32, #tpu.memory_space<vmem>>, vector<1x16x4xf32>
    %18 = vector.shape_cast %17 : vector<1x16x4xf32> to vector<16x4xf32>
    %19 = arith.truncf %18 : vector<16x4xf32> to vector<16x4xbf16>
    %c2_18 = arith.constant 2 : index
    %c0_19 = arith.constant 0 : index
    %c0_20 = arith.constant 0 : index
    %20 = vector.load %arg3[%c2_18, %c0_19, %c0_20] : memref<3x4x64xbf16, #tpu.memory_space<vmem>>, vector<1x4x64xbf16>
    %21 = vector.shape_cast %20 : vector<1x4x64xbf16> to vector<4x64xbf16>
    %cst_21 = arith.constant dense<0.000000e+00> : vector<16x64xf32>
    %22 = tpu.matmul %19, %21, %cst_21 {dimension_numbers = #tpu.dot_dimension_numbers<[1], [0], [0], [1], [0, 0, 1, 1], [], []>} : vector<16x4xbf16>, vector<4x64xbf16>, vector<16x64xf32> -> vector<16x64xf32>
    %23 = arith.addf %16, %22 : vector<16x64xf32>
    %24 = vector.broadcast %1 : vector<1x64xf32> to vector<16x64xf32>
    %25 = arith.addf %23, %24 : vector<16x64xf32>
    %cst_22 = arith.constant 0.000000e+00 : f32
    %26 = vector.broadcast %cst_22 : f32 to vector<16x64xf32>
    %27 = arith.maximumf %25, %26 : vector<16x64xf32>
    %cst_23 = arith.constant dense<0.000000e+00> : vector<64xf32>
    %28 = vector.multi_reduction <add>, %27, %cst_23 [0] : vector<16x64xf32> to vector<64xf32>
    %29 = vector.shape_cast %28 : vector<64xf32> to vector<1x64xf32>
    %cst_24 = arith.constant 1.600000e+01 : f32
    %30 = vector.broadcast %cst_24 : f32 to vector<1x64xf32>
    %31 = arith.divf %29, %30 : vector<1x64xf32>
    %cst_25 = arith.constant 0.000000e+00 : f32
    %32 = vector.broadcast %cst_25 : f32 to vector<16x64xf32>
    %c1_26 = arith.constant 1 : index
    %c0_27 = arith.constant 0 : index
    %c0_28 = arith.constant 0 : index
    %33 = vector.load %arg0[%c1_26, %c0_27, %c0_28] : memref<2x18x4xf32, #tpu.memory_space<vmem>>, vector<1x16x4xf32>
    %34 = vector.shape_cast %33 : vector<1x16x4xf32> to vector<16x4xf32>
    %35 = arith.truncf %34 : vector<16x4xf32> to vector<16x4xbf16>
    %c0_29 = arith.constant 0 : index
    %c0_30 = arith.constant 0 : index
    %c0_31 = arith.constant 0 : index
    %36 = vector.load %arg3[%c0_29, %c0_30, %c0_31] : memref<3x4x64xbf16, #tpu.memory_space<vmem>>, vector<1x4x64xbf16>
    %37 = vector.shape_cast %36 : vector<1x4x64xbf16> to vector<4x64xbf16>
    %cst_32 = arith.constant dense<0.000000e+00> : vector<16x64xf32>
    %38 = tpu.matmul %35, %37, %cst_32 {dimension_numbers = #tpu.dot_dimension_numbers<[1], [0], [0], [1], [0, 0, 1, 1], [], []>} : vector<16x4xbf16>, vector<4x64xbf16>, vector<16x64xf32> -> vector<16x64xf32>
    %39 = arith.addf %32, %38 : vector<16x64xf32>
    %c1_33 = arith.constant 1 : index
    %c1_34 = arith.constant 1 : index
    %c0_35 = arith.constant 0 : index
    %40 = vector.load %arg0[%c1_33, %c1_34, %c0_35] : memref<2x18x4xf32, #tpu.memory_space<vmem>>, vector<1x16x4xf32>
    %41 = vector.shape_cast %40 : vector<1x16x4xf32> to vector<16x4xf32>
    %42 = arith.truncf %41 : vector<16x4xf32> to vector<16x4xbf16>
    %c1_36 = arith.constant 1 : index
    %c0_37 = arith.constant 0 : index
    %c0_38 = arith.constant 0 : index
    %43 = vector.load %arg3[%c1_36, %c0_37, %c0_38] : memref<3x4x64xbf16, #tpu.memory_space<vmem>>, vector<1x4x64xbf16>
    %44 = vector.shape_cast %43 : vector<1x4x64xbf16> to vector<4x64xbf16>
    %cst_39 = arith.constant dense<0.000000e+00> : vector<16x64xf32>
    %45 = tpu.matmul %42, %44, %cst_39 {dimension_numbers = #tpu.dot_dimension_numbers<[1], [0], [0], [1], [0, 0, 1, 1], [], []>} : vector<16x4xbf16>, vector<4x64xbf16>, vector<16x64xf32> -> vector<16x64xf32>
    %46 = arith.addf %39, %45 : vector<16x64xf32>
    %c1_40 = arith.constant 1 : index
    %c2_41 = arith.constant 2 : index
    %c0_42 = arith.constant 0 : index
    %47 = vector.load %arg0[%c1_40, %c2_41, %c0_42] : memref<2x18x4xf32, #tpu.memory_space<vmem>>, vector<1x16x4xf32>
    %48 = vector.shape_cast %47 : vector<1x16x4xf32> to vector<16x4xf32>
    %49 = arith.truncf %48 : vector<16x4xf32> to vector<16x4xbf16>
    %c2_43 = arith.constant 2 : index
    %c0_44 = arith.constant 0 : index
    %c0_45 = arith.constant 0 : index
    %50 = vector.load %arg3[%c2_43, %c0_44, %c0_45] : memref<3x4x64xbf16, #tpu.memory_space<vmem>>, vector<1x4x64xbf16>
    %51 = vector.shape_cast %50 : vector<1x4x64xbf16> to vector<4x64xbf16>
    %cst_46 = arith.constant dense<0.000000e+00> : vector<16x64xf32>
    %52 = tpu.matmul %49, %51, %cst_46 {dimension_numbers = #tpu.dot_dimension_numbers<[1], [0], [0], [1], [0, 0, 1, 1], [], []>} : vector<16x4xbf16>, vector<4x64xbf16>, vector<16x64xf32> -> vector<16x64xf32>
    %53 = arith.addf %46, %52 : vector<16x64xf32>
    %54 = vector.broadcast %1 : vector<1x64xf32> to vector<16x64xf32>
    %55 = arith.addf %53, %54 : vector<16x64xf32>
    %cst_47 = arith.constant 0.000000e+00 : f32
    %56 = vector.broadcast %cst_47 : f32 to vector<16x64xf32>
    %57 = arith.maximumf %55, %56 : vector<16x64xf32>
    %cst_48 = arith.constant dense<0.000000e+00> : vector<64xf32>
    %58 = vector.multi_reduction <add>, %57, %cst_48 [0] : vector<16x64xf32> to vector<64xf32>
    %59 = vector.shape_cast %58 : vector<64xf32> to vector<1x64xf32>
    %cst_49 = arith.constant 1.600000e+01 : f32
    %60 = vector.broadcast %cst_49 : f32 to vector<1x64xf32>
    %61 = arith.divf %59, %60 : vector<1x64xf32>
    %62 = tpu.concatenate %31, %61 in 0 : vector<1x64xf32>, vector<1x64xf32> -> vector<2x64xf32>
    %c0_50 = arith.constant 0 : index
    %c0_51 = arith.constant 0 : index
    %c0_52 = arith.constant 0 : index
    %63 = vector.load %arg1[%c0_50, %c0_51, %c0_52] : memref<2x8x768xf32, #tpu.memory_space<vmem>>, vector<2x8x768xf32>
    %cst_53 = arith.constant dense<0.000000e+00> : vector<2x768xf32>
    %64 = vector.multi_reduction <add>, %63, %cst_53 [1] : vector<2x8x768xf32> to vector<2x768xf32>
    %cst_54 = arith.constant 8.000000e+00 : f32
    %65 = vector.broadcast %cst_54 : f32 to vector<2x768xf32>
    %66 = arith.divf %64, %65 : vector<2x768xf32>
    %c0_55 = arith.constant 0 : index
    %c0_56 = arith.constant 0 : index
    %c0_57 = arith.constant 0 : index
    %67 = vector.load %arg2[%c0_55, %c0_56, %c0_57] : memref<2x4x192xf32, #tpu.memory_space<vmem>>, vector<2x4x192xf32>
    %cst_58 = arith.constant dense<0.000000e+00> : vector<2x192xf32>
    %68 = vector.multi_reduction <add>, %67, %cst_58 [1] : vector<2x4x192xf32> to vector<2x192xf32>
    %cst_59 = arith.constant 4.000000e+00 : f32
    %69 = vector.broadcast %cst_59 : f32 to vector<2x192xf32>
    %70 = arith.divf %68, %69 : vector<2x192xf32>
    %71 = arith.truncf %62 : vector<2x64xf32> to vector<2x64xbf16>
    %c0_60 = arith.constant 0 : index
    %c0_61 = arith.constant 0 : index
    %72 = vector.load %arg5[%c0_60, %c0_61] : memref<64x768xbf16, #tpu.memory_space<vmem>>, vector<64x768xbf16>
    %cst_62 = arith.constant dense<0.000000e+00> : vector<2x768xf32>
    %73 = tpu.matmul %71, %72, %cst_62 {dimension_numbers = #tpu.dot_dimension_numbers<[1], [0], [0], [1], [0, 0, 1, 1], [], []>} : vector<2x64xbf16>, vector<64x768xbf16>, vector<2x768xf32> -> vector<2x768xf32>
    %74 = arith.truncf %70 : vector<2x192xf32> to vector<2x192xbf16>
    %c0_63 = arith.constant 0 : index
    %c0_64 = arith.constant 0 : index
    %75 = vector.load %arg6[%c0_63, %c0_64] : memref<192x768xbf16, #tpu.memory_space<vmem>>, vector<192x768xbf16>
    %cst_65 = arith.constant dense<0.000000e+00> : vector<2x768xf32>
    %76 = tpu.matmul %74, %75, %cst_65 {dimension_numbers = #tpu.dot_dimension_numbers<[1], [0], [0], [1], [0, 0, 1, 1], [], []>} : vector<2x192xbf16>, vector<192x768xbf16>, vector<2x768xf32> -> vector<2x768xf32>
    %77 = arith.addf %73, %76 : vector<2x768xf32>
    %78 = arith.truncf %66 : vector<2x768xf32> to vector<2x768xbf16>
    %c0_66 = arith.constant 0 : index
    %c0_67 = arith.constant 0 : index
    %79 = vector.load %arg7[%c0_66, %c0_67] : memref<768x768xbf16, #tpu.memory_space<vmem>>, vector<768x768xbf16>
    %cst_68 = arith.constant dense<0.000000e+00> : vector<2x768xf32>
    %80 = tpu.matmul %78, %79, %cst_68 {dimension_numbers = #tpu.dot_dimension_numbers<[1], [0], [0], [1], [0, 0, 1, 1], [], []>} : vector<2x768xbf16>, vector<768x768xbf16>, vector<2x768xf32> -> vector<2x768xf32>
    %81 = arith.addf %77, %80 : vector<2x768xf32>
    %82 = vector.extract_strided_slice %0 {offsets = [0, 0], sizes = [1, 768], strides = [1, 1]} : vector<5x768xf32> to vector<1x768xf32>
    %83 = vector.broadcast %82 : vector<1x768xf32> to vector<2x768xf32>
    %84 = arith.addf %81, %83 : vector<2x768xf32>
    %85 = arith.truncf %84 : vector<2x768xf32> to vector<2x768xbf16>
    %c0_69 = arith.constant 0 : index
    %c0_70 = arith.constant 0 : index
    %86 = vector.load %arg9[%c0_69, %c0_70] : memref<768x768xbf16, #tpu.memory_space<vmem>>, vector<768x768xbf16>
    %cst_71 = arith.constant dense<0.000000e+00> : vector<2x768xf32>
    %87 = tpu.matmul %85, %86, %cst_71 {dimension_numbers = #tpu.dot_dimension_numbers<[1], [0], [0], [1], [0, 0, 1, 1], [], []>} : vector<2x768xbf16>, vector<768x768xbf16>, vector<2x768xf32> -> vector<2x768xf32>
    %88 = vector.extract_strided_slice %0 {offsets = [1, 0], sizes = [1, 768], strides = [1, 1]} : vector<5x768xf32> to vector<1x768xf32>
    %89 = vector.broadcast %88 : vector<1x768xf32> to vector<2x768xf32>
    %90 = arith.addf %87, %89 : vector<2x768xf32>
    %c0_72 = arith.constant 0 : index
    %c0_73 = arith.constant 0 : index
    %91 = vector.load %arg8[%c0_72, %c0_73] : memref<8x768xbf16, #tpu.memory_space<vmem>>, vector<8x768xbf16>
    %c0_74 = arith.constant 0 : index
    %c0_75 = arith.constant 0 : index
    %92 = vector.load %arg10[%c0_74, %c0_75] : memref<768x1536xbf16, #tpu.memory_space<vmem>>, vector<768x1536xbf16>
    %cst_76 = arith.constant dense<0.000000e+00> : vector<8x1536xf32>
    %93 = tpu.matmul %91, %92, %cst_76 {dimension_numbers = #tpu.dot_dimension_numbers<[1], [0], [0], [1], [0, 0, 1, 1], [], []>} : vector<8x768xbf16>, vector<768x1536xbf16>, vector<8x1536xf32> -> vector<8x1536xf32>
    %94 = vector.extract_strided_slice %93 {offsets = [0, 0], sizes = [8, 768], strides = [1, 1]} : vector<8x1536xf32> to vector<8x768xf32>
    %95 = vector.extract_strided_slice %0 {offsets = [2, 0], sizes = [1, 768], strides = [1, 1]} : vector<5x768xf32> to vector<1x768xf32>
    %96 = vector.broadcast %95 : vector<1x768xf32> to vector<8x768xf32>
    %97 = arith.addf %94, %96 : vector<8x768xf32>
    %98 = vector.extract_strided_slice %93 {offsets = [0, 768], sizes = [8, 768], strides = [1, 1]} : vector<8x1536xf32> to vector<8x768xf32>
    %99 = vector.extract_strided_slice %0 {offsets = [3, 0], sizes = [1, 768], strides = [1, 1]} : vector<5x768xf32> to vector<1x768xf32>
    %100 = vector.broadcast %99 : vector<1x768xf32> to vector<8x768xf32>
    %101 = arith.addf %98, %100 : vector<8x768xf32>
    %102 = arith.truncf %90 : vector<2x768xf32> to vector<2x768xbf16>
    %103 = arith.truncf %97 : vector<8x768xf32> to vector<8x768xbf16>
    %cst_77 = arith.constant dense<0.000000e+00> : vector<2x8xf32>
    %104 = tpu.matmul %102, %103, %cst_77 {dimension_numbers = #tpu.dot_dimension_numbers<[1], [1], [0], [0], [0, 0, 1, 0], [], []>} : vector<2x768xbf16>, vector<8x768xbf16>, vector<2x8xf32> -> vector<2x8xf32>
    %cst_78 = arith.constant 0.0360843912 : f32
    %105 = vector.broadcast %cst_78 : f32 to vector<2x8xf32>
    %106 = arith.mulf %104, %105 : vector<2x8xf32>
    %cst_79 = arith.constant dense<0xFF800000> : vector<2xf32>
    %107 = vector.multi_reduction <maximumf>, %106, %cst_79 [1] : vector<2x8xf32> to vector<2xf32>
    %108 = vector.shape_cast %107 : vector<2xf32> to vector<2x1xf32>
    %109 = vector.broadcast %108 : vector<2x1xf32> to vector<2x8xf32>
    %110 = arith.subf %106, %109 : vector<2x8xf32>
    %111 = math.exp %110 : vector<2x8xf32>
    %cst_80 = arith.constant dense<0.000000e+00> : vector<2xf32>
    %112 = vector.multi_reduction <add>, %111, %cst_80 [1] : vector<2x8xf32> to vector<2xf32>
    %113 = vector.shape_cast %112 : vector<2xf32> to vector<2x1xf32>
    %114 = tpu.reciprocal %113 {approx = true} : vector<2x1xf32> -> vector<2x1xf32>
    %115 = vector.broadcast %114 : vector<2x1xf32> to vector<2x8xf32>
    %116 = arith.mulf %111, %115 : vector<2x8xf32>
    %117 = arith.truncf %116 : vector<2x8xf32> to vector<2x8xbf16>
    %118 = arith.truncf %101 : vector<8x768xf32> to vector<8x768xbf16>
    %cst_81 = arith.constant dense<0.000000e+00> : vector<2x768xf32>
    %119 = tpu.matmul %117, %118, %cst_81 {dimension_numbers = #tpu.dot_dimension_numbers<[1], [0], [0], [1], [0, 0, 1, 1], [], []>} : vector<2x8xbf16>, vector<8x768xbf16>, vector<2x768xf32> -> vector<2x768xf32>
    %120 = arith.truncf %119 : vector<2x768xf32> to vector<2x768xbf16>
    %c0_82 = arith.constant 0 : index
    %c0_83 = arith.constant 0 : index
    %121 = vector.load %arg11[%c0_82, %c0_83] : memref<768x768xbf16, #tpu.memory_space<vmem>>, vector<768x768xbf16>
    %cst_84 = arith.constant dense<0.000000e+00> : vector<2x768xf32>
    %122 = tpu.matmul %120, %121, %cst_84 {dimension_numbers = #tpu.dot_dimension_numbers<[1], [0], [0], [1], [0, 0, 1, 1], [], []>} : vector<2x768xbf16>, vector<768x768xbf16>, vector<2x768xf32> -> vector<2x768xf32>
    %123 = vector.extract_strided_slice %0 {offsets = [4, 0], sizes = [1, 768], strides = [1, 1]} : vector<5x768xf32> to vector<1x768xf32>
    %124 = vector.broadcast %123 : vector<1x768xf32> to vector<2x768xf32>
    %125 = arith.addf %122, %124 : vector<2x768xf32>
    %c0_85 = arith.constant 0 : index
    %c0_86 = arith.constant 0 : index
    %126 = vector.load %arg13[%c0_85, %c0_86] : memref<2x768xf32, #tpu.memory_space<vmem>>, vector<2x768xf32>
    tpu.vector_store %arg13[%c0_85, %c0_86], %125 {strides = array<i32>} : memref<2x768xf32, #tpu.memory_space<vmem>>, vector<2x768xf32>,
    return
  }
}

</mosaic_0001>

<bundles_post_ra>
// kernel: tpu_custom_call.1
= control target key start
LH: loop header
LB: loop body
LE: loop exit
PB: predicated region body
PF: predicated region fallthrough
CT: control target
= control target key end

     0   :  { %18 = vsyncpa [#allocation3], 0  ;;  %s17701_s0 = inlined_call_operand.vmem [shape: f32[2,18,4], index: 0, kind: input, shape index: {}]   ;;  %s17702_s1 = inlined_call_operand.hbm [shape: f32[2,8,768], index: 1, kind: input, shape index: {}]   ;;  %s17703_s2 = inlined_call_operand.hbm [shape: f32[2,4,192], index: 2, kind: input, shape index: {}]   ;;  %s17704_s3 = inlined_call_operand.hbm [shape: bf16[3,4,64], index: 3, kind: input, shape index: {}]   ;;  %s17705_s4 = inlined_call_operand.hbm [shape: f32[1,64], index: 4, kind: input, shape index: {}]   ;;  %s17706_s5 = inlined_call_operand.hbm [shape: bf16[64,768], index: 5, kind: input, shape index: {}]   ;;  %s17707_s6 = inlined_call_operand.hbm [shape: bf16[192,768], index: 6, kind: input, shape index: {}]   ;;  %s17708_s7 = inlined_call_operand.hbm [shape: bf16[768,768], index: 7, kind: input, shape index: {}]   ;;  %s17709_s8 = inlined_call_operand.hbm [shape: bf16[8,768], index: 8, kind: input, shape index: {}]   ;;  %s17710_s9 = inlined_call_operand.hbm [shape: bf16[768,768], index: 9, kind: input, shape index: {}]   ;;  %s17711_s10 = inlined_call_operand.hbm [shape: bf16[768,1536], index: 10, kind: input, shape index: {}]   ;;  %s17712_s11 = inlined_call_operand.hbm [shape: bf16[768,768], index: 11, kind: input, shape index: {}]   ;;  %s17713_s12 = inlined_call_operand.hbm [shape: f32[5,768], index: 12, kind: input, shape index: {}]   ;;  %s17714_s13 = inlined_call_operand.hbm [shape: f32[2,768], index: 13, kind: output, shape index: {}]  }
   0x1   :  { %19 = vsyncpa [#allocation6], 0 }
   0x2   :  { %20 = vsyncpa [#allocation9], 0 }
   0x3   :  { %21 = vsyncpa [#allocation12], 0 }
   0x4   :  { %22 = vsyncpa [#allocation15], 0 }
   0x5   :  { %23 = vsyncpa [#allocation18], 0 }
   0x6   :  { %24 = vsyncpa [#allocation21], 0 }
   0x7   :  { %25 = vsyncpa [#allocation4], 0  ;;  %s16949_s25 = smov [#allocation5]   ;;  %s16647_s29 = scalar_lea.hbm %s17703_s2, 256 }
   0x8   :  { %s45_s26 = sshll.u32 %s16949_s25, 4  ;;  %p16648_p0 = scmp.ne.s32.totalorder %s17703_s2, %s16647_s29  ;;  %s46_s26 = int_to_ptr.vmem [resolvable:$true] %s45_s26 }
   0x9   :  { %p16651_p1 = scmp.lt.u32.totalorder %s16647_s29, %s17703_s2 }
   0xb   :  { %p16653_p2 = pnand %p16651_p1, %p16648_p0 }
   0xd   :  { %16656 = shalt.err (!%p16653_p2)
}
   0xe   :  { %s16657_s17 = scalar_lea.vmem %s46_s26, 256  ;;  %p16662_p4 = scmp.lt.s32.totalorder %s46_s26, %s46_s26 }
   0xf   :  { %p16658_p3 = scmp.ne.s32.totalorder %s46_s26, %s16657_s17  ;;  %p16663_p5 = scmp.lt.s32.totalorder %s16657_s17, %s16657_s17 }
  0x11   :  { %p16664_p6 = por %p16663_p5, %p16662_p4 }
  0x13   :  { %p16665_p7 = pnand %p16664_p6, %p16658_p3 }
  0x15   :  { %16668 = shalt.err (!%p16665_p7)
}
  0x16   :  { %s16950_s18 = smov 128   ;;  %s16951_s19 = smov 8  }
  0x17   :  { %51 = dma.hbm_to_vmem [thread:$0]  %s17703_s2, 256, %s46_s26, [#allocation6], %s16950_s18, %s16950_s18, %s16951_s19  }
  0x18   :  { %s16952_s22 = smov [#allocation8]   ;;  %s16669_s27 = scalar_lea.hbm %s17705_s4, 16 }
  0x19   :  { %s70_s23 = sshll.u32 %s16952_s22, 4  ;;  %p16670_p8 = scmp.ne.s32.totalorder %s17705_s4, %s16669_s27  ;;  %s71_s23 = int_to_ptr.vmem [resolvable:$true] %s70_s23 }
  0x1a   :  { %p16673_p9 = scmp.lt.u32.totalorder %s16669_s27, %s17705_s4 }
  0x1c   :  { %p16675_p10 = pnand %p16673_p9, %p16670_p8 }
  0x1e   :  { %16678 = shalt.err (!%p16675_p10)
}
  0x1f   :  { %s16679_s15 = scalar_lea.vmem %s71_s23, 16  ;;  %s16683_s2 = scalar_lea.vmem %s71_s23, 32 }
  0x20   :  { %p16680_p11 = scmp.ne.s32.totalorder %s71_s23, %s16679_s15  ;;  %p16684_p12 = scmp.lt.s32.totalorder %s71_s23, %s71_s23 }
  0x21   :  { %p16685_p13 = scmp.lt.s32.totalorder %s16683_s2, %s16679_s15 }
  0x23   :  { %p16686_p0 = por %p16685_p13, %p16684_p12 }
  0x25   :  { %p16687_p1 = pnand %p16686_p0, %p16680_p11 }
  0x27   :  { %16690 = shalt.err (!%p16687_p1)
}
  0x28   :  { %73 = dma.hbm_to_vmem [thread:$0]  %s17705_s4, 16, %s71_s23, [#allocation9]  }
  0x29   :  { %s16953_s17 = smov [#allocation11]   ;;  %s16954_s19 = smov [#allocation14]  }
  0x2a   :  { %s91_s18 = sshll.u32 %s16953_s17, 4  ;;  %s116_s20 = sshll.u32 %s16954_s19, 4  ;;  %s92_s18 = int_to_ptr.vmem [resolvable:$true] %s91_s18  ;;  %s117_s20 = int_to_ptr.vmem [resolvable:$true] %s116_s20 }
  0x2b   :  { %s16691_s24 = scalar_lea.hbm %s17707_s6, 9216 }
  0x2c   :  { %p16692_p2 = scmp.ne.s32.totalorder %s17707_s6, %s16691_s24  ;;  %p16695_p3 = scmp.lt.u32.totalorder %s16691_s24, %s17707_s6 }
  0x2e   :  { %p16697_p4 = pnand %p16695_p3, %p16692_p2 }
  0x30   :  { %16700 = shalt.err (!%p16697_p4)
}
  0x31   :  { %s16701_s4 = scalar_lea.vmem %s92_s18, 9216  ;;  %p16706_p6 = scmp.lt.s32.totalorder %s92_s18, %s92_s18 }
  0x32   :  { %p16702_p5 = scmp.ne.s32.totalorder %s92_s18, %s16701_s4  ;;  %p16707_p7 = scmp.lt.s32.totalorder %s16701_s4, %s16701_s4 }
  0x34   :  { %p16708_p8 = por %p16707_p7, %p16706_p6 }
  0x36   :  { %p16709_p9 = pnand %p16708_p8, %p16702_p5 }
  0x38   :  { %16712 = shalt.err (!%p16709_p9)
}
  0x39   :  { %s16955_s23 = smov 384   ;;  %s16956_s30 = smov 24  }
  0x3a   :  { %97 = dma.hbm_to_vmem [thread:$0]  %s17707_s6, 9216, %s92_s18, [#allocation12], %s16955_s23, %s16955_s23, %s16956_s30  }
  0x3b   :  { %s16713_s16 = scalar_lea.hbm %s17709_s8, 384 }
  0x3c   :  { %p16714_p10 = scmp.ne.s32.totalorder %s17709_s8, %s16713_s16  ;;  %p16717_p11 = scmp.lt.u32.totalorder %s16713_s16, %s17709_s8 }
  0x3e   :  { %p16719_p12 = pnand %p16717_p11, %p16714_p10 }
  0x40   :  { %16722 = shalt.err (!%p16719_p12)
}
  0x41   :  { %s16723_s24 = scalar_lea.vmem %s117_s20, 384  ;;  %p16728_p0 = scmp.lt.s32.totalorder %s117_s20, %s117_s20 }
  0x42   :  { %p16724_p13 = scmp.ne.s32.totalorder %s117_s20, %s16723_s24  ;;  %p16729_p1 = scmp.lt.s32.totalorder %s16723_s24, %s16723_s24 }
  0x44   :  { %p16730_p2 = por %p16729_p1, %p16728_p0 }
  0x46   :  { %p16731_p3 = pnand %p16730_p2, %p16724_p13 }
  0x48   :  { %16734 = shalt.err (!%p16731_p3)
}
  0x49   :  { %119 = dma.hbm_to_vmem [thread:$0]  %s17709_s8, 384, %s117_s20, [#allocation15]  }
  0x4a   :  { %s16957_s25 = smov [#allocation17]   ;;  %s16958_s28 = smov [#allocation2]  }
  0x4b   :  { %s137_s27 = sshll.u32 %s16957_s25, 4  ;;  %s33_s29 = sshll.u32 %s16958_s28, 4  ;;  %s138_s27 = int_to_ptr.vmem [resolvable:$true] %s137_s27  ;;  %s17095_s29 = int_to_ptr.vmem [resolvable:$true] %s33_s29 }
  0x4c   :  { %s16735_s15 = scalar_lea.hbm %s17711_s10, 73728 }
  0x4d   :  { %p16736_p4 = scmp.ne.s32.totalorder %s17711_s10, %s16735_s15  ;;  %p16739_p5 = scmp.lt.u32.totalorder %s16735_s15, %s17711_s10 }
  0x4f   :  { %p16741_p6 = pnand %p16739_p5, %p16736_p4 }
  0x51   :  { %16744 = shalt.err (!%p16741_p6)
}
  0x52   :  { %s16745_s8 = scalar_lea.vmem %s138_s27, 73728  ;;  %p16750_p8 = scmp.lt.s32.totalorder %s138_s27, %s138_s27 }
  0x53   :  { %p16746_p7 = scmp.ne.s32.totalorder %s138_s27, %s16745_s8  ;;  %p16751_p9 = scmp.lt.s32.totalorder %s16745_s8, %s16745_s8 }
  0x55   :  { %p16752_p10 = por %p16751_p9, %p16750_p8 }
  0x57   :  { %p16753_p11 = pnand %p16752_p10, %p16746_p7 }
  0x59   :  { %16756 = shalt.err (!%p16753_p11)
}
  0x5a   :  { %s16959_s20 = smov 768   ;;  %s16960_s19 = smov 48  }
  0x5b   :  { %143 = dma.hbm_to_vmem [thread:$0]  %s17711_s10, 73728, %s138_s27, [#allocation18], %s16959_s20, %s16959_s20, %s16960_s19  }
  0x5c   :  { %s16757_s18 = scalar_lea.hbm %s17702_s1, 1536 }
  0x5d   :  { %p16758_p12 = scmp.ne.s32.totalorder %s17702_s1, %s16757_s18  ;;  %p16761_p13 = scmp.lt.u32.totalorder %s16757_s18, %s17702_s1 }
  0x5f   :  { %p16763_p0 = pnand %p16761_p13, %p16758_p12 }
  0x61   :  { %16766 = shalt.err (!%p16763_p0)
}
  0x62   :  { %s16767_s15 = scalar_lea.vmem %s17095_s29, 1536  ;;  %p16772_p2 = scmp.lt.s32.totalorder %s17095_s29, %s17095_s29 }
  0x63   :  { %p16768_p1 = scmp.ne.s32.totalorder %s17095_s29, %s16767_s15  ;;  %p16773_p3 = scmp.lt.s32.totalorder %s16767_s15, %s16767_s15 }
  0x65   :  { %p16774_p4 = por %p16773_p3, %p16772_p2 }
  0x67   :  { %p16775_p5 = pnand %p16774_p4, %p16768_p1 }
  0x69   :  { %16778 = shalt.err (!%p16775_p5)
}
  0x6a   :  { %39 = dma.hbm_to_vmem [thread:$0]  %s17702_s1, 1536, %s17095_s29, [#allocation3], %s16959_s20, %s16959_s20, %s16960_s19  }
  0x6b   :  { %s16961_s2 = smov [#allocation7]   ;;  %s16779_s8 = scalar_lea.hbm %s17704_s3, 96 }
  0x6c   :  { %s57_s26 = sshll.u32 %s16961_s2, 4  ;;  %p16780_p6 = scmp.ne.s32.totalorder %s17704_s3, %s16779_s8  ;;  %s58_s26 = int_to_ptr.vmem [resolvable:$true] %s57_s26 }
  0x6d   :  { %p16783_p7 = scmp.lt.u32.totalorder %s16779_s8, %s17704_s3 }
  0x6f   :  { %p16785_p8 = pnand %p16783_p7, %p16780_p6 }
  0x71   :  { %16788 = shalt.err (!%p16785_p8)
}
  0x72   :  { %s16789_s18 = scalar_lea.vmem %s58_s26, 96  ;;  %p16794_p10 = scmp.lt.s32.totalorder %s58_s26, %s58_s26 }
  0x73   :  { %p16790_p9 = scmp.ne.s32.totalorder %s58_s26, %s16789_s18  ;;  %p16795_p11 = scmp.lt.s32.totalorder %s16789_s18, %s16789_s18 }
  0x75   :  { %p16796_p12 = por %p16795_p11, %p16794_p10 }
  0x77   :  { %p16797_p13 = pnand %p16796_p12, %p16790_p9 }
  0x79   :  { %16800 = shalt.err (!%p16797_p13)
}
  0x7a   :  { %s16962_s1 = smov 32   ;;  %s16963_s29 = smov 2  }
  0x7b   :  { %63 = dma.hbm_to_vmem [thread:$0]  %s17704_s3, 96, %s58_s26, [#allocation6], %s16962_s1, %s16962_s1, %s16963_s29  }
  0x7c   :  { %s16964_s25 = smov [#allocation10]   ;;  %s16965_s4 = smov [#allocation13]  }
  0x7d   :  { %s79_s28 = sshll.u32 %s16964_s25, 4  ;;  %s103_s14 = sshll.u32 %s16965_s4, 4  ;;  %s80_s28 = int_to_ptr.vmem [resolvable:$true] %s79_s28  ;;  %s104_s14 = int_to_ptr.vmem [resolvable:$true] %s103_s14 }
  0x7e   :  { %s16801_s27 = scalar_lea.hbm %s17706_s5, 3072 }
  0x7f   :  { %p16802_p0 = scmp.ne.s32.totalorder %s17706_s5, %s16801_s27  ;;  %p16805_p1 = scmp.lt.u32.totalorder %s16801_s27, %s17706_s5 }
  0x81   :  { %p16807_p2 = pnand %p16805_p1, %p16802_p0 }
  0x83   :  { %16810 = shalt.err (!%p16807_p2)
}
  0x84   :  { %s16811_s3 = scalar_lea.vmem %s80_s28, 3072  ;;  %p16816_p4 = scmp.lt.s32.totalorder %s80_s28, %s80_s28 }
  0x85   :  { %p16812_p3 = scmp.ne.s32.totalorder %s80_s28, %s16811_s3  ;;  %p16817_p5 = scmp.lt.s32.totalorder %s16811_s3, %s16811_s3 }
  0x87   :  { %p16818_p6 = por %p16817_p5, %p16816_p4 }
  0x89   :  { %p16819_p7 = pnand %p16818_p6, %p16812_p3 }
  0x8b   :  { %16822 = shalt.err (!%p16819_p7)
}
  0x8c   :  { %85 = dma.hbm_to_vmem [thread:$0]  %s17706_s5, 3072, %s80_s28, [#allocation9], %s16955_s23, %s16955_s23, %s16956_s30  }
  0x8d   :  { %s16823_s6 = scalar_lea.hbm %s17708_s7, 36864 }
  0x8e   :  { %p16824_p8 = scmp.ne.s32.totalorder %s17708_s7, %s16823_s6  ;;  %p16827_p9 = scmp.lt.u32.totalorder %s16823_s6, %s17708_s7 }
  0x90   :  { %p16829_p10 = pnand %p16827_p9, %p16824_p8 }
  0x92   :  { %16832 = shalt.err (!%p16829_p10)
}
  0x93   :  { %s16833_s19 = scalar_lea.vmem %s104_s14, 36864  ;;  %p16838_p12 = scmp.lt.s32.totalorder %s104_s14, %s104_s14 }
  0x94   :  { %p16834_p11 = scmp.ne.s32.totalorder %s104_s14, %s16833_s19  ;;  %p16839_p13 = scmp.lt.s32.totalorder %s16833_s19, %s16833_s19 }
  0x96   :  { %p16840_p0 = por %p16839_p13, %p16838_p12 }
  0x98   :  { %p16841_p1 = pnand %p16840_p0, %p16834_p11 }
  0x9a   :  { %16844 = shalt.err (!%p16841_p1)
}
  0x9b   :  { %109 = dma.hbm_to_vmem [thread:$0]  %s17708_s7, 36864, %s104_s14, [#allocation12], %s16955_s23, %s16955_s23, %s16956_s30  }
  0x9c   :  { %s16966_s28 = smov [#allocation16]   ;;  %s16967_s15 = smov [#allocation19]  }
  0x9d   :  { %s125_s4 = sshll.u32 %s16966_s28, 4  ;;  %s149_s10 = sshll.u32 %s16967_s15, 4  ;;  %s126_s4 = int_to_ptr.vmem [resolvable:$true] %s125_s4  ;;  %s150_s10 = int_to_ptr.vmem [resolvable:$true] %s149_s10 }
  0x9e   :  { %s16845_s16 = scalar_lea.hbm %s17710_s9, 36864 }
  0x9f   :  { %p16846_p2 = scmp.ne.s32.totalorder %s17710_s9, %s16845_s16  ;;  %p16849_p3 = scmp.lt.u32.totalorder %s16845_s16, %s17710_s9 }
  0xa1   :  { %p16851_p4 = pnand %p16849_p3, %p16846_p2 }
  0xa3   :  { %16854 = shalt.err (!%p16851_p4)
}
  0xa4   :  { %s16855_s7 = scalar_lea.vmem %s126_s4, 36864  ;;  %p16860_p6 = scmp.lt.s32.totalorder %s126_s4, %s126_s4 }
  0xa5   :  { %p16856_p5 = scmp.ne.s32.totalorder %s126_s4, %s16855_s7  ;;  %p16861_p7 = scmp.lt.s32.totalorder %s16855_s7, %s16855_s7 }
  0xa7   :  { %p16862_p8 = por %p16861_p7, %p16860_p6 }
  0xa9   :  { %p16863_p9 = pnand %p16862_p8, %p16856_p5 }
  0xab   :  { %16866 = shalt.err (!%p16863_p9)
}
  0xac   :  { %131 = dma.hbm_to_vmem [thread:$0]  %s17710_s9, 36864, %s126_s4, [#allocation15], %s16955_s23, %s16955_s23, %s16956_s30  }
  0xad   :  { %s16867_s6 = scalar_lea.hbm %s17712_s11, 36864 }
  0xae   :  { %p16868_p10 = scmp.ne.s32.totalorder %s17712_s11, %s16867_s6  ;;  %p16871_p11 = scmp.lt.u32.totalorder %s16867_s6, %s17712_s11 }
  0xb0   :  { %p16873_p12 = pnand %p16871_p11, %p16868_p10 }
  0xb2   :  { %16876 = shalt.err (!%p16873_p12)
}
  0xb3   :  { %s16877_s19 = scalar_lea.vmem %s150_s10, 36864  ;;  %p16882_p0 = scmp.lt.s32.totalorder %s150_s10, %s150_s10 }
  0xb4   :  { %p16878_p13 = scmp.ne.s32.totalorder %s150_s10, %s16877_s19  ;;  %p16883_p1 = scmp.lt.s32.totalorder %s16877_s19, %s16877_s19 }
  0xb6   :  { %p16884_p2 = por %p16883_p1, %p16882_p0 }
  0xb8   :  { %p16885_p3 = pnand %p16884_p2, %p16878_p13 }
  0xba   :  { %16888 = shalt.err (!%p16885_p3)
}
  0xbb   :  { %155 = dma.hbm_to_vmem [thread:$0]  %s17712_s11, 36864, %s150_s10, [#allocation18], %s16955_s23, %s16955_s23, %s16956_s30  }
  0xbc   :  { %s16968_s25 = smov [#allocation20]   ;;  %s16889_s27 = scalar_lea.hbm %s17713_s12, 768 }
  0xbd   :  { %s162_s28 = sshll.u32 %s16968_s25, 4  ;;  %p16890_p4 = scmp.ne.s32.totalorder %s17713_s12, %s16889_s27  ;;  %s163_s28 = int_to_ptr.vmem [resolvable:$true] %s162_s28 }
  0xbe   :  { %p16893_p5 = scmp.lt.u32.totalorder %s16889_s27, %s17713_s12 }
  0xc0   :  { %p16895_p6 = pnand %p16893_p5, %p16890_p4 }
  0xc2   :  { %16898 = shalt.err (!%p16895_p6)
}
  0xc3   :  { %s16899_s3 = scalar_lea.vmem %s163_s28, 768  ;;  %p16904_p8 = scmp.lt.s32.totalorder %s163_s28, %s163_s28 }
  0xc4   :  { %p16900_p7 = scmp.ne.s32.totalorder %s163_s28, %s16899_s3  ;;  %p16905_p9 = scmp.lt.s32.totalorder %s16899_s3, %s16899_s3 }
  0xc6   :  { %p16906_p10 = por %p16905_p9, %p16904_p8 }
  0xc8   :  { %p16907_p11 = pnand %p16906_p10, %p16900_p7 }
  0xca   :  { %16910 = shalt.err (!%p16907_p11)
}
  0xcb   :  { %165 = dma.hbm_to_vmem [thread:$0]  %s17713_s12, 768, %s163_s28, [#allocation21]  }
  0xcc   :  { %16933 = dma.done.wait [#allocation3], 1536  }
  0xcd   :  { %16934 = vsyncadd [#allocation3], 4294965760 }
  0xce   :  { %16935 = dma.done.wait [#allocation6], 352  }
  0xcf   :  { %16936 = vsyncadd [#allocation6], 4294966944 }
  0xd0   :  { %16937 = dma.done.wait [#allocation9], 3088  }
  0xd1   :  { %16938 = vsyncadd [#allocation9], 4294964208 }
  0xd2   :  { %16939 = dma.done.wait [#allocation12], 46080  }
  0xd3   :  { %16940 = vsyncadd [#allocation12], 4294921216 }
  0xd4   :  { %16941 = dma.done.wait [#allocation15], 37248  }
  0xd5   :  { %16942 = vsyncadd [#allocation15], 4294930048 }
  0xd6   :  { %16943 = dma.done.wait [#allocation18], 110592  }
  0xd7   :  { %16944 = vsyncadd [#allocation18], 4294856704 }
  0xd8   :  { %16945 = dma.done.wait [#allocation21], 768  }
  0xd9   :  { %16946 = vsyncadd [#allocation21], 4294966528  ;;  %v16969_v0 = vmov 0.0   ;;  %vm16970_vm0 = vmmov 0   ;;  %vm223_vm1 = vcmask 1041408   ;;  %v214_v3 = vld [vmem:[%s17701_s0 + $0x1] sm:$0xff] }
  0xda   :  { %14190 = vmatprep.subr.bf16.mxu0 %v16969_v0  ;;  %14196 = vmatprep.subr.bf16.mxu1 %v16969_v0  ;;  %v218_v1 = vld [vmem:[#allocation7 + $0x2] sm:$0x3]  ;;  %v213_v2 = vld [vmem:[#allocation7] sm:$0x3]  ;;  %v210_v7 = vld [vmem:[%s17701_s0] sm:$0xff]  ;;  %vm219_vm2 = vcmask 31744  }
  0xdb   :  { %14192 = vmatprep.mubr.msk.bf16.mxu0 %vm16970_vm0, %v16969_v0  ;;  %14198 = vmatprep.mubr.msk.bf16.mxu1 %vm16970_vm0, %v16969_v0  ;;  %v225_v4 = vsel %vm223_vm1, %v218_v1, 0  ;;  %v272_v5 = vsel %vm223_vm1, %v213_v2, 0  ;;  %v215_v6 = vld [vmem:[%s17701_s0 + $0x9] sm:$0xff]  ;;  %v319_v11 = vld [vmem:[#allocation7 + $0x4] sm:$0x3]  ;;  %v12616_v15 = vld [vmem:[%s17701_s0 + $0x19] sm:$0xff] }
  0xdc   :  { %v211_v8 = vld [vmem:[%s17701_s0 + $0x8] sm:$0xff]  ;;  %14191 = vmatpush3.bf16.msra.mxu0 %v225_v4  ;;  %14197 = vmatpush3.bf16.msra.mxu1 %v272_v5  ;;  %v216_v9 = vpack.c.bf16 %v215_v6, %v214_v3  ;;  %v324_v12 = vsel %vm223_vm1, %v319_v11, 0  ;;  %v12614_v19 = vld [vmem:[%s17701_s0 + $0x18] sm:$0xff]  ;;  %v12615_v20 = vld [vmem:[%s17701_s0 + $0x20] sm:$0xff]  ;;  %vm656_vm3 = vcmask 1043456   ;;  %vm664_vm4 = vcmask 519168  }
  0xdd   :  { %v212_v10 = vpack.c.bf16 %v211_v8, %v210_v7  ;;  %14202 = vmatprep.subr.bf16.mxu0 %v16969_v0  ;;  %14208 = vmatprep.subr.bf16.mxu1 %v16969_v0  ;;  %v315_v13 = vld [vmem:[%s17701_s0 + $0x2] sm:$0xff]  ;;  %v316_v14 = vld [vmem:[%s17701_s0 + $0xa] sm:$0xff]  ;;  %v14321_v21 = vld [vmem:[#allocation11 + $0x4] ss:$24 sps:$4 sm:$0xff]   ;;  %v394_v24 = vpack.c.bf16 %v12615_v20, %v12614_v19  ;;  %vm800_vm5 = vcmask 1041409   ;;  %vm379_vm6 = vcmask 523264  }
  0xde   :  { %v12617_v16 = vld [vmem:[%s17701_s0 + $0x21] sm:$0xff]  ;;  %v317_v17 = vpack.c.bf16 %v316_v14, %v315_v13  ;;  %v14319_v26 = vld [vmem:[#allocation11] ss:$24 sps:$4 sm:$0xff]   ;;  %v14327_v33 = vld [vmem:[#allocation11 + $0x64] ss:$24 sps:$4 sm:$0xff]   ;;  %vm549_vm7 = vcmask 1040384  }
  0xdf   :  { %14193 = vmatmul.mubr.msk.bf16.vlgmr.msra.gmra.mrb[0].mxu0 %vm219_vm2, %v216_v9  ;;  %14199 = vmatmul.mubr.msk.bf16.vlgmr.msra.gmra.mrb[0].mxu1 %vm219_vm2, %v212_v10  ;;  %v397_v18 = vpack.c.bf16 %v12617_v16, %v12616_v15  ;;  %v12620_v22 = vld [vmem:[%s17701_s0 + $0x1a] sm:$0xff]  ;;  %v12621_v23 = vld [vmem:[%s17701_s0 + $0x22] sm:$0xff]  ;;  %vm10263_vm8 = vcmask 58368   ;;  %vm10282_vm9 = vcmask 64512   ;;  %s16973_s0 = smov [#allocation22]  }
  0xe0   :  { %14203 = vmatpush3.bf16.msra.mxu0 %v324_v12  ;;  %14209 = vmatpush3.bf16.msra.mxu1 %v225_v4  ;;  %v488_v25 = vpack.c.bf16 %v12621_v23, %v12620_v22  ;;  %v14324_v27 = vld [vmem:[#allocation11 + $0x34] ss:$24 sps:$4 sm:$0xff]   ;;  %v14322_v30 = vld [vmem:[#allocation11 + $0x30] ss:$24 sps:$4 sm:$0xff]   ;;  %v14325_v36 = vld [vmem:[#allocation11 + $0x60] ss:$24 sps:$4 sm:$0xff]  }
  0xe1   :  { %14204 = vmatprep.mubr.msk.bf16.mxu0 %vm16970_vm0, %v16969_v0  ;;  %14210 = vmatprep.mubr.msk.bf16.mxu1 %vm16970_vm0, %v16969_v0  ;;  %v648_v28 = vld [vmem:[#allocation5] sm:$0xff]  ;;  %v649_v29 = vld [vmem:[#allocation5 + $0x8] sm:$0xff]  ;;  %v14366_v46 = vld [vmem:[#allocation11 + $0x40] ss:$24 sps:$4 sm:$0xff]   ;;  %s12595_s17 = sshll.u32 %s16973_s0, 4  ;;  %s12596_s17 = int_to_ptr.vmem [resolvable:$true] %s12595_s17 }
  0xe2   :  { %14214 = vmatprep.subr.bf16.mxu0 %v16969_v0  ;;  %14220 = vmatprep.subr.bf16.mxu1 %v16969_v0  ;;  %v652_v31 = vcombine.high %v648_v28, %v648_v28  ;;  %v653_v32 = vcombine.high %v649_v29, %v649_v29  ;;  %v657_v34 = vsel %vm656_vm3, %v648_v28, 0.0  ;;  %v672_v35 = vsel %vm656_vm3, %v649_v29, 0.0  ;;  %v14360_v39 = vld [vmem:[#allocation11 + $0x10] ss:$24 sps:$4 sm:$0xff]   ;;  %v14362_v40 = vld [vmem:[#allocation11 + $0x14] ss:$24 sps:$4 sm:$0xff]   ;;  %p16916_p13 = scmp.lt.s32.totalorder %s12596_s17, %s12596_s17 }
  0xe3   :  { %v14330_v41 = vld [vmem:[#allocation11 + $0x94] ss:$24 sps:$4 sm:$0xff]   ;;  %v658_v44 = vrot.slane %v657_v34, 4  ;;  %v673_v45 = vrot.slane %v672_v35, 4  ;;  %v14368_v49 = vld [vmem:[#allocation11 + $0x44] ss:$24 sps:$4 sm:$0xff]  }
  0xe4   :  { %v665_v37 = vsel %vm664_vm4, %v652_v31, 0.0  ;;  %v679_v38 = vsel %vm664_vm4, %v653_v32, 0.0  ;;  %v14328_v50 = vld [vmem:[#allocation11 + $0x90] ss:$24 sps:$4 sm:$0xff]   ;;  %v14333_v53 = vld [vmem:[#allocation11 + $0xc4] ss:$24 sps:$4 sm:$0xff]  }
  0xe5   :  { %v666_v42 = vrot.slane %v665_v37, 4  ;;  %v680_v43 = vrot.slane %v679_v38, 4  ;;  %v659_v54 = vadd.f32 %v658_v44, %v657_v34  ;;  %v674_v55 = vadd.f32 %v673_v45, %v672_v35  ;;  %v14374_v56 = vld [vmem:[#allocation11 + $0x74] ss:$24 sps:$4 sm:$0xff]   ;;  %v14372_v59 = vld [vmem:[#allocation11 + $0x70] ss:$24 sps:$4 sm:$0xff]  }
  0xe6   :  { %v14331_v60 = vld [vmem:[#allocation11 + $0xc0] ss:$24 sps:$4 sm:$0xff]   ;;  %v14380_v61 = vld [vmem:[#allocation11 + $0xa4] ss:$24 sps:$4 sm:$0xff]   ;;  %v14336_v62 = vld [vmem:[#allocation11 + $0xf4] ss:$24 sps:$4 sm:$0xff]  }
  0xe7   :  { %14205 = vmatmul.mubr.msk.bf16.vlgmr.msra.gmra.mrb[4].mxu0 %vm219_vm2, %v317_v17  ;;  %14211 = vmatmul.mubr.msk.bf16.vlgmr.msra.gmra.mrb[4].mxu1 %vm219_vm2, %v397_v18  ;;  %v667_v47 = vadd.f32 %v666_v42, %v665_v37  ;;  %v681_v48 = vadd.f32 %v680_v43, %v679_v38  ;;  %v660_v1 = vrot.slane %v659_v54, 2  ;;  %v675_v2 = vrot.slane %v674_v55, 2  ;;  %v14378_v3 = vld [vmem:[#allocation11 + $0xa0] ss:$24 sps:$4 sm:$0xff]   ;;  %v14386_v6 = vld [vmem:[#allocation11 + $0xd4] ss:$24 sps:$4 sm:$0xff]  }
  0xe8   :  { %14215 = vmatpush3.bf16.msra.mxu0 %v272_v5  ;;  %14221 = vmatpush3.bf16.msra.mxu1 %v324_v12  ;;  %v14334_v7 = vld [vmem:[#allocation11 + $0xf0] ss:$24 sps:$4 sm:$0xff]   ;;  %v14339_v8 = vld [vmem:[#allocation11 + $0x124] ss:$24 sps:$4 sm:$0xff]   ;;  %v14337_v16 = vld [vmem:[#allocation11 + $0x120] ss:$24 sps:$4 sm:$0xff]  }
  0xe9   :  { %14216 = vmatprep.mubr.msk.bf16.mxu0 %vm16970_vm0, %v16969_v0  ;;  %14222 = vmatprep.mubr.msk.bf16.mxu1 %vm16970_vm0, %v16969_v0  ;;  %v668_v51 = vrot.slane %v667_v47, 2  ;;  %v682_v52 = vrot.slane %v681_v48, 2  ;;  %v14384_v11 = vld [vmem:[#allocation11 + $0xd0] ss:$24 sps:$4 sm:$0xff]   ;;  %v661_v12 = vadd.f32 %v660_v1, %v659_v54  ;;  %v676_v13 = vadd.f32 %v675_v2, %v674_v55  ;;  %v14342_v17 = vld [vmem:[#allocation11 + $0x154] ss:$24 sps:$4 sm:$0xff]  }
  0xea   :  { %1169 = vmatprep.subr.bf16.mxu1 %v14321_v21  ;;  %1251 = vmatprep.subr.bf16.mxu0 %v14362_v40  ;;  %v14340_v23 = vld [vmem:[#allocation11 + $0x150] ss:$24 sps:$4 sm:$0xff]   ;;  %v14343_v28 = vld [vmem:[#allocation11 + $0x180] ss:$24 sps:$4 sm:$0xff]   ;;  %v14348_v29 = vld [vmem:[#allocation11 + $0x1b4] ss:$24 sps:$4 sm:$0xff]  }
  0xeb   :  { %v669_v57 = vadd.f32 %v668_v51, %v667_v47  ;;  %v683_v58 = vadd.f32 %v682_v52, %v681_v48  ;;  %v662_v20 = vrot.slane %v661_v12, 1  ;;  %v677_v21 = vrot.slane %v676_v13, 1  ;;  %v14346_v32 = vld [vmem:[#allocation11 + $0x1b0] ss:$24 sps:$4 sm:$0xff]   ;;  %v14354_v37 = vld [vmem:[#allocation11 + $0x214] ss:$24 sps:$4 sm:$0xff]  }
  0xec   :  { %v14352_v40 = vld [vmem:[#allocation11 + $0x210] ss:$24 sps:$4 sm:$0xff]   ;;  %v14365_v45 = vld [vmem:[#allocation11 + $0x3c] ss:$24 sps:$4 sm:$0xff]   ;;  %v14371_v47 = vld [vmem:[#allocation11 + $0x6c] ss:$24 sps:$4 sm:$0xff]  }
  0xed   :  { %v670_v63 = vrot.slane %v669_v57, 1  ;;  %v684_v0 = vrot.slane %v683_v58, 1  ;;  %v14357_v43 = vld [vmem:[#allocation11 + $0x8] ss:$24 sps:$4 sm:$0xff]   ;;  %v14383_v51 = vld [vmem:[#allocation11 + $0xcc] ss:$24 sps:$4 sm:$0xff]  }
  0xee   :  { %v14369_v48 = vld [vmem:[#allocation11 + $0x68] ss:$24 sps:$4 sm:$0xff]   ;;  %v14387_v54 = vld [vmem:[#allocation11 + $0xf8] ss:$24 sps:$4 sm:$0xff]   ;;  %v14392_v55 = vld [vmem:[#allocation11 + $0x104] ss:$24 sps:$4 sm:$0xff]  }
  0xef   :  { %14217 = vmatmul.mubr.msk.bf16.vlgmr.msra.gmra.mrb[8].mxu0 %vm219_vm2, %v394_v24  ;;  %14223 = vmatmul.mubr.msk.bf16.vlgmr.msra.gmra.mrb[8].mxu1 %vm219_vm2, %v488_v25  ;;  %v671_v4 = vadd.f32 %v670_v63, %v669_v57  ;;  %v685_v5 = vadd.f32 %v684_v0, %v683_v58  ;;  %v14345_v25 = vld [vmem:[#allocation11 + $0x184] ss:$24 sps:$4 sm:$0xff]   ;;  %v14381_v52 = vld [vmem:[#allocation11 + $0xc8] ss:$24 sps:$4 sm:$0xff]   ;;  %s16911_s8 = scalar_lea.vmem %s12596_s17, 192 }
  0xf0   :  { %1170 = vmatpush1.bf16.msra.mxu1 %v14319_v26  ;;  %1252 = vmatpush1.bf16.msra.mxu0 %v14360_v39  ;;  %v663_v26 = vadd.f32 %v662_v20, %v661_v12  ;;  %v14395_v57 = vld [vmem:[#allocation11 + $0x12c] ss:$24 sps:$4 sm:$0xff]   ;;  %v14393_v58 = vld [vmem:[#allocation11 + $0x128] ss:$24 sps:$4 sm:$0xff]   ;;  %p16912_p12 = scmp.ne.s32.totalorder %s12596_s17, %s16911_s8  ;;  %p16917_p0 = scmp.lt.s32.totalorder %s16911_s8, %s16911_s8 }
  0xf1   :  { %1171 = vmatprep.subr.bf16.mxu1 %v14324_v27  ;;  %1253 = vmatprep.subr.bf16.mxu0 %v14368_v49  ;;  %v688_v9 = vmul.f32 0.25, %v671_v4  ;;  %v690_v10 = vmul.f32 0.25, %v685_v5  ;;  %v678_v27 = vadd.f32 %v677_v21, %v676_v13  ;;  %v14377_v49 = vld [vmem:[#allocation11 + $0x9c] ss:$24 sps:$4 sm:$0xff]   ;;  %v14402_v0 = vld [vmem:[#allocation11 + $0x160] ss:$24 sps:$4 sm:$0xff]  }
  0xf2   :  { %v14404_v63 = vld [vmem:[#allocation11 + $0x164] ss:$24 sps:$4 sm:$0xff]   ;;  %v14405_v2 = vld [vmem:[#allocation11 + $0x188] ss:$24 sps:$4 sm:$0xff]   ;;  %p16918_p1 = por %p16917_p0, %p16916_p13 }
  0xf3   :  { %v717_v14 = vpack.c.bf16 %v688_v9, %v688_v9  ;;  %v719_v15 = vpack.c.bf16 %v690_v10, %v690_v10  ;;  %v689_v31 = vmul.f32 0.25, %v678_v27  ;;  %v14407_v1 = vld [vmem:[#allocation11 + $0x18c] ss:$24 sps:$4 sm:$0xff]   ;;  %v14408_v4 = vld [vmem:[#allocation11 + $0x190] ss:$24 sps:$4 sm:$0xff]  }
  0xf4   :  { %1172 = vmatpush1.bf16.msra.mxu1 %v14322_v30  ;;  %1254 = vmatpush1.bf16.msra.mxu0 %v14366_v46  ;;  %v687_v30 = vmul.f32 0.25, %v663_v26  ;;  %v14363_v46 = vld [vmem:[#allocation11 + $0x38] ss:$24 sps:$4 sm:$0xff]   ;;  %v14413_v5 = vld [vmem:[#allocation11 + $0x1bc] ss:$24 sps:$4 sm:$0xff]   ;;  %p16919_p2 = pnand %p16918_p1, %p16912_p12 }
  0xf5   :  { %1173 = vmatprep.subr.bf16.mxu1 %v14327_v33  ;;  %1255 = vmatprep.subr.bf16.mxu0 %v14374_v56  ;;  %v797_v18 = vunpack.c.l.b16 %v717_v14  ;;  %v799_v19 = vunpack.c.l.b16 %v719_v15  ;;  %v14351_v33 = vld [vmem:[#allocation11 + $0x1e4] ss:$24 sps:$4 sm:$0xff]   ;;  %v718_v35 = vpack.c.bf16 %v689_v31, %v689_v31  ;;  %v14390_v56 = vld [vmem:[#allocation11 + $0x100] ss:$24 sps:$4 sm:$0xff]   ;;  %v14420_v12 = vld [vmem:[#allocation11 + $0x1f0] ss:$24 sps:$4 sm:$0xff]  }
  0xf6   :  { %v716_v34 = vpack.c.bf16 %v687_v30, %v687_v30  ;;  %v14419_v9 = vld [vmem:[#allocation11 + $0x1ec] ss:$24 sps:$4 sm:$0xff]   ;;  %v14417_v10 = vld [vmem:[#allocation11 + $0x1e8] ss:$24 sps:$4 sm:$0xff]   ;;  %v14425_v13 = vld [vmem:[#allocation11 + $0x21c] ss:$24 sps:$4 sm:$0xff]  }
  0xf7   :  { %v802_v22 = vsel %vm800_vm5, %v799_v19, %v797_v18  ;;  %v798_v39 = vunpack.c.l.b16 %v718_v35  ;;  %v14423_v14 = vld [vmem:[#allocation11 + $0x218] ss:$24 sps:$4 sm:$0xff]   ;;  %v14428_v15 = vld [vmem:[#allocation11 + $0x224] ss:$24 sps:$4 sm:$0xff]   ;;  %v14429_v18 = vld [vmem:[#allocation10 + $0x8] ss:$24 sps:$4 sm:$0xff]  }
  0xf8   :  { %1174 = vmatpush1.bf16.msra.mxu1 %v14325_v36  ;;  %1256 = vmatpush1.bf16.msra.mxu0 %v14372_v59  ;;  %v804_v24 = vpack.c.b16 %v802_v22, %v802_v22  ;;  %v14349_v36 = vld [vmem:[#allocation11 + $0x1e0] ss:$24 sps:$4 sm:$0xff]   ;;  %v796_v38 = vunpack.c.l.b16 %v716_v34  ;;  %v14398_v59 = vld [vmem:[#allocation11 + $0x134] ss:$24 sps:$4 sm:$0xff]   ;;  %v14434_v19 = vld [vmem:[#allocation10 + $0x4] ss:$24 sps:$4 sm:$0xff]  }
  0xf9   :  { %1175 = vmatprep.subr.bf16.mxu1 %v14330_v41  ;;  %1257 = vmatprep.subr.bf16.mxu0 %v14380_v61  ;;  %v14359_v41 = vld [vmem:[#allocation11 + $0xc] ss:$24 sps:$4 sm:$0xff]   ;;  %v14401_v61 = vld [vmem:[#allocation11 + $0x15c] ss:$24 sps:$4 sm:$0xff]   ;;  %v14432_v20 = vld [vmem:[#allocation10] ss:$24 sps:$4 sm:$0xff]  }
  0xfa   :  { %12695 = vmatprep.mubr.msk.bf16.mxu1 %vm379_vm6, %v804_v24  ;;  %12697 = vmatprep.mubr.msk.bf16.mxu0 %vm379_vm6, %v804_v24  ;;  %v801_v42 = vsel %vm800_vm5, %v798_v39, %v796_v38  ;;  %v14437_v21 = vld [vmem:[#allocation10 + $0x3c] ss:$24 sps:$4 sm:$0xff]   ;;  %v14435_v22 = vld [vmem:[#allocation10 + $0x38] ss:$24 sps:$4 sm:$0xff]   ;;  %v14441_v26 = vld [vmem:[#allocation10 + $0x68] ss:$24 sps:$4 sm:$0xff]  }
  0xfb   :  { %v17267_v44 = vpack.c.b16 %v801_v42, %v801_v42  ;;  %v14446_v27 = vld [vmem:[#allocation10 + $0x64] ss:$24 sps:$4 sm:$0xff]   ;;  %v14447_v30 = vld [vmem:[#allocation10 + $0x98] ss:$24 sps:$4 sm:$0xff]   ;;  %v14452_v31 = vld [vmem:[#allocation10 + $0x94] ss:$24 sps:$4 sm:$0xff]  }
  0xfc   :  { %1176 = vmatpush1.bf16.msra.mxu1 %v14328_v50  ;;  %1258 = vmatpush1.bf16.msra.mxu0 %v14378_v3  ;;  %v14375_v50 = vld [vmem:[#allocation11 + $0x98] ss:$24 sps:$4 sm:$0xff]   ;;  %v14410_v3 = vld [vmem:[#allocation11 + $0x194] ss:$24 sps:$4 sm:$0xff]   ;;  %v16971_v34 = vmov 0  }
  0xfd   :  { %1177 = vmatprep.subr.bf16.mxu1 %v14333_v53  ;;  %1259 = vmatprep.subr.bf16.mxu0 %v14386_v6  ;;  %v14389_v53 = vld [vmem:[#allocation11 + $0xfc] ss:$24 sps:$4 sm:$0xff]   ;;  %v14411_v6 = vld [vmem:[#allocation11 + $0x1b8] ss:$24 sps:$4 sm:$0xff]  }
  0xfe   :  { %v14494_v35 = vld [vmem:[#allocation13 + $0x604] ss:$24 sps:$4 sm:$0xff]  }
 0x100   :  { %1178 = vmatpush1.bf16.msra.mxu1 %v14331_v60  ;;  %1260 = vmatpush1.bf16.msra.mxu0 %v14384_v11  ;;  %v14396_v60 = vld [vmem:[#allocation11 + $0x130] ss:$24 sps:$4 sm:$0xff]   ;;  %v14422_v11 = vld [vmem:[#allocation11 + $0x1f4] ss:$24 sps:$4 sm:$0xff]  }
 0x101   :  { %1179 = vmatprep.subr.bf16.mxu1 %v14336_v62  ;;  %1261 = vmatprep.subr.bf16.mxu0 %v14392_v55  ;;  %v14399_v62 = vld [vmem:[#allocation11 + $0x158] ss:$24 sps:$4 sm:$0xff]   ;;  %v562_v55 = vld [vmem:[#allocation2 + $0x58] sm:$0xff] }
 0x104   :  { %1180 = vmatpush1.bf16.msra.mxu1 %v14334_v7  ;;  %1262 = vmatpush1.bf16.msra.mxu0 %v14390_v56  ;;  %v14416_v7 = vld [vmem:[#allocation11 + $0x1c4] ss:$24 sps:$4 sm:$0xff]  }
 0x105   :  { %1181 = vmatprep.subr.bf16.mxu1 %v14339_v8  ;;  %1263 = vmatprep.subr.bf16.mxu0 %v14398_v59  ;;  %v14414_v8 = vld [vmem:[#allocation11 + $0x1c0] ss:$24 sps:$4 sm:$0xff]  }
 0x108   :  { %1182 = vmatpush1.bf16.msra.mxu1 %v14337_v16  ;;  %1264 = vmatpush1.bf16.msra.mxu0 %v14396_v60  ;;  %v14426_v16 = vld [vmem:[#allocation11 + $0x220] ss:$24 sps:$4 sm:$0xff]  }
 0x109   :  { %1183 = vmatprep.subr.bf16.mxu1 %v14342_v17  ;;  %1265 = vmatprep.subr.bf16.mxu0 %v14404_v63  ;;  %v14431_v17 = vld [vmem:[#allocation10 + $0xc] ss:$24 sps:$4 sm:$0xff]  }
 0x10c   :  { %1184 = vmatpush1.bf16.msra.mxu1 %v14340_v23  ;;  %1266 = vmatpush1.bf16.msra.mxu0 %v14402_v0  ;;  %v14440_v23 = vld [vmem:[#allocation10 + $0x34] ss:$24 sps:$4 sm:$0xff]  }
 0x10d   :  { %1185 = vmatprep.subr.bf16.mxu1 %v14345_v25  ;;  %1267 = vmatprep.subr.bf16.mxu0 %v14410_v3  ;;  %v14443_v25 = vld [vmem:[#allocation10 + $0x6c] ss:$24 sps:$4 sm:$0xff]  }
 0x110   :  { %1186 = vmatpush1.bf16.msra.mxu1 %v14343_v28  ;;  %1268 = vmatpush1.bf16.msra.mxu0 %v14408_v4  ;;  %v14444_v28 = vld [vmem:[#allocation10 + $0x60] ss:$24 sps:$4 sm:$0xff]  }
 0x111   :  { %1187 = vmatprep.subr.bf16.mxu1 %v14348_v29  ;;  %1269 = vmatprep.subr.bf16.mxu0 %v14416_v7  ;;  %v14449_v29 = vld [vmem:[#allocation10 + $0x9c] ss:$24 sps:$4 sm:$0xff]  }
 0x114   :  { %1188 = vmatpush1.bf16.msra.mxu1 %v14346_v32  ;;  %1270 = vmatpush1.bf16.msra.mxu0 %v14414_v8  ;;  %v14450_v32 = vld [vmem:[#allocation10 + $0x90] ss:$24 sps:$4 sm:$0xff]  }
 0x115   :  { %1189 = vmatprep.subr.bf16.mxu1 %v14351_v33  ;;  %1271 = vmatprep.subr.bf16.mxu0 %v14422_v11  ;;  %v14455_v33 = vld [vmem:[#allocation10 + $0x14] ss:$24 sps:$4 sm:$0xff]  }
 0x118   :  { %1190 = vmatpush1.bf16.msra.mxu1 %v14349_v36  ;;  %1272 = vmatpush1.bf16.msra.mxu0 %v14420_v12 }
 0x119   :  { %1191 = vmatprep.subr.bf16.mxu1 %v14354_v37  ;;  %1273 = vmatprep.subr.bf16.mxu0 %v14428_v15  ;;  %v552_v15 = vld [vmem:[#allocation2 + $0x8] sm:$0xff] }
 0x11c   :  { %1192 = vmatpush1.bf16.msra.mxu1 %v14352_v40  ;;  %1274 = vmatpush1.bf16.msra.mxu0 %v14426_v16  ;;  %v558_v16 = vld [vmem:[#allocation2 + $0x38] sm:$0xff] }
 0x11d   :  { %1210 = vmatprep.subr.bf16.mxu1 %v14359_v41  ;;  %1415 = vmatprep.subr.bf16.mxu0 %v14434_v19 }
 0x11f   :  { %1202 = vmatmul.mubr.bf16.vlgmr.msra.gmra.mrb[12].mxu1 %v17267_v44  ;;  %1284 = vmatmul.mubr.bf16.vlgmr.msra.gmra.mrb[12].mxu0 %v17267_v44 }
 0x120   :  { %1211 = vmatpush1.bf16.msra.mxu1 %v14357_v43  ;;  %12696 = vmatprep.mubr.msk.bf16.mxu1 %vm379_vm6, %v804_v24  ;;  %v14438_v24 = vld [vmem:[#allocation10 + $0x30] ss:$24 sps:$4 sm:$0xff]  }
 0x121   :  { %1212 = vmatprep.subr.bf16.mxu1 %v14365_v45  ;;  %1416 = vmatpush1.bf16.msra.mxu0 %v14432_v20 }
 0x122   :  { %1417 = vmatprep.subr.bf16.mxu0 %v14440_v23  ;;  %1447 = vmatprep.mubr.bf16.mxu0 %v16971_v34 }
 0x124   :  { %1213 = vmatpush1.bf16.msra.mxu1 %v14363_v46  ;;  %v12613_v46 = vld [vmem:[#allocation8] ss:$0 sm:$0xff] }
 0x125   :  { %1214 = vmatprep.subr.bf16.mxu1 %v14371_v47  ;;  %1418 = vmatpush1.bf16.msra.mxu0 %v14438_v24 }
 0x126   :  { %1419 = vmatprep.subr.bf16.mxu0 %v14446_v27  ;;  %v605_v27 = vrot.slane %v558_v16, 4 }
 0x128   :  { %1215 = vmatpush1.bf16.msra.mxu1 %v14369_v48 }
 0x129   :  { %1216 = vmatprep.subr.bf16.mxu1 %v14377_v49  ;;  %1420 = vmatpush1.bf16.msra.mxu0 %v14444_v28 }
 0x12a   :  { %1421 = vmatprep.subr.bf16.mxu0 %v14452_v31 }
 0x12c   :  { %1217 = vmatpush1.bf16.msra.mxu1 %v14375_v50 }
 0x12d   :  { %1218 = vmatprep.subr.bf16.mxu1 %v14383_v51  ;;  %1422 = vmatpush1.bf16.msra.mxu0 %v14450_v32 }
 0x12e   :  { %3402 = vmatprep.subr.bf16.mxu0 %v14494_v35 }
 0x130   :  { %1219 = vmatpush1.bf16.msra.mxu1 %v14381_v52 }
 0x131   :  { %1220 = vmatprep.subr.bf16.mxu1 %v14389_v53 }
 0x134   :  { %1221 = vmatpush1.bf16.msra.mxu1 %v14387_v54  ;;  %v556_v54 = vld [vmem:[#allocation2 + $0x28] sm:$0xff] }
 0x135   :  { %1222 = vmatprep.subr.bf16.mxu1 %v14395_v57  ;;  %v593_v60 = vrot.slane %v556_v54, 4 }
 0x137   :  { %v594_v0 = vadd.f32 %v593_v60, %v556_v54 }
 0x138   :  { %1223 = vmatpush1.bf16.msra.mxu1 %v14393_v58 }
 0x139   :  { %1224 = vmatprep.subr.bf16.mxu1 %v14401_v61  ;;  %v629_v61 = vrot.slane %v562_v55, 4  ;;  %v595_v3 = vrot.slane %v594_v0, 2 }
 0x13c   :  { %1225 = vmatpush1.bf16.msra.mxu1 %v14399_v62 }
 0x13d   :  { %1226 = vmatprep.subr.bf16.mxu1 %v14407_v1  ;;  %v630_v1 = vadd.f32 %v629_v61, %v562_v55 }
 0x13f   :  { %v631_v4 = vrot.slane %v630_v1, 2 }
 0x140   :  { %1227 = vmatpush1.bf16.msra.mxu1 %v14405_v2 }
 0x141   :  { %1228 = vmatprep.subr.bf16.mxu1 %v14413_v5 }
 0x144   :  { %1229 = vmatpush1.bf16.msra.mxu1 %v14411_v6 }
 0x145   :  { %1230 = vmatprep.subr.bf16.mxu1 %v14419_v9 }
 0x148   :  { %1231 = vmatpush1.bf16.msra.mxu1 %v14417_v10 }
 0x149   :  { %1232 = vmatprep.subr.bf16.mxu1 %v14425_v13 }
 0x14c   :  { %1233 = vmatpush1.bf16.msra.mxu1 %v14423_v14 }
 0x14d   :  { %1456 = vmatprep.subr.bf16.mxu1 %v14431_v17 }
 0x14f   :  { %1243 = vmatmul.mubr.bf16.vlgmr.msra.gmra.mrb[16].mxu1 %v17267_v44 }
 0x150   :  { %1457 = vmatpush1.bf16.msra.mxu1 %v14429_v18  ;;  %1488 = vmatprep.mubr.bf16.mxu1 %v16971_v34 }
 0x151   :  { %1458 = vmatprep.subr.bf16.mxu1 %v14437_v21  ;;  %v596_v21 = vadd.f32 %v595_v3, %v594_v0 }
 0x153   :  { %v597_v31 = vrot.slane %v596_v21, 1 }
 0x154   :  { %1459 = vmatpush1.bf16.msra.mxu1 %v14435_v22  ;;  %v632_v22 = vadd.f32 %v631_v4, %v630_v1  ;;  %v14453_v4 = vld [vmem:[#allocation10 + $0x10] ss:$24 sps:$4 sm:$0xff]  }
 0x155   :  { %1460 = vmatprep.subr.bf16.mxu1 %v14443_v25 }
 0x156   :  { %v633_v32 = vrot.slane %v632_v22, 1 }
 0x158   :  { %1461 = vmatpush1.bf16.msra.mxu1 %v14441_v26  ;;  %v569_v26 = vrot.slane %v552_v15, 4 }
 0x159   :  { %1462 = vmatprep.subr.bf16.mxu1 %v14449_v29 }
 0x15a   :  { %v570_v35 = vadd.f32 %v569_v26, %v552_v15  ;;  %v14461_v15 = vld [vmem:[#allocation10 + $0x74] ss:$24 sps:$4 sm:$0xff]   ;;  %v14462_v26 = vld [vmem:[#allocation10 + $0xa0] ss:$24 sps:$4 sm:$0xff]  }
 0x15c   :  { %1463 = vmatpush1.bf16.msra.mxu1 %v14447_v30 }
 0x15d   :  { %1497 = vmatprep.subr.bf16.mxu1 %v14455_v33 }
 0x1b2   :  { %v261_v36 = vpop.f32.mrb[0].mxu0  ;;  %v308_v37 = vpop.f32.mrb[0].mxu1 }
 0x1b3   :  { %v309_v38 = vadd.f32 %v308_v37, %v261_v36  ;;  %v14194_v39 = vpop.f32.mrb[1].mxu0  ;;  %v14200_v40 = vpop.f32.mrb[1].mxu1  ;;  %v606_v36 = vadd.f32 %v605_v27, %v558_v16  ;;  %v14498_v16 = vld [vmem:[#allocation13 + $0x630] ss:$24 sps:$4 sm:$0xff]   ;;  %v14467_v27 = vld [vmem:[#allocation13 + $0x4] ss:$24 sps:$4 sm:$0xff]  }
 0x1b4   :  { %v264_v41 = vpop.f32.mrb[2].mxu0  ;;  %v311_v42 = vpop.f32.mrb[2].mxu1  ;;  %v598_v40 = vadd.f32 %v597_v31, %v596_v21  ;;  %v14464_v21 = vld [vmem:[#allocation10 + $0xa4] ss:$24 sps:$4 sm:$0xff]   ;;  %v14465_v31 = vld [vmem:[#allocation13] ss:$24 sps:$4 sm:$0xff]  }
 0x1b5   :  { %v312_v43 = vadd.f32 %v311_v42, %v264_v41  ;;  %v14195_v44 = vpop.f32.mrb[3].mxu0  ;;  %v14201_v45 = vpop.f32.mrb[3].mxu1  ;;  %v634_v41 = vadd.f32 %v633_v32, %v632_v22  ;;  %v14504_v22 = vld [vmem:[#allocation13 + $0x660] ss:$24 sps:$4 sm:$0xff]  }
 0x1b6   :  { %v607_v44 = vrot.slane %v606_v36, 2 }
 0x1ba   :  { %v360_v47 = vpop.f32.mrb[4].mxu0  ;;  %v435_v48 = vpop.f32.mrb[4].mxu1 }
 0x1bb   :  { %v367_v49 = vadd.f32 %v360_v47, %v309_v38  ;;  %v14206_v50 = vpop.f32.mrb[5].mxu0  ;;  %v14212_v51 = vpop.f32.mrb[5].mxu1 }
 0x1bc   :  { %v363_v52 = vpop.f32.mrb[6].mxu0  ;;  %v438_v53 = vpop.f32.mrb[6].mxu1  ;;  %v608_v51 = vadd.f32 %v607_v44, %v606_v36  ;;  %v14468_v36 = vld [vmem:[#allocation13 + $0x30] ss:$24 sps:$4 sm:$0xff]  }
 0x1bd   :  { %v375_v56 = vadd.f32 %v12613_v46, %v367_v49  ;;  %v368_v57 = vadd.f32 %v363_v52, %v312_v43  ;;  %v14207_v58 = vpop.f32.mrb[7].mxu0  ;;  %v14213_v59 = vpop.f32.mrb[7].mxu1  ;;  %v571_v43 = vrot.slane %v570_v35, 2  ;;  %v647_v49 = vmul.f32 0.125, %v634_v41 }
 0x1be   :  { %v609_v58 = vrot.slane %v608_v51, 1 }
 0x1bf   :  { %v377_v62 = vmax.f32 %v375_v56, 0.0  ;;  %v376_v63 = vadd.f32 %v12613_v46, %v368_v57  ;;  %v572_v50 = vadd.f32 %v571_v43, %v570_v35  ;;  %v1549_v55 = vpack.c.bf16 %v647_v49, %v647_v49  ;;  %v14516_v35 = vld [vmem:[#allocation13 + $0x6c0] ss:$24 sps:$4 sm:$0xff]  }
 0x1c0   :  { %v610_v1 = vadd.f32 %v609_v58, %v608_v51  ;;  %v561_v43 = vld [vmem:[#allocation2 + $0x50] sm:$0xff] }
 0x1c1   :  { %v378_v2 = vmax.f32 %v376_v63, 0.0  ;;  %v380_v7 = vsel %vm379_vm6, %v377_v62, 0.0  ;;  %v573_v57 = vrot.slane %v572_v50, 1  ;;  %v1861_v62 = vunpack.c.l.b16 %v1549_v55  ;;  %v14474_v55 = vld [vmem:[#allocation13 + $0x90] ss:$24 sps:$4 sm:$0xff]  }
 0x1c2   :  { %v479_v5 = vpop.f32.mrb[8].mxu0  ;;  %v526_v6 = vpop.f32.mrb[8].mxu1  ;;  %v14542_v58 = vld [vmem:[#allocation13 + $0x784] ss:$24 sps:$4 sm:$0xff]  }
 0x1c3   :  { %v381_v8 = vsel %vm379_vm6, %v378_v2, 0.0  ;;  %v480_v9 = vadd.f32 %v479_v5, %v435_v48  ;;  %v14218_v10 = vpop.f32.mrb[9].mxu0  ;;  %v14224_v11 = vpop.f32.mrb[9].mxu1  ;;  %v641_v48 = vmul.f32 0.125, %v598_v40  ;;  %v574_v0 = vadd.f32 %v573_v57, %v572_v50  ;;  %v14530_v40 = vld [vmem:[#allocation13 + $0x724] ss:$24 sps:$4 sm:$0xff]  }
 0x1c4   :  { %v382_v12 = vadd.f32 %v381_v8, %v380_v7  ;;  %v482_v13 = vpop.f32.mrb[10].mxu0  ;;  %v529_v14 = vpop.f32.mrb[10].mxu1  ;;  %v14458_v7 = vld [vmem:[#allocation10 + $0x44] ss:$24 sps:$4 sm:$0xff]   ;;  %v14492_v8 = vld [vmem:[#allocation13 + $0x600] ss:$24 sps:$4 sm:$0xff]  }
 0x1c5   :  { %v533_v17 = vadd.f32 %v526_v6, %v480_v9  ;;  %v483_v18 = vadd.f32 %v482_v13, %v438_v53  ;;  %v14219_v19 = vpop.f32.mrb[11].mxu0  ;;  %v14225_v20 = vpop.f32.mrb[11].mxu1  ;;  %v1543_v54 = vpack.c.bf16 %v641_v48, %v641_v48  ;;  %v14500_v10 = vld [vmem:[#allocation13 + $0x634] ss:$24 sps:$4 sm:$0xff]   ;;  %v637_v11 = vmul.f32 0.125, %v574_v0 }
 0x1c6   :  { %v383_v23 = vrot.slane %v382_v12, 4  ;;  %v14459_v20 = vld [vmem:[#allocation10 + $0x70] ss:$24 sps:$4 sm:$0xff]   ;;  %v14476_v48 = vld [vmem:[#allocation13 + $0x94] ss:$24 sps:$4 sm:$0xff]  }
 0x1c7   :  { %v535_v24 = vadd.f32 %v12613_v46, %v533_v17  ;;  %v534_v25 = vadd.f32 %v529_v14, %v483_v18  ;;  %v1855_v61 = vunpack.c.l.b16 %v1543_v54  ;;  %v14456_v14 = vld [vmem:[#allocation10 + $0x40] ss:$24 sps:$4 sm:$0xff]   ;;  %v14506_v17 = vld [vmem:[#allocation13 + $0x664] ss:$24 sps:$4 sm:$0xff]   ;;  %v1539_v18 = vpack.c.bf16 %v637_v11, %v637_v11  ;;  %v14536_v50 = vld [vmem:[#allocation13 + $0x754] ss:$24 sps:$4 sm:$0xff]  }
 0x1c8   :  { %v384_v28 = vadd.f32 %v383_v23, %v382_v12  ;;  %v643_v12 = vmul.f32 0.125, %v610_v1  ;;  %v14512_v23 = vld [vmem:[#allocation13 + $0x694] ss:$24 sps:$4 sm:$0xff]   ;;  %v14534_v57 = vld [vmem:[#allocation13 + $0x750] ss:$24 sps:$4 sm:$0xff]   ;;  %v557_v11 = vld [vmem:[#allocation2 + $0x30] sm:$0xff] }
 0x1c9   :  { %v537_v29 = vmax.f32 %v535_v24, 0.0  ;;  %v536_v30 = vadd.f32 %v12613_v46, %v534_v25  ;;  %v1867_v5 = vsel %vm800_vm5, %v1861_v62, %v1855_v61  ;;  %v1851_v24 = vunpack.c.l.b16 %v1539_v18  ;;  %v560_v54 = vld [vmem:[#allocation2 + $0x48] sm:$0xff]  ;;  %v14540_v1 = vld [vmem:[#allocation13 + $0x780] ss:$24 sps:$4 sm:$0xff]  }
 0x1ca   :  { %v385_v37 = vrot.slane %v384_v28, 2  ;;  %v17280_v13 = vpack.c.b16 %v1867_v5, %v1867_v5  ;;  %v1545_v19 = vpack.c.bf16 %v643_v12, %v643_v12  ;;  %v617_v62 = vrot.slane %v560_v54, 4  ;;  %v14482_v0 = vld [vmem:[#allocation13 + $0xf4] ss:$24 sps:$4 sm:$0xff]   ;;  %v14554_v12 = vld [vmem:[#allocation13 + $0x7e4] ss:$24 sps:$4 sm:$0xff]  }
 0x1cb   :  { %v538_v33 = vmax.f32 %v536_v30, 0.0  ;;  %v539_v38 = vsel %vm379_vm6, %v537_v29, 0.0  ;;  %v14518_v29 = vld [vmem:[#allocation13 + $0x6c4] ss:$24 sps:$4 sm:$0xff]   ;;  %v14483_v18 = vld [vmem:[#allocation13 + $0x120] ss:$24 sps:$4 sm:$0xff]  }
 0x1cc   :  { %v386_v45 = vadd.f32 %v385_v37, %v384_v28  ;;  %v1857_v25 = vunpack.c.l.b16 %v1545_v19  ;;  %v14510_v28 = vld [vmem:[#allocation13 + $0x690] ss:$24 sps:$4 sm:$0xff]   ;;  %v14524_v37 = vld [vmem:[#allocation13 + $0x6f4] ss:$24 sps:$4 sm:$0xff]  }
 0x1cd   :  { %v540_v39 = vsel %vm379_vm6, %v538_v33, 0.0  ;;  %v14470_v33 = vld [vmem:[#allocation13 + $0x34] ss:$24 sps:$4 sm:$0xff]  }
 0x1ce   :  { %v541_v42 = vadd.f32 %v540_v39, %v539_v38  ;;  %v387_v52 = vrot.slane %v386_v45, 1  ;;  %v1863_v30 = vsel %vm800_vm5, %v1857_v25, %v1851_v24  ;;  %v14473_v38 = vld [vmem:[#allocation13 + $0x64] ss:$24 sps:$4 sm:$0xff]   ;;  %v14522_v39 = vld [vmem:[#allocation13 + $0x6f0] ss:$24 sps:$4 sm:$0xff]  }
 0x1cf   :  { %v17287_v32 = vpack.c.b16 %v1863_v30, %v1863_v30  ;;  %v14488_v19 = vld [vmem:[#allocation13 + $0x154] ss:$24 sps:$4 sm:$0xff]  }
 0x1d0   :  { %v542_v47 = vrot.slane %v541_v42, 4  ;;  %v388_v59 = vadd.f32 %v387_v52, %v386_v45  ;;  %v14471_v45 = vld [vmem:[#allocation13 + $0x60] ss:$24 sps:$4 sm:$0xff]   ;;  %v623_v52 = vrot.slane %v561_v43, 4 }
 0x1d2   :  { %v543_v46 = vadd.f32 %v542_v47, %v541_v42  ;;  %v390_v2 = vmul.f32 0.0625, %v388_v59  ;;  %v555_v42 = vld [vmem:[#allocation2 + $0x20] sm:$0xff] }
 0x1d3   :  { %v587_v51 = vrot.slane %v555_v42, 4 }
 0x1d4   :  { %v544_v53 = vrot.slane %v543_v46, 2 }
 0x1d5   :  { %v588_v59 = vadd.f32 %v587_v51, %v555_v42  ;;  %v14497_v42 = vld [vmem:[#allocation13 + $0x1b4] ss:$24 sps:$4 sm:$0xff]  }
 0x1d6   :  { %v545_v56 = vadd.f32 %v544_v53, %v543_v46  ;;  %v14528_v46 = vld [vmem:[#allocation13 + $0x720] ss:$24 sps:$4 sm:$0xff]  }
 0x1d7   :  { %v554_v53 = vld [vmem:[#allocation2 + $0x18] sm:$0xff] }
 0x1d8   :  { %v546_v60 = vrot.slane %v545_v56, 1  ;;  %v581_v61 = vrot.slane %v554_v53, 4 }
 0x1da   :  { %v547_v63 = vadd.f32 %v546_v60, %v545_v56  ;;  %v14479_v56 = vld [vmem:[#allocation13 + $0xc4] ss:$24 sps:$4 sm:$0xff]   ;;  %v624_v60 = vadd.f32 %v623_v52, %v561_v43  ;;  %v582_v5 = vadd.f32 %v581_v61, %v554_v53  ;;  %v14495_v52 = vld [vmem:[#allocation13 + $0x1b0] ss:$24 sps:$4 sm:$0xff]  }
 0x1db   :  { %v14503_v53 = vld [vmem:[#allocation13 + $0x1e4] ss:$24 sps:$4 sm:$0xff]  }
 0x1dc   :  { %v548_v3 = vmul.f32 0.0625, %v547_v63  ;;  %v14477_v63 = vld [vmem:[#allocation13 + $0xc0] ss:$24 sps:$4 sm:$0xff]  }
 0x1de   :  { %v550_v6 = vsel %vm549_vm7, %v390_v2, %v548_v3  ;;  %v14548_v2 = vld [vmem:[#allocation13 + $0x7b4] ss:$24 sps:$4 sm:$0xff]   ;;  %v589_v3 = vrot.slane %v588_v59, 2 }
 0x1df   :  { %v691_v9 = vpack.c.bf16 %v550_v6, %v550_v6  ;;  %v618_v6 = vadd.f32 %v617_v62, %v560_v54  ;;  %v14501_v62 = vld [vmem:[#allocation13 + $0x1e0] ss:$24 sps:$4 sm:$0xff]  }
 0x1e1   :  { %12722 = vmatmul.mubr.msk.bf16.vlgmr.msra.gmra.mrb[16].mxu0 %vm379_vm6, %v691_v9  ;;  %12723 = vmatmul.mubr.msk.bf16.vlgmr.msra.gmra.mrb[20].mxu1 %vm379_vm6, %v691_v9 }
 0x1e2   :  { %1498 = vmatpush1.bf16.msra.mxu1 %v14453_v4  ;;  %1529 = vmatprep.mubr.bf16.mxu1 %v16971_v34  ;;  %v625_v4 = vrot.slane %v624_v60, 2 }
 0x1e3   :  { %1499 = vmatprep.subr.bf16.mxu1 %v14458_v7  ;;  %3403 = vmatpush1.bf16.msra.mxu0 %v14492_v8  ;;  %v14480_v7 = vld [vmem:[#allocation13 + $0xf0] ss:$24 sps:$4 sm:$0xff]   ;;  %v14485_v8 = vld [vmem:[#allocation13 + $0x124] ss:$24 sps:$4 sm:$0xff]  }
 0x1e4   :  { %3404 = vmatprep.subr.bf16.mxu0 %v14500_v10  ;;  %3434 = vmatprep.mubr.bf16.mxu0 %v17280_v13  ;;  %v14546_v10 = vld [vmem:[#allocation13 + $0x7b0] ss:$24 sps:$4 sm:$0xff]  }
 0x1e6   :  { %1500 = vmatpush1.bf16.msra.mxu1 %v14456_v14  ;;  %v590_v14 = vadd.f32 %v589_v3, %v588_v59  ;;  %v14584_v3 = vld [vmem:[#allocation13 + $0x8d4] ss:$24 sps:$4 sm:$0xff]  }
 0x1e7   :  { %1501 = vmatprep.subr.bf16.mxu1 %v14461_v15  ;;  %3405 = vmatpush1.bf16.msra.mxu0 %v14498_v16  ;;  %v626_v15 = vadd.f32 %v625_v4, %v624_v60  ;;  %v583_v16 = vrot.slane %v582_v5, 2 }
 0x1e8   :  { %3406 = vmatprep.subr.bf16.mxu0 %v14506_v17  ;;  %v619_v17 = vrot.slane %v618_v6, 2  ;;  %v591_v24 = vrot.slane %v590_v14, 1 }
 0x1e9   :  { %v627_v25 = vrot.slane %v626_v15, 1 }
 0x1ea   :  { %1502 = vmatpush1.bf16.msra.mxu1 %v14459_v20 }
 0x1eb   :  { %1503 = vmatprep.subr.bf16.mxu1 %v14464_v21  ;;  %3407 = vmatpush1.bf16.msra.mxu0 %v14504_v22  ;;  %v599_v21 = vrot.slane %v557_v11, 4  ;;  %v14552_v22 = vld [vmem:[#allocation13 + $0x7e0] ss:$24 sps:$4 sm:$0xff]  }
 0x1ec   :  { %3408 = vmatprep.subr.bf16.mxu0 %v14512_v23  ;;  %v14560_v23 = vld [vmem:[#allocation13 + $0x814] ss:$24 sps:$4 sm:$0xff]  }
 0x1ee   :  { %1504 = vmatpush1.bf16.msra.mxu1 %v14462_v26  ;;  %v584_v26 = vadd.f32 %v583_v16, %v582_v5 }
 0x1ef   :  { %3320 = vmatprep.subr.bf16.mxu1 %v14467_v27  ;;  %3409 = vmatpush1.bf16.msra.mxu0 %v14510_v28  ;;  %v620_v27 = vadd.f32 %v619_v17, %v618_v6  ;;  %v14486_v28 = vld [vmem:[#allocation13 + $0x150] ss:$24 sps:$4 sm:$0xff]  }
 0x1f0   :  { %3410 = vmatprep.subr.bf16.mxu0 %v14518_v29  ;;  %v14491_v29 = vld [vmem:[#allocation13 + $0x184] ss:$24 sps:$4 sm:$0xff]  }
 0x1f1   :  { %12724 = vmatmul.mubr.msk.bf16.vlgmr.msra.gmra.mrb[24].mxu1 %vm379_vm6, %v691_v9  ;;  %v551_v9 = vld [vmem:[#allocation2] sm:$0xff] }
 0x1f2   :  { %3321 = vmatpush1.bf16.msra.mxu1 %v14465_v31  ;;  %3352 = vmatprep.mubr.bf16.mxu1 %v17287_v32  ;;  %v17291_v41 = vpop.f32.mrb[12].mxu1  ;;  %v563_v20 = vrot.slane %v551_v9, 4  ;;  %v600_v31 = vadd.f32 %v599_v21, %v557_v11 }
 0x1f3   :  { %3322 = vmatprep.subr.bf16.mxu1 %v14470_v33  ;;  %3411 = vmatpush1.bf16.msra.mxu0 %v14516_v35  ;;  %v17293_v44 = vpop.f32.mrb[13].mxu1  ;;  %v14558_v33 = vld [vmem:[#allocation13 + $0x810] ss:$24 sps:$4 sm:$0xff]   ;;  %v14566_v35 = vld [vmem:[#allocation13 + $0x844] ss:$24 sps:$4 sm:$0xff]  }
 0x1f4   :  { %3412 = vmatprep.subr.bf16.mxu0 %v14524_v37  ;;  %v1207_v47 = vpop.f32.mrb[14].mxu1  ;;  %v564_v30 = vadd.f32 %v563_v20, %v551_v9  ;;  %v628_v37 = vadd.f32 %v627_v25, %v626_v15  ;;  %v14515_v9 = vld [vmem:[#allocation13 + $0x244] ss:$24 sps:$4 sm:$0xff]  }
 0x1f5   :  { %v1208_v49 = vpop.f32.mrb[15].mxu1  ;;  %v14564_v47 = vld [vmem:[#allocation13 + $0x840] ss:$24 sps:$4 sm:$0xff]  }
 0x1f6   :  { %3323 = vmatpush1.bf16.msra.mxu1 %v14468_v36  ;;  %v592_v36 = vadd.f32 %v591_v24, %v590_v14  ;;  %v565_v43 = vrot.slane %v564_v30, 2  ;;  %v14590_v14 = vld [vmem:[#allocation13 + $0x30c] ss:$24 sps:$4 sm:$0xff]   ;;  %v14596_v24 = vld [vmem:[#allocation13 + $0x33c] ss:$24 sps:$4 sm:$0xff]  }
 0x1f7   :  { %3324 = vmatprep.subr.bf16.mxu1 %v14473_v38  ;;  %3413 = vmatpush1.bf16.msra.mxu0 %v14522_v39  ;;  %v585_v38 = vrot.slane %v584_v26, 1  ;;  %v621_v39 = vrot.slane %v620_v27, 1 }
 0x1f8   :  { %3414 = vmatprep.subr.bf16.mxu0 %v14530_v40  ;;  %v14489_v40 = vld [vmem:[#allocation13 + $0x180] ss:$24 sps:$4 sm:$0xff]   ;;  %v640_v49 = vmul.f32 0.125, %v592_v36  ;;  %v566_v54 = vadd.f32 %v565_v43, %v564_v30 }
 0x1f9   :  { %v622_v51 = vadd.f32 %v621_v39, %v620_v27  ;;  %v14527_v27 = vld [vmem:[#allocation13 + $0x2a4] ss:$24 sps:$4 sm:$0xff]   ;;  %v14525_v39 = vld [vmem:[#allocation13 + $0x2a0] ss:$24 sps:$4 sm:$0xff]  }
 0x1fa   :  { %3325 = vmatpush1.bf16.msra.mxu1 %v14471_v45  ;;  %v601_v45 = vrot.slane %v600_v31, 2 }
 0x1fb   :  { %3326 = vmatprep.subr.bf16.mxu1 %v14476_v48  ;;  %3415 = vmatpush1.bf16.msra.mxu0 %v14528_v46  ;;  %v14572_v48 = vld [vmem:[#allocation13 + $0x874] ss:$24 sps:$4 sm:$0xff]   ;;  %v646_v46 = vmul.f32 0.125, %v628_v37  ;;  %v645_v61 = vmul.f32 0.125, %v622_v51 }
 0x1fc   :  { %3416 = vmatprep.subr.bf16.mxu0 %v14536_v50  ;;  %v586_v50 = vadd.f32 %v585_v38, %v584_v26  ;;  %v14519_v26 = vld [vmem:[#allocation13 + $0x270] ss:$24 sps:$4 sm:$0xff]   ;;  %v14614_v51 = vld [vmem:[#allocation13 + $0x3cc] ss:$24 sps:$4 sm:$0xff]  }
 0x1fd   :  { %v1548_v59 = vpack.c.bf16 %v646_v46, %v646_v46  ;;  %v14539_v46 = vld [vmem:[#allocation13 + $0x304] ss:$24 sps:$4 sm:$0xff]  }
 0x1fe   :  { %3327 = vmatpush1.bf16.msra.mxu1 %v14474_v55  ;;  %v602_v55 = vadd.f32 %v601_v45, %v600_v31  ;;  %v639_v60 = vmul.f32 0.125, %v586_v50  ;;  %v14600_v45 = vld [vmem:[#allocation13 + $0x368] ss:$24 sps:$4 sm:$0xff]   ;;  %v14606_v50 = vld [vmem:[#allocation13 + $0x398] ss:$24 sps:$4 sm:$0xff]  }
 0x1ff   :  { %3328 = vmatprep.subr.bf16.mxu1 %v14479_v56  ;;  %3417 = vmatpush1.bf16.msra.mxu0 %v14534_v57  ;;  %v14570_v56 = vld [vmem:[#allocation13 + $0x870] ss:$24 sps:$4 sm:$0xff]   ;;  %v14578_v57 = vld [vmem:[#allocation13 + $0x8a4] ss:$24 sps:$4 sm:$0xff]   ;;  %v1860_v5 = vunpack.c.l.b16 %v1548_v59 }
 0x200   :  { %3418 = vmatprep.subr.bf16.mxu0 %v14542_v58  ;;  %v1542_v58 = vpack.c.bf16 %v640_v49, %v640_v49  ;;  %v1541_v6 = vpack.c.bf16 %v639_v60, %v639_v60 }
 0x202   :  { %3329 = vmatpush1.bf16.msra.mxu1 %v14477_v63  ;;  %v14509_v63 = vld [vmem:[#allocation13 + $0x214] ss:$24 sps:$4 sm:$0xff]   ;;  %v1854_v4 = vunpack.c.l.b16 %v1542_v58  ;;  %v1853_v16 = vunpack.c.l.b16 %v1541_v6 }
 0x203   :  { %3330 = vmatprep.subr.bf16.mxu1 %v14482_v0  ;;  %3419 = vmatpush1.bf16.msra.mxu0 %v14540_v1  ;;  %v567_v0 = vrot.slane %v566_v54, 1  ;;  %v603_v1 = vrot.slane %v602_v55, 1  ;;  %v14620_v58 = vld [vmem:[#allocation13 + $0x3fc] ss:$24 sps:$4 sm:$0xff]  }
 0x204   :  { %3420 = vmatprep.subr.bf16.mxu0 %v14548_v2  ;;  %v14576_v2 = vld [vmem:[#allocation13 + $0x8a0] ss:$24 sps:$4 sm:$0xff]   ;;  %v1866_v15 = vsel %vm800_vm5, %v1860_v5, %v1854_v4  ;;  %v14557_v4 = vld [vmem:[#allocation13 + $0x394] ss:$24 sps:$4 sm:$0xff]  }
 0x205   :  { %v604_v11 = vadd.f32 %v603_v1, %v602_v55  ;;  %v14545_v55 = vld [vmem:[#allocation13 + $0x334] ss:$24 sps:$4 sm:$0xff]   ;;  %v14624_v5 = vld [vmem:[#allocation13 + $0x428] ss:$24 sps:$4 sm:$0xff]  }
 0x206   :  { %3331 = vmatpush1.bf16.msra.mxu1 %v14480_v7  ;;  %v1547_v7 = vpack.c.bf16 %v645_v61, %v645_v61  ;;  %v14551_v61 = vld [vmem:[#allocation13 + $0x364] ss:$24 sps:$4 sm:$0xff]  }
 0x207   :  { %3332 = vmatprep.subr.bf16.mxu1 %v14485_v8  ;;  %3421 = vmatpush1.bf16.msra.mxu0 %v14546_v10  ;;  %v14507_v8 = vld [vmem:[#allocation13 + $0x210] ss:$24 sps:$4 sm:$0xff]   ;;  %v568_v10 = vadd.f32 %v567_v0, %v566_v54  ;;  %v642_v21 = vmul.f32 0.125, %v604_v11  ;;  %v17310_v54 = vpop.f32.mrb[12].mxu0  ;;  %v14549_v0 = vld [vmem:[#allocation13 + $0x360] ss:$24 sps:$4 sm:$0xff]  }
 0x208   :  { %3422 = vmatprep.subr.bf16.mxu0 %v14554_v12  ;;  %v14582_v12 = vld [vmem:[#allocation13 + $0x8d0] ss:$24 sps:$4 sm:$0xff]   ;;  %v1859_v17 = vunpack.c.l.b16 %v1547_v7  ;;  %v17313_v59 = vpop.f32.mrb[13].mxu0  ;;  %v14626_v1 = vld [vmem:[#allocation13 + $0x42c] ss:$24 sps:$4 sm:$0xff]  }
 0x209   :  { %v636_v20 = vmul.f32 0.125, %v568_v10  ;;  %v1289_v60 = vpop.f32.mrb[14].mxu0  ;;  %v14632_v6 = vld [vmem:[#allocation13 + $0x45c] ss:$24 sps:$4 sm:$0xff]   ;;  %v14630_v11 = vld [vmem:[#allocation13 + $0x458] ss:$24 sps:$4 sm:$0xff]  }
 0x20a   :  { %3333 = vmatpush1.bf16.msra.mxu1 %v14483_v18  ;;  %v14513_v18 = vld [vmem:[#allocation13 + $0x240] ss:$24 sps:$4 sm:$0xff]   ;;  %v1865_v25 = vsel %vm800_vm5, %v1859_v17, %v1853_v16  ;;  %v14563_v10 = vld [vmem:[#allocation13 + $0x3c4] ss:$24 sps:$4 sm:$0xff]   ;;  %v14569_v17 = vld [vmem:[#allocation13 + $0x3f4] ss:$24 sps:$4 sm:$0xff]  }
 0x20b   :  { %3334 = vmatprep.subr.bf16.mxu1 %v14488_v19  ;;  %3423 = vmatpush1.bf16.msra.mxu0 %v14552_v22  ;;  %v14521_v19 = vld [vmem:[#allocation13 + $0x274] ss:$24 sps:$4 sm:$0xff]   ;;  %v17296_v22 = vpack.c.b16 %v1866_v15, %v1866_v15  ;;  %v17300_v30 = vpack.c.b16 %v1865_v25, %v1865_v25  ;;  %v14561_v16 = vld [vmem:[#allocation13 + $0x3c0] ss:$24 sps:$4 sm:$0xff]  }
 0x20c   :  { %3424 = vmatprep.subr.bf16.mxu0 %v14560_v23  ;;  %v14588_v23 = vld [vmem:[#allocation13 + $0x308] ss:$24 sps:$4 sm:$0xff]   ;;  %v14642_v25 = vld [vmem:[#allocation13 + $0x4b8] ss:$24 sps:$4 sm:$0xff]   ;;  %v14674_v60 = vld [vmem:[#allocation13 + $0x5ac] ss:$24 sps:$4 sm:$0xff]  }
 0x20e   :  { %3335 = vmatpush1.bf16.msra.mxu1 %v14486_v28  ;;  %v1538_v28 = vpack.c.bf16 %v636_v20, %v636_v20  ;;  %v14567_v20 = vld [vmem:[#allocation13 + $0x3f0] ss:$24 sps:$4 sm:$0xff]  }
 0x20f   :  { %3336 = vmatprep.subr.bf16.mxu1 %v14491_v29  ;;  %3425 = vmatpush1.bf16.msra.mxu0 %v14558_v33  ;;  %v1544_v29 = vpack.c.bf16 %v642_v21, %v642_v21  ;;  %v14594_v33 = vld [vmem:[#allocation13 + $0x338] ss:$24 sps:$4 sm:$0xff]  }
 0x210   :  { %3426 = vmatprep.subr.bf16.mxu0 %v14566_v35  ;;  %v14602_v35 = vld [vmem:[#allocation13 + $0x36c] ss:$24 sps:$4 sm:$0xff]  }
 0x211   :  { %v1856_v43 = vunpack.c.l.b16 %v1544_v29 }
 0x212   :  { %3337 = vmatpush1.bf16.msra.mxu1 %v14489_v40  ;;  %v14533_v40 = vld [vmem:[#allocation13 + $0x2d4] ss:$24 sps:$4 sm:$0xff]  }
 0x213   :  { %3338 = vmatprep.subr.bf16.mxu1 %v14497_v42  ;;  %3427 = vmatpush1.bf16.msra.mxu0 %v14564_v47  ;;  %v1850_v42 = vunpack.c.l.b16 %v1538_v28  ;;  %v14608_v47 = vld [vmem:[#allocation13 + $0x39c] ss:$24 sps:$4 sm:$0xff]  }
 0x214   :  { %3428 = vmatprep.subr.bf16.mxu0 %v14572_v48  ;;  %v14531_v48 = vld [vmem:[#allocation13 + $0x2d0] ss:$24 sps:$4 sm:$0xff]  }
 0x215   :  { %v1862_v49 = vsel %vm800_vm5, %v1856_v43, %v1850_v42  ;;  %v14587_v42 = vld [vmem:[#allocation13 + $0x484] ss:$24 sps:$4 sm:$0xff]   ;;  %v14654_v43 = vld [vmem:[#allocation13 + $0x518] ss:$24 sps:$4 sm:$0xff]  }
 0x216   :  { %3339 = vmatpush1.bf16.msra.mxu1 %v14495_v52  ;;  %v14537_v52 = vld [vmem:[#allocation13 + $0x300] ss:$24 sps:$4 sm:$0xff]  }
 0x217   :  { %3340 = vmatprep.subr.bf16.mxu1 %v14503_v53  ;;  %3429 = vmatpush1.bf16.msra.mxu0 %v14570_v56  ;;  %v17308_v53 = vpack.c.b16 %v1862_v49, %v1862_v49  ;;  %v14612_v56 = vld [vmem:[#allocation13 + $0x3c8] ss:$24 sps:$4 sm:$0xff]  }
 0x218   :  { %3430 = vmatprep.subr.bf16.mxu0 %v14578_v57  ;;  %v14543_v57 = vld [vmem:[#allocation13 + $0x330] ss:$24 sps:$4 sm:$0xff]   ;;  %v14585_v49 = vld [vmem:[#allocation13 + $0x480] ss:$24 sps:$4 sm:$0xff]  }
 0x21a   :  { %3341 = vmatpush1.bf16.msra.mxu1 %v14501_v62  ;;  %v14618_v62 = vld [vmem:[#allocation13 + $0x3f8] ss:$24 sps:$4 sm:$0xff]  }
 0x21b   :  { %3342 = vmatprep.subr.bf16.mxu1 %v14509_v63  ;;  %3431 = vmatpush1.bf16.msra.mxu0 %v14576_v2  ;;  %v1290_v63 = vpop.f32.mrb[15].mxu0  ;;  %v553_v2 = vld [vmem:[#allocation2 + $0x10] sm:$0xff] }
 0x21c   :  { %3432 = vmatprep.subr.bf16.mxu0 %v14584_v3  ;;  %v559_v3 = vld [vmem:[#allocation2 + $0x40] sm:$0xff]  ;;  %v575_v7 = vrot.slane %v553_v2, 4  ;;  %v14597_v63 = vld [vmem:[#allocation13 + $0x4e0] ss:$24 sps:$4 sm:$0xff]  }
 0x21e   :  { %3343 = vmatpush1.bf16.msra.mxu1 %v14507_v8  ;;  %v611_v8 = vrot.slane %v559_v3, 4 }
 0x21f   :  { %3344 = vmatprep.subr.bf16.mxu1 %v14515_v9  ;;  %3433 = vmatpush1.bf16.msra.mxu0 %v14582_v12  ;;  %v14555_v9 = vld [vmem:[#allocation13 + $0x390] ss:$24 sps:$4 sm:$0xff]   ;;  %v14638_v12 = vld [vmem:[#allocation13 + $0x48c] ss:$24 sps:$4 sm:$0xff]  }
 0x220   :  { %3484 = vmatprep.subr.bf16.mxu0 %v14590_v14  ;;  %v576_v14 = vadd.f32 %v575_v7, %v553_v2  ;;  %v612_v15 = vadd.f32 %v611_v8, %v559_v3  ;;  %v14680_v2 = vld [vmem:[#allocation13 + $0x5dc] ss:$24 sps:$4 sm:$0xff]   ;;  %v14678_v7 = vld [vmem:[#allocation13 + $0x5d8] ss:$24 sps:$4 sm:$0xff]  }
 0x221   :  { %v14686_v8 = vld [vmem:[#allocation13 + $0x14] ss:$24 sps:$4 sm:$0xff]  }
 0x222   :  { %3345 = vmatpush1.bf16.msra.mxu1 %v14513_v18  ;;  %3435 = vmatmul.mubr.bf16.vlgmr.msra.gmra.mrb[20].mxu0 %v17296_v22  ;;  %v17302_v31 = vpop.f32.mrb[16].mxu1  ;;  %v14636_v18 = vld [vmem:[#allocation13 + $0x488] ss:$24 sps:$4 sm:$0xff]   ;;  %v577_v21 = vrot.slane %v576_v14, 2 }
 0x223   :  { %3346 = vmatprep.subr.bf16.mxu1 %v14521_v19  ;;  %3485 = vmatpush1.bf16.msra.mxu0 %v14588_v23  ;;  %v17304_v36 = vpop.f32.mrb[17].mxu1  ;;  %v14644_v19 = vld [vmem:[#allocation13 + $0x4bc] ss:$24 sps:$4 sm:$0xff]   ;;  %v613_v23 = vrot.slane %v612_v15, 2 }
 0x224   :  { %3486 = vmatprep.subr.bf16.mxu0 %v14596_v24  ;;  %3516 = vmatprep.mubr.bf16.mxu0 %v17300_v30  ;;  %v1248_v37 = vpop.f32.mrb[18].mxu1  ;;  %v14575_v24 = vld [vmem:[#allocation13 + $0x424] ss:$24 sps:$4 sm:$0xff]   ;;  %v578_v28 = vadd.f32 %v577_v21, %v576_v14  ;;  %v14629_v21 = vld [vmem:[#allocation13 + $0x5d4] ss:$24 sps:$4 sm:$0xff]  }
 0x225   :  { %v1249_v38 = vpop.f32.mrb[19].mxu1  ;;  %v614_v29 = vadd.f32 %v613_v23, %v612_v15  ;;  %v14656_v37 = vld [vmem:[#allocation13 + $0x51c] ss:$24 sps:$4 sm:$0xff]   ;;  %v14696_v23 = vld [vmem:[#allocation13 + $0x70] ss:$24 sps:$4 sm:$0xff]  }
 0x226   :  { %3347 = vmatpush1.bf16.msra.mxu1 %v14519_v26  ;;  %v14573_v26 = vld [vmem:[#allocation13 + $0x420] ss:$24 sps:$4 sm:$0xff]   ;;  %v579_v38 = vrot.slane %v578_v28, 1  ;;  %v14692_v14 = vld [vmem:[#allocation13 + $0x44] ss:$24 sps:$4 sm:$0xff]  }
 0x227   :  { %3348 = vmatprep.subr.bf16.mxu1 %v14527_v27  ;;  %3487 = vmatpush1.bf16.msra.mxu0 %v14594_v33  ;;  %v14650_v27 = vld [vmem:[#allocation13 + $0x4ec] ss:$24 sps:$4 sm:$0xff]  }
 0x228   :  { %3488 = vmatprep.subr.bf16.mxu0 %v14602_v35  ;;  %v14581_v33 = vld [vmem:[#allocation13 + $0x454] ss:$24 sps:$4 sm:$0xff]   ;;  %v14648_v35 = vld [vmem:[#allocation13 + $0x4e8] ss:$24 sps:$4 sm:$0xff]  }
 0x22a   :  { %3349 = vmatpush1.bf16.msra.mxu1 %v14525_v39  ;;  %v615_v39 = vrot.slane %v614_v29, 1 }
 0x22b   :  { %3350 = vmatprep.subr.bf16.mxu1 %v14533_v40  ;;  %3489 = vmatpush1.bf16.msra.mxu0 %v14600_v45  ;;  %v14579_v40 = vld [vmem:[#allocation13 + $0x450] ss:$24 sps:$4 sm:$0xff]   ;;  %v14662_v45 = vld [vmem:[#allocation13 + $0x54c] ss:$24 sps:$4 sm:$0xff]  }
 0x22c   :  { %3490 = vmatprep.subr.bf16.mxu0 %v14608_v47  ;;  %v580_v47 = vadd.f32 %v579_v38, %v578_v28  ;;  %v14710_v28 = vld [vmem:[#allocation13 + $0xd4] ss:$24 sps:$4 sm:$0xff]   ;;  %v14639_v38 = vld [vmem:[#allocation13 + $0x38] ss:$24 sps:$4 sm:$0xff]  }
 0x22e   :  { %3351 = vmatpush1.bf16.msra.mxu1 %v14531_v48  ;;  %v616_v48 = vadd.f32 %v615_v39, %v614_v29  ;;  %v14633_v29 = vld [vmem:[#allocation13 + $0x8] ss:$24 sps:$4 sm:$0xff]   ;;  %v14647_v39 = vld [vmem:[#allocation13 + $0x6c] ss:$24 sps:$4 sm:$0xff]  }
 0x22f   :  { %3361 = vmatprep.subr.bf16.mxu1 %v14539_v46  ;;  %3491 = vmatpush1.bf16.msra.mxu0 %v14606_v50  ;;  %v14593_v46 = vld [vmem:[#allocation13 + $0x4b4] ss:$24 sps:$4 sm:$0xff]   ;;  %v14660_v50 = vld [vmem:[#allocation13 + $0x548] ss:$24 sps:$4 sm:$0xff]  }
 0x230   :  { %3492 = vmatprep.subr.bf16.mxu0 %v14614_v51  ;;  %v14668_v51 = vld [vmem:[#allocation13 + $0x57c] ss:$24 sps:$4 sm:$0xff]  }
 0x231   :  { %3353 = vmatmul.mubr.bf16.vlgmr.msra.gmra.mrb[28].mxu1 %v17308_v53 }
 0x232   :  { %3362 = vmatpush1.bf16.msra.mxu1 %v14537_v52  ;;  %3393 = vmatprep.mubr.bf16.mxu1 %v17300_v30  ;;  %v638_v52 = vmul.f32 0.125, %v580_v47  ;;  %v14720_v47 = vld [vmem:[#allocation13 + $0x130] ss:$24 sps:$4 sm:$0xff]  }
 0x233   :  { %3363 = vmatprep.subr.bf16.mxu1 %v14545_v55  ;;  %3493 = vmatpush1.bf16.msra.mxu0 %v14612_v56  ;;  %v644_v55 = vmul.f32 0.125, %v616_v48  ;;  %v14591_v56 = vld [vmem:[#allocation13 + $0x4b0] ss:$24 sps:$4 sm:$0xff]   ;;  %v14728_v48 = vld [vmem:[#allocation13 + $0x164] ss:$24 sps:$4 sm:$0xff]  }
 0x234   :  { %3494 = vmatprep.subr.bf16.mxu0 %v14620_v58  ;;  %v14666_v58 = vld [vmem:[#allocation13 + $0x578] ss:$24 sps:$4 sm:$0xff]  }
 0x236   :  { %3364 = vmatpush1.bf16.msra.mxu1 %v14543_v57  ;;  %v14599_v57 = vld [vmem:[#allocation13 + $0x4e4] ss:$24 sps:$4 sm:$0xff]  }
 0x237   :  { %3365 = vmatprep.subr.bf16.mxu1 %v14551_v61  ;;  %3495 = vmatpush1.bf16.msra.mxu0 %v14618_v62  ;;  %v1540_v61 = vpack.c.bf16 %v638_v52, %v638_v52  ;;  %v1546_v62 = vpack.c.bf16 %v644_v55, %v644_v55  ;;  %v14665_v52 = vld [vmem:[#allocation13 + $0xfc] ss:$24 sps:$4 sm:$0xff]   ;;  %v14732_v55 = vld [vmem:[#allocation13 + $0x190] ss:$24 sps:$4 sm:$0xff]  }
 0x238   :  { %3496 = vmatprep.subr.bf16.mxu0 %v14626_v1  ;;  %v14672_v1 = vld [vmem:[#allocation13 + $0x5a8] ss:$24 sps:$4 sm:$0xff]  }
 0x239   :  { %v1852_v3 = vunpack.c.l.b16 %v1540_v61  ;;  %v14669_v61 = vld [vmem:[#allocation13 + $0x128] ss:$24 sps:$4 sm:$0xff]  }
 0x23a   :  { %3366 = vmatpush1.bf16.msra.mxu1 %v14549_v0  ;;  %v14605_v0 = vld [vmem:[#allocation13 + $0x514] ss:$24 sps:$4 sm:$0xff]  }
 0x23b   :  { %3367 = vmatprep.subr.bf16.mxu1 %v14557_v4  ;;  %3497 = vmatpush1.bf16.msra.mxu0 %v14624_v5  ;;  %v1858_v4 = vunpack.c.l.b16 %v1546_v62  ;;  %v14603_v5 = vld [vmem:[#allocation13 + $0x510] ss:$24 sps:$4 sm:$0xff]   ;;  %v14746_v62 = vld [vmem:[#allocation13 + $0x1f4] ss:$24 sps:$4 sm:$0xff]  }
 0x23c   :  { %3498 = vmatprep.subr.bf16.mxu0 %v14632_v6  ;;  %v14611_v6 = vld [vmem:[#allocation13 + $0x544] ss:$24 sps:$4 sm:$0xff]  }
 0x23e   :  { %3368 = vmatpush1.bf16.msra.mxu1 %v14555_v9  ;;  %v1864_v9 = vsel %vm800_vm5, %v1858_v4, %v1852_v3  ;;  %v14683_v3 = vld [vmem:[#allocation13 + $0x18c] ss:$24 sps:$4 sm:$0xff]   ;;  %v14750_v4 = vld [vmem:[#allocation13 + $0x220] ss:$24 sps:$4 sm:$0xff]  }
 0x23f   :  { %3369 = vmatprep.subr.bf16.mxu1 %v14563_v10  ;;  %3499 = vmatpush1.bf16.msra.mxu0 %v14630_v11  ;;  %v14609_v10 = vld [vmem:[#allocation13 + $0x540] ss:$24 sps:$4 sm:$0xff]   ;;  %v14617_v11 = vld [vmem:[#allocation13 + $0x574] ss:$24 sps:$4 sm:$0xff]   ;;  %v17317_v15 = vpack.c.b16 %v1864_v9, %v1864_v9  ;;  %v14764_v9 = vld [vmem:[#allocation13 + $0x284] ss:$24 sps:$4 sm:$0xff]  }
 0x240   :  { %3500 = vmatprep.subr.bf16.mxu0 %v14638_v12  ;;  %v14684_v12 = vld [vmem:[#allocation13 + $0x10] ss:$24 sps:$4 sm:$0xff]  }
 0x242   :  { %3370 = vmatpush1.bf16.msra.mxu1 %v14561_v16  ;;  %v14615_v16 = vld [vmem:[#allocation13 + $0x570] ss:$24 sps:$4 sm:$0xff]  }
 0x243   :  { %3371 = vmatprep.subr.bf16.mxu1 %v14569_v17  ;;  %3501 = vmatpush1.bf16.msra.mxu0 %v14636_v18  ;;  %v14623_v17 = vld [vmem:[#allocation13 + $0x5a4] ss:$24 sps:$4 sm:$0xff]   ;;  %v14690_v18 = vld [vmem:[#allocation13 + $0x40] ss:$24 sps:$4 sm:$0xff]  }
 0x244   :  { %3502 = vmatprep.subr.bf16.mxu0 %v14644_v19  ;;  %v14698_v19 = vld [vmem:[#allocation13 + $0x74] ss:$24 sps:$4 sm:$0xff]  }
 0x246   :  { %3372 = vmatpush1.bf16.msra.mxu1 %v14567_v20  ;;  %v14621_v20 = vld [vmem:[#allocation13 + $0x5a0] ss:$24 sps:$4 sm:$0xff]  }
 0x247   :  { %3373 = vmatprep.subr.bf16.mxu1 %v14575_v24  ;;  %3503 = vmatpush1.bf16.msra.mxu0 %v14642_v25  ;;  %v14704_v24 = vld [vmem:[#allocation13 + $0xa4] ss:$24 sps:$4 sm:$0xff]   ;;  %v14627_v25 = vld [vmem:[#allocation13 + $0x5d0] ss:$24 sps:$4 sm:$0xff]  }
 0x248   :  { %3504 = vmatprep.subr.bf16.mxu0 %v14650_v27  ;;  %v14702_v27 = vld [vmem:[#allocation13 + $0xa0] ss:$24 sps:$4 sm:$0xff]  }
 0x24a   :  { %3374 = vmatpush1.bf16.msra.mxu1 %v14573_v26  ;;  %v14635_v26 = vld [vmem:[#allocation13 + $0xc] ss:$24 sps:$4 sm:$0xff]  }
 0x24b   :  { %3375 = vmatprep.subr.bf16.mxu1 %v14581_v33  ;;  %3505 = vmatpush1.bf16.msra.mxu0 %v14648_v35  ;;  %v14641_v33 = vld [vmem:[#allocation13 + $0x3c] ss:$24 sps:$4 sm:$0xff]   ;;  %v14708_v35 = vld [vmem:[#allocation13 + $0xd0] ss:$24 sps:$4 sm:$0xff]  }
 0x24c   :  { %3506 = vmatprep.subr.bf16.mxu0 %v14656_v37  ;;  %v14716_v37 = vld [vmem:[#allocation13 + $0x104] ss:$24 sps:$4 sm:$0xff]  }
 0x24e   :  { %3376 = vmatpush1.bf16.msra.mxu1 %v14579_v40  ;;  %v14714_v40 = vld [vmem:[#allocation13 + $0x100] ss:$24 sps:$4 sm:$0xff]  }
 0x24f   :  { %3377 = vmatprep.subr.bf16.mxu1 %v14587_v42  ;;  %3507 = vmatpush1.bf16.msra.mxu0 %v14654_v43  ;;  %v14722_v42 = vld [vmem:[#allocation13 + $0x134] ss:$24 sps:$4 sm:$0xff]   ;;  %v14645_v43 = vld [vmem:[#allocation13 + $0x68] ss:$24 sps:$4 sm:$0xff]  }
 0x250   :  { %3508 = vmatprep.subr.bf16.mxu0 %v14662_v45  ;;  %v14653_v45 = vld [vmem:[#allocation13 + $0x9c] ss:$24 sps:$4 sm:$0xff]  }
 0x252   :  { %3378 = vmatpush1.bf16.msra.mxu1 %v14585_v49  ;;  %v14651_v49 = vld [vmem:[#allocation13 + $0x98] ss:$24 sps:$4 sm:$0xff]  }
 0x253   :  { %3379 = vmatprep.subr.bf16.mxu1 %v14593_v46  ;;  %3509 = vmatpush1.bf16.msra.mxu0 %v14660_v50  ;;  %v14659_v46 = vld [vmem:[#allocation13 + $0xcc] ss:$24 sps:$4 sm:$0xff]   ;;  %v14726_v50 = vld [vmem:[#allocation13 + $0x160] ss:$24 sps:$4 sm:$0xff]  }
 0x254   :  { %3510 = vmatprep.subr.bf16.mxu0 %v14668_v51  ;;  %v14657_v51 = vld [vmem:[#allocation13 + $0xc8] ss:$24 sps:$4 sm:$0xff]  }
 0x256   :  { %3380 = vmatpush1.bf16.msra.mxu1 %v14591_v56  ;;  %v14740_v56 = vld [vmem:[#allocation13 + $0x1c4] ss:$24 sps:$4 sm:$0xff]  }
 0x257   :  { %3381 = vmatprep.subr.bf16.mxu1 %v14599_v57  ;;  %3511 = vmatpush1.bf16.msra.mxu0 %v14666_v58  ;;  %v14663_v57 = vld [vmem:[#allocation13 + $0xf8] ss:$24 sps:$4 sm:$0xff]   ;;  %v14671_v58 = vld [vmem:[#allocation13 + $0x12c] ss:$24 sps:$4 sm:$0xff]  }
 0x258   :  { %3512 = vmatprep.subr.bf16.mxu0 %v14674_v60  ;;  %v14738_v60 = vld [vmem:[#allocation13 + $0x1c0] ss:$24 sps:$4 sm:$0xff]  }
 0x25a   :  { %3382 = vmatpush1.bf16.msra.mxu1 %v14597_v63  ;;  %v14677_v63 = vld [vmem:[#allocation13 + $0x15c] ss:$24 sps:$4 sm:$0xff]  }
 0x25b   :  { %3383 = vmatprep.subr.bf16.mxu1 %v14605_v0  ;;  %3513 = vmatpush1.bf16.msra.mxu0 %v14672_v1  ;;  %v14744_v0 = vld [vmem:[#allocation13 + $0x1f0] ss:$24 sps:$4 sm:$0xff]   ;;  %v14752_v1 = vld [vmem:[#allocation13 + $0x224] ss:$24 sps:$4 sm:$0xff]  }
 0x25c   :  { %3514 = vmatprep.subr.bf16.mxu0 %v14680_v2  ;;  %v14675_v2 = vld [vmem:[#allocation13 + $0x158] ss:$24 sps:$4 sm:$0xff]  }
 0x25e   :  { %3384 = vmatpush1.bf16.msra.mxu1 %v14603_v5  ;;  %v14758_v5 = vld [vmem:[#allocation13 + $0x254] ss:$24 sps:$4 sm:$0xff]  }
 0x25f   :  { %3385 = vmatprep.subr.bf16.mxu1 %v14611_v6  ;;  %3515 = vmatpush1.bf16.msra.mxu0 %v14678_v7  ;;  %v14681_v6 = vld [vmem:[#allocation13 + $0x188] ss:$24 sps:$4 sm:$0xff]   ;;  %v14689_v7 = vld [vmem:[#allocation13 + $0x1bc] ss:$24 sps:$4 sm:$0xff]  }
 0x260   :  { %3566 = vmatprep.subr.bf16.mxu0 %v14686_v8  ;;  %v14756_v8 = vld [vmem:[#allocation13 + $0x250] ss:$24 sps:$4 sm:$0xff]  }
 0x262   :  { %3386 = vmatpush1.bf16.msra.mxu1 %v14609_v10  ;;  %3517 = vmatmul.mubr.bf16.vlgmr.msra.gmra.mrb[24].mxu0 %v17317_v15  ;;  %v14687_v10 = vld [vmem:[#allocation13 + $0x1b8] ss:$24 sps:$4 sm:$0xff]  }
 0x263   :  { %3387 = vmatprep.subr.bf16.mxu1 %v14617_v11  ;;  %3567 = vmatpush1.bf16.msra.mxu0 %v14684_v12  ;;  %v14695_v11 = vld [vmem:[#allocation13 + $0x1ec] ss:$24 sps:$4 sm:$0xff]   ;;  %v14762_v12 = vld [vmem:[#allocation13 + $0x280] ss:$24 sps:$4 sm:$0xff]  }
 0x264   :  { %3568 = vmatprep.subr.bf16.mxu0 %v14692_v14  ;;  %3598 = vmatprep.mubr.bf16.mxu0 %v17287_v32  ;;  %v14770_v14 = vld [vmem:[#allocation13 + $0x2b4] ss:$24 sps:$4 sm:$0xff]  }
 0x266   :  { %3388 = vmatpush1.bf16.msra.mxu1 %v14615_v16  ;;  %v14693_v16 = vld [vmem:[#allocation13 + $0x1e8] ss:$24 sps:$4 sm:$0xff]  }
 0x267   :  { %3389 = vmatprep.subr.bf16.mxu1 %v14623_v17  ;;  %3569 = vmatpush1.bf16.msra.mxu0 %v14690_v18  ;;  %v14701_v17 = vld [vmem:[#allocation13 + $0x21c] ss:$24 sps:$4 sm:$0xff]   ;;  %v14768_v18 = vld [vmem:[#allocation13 + $0x2b0] ss:$24 sps:$4 sm:$0xff]  }
 0x268   :  { %3570 = vmatprep.subr.bf16.mxu0 %v14698_v19  ;;  %v14776_v19 = vld [vmem:[#allocation13 + $0x2e4] ss:$24 sps:$4 sm:$0xff]  }
 0x26a   :  { %3390 = vmatpush1.bf16.msra.mxu1 %v14621_v20  ;;  %v14699_v20 = vld [vmem:[#allocation13 + $0x218] ss:$24 sps:$4 sm:$0xff]  }
 0x26b   :  { %3391 = vmatprep.subr.bf16.mxu1 %v14629_v21  ;;  %3571 = vmatpush1.bf16.msra.mxu0 %v14696_v23  ;;  %v14707_v21 = vld [vmem:[#allocation13 + $0x24c] ss:$24 sps:$4 sm:$0xff]   ;;  %v14774_v23 = vld [vmem:[#allocation13 + $0x2e0] ss:$24 sps:$4 sm:$0xff]  }
 0x26c   :  { %3572 = vmatprep.subr.bf16.mxu0 %v14704_v24  ;;  %v14782_v24 = vld [vmem:[#allocation13 + $0x614] ss:$24 sps:$4 sm:$0xff]  }
 0x26e   :  { %3392 = vmatpush1.bf16.msra.mxu1 %v14627_v25  ;;  %v14705_v25 = vld [vmem:[#allocation13 + $0x248] ss:$24 sps:$4 sm:$0xff]  }
 0x26f   :  { %3443 = vmatprep.subr.bf16.mxu1 %v14635_v26  ;;  %3573 = vmatpush1.bf16.msra.mxu0 %v14702_v27  ;;  %v14713_v26 = vld [vmem:[#allocation13 + $0x27c] ss:$24 sps:$4 sm:$0xff]   ;;  %v14780_v27 = vld [vmem:[#allocation13 + $0x610] ss:$24 sps:$4 sm:$0xff]  }
 0x270   :  { %3574 = vmatprep.subr.bf16.mxu0 %v14710_v28  ;;  %v14788_v28 = vld [vmem:[#allocation13 + $0x644] ss:$24 sps:$4 sm:$0xff]  }
 0x271   :  { %3394 = vmatmul.mubr.bf16.vlgmr.msra.gmra.mrb[32].mxu1 %v17317_v15 }
 0x272   :  { %3444 = vmatpush1.bf16.msra.mxu1 %v14633_v29  ;;  %3475 = vmatprep.mubr.bf16.mxu1 %v17287_v32  ;;  %v14734_v32 = vld [vmem:[#allocation13 + $0x194] ss:$24 sps:$4 sm:$0xff]   ;;  %v14711_v29 = vld [vmem:[#allocation13 + $0x278] ss:$24 sps:$4 sm:$0xff]  }
 0x273   :  { %3445 = vmatprep.subr.bf16.mxu1 %v14641_v33  ;;  %3575 = vmatpush1.bf16.msra.mxu0 %v14708_v35  ;;  %v14719_v33 = vld [vmem:[#allocation13 + $0x2ac] ss:$24 sps:$4 sm:$0xff]   ;;  %v14786_v35 = vld [vmem:[#allocation13 + $0x640] ss:$24 sps:$4 sm:$0xff]  }
 0x274   :  { %3576 = vmatprep.subr.bf16.mxu0 %v14716_v37  ;;  %v14794_v37 = vld [vmem:[#allocation13 + $0x674] ss:$24 sps:$4 sm:$0xff]  }
 0x276   :  { %3446 = vmatpush1.bf16.msra.mxu1 %v14639_v38  ;;  %v14717_v38 = vld [vmem:[#allocation13 + $0x2a8] ss:$24 sps:$4 sm:$0xff]  }
 0x277   :  { %3447 = vmatprep.subr.bf16.mxu1 %v14647_v39  ;;  %3577 = vmatpush1.bf16.msra.mxu0 %v14714_v40  ;;  %v14725_v39 = vld [vmem:[#allocation13 + $0x2dc] ss:$24 sps:$4 sm:$0xff]   ;;  %v14792_v40 = vld [vmem:[#allocation13 + $0x670] ss:$24 sps:$4 sm:$0xff]  }
 0x278   :  { %3578 = vmatprep.subr.bf16.mxu0 %v14722_v42  ;;  %v14800_v42 = vld [vmem:[#allocation13 + $0x6a4] ss:$24 sps:$4 sm:$0xff]  }
 0x27a   :  { %3448 = vmatpush1.bf16.msra.mxu1 %v14645_v43  ;;  %v14723_v43 = vld [vmem:[#allocation13 + $0x2d8] ss:$24 sps:$4 sm:$0xff]  }
 0x27b   :  { %3449 = vmatprep.subr.bf16.mxu1 %v14653_v45  ;;  %3579 = vmatpush1.bf16.msra.mxu0 %v14720_v47  ;;  %v14731_v45 = vld [vmem:[#allocation13 + $0x60c] ss:$24 sps:$4 sm:$0xff]   ;;  %v14798_v47 = vld [vmem:[#allocation13 + $0x6a0] ss:$24 sps:$4 sm:$0xff]  }
 0x27c   :  { %3580 = vmatprep.subr.bf16.mxu0 %v14728_v48  ;;  %v14806_v48 = vld [vmem:[#allocation13 + $0x6d4] ss:$24 sps:$4 sm:$0xff]  }
 0x27e   :  { %3450 = vmatpush1.bf16.msra.mxu1 %v14651_v49  ;;  %v14729_v49 = vld [vmem:[#allocation13 + $0x608] ss:$24 sps:$4 sm:$0xff]  }
 0x27f   :  { %3451 = vmatprep.subr.bf16.mxu1 %v14659_v46  ;;  %3581 = vmatpush1.bf16.msra.mxu0 %v14726_v50  ;;  %v14737_v46 = vld [vmem:[#allocation13 + $0x63c] ss:$24 sps:$4 sm:$0xff]   ;;  %v14804_v50 = vld [vmem:[#allocation13 + $0x6d0] ss:$24 sps:$4 sm:$0xff]  }
 0x280   :  { %3582 = vmatprep.subr.bf16.mxu0 %v14734_v32  ;;  %v14812_v32 = vld [vmem:[#allocation13 + $0x704] ss:$24 sps:$4 sm:$0xff]  }
 0x282   :  { %3452 = vmatpush1.bf16.msra.mxu1 %v14657_v51  ;;  %v14735_v51 = vld [vmem:[#allocation13 + $0x638] ss:$24 sps:$4 sm:$0xff]  }
 0x283   :  { %3453 = vmatprep.subr.bf16.mxu1 %v14665_v52  ;;  %3583 = vmatpush1.bf16.msra.mxu0 %v14732_v55  ;;  %v14743_v52 = vld [vmem:[#allocation13 + $0x66c] ss:$24 sps:$4 sm:$0xff]   ;;  %v14810_v55 = vld [vmem:[#allocation13 + $0x700] ss:$24 sps:$4 sm:$0xff]  }
 0x284   :  { %3584 = vmatprep.subr.bf16.mxu0 %v14740_v56  ;;  %v14818_v56 = vld [vmem:[#allocation13 + $0x734] ss:$24 sps:$4 sm:$0xff]  }
 0x286   :  { %3454 = vmatpush1.bf16.msra.mxu1 %v14663_v57 }
 0x287   :  { %3455 = vmatprep.subr.bf16.mxu1 %v14671_v58  ;;  %3585 = vmatpush1.bf16.msra.mxu0 %v14738_v60 }
 0x288   :  { %3586 = vmatprep.subr.bf16.mxu0 %v14746_v62 }
 0x28a   :  { %3456 = vmatpush1.bf16.msra.mxu1 %v14669_v61 }
 0x28b   :  { %3457 = vmatprep.subr.bf16.mxu1 %v14677_v63  ;;  %3587 = vmatpush1.bf16.msra.mxu0 %v14744_v0 }
 0x28c   :  { %3588 = vmatprep.subr.bf16.mxu0 %v14752_v1 }
 0x28e   :  { %3458 = vmatpush1.bf16.msra.mxu1 %v14675_v2  ;;  %v14741_v2 = vld [vmem:[#allocation13 + $0x668] ss:$24 sps:$4 sm:$0xff]  }
 0x28f   :  { %3459 = vmatprep.subr.bf16.mxu1 %v14683_v3  ;;  %3589 = vmatpush1.bf16.msra.mxu0 %v14750_v4  ;;  %v14749_v3 = vld [vmem:[#allocation13 + $0x69c] ss:$24 sps:$4 sm:$0xff]  }
 0x290   :  { %3590 = vmatprep.subr.bf16.mxu0 %v14758_v5 }
 0x292   :  { %3460 = vmatpush1.bf16.msra.mxu1 %v14681_v6  ;;  %v14747_v6 = vld [vmem:[#allocation13 + $0x698] ss:$24 sps:$4 sm:$0xff]  }
 0x293   :  { %3461 = vmatprep.subr.bf16.mxu1 %v14689_v7  ;;  %3591 = vmatpush1.bf16.msra.mxu0 %v14756_v8  ;;  %v14755_v7 = vld [vmem:[#allocation13 + $0x6cc] ss:$24 sps:$4 sm:$0xff]   ;;  %v14753_v8 = vld [vmem:[#allocation13 + $0x6c8] ss:$24 sps:$4 sm:$0xff]  }
 0x294   :  { %3592 = vmatprep.subr.bf16.mxu0 %v14764_v9  ;;  %v14761_v9 = vld [vmem:[#allocation13 + $0x6fc] ss:$24 sps:$4 sm:$0xff]  }
 0x296   :  { %3462 = vmatpush1.bf16.msra.mxu1 %v14687_v10  ;;  %v14828_v10 = vld [vmem:[#allocation13 + $0x790] ss:$24 sps:$4 sm:$0xff]  }
 0x297   :  { %3463 = vmatprep.subr.bf16.mxu1 %v14695_v11  ;;  %3593 = vmatpush1.bf16.msra.mxu0 %v14762_v12  ;;  %v14836_v11 = vld [vmem:[#allocation13 + $0x7c4] ss:$24 sps:$4 sm:$0xff]   ;;  %v14759_v12 = vld [vmem:[#allocation13 + $0x6f8] ss:$24 sps:$4 sm:$0xff]  }
 0x298   :  { %3594 = vmatprep.subr.bf16.mxu0 %v14770_v14  ;;  %v14767_v14 = vld [vmem:[#allocation13 + $0x72c] ss:$24 sps:$4 sm:$0xff]  }
 0x29a   :  { %3464 = vmatpush1.bf16.msra.mxu1 %v14693_v16  ;;  %v14834_v16 = vld [vmem:[#allocation13 + $0x7c0] ss:$24 sps:$4 sm:$0xff]  }
 0x29b   :  { %3465 = vmatprep.subr.bf16.mxu1 %v14701_v17  ;;  %3595 = vmatpush1.bf16.msra.mxu0 %v14768_v18  ;;  %v14842_v18 = vld [vmem:[#allocation13 + $0x7f4] ss:$24 sps:$4 sm:$0xff]  }
 0x29c   :  { %3596 = vmatprep.subr.bf16.mxu0 %v14776_v19 }
 0x29e   :  { %3466 = vmatpush1.bf16.msra.mxu1 %v14699_v20 }
 0x29f   :  { %3467 = vmatprep.subr.bf16.mxu1 %v14707_v21  ;;  %3597 = vmatpush1.bf16.msra.mxu0 %v14774_v23  ;;  %v14765_v21 = vld [vmem:[#allocation13 + $0x728] ss:$24 sps:$4 sm:$0xff]  }
 0x2a0   :  { %3648 = vmatprep.subr.bf16.mxu0 %v14782_v24 }
 0x2a2   :  { %3468 = vmatpush1.bf16.msra.mxu1 %v14705_v25  ;;  %3599 = vmatmul.mubr.bf16.vlgmr.msra.gmra.mrb[28].mxu0 %v17308_v53 }
 0x2a3   :  { %3469 = vmatprep.subr.bf16.mxu1 %v14713_v26  ;;  %3649 = vmatpush1.bf16.msra.mxu0 %v14780_v27  ;;  %v14773_v26 = vld [vmem:[#allocation13 + $0x75c] ss:$24 sps:$4 sm:$0xff]   ;;  %v14840_v27 = vld [vmem:[#allocation13 + $0x7f0] ss:$24 sps:$4 sm:$0xff]  }
 0x2a4   :  { %3650 = vmatprep.subr.bf16.mxu0 %v14788_v28  ;;  %3680 = vmatprep.mubr.bf16.mxu0 %v17280_v13  ;;  %v14848_v28 = vld [vmem:[#allocation13 + $0x824] ss:$24 sps:$4 sm:$0xff]  }
 0x2a6   :  { %3470 = vmatpush1.bf16.msra.mxu1 %v14711_v29  ;;  %v14771_v29 = vld [vmem:[#allocation13 + $0x758] ss:$24 sps:$4 sm:$0xff]  }
 0x2a7   :  { %3471 = vmatprep.subr.bf16.mxu1 %v14719_v33  ;;  %3651 = vmatpush1.bf16.msra.mxu0 %v14786_v35  ;;  %v14779_v33 = vld [vmem:[#allocation13 + $0x78c] ss:$24 sps:$4 sm:$0xff]   ;;  %v14777_v35 = vld [vmem:[#allocation13 + $0x788] ss:$24 sps:$4 sm:$0xff]  }
 0x2a8   :  { %3652 = vmatprep.subr.bf16.mxu0 %v14794_v37  ;;  %v14854_v37 = vld [vmem:[#allocation13 + $0x854] ss:$24 sps:$4 sm:$0xff]  }
 0x2aa   :  { %3472 = vmatpush1.bf16.msra.mxu1 %v14717_v38  ;;  %v14852_v38 = vld [vmem:[#allocation13 + $0x850] ss:$24 sps:$4 sm:$0xff]  }
 0x2ab   :  { %3473 = vmatprep.subr.bf16.mxu1 %v14725_v39  ;;  %3653 = vmatpush1.bf16.msra.mxu0 %v14792_v40  ;;  %v14783_v39 = vld [vmem:[#allocation13 + $0x7b8] ss:$24 sps:$4 sm:$0xff]   ;;  %v14860_v40 = vld [vmem:[#allocation13 + $0x884] ss:$24 sps:$4 sm:$0xff]  }
 0x2ac   :  { %3654 = vmatprep.subr.bf16.mxu0 %v14800_v42  ;;  %v14791_v42 = vld [vmem:[#allocation13 + $0x7ec] ss:$24 sps:$4 sm:$0xff]  }
 0x2ae   :  { %3474 = vmatpush1.bf16.msra.mxu1 %v14723_v43  ;;  %v14858_v43 = vld [vmem:[#allocation13 + $0x880] ss:$24 sps:$4 sm:$0xff]  }
 0x2af   :  { %3525 = vmatprep.subr.bf16.mxu1 %v14731_v45  ;;  %3655 = vmatpush1.bf16.msra.mxu0 %v14798_v47  ;;  %v14866_v45 = vld [vmem:[#allocation13 + $0x8b4] ss:$24 sps:$4 sm:$0xff]   ;;  %v14789_v47 = vld [vmem:[#allocation13 + $0x7e8] ss:$24 sps:$4 sm:$0xff]  }
 0x2b0   :  { %3656 = vmatprep.subr.bf16.mxu0 %v14806_v48  ;;  %v14797_v48 = vld [vmem:[#allocation13 + $0x81c] ss:$24 sps:$4 sm:$0xff]  }
 0x2b1   :  { %3476 = vmatmul.mubr.bf16.vlgmr.msra.gmra.mrb[36].mxu1 %v17308_v53 }
 0x2b2   :  { %3526 = vmatpush1.bf16.msra.mxu1 %v14729_v49  ;;  %3557 = vmatprep.mubr.bf16.mxu1 %v17280_v13  ;;  %v14864_v49 = vld [vmem:[#allocation13 + $0x8b0] ss:$24 sps:$4 sm:$0xff]  }
 0x2b3   :  { %3527 = vmatprep.subr.bf16.mxu1 %v14737_v46  ;;  %3657 = vmatpush1.bf16.msra.mxu0 %v14804_v50  ;;  %v14872_v46 = vld [vmem:[#allocation13 + $0x8e4] ss:$24 sps:$4 sm:$0xff]   ;;  %v14795_v50 = vld [vmem:[#allocation13 + $0x818] ss:$24 sps:$4 sm:$0xff]  }
 0x2b4   :  { %v1449_v57 = vpop.f32.mrb[16].mxu0  ;;  %v1490_v58 = vpop.f32.mrb[20].mxu1  ;;  %3658 = vmatprep.subr.bf16.mxu0 %v14812_v32  ;;  %v14803_v32 = vld [vmem:[#allocation13 + $0x84c] ss:$24 sps:$4 sm:$0xff]  }
 0x2b5   :  { %v17328_v60 = vadd.f32 %v1449_v57, %v17291_v41  ;;  %v17331_v61 = vadd.f32 %v1490_v58, %v17302_v31  ;;  %v1451_v62 = vpop.f32.mrb[17].mxu0  ;;  %v1492_v53 = vpop.f32.mrb[21].mxu1  ;;  %v14816_v41 = vld [vmem:[#allocation13 + $0x730] ss:$24 sps:$4 sm:$0xff]   ;;  %v14824_v31 = vld [vmem:[#allocation13 + $0x764] ss:$24 sps:$4 sm:$0xff]  }
 0x2b6   :  { %v17334_v63 = vadd.f32 %v1451_v62, %v17293_v44  ;;  %v17337_v13 = vadd.f32 %v1492_v53, %v17304_v36  ;;  %3528 = vmatpush1.bf16.msra.mxu1 %v14735_v51  ;;  %v1453_v0 = vpop.f32.mrb[18].mxu0  ;;  %v1494_v1 = vpop.f32.mrb[22].mxu1  ;;  %v14822_v44 = vld [vmem:[#allocation13 + $0x760] ss:$24 sps:$4 sm:$0xff]   ;;  %v14830_v36 = vld [vmem:[#allocation13 + $0x794] ss:$24 sps:$4 sm:$0xff]  }
 0x2b7   :  { %v1454_v4 = vpop.f32.mrb[19].mxu0  ;;  %v1495_v5 = vpop.f32.mrb[23].mxu1  ;;  %3529 = vmatprep.subr.bf16.mxu1 %v14743_v52  ;;  %3659 = vmatpush1.bf16.msra.mxu0 %v14810_v55  ;;  %v14870_v51 = vld [vmem:[#allocation13 + $0x8e0] ss:$24 sps:$4 sm:$0xff]   ;;  %v14878_v52 = vld [vmem:[#allocation16 + $0xc] ss:$24 sps:$4 sm:$0xff]  }
 0x2b8   :  { %3660 = vmatprep.subr.bf16.mxu0 %v14818_v56  ;;  %v14801_v55 = vld [vmem:[#allocation13 + $0x848] ss:$24 sps:$4 sm:$0xff]   ;;  %v14809_v56 = vld [vmem:[#allocation13 + $0x87c] ss:$24 sps:$4 sm:$0xff]   ;;  %v14807_v62 = vld [vmem:[#allocation13 + $0x878] ss:$24 sps:$4 sm:$0xff]  }
 0x2b9   :  { %v14876_v57 = vld [vmem:[#allocation16 + $0x8] ss:$24 sps:$4 sm:$0xff]   ;;  %v14884_v58 = vld [vmem:[#allocation16 + $0x3c] ss:$24 sps:$4 sm:$0xff]   ;;  %v14882_v0 = vld [vmem:[#allocation16 + $0x38] ss:$24 sps:$4 sm:$0xff]  }
 0x2ba   :  { %3530 = vmatpush1.bf16.msra.mxu1 %v14741_v2  ;;  %v14815_v53 = vld [vmem:[#allocation13 + $0x8ac] ss:$24 sps:$4 sm:$0xff]   ;;  %v14813_v2 = vld [vmem:[#allocation13 + $0x8a8] ss:$24 sps:$4 sm:$0xff]  }
 0x2bb   :  { %3531 = vmatprep.subr.bf16.mxu1 %v14749_v3  ;;  %3661 = vmatpush1.bf16.msra.mxu0 %v14816_v41  ;;  %v14890_v1 = vld [vmem:[#allocation16 + $0x6c] ss:$24 sps:$4 sm:$0xff]   ;;  %v14888_v4 = vld [vmem:[#allocation16 + $0x68] ss:$24 sps:$4 sm:$0xff]   ;;  %v14896_v5 = vld [vmem:[#allocation16 + $0x9c] ss:$24 sps:$4 sm:$0xff]  }
 0x2bc   :  { %3662 = vmatprep.subr.bf16.mxu0 %v14824_v31  ;;  %v14821_v3 = vld [vmem:[#allocation13 + $0x8dc] ss:$24 sps:$4 sm:$0xff]   ;;  %v14819_v41 = vld [vmem:[#allocation13 + $0x8d8] ss:$24 sps:$4 sm:$0xff]  }
 0x2bd   :  { %v14827_v31 = vld [vmem:[#allocation13 + $0x314] ss:$24 sps:$4 sm:$0xff]  }
 0x2be   :  { %3532 = vmatpush1.bf16.msra.mxu1 %v14747_v6  ;;  %v14894_v6 = vld [vmem:[#allocation16 + $0x98] ss:$24 sps:$4 sm:$0xff]  }
 0x2bf   :  { %3533 = vmatprep.subr.bf16.mxu1 %v14755_v7  ;;  %3663 = vmatpush1.bf16.msra.mxu0 %v14822_v44  ;;  %v14902_v7 = vld [vmem:[#allocation16 + $0xcc] ss:$24 sps:$4 sm:$0xff]   ;;  %v14825_v44 = vld [vmem:[#allocation13 + $0x310] ss:$24 sps:$4 sm:$0xff]  }
 0x2c0   :  { %3664 = vmatprep.subr.bf16.mxu0 %v14830_v36  ;;  %v14833_v36 = vld [vmem:[#allocation13 + $0x344] ss:$24 sps:$4 sm:$0xff]  }
 0x2c2   :  { %3534 = vmatpush1.bf16.msra.mxu1 %v14753_v8  ;;  %v14900_v8 = vld [vmem:[#allocation16 + $0xc8] ss:$24 sps:$4 sm:$0xff]  }
 0x2c3   :  { %3535 = vmatprep.subr.bf16.mxu1 %v14761_v9  ;;  %3665 = vmatpush1.bf16.msra.mxu0 %v14828_v10  ;;  %v14908_v9 = vld [vmem:[#allocation16 + $0xfc] ss:$24 sps:$4 sm:$0xff]   ;;  %v14831_v10 = vld [vmem:[#allocation13 + $0x340] ss:$24 sps:$4 sm:$0xff]  }
 0x2c4   :  { %v1531_v17 = vpop.f32.mrb[24].mxu1  ;;  %3666 = vmatprep.subr.bf16.mxu0 %v14836_v11  ;;  %v14839_v11 = vld [vmem:[#allocation13 + $0x374] ss:$24 sps:$4 sm:$0xff]  }
 0x2c5   :  { %v17340_v19 = vadd.f32 %v1531_v17, %v17310_v54  ;;  %v1533_v20 = vpop.f32.mrb[25].mxu1  ;;  %v14846_v54 = vld [vmem:[#allocation13 + $0x820] ss:$24 sps:$4 sm:$0xff]   ;;  %v14845_v17 = vld [vmem:[#allocation13 + $0x3a4] ss:$24 sps:$4 sm:$0xff]  }
 0x2c6   :  { %v17343_v23 = vadd.f32 %v1533_v20, %v17313_v59  ;;  %v1535_v24 = vpop.f32.mrb[26].mxu1  ;;  %3536 = vmatpush1.bf16.msra.mxu1 %v14759_v12  ;;  %v14785_v59 = vld [vmem:[#allocation13 + $0x7bc] ss:$24 sps:$4 sm:$0xff]   ;;  %v14906_v12 = vld [vmem:[#allocation16 + $0xf8] ss:$24 sps:$4 sm:$0xff]  }
 0x2c7   :  { %v1536_v25 = vpop.f32.mrb[27].mxu1  ;;  %3537 = vmatprep.subr.bf16.mxu1 %v14767_v14  ;;  %3667 = vmatpush1.bf16.msra.mxu0 %v14834_v16  ;;  %v14914_v14 = vld [vmem:[#allocation16 + $0x12c] ss:$24 sps:$4 sm:$0xff]   ;;  %v14837_v16 = vld [vmem:[#allocation13 + $0x370] ss:$24 sps:$4 sm:$0xff]  }
 0x2c8   :  { %3668 = vmatprep.subr.bf16.mxu0 %v14842_v18  ;;  %v14912_v18 = vld [vmem:[#allocation16 + $0x128] ss:$24 sps:$4 sm:$0xff]  }
 0x2c9   :  { %v14843_v25 = vld [vmem:[#allocation13 + $0x3a0] ss:$24 sps:$4 sm:$0xff]  }
 0x2ca   :  { %3538 = vmatpush1.bf16.msra.mxu1 %v14765_v21  ;;  %v14920_v21 = vld [vmem:[#allocation16 + $0x15c] ss:$24 sps:$4 sm:$0xff]  }
 0x2cb   :  { %3539 = vmatprep.subr.bf16.mxu1 %v14773_v26  ;;  %3669 = vmatpush1.bf16.msra.mxu0 %v14840_v27  ;;  %v14851_v27 = vld [vmem:[#allocation13 + $0x3d4] ss:$24 sps:$4 sm:$0xff]  }
 0x2cc   :  { %3670 = vmatprep.subr.bf16.mxu0 %v14848_v28  ;;  %v14926_v28 = vld [vmem:[#allocation16 + $0x18c] ss:$24 sps:$4 sm:$0xff]  }
 0x2ce   :  { %3540 = vmatpush1.bf16.msra.mxu1 %v14771_v29  ;;  %v14849_v29 = vld [vmem:[#allocation13 + $0x3d0] ss:$24 sps:$4 sm:$0xff]  }
 0x2cf   :  { %3541 = vmatprep.subr.bf16.mxu1 %v14779_v33  ;;  %3671 = vmatpush1.bf16.msra.mxu0 %v14846_v54  ;;  %v14857_v33 = vld [vmem:[#allocation13 + $0x404] ss:$24 sps:$4 sm:$0xff]   ;;  %v14924_v54 = vld [vmem:[#allocation16 + $0x188] ss:$24 sps:$4 sm:$0xff]  }
 0x2d0   :  { %3672 = vmatprep.subr.bf16.mxu0 %v14854_v37  ;;  %v14855_v37 = vld [vmem:[#allocation13 + $0x400] ss:$24 sps:$4 sm:$0xff]  }
 0x2d2   :  { %3542 = vmatpush1.bf16.msra.mxu1 %v14777_v35  ;;  %v14932_v35 = vld [vmem:[#allocation16 + $0x1bc] ss:$24 sps:$4 sm:$0xff]  }
 0x2d3   :  { %3543 = vmatprep.subr.bf16.mxu1 %v14785_v59  ;;  %3673 = vmatpush1.bf16.msra.mxu0 %v14852_v38  ;;  %v14863_v59 = vld [vmem:[#allocation13 + $0x434] ss:$24 sps:$4 sm:$0xff]   ;;  %v14930_v38 = vld [vmem:[#allocation16 + $0x1b8] ss:$24 sps:$4 sm:$0xff]  }
 0x2d4   :  { %3674 = vmatprep.subr.bf16.mxu0 %v14860_v40 }
 0x2d6   :  { %3544 = vmatpush1.bf16.msra.mxu1 %v14783_v39  ;;  %v14938_v39 = vld [vmem:[#allocation16 + $0x1ec] ss:$24 sps:$4 sm:$0xff]  }
 0x2d7   :  { %3545 = vmatprep.subr.bf16.mxu1 %v14791_v42  ;;  %3675 = vmatpush1.bf16.msra.mxu0 %v14858_v43  ;;  %v14861_v42 = vld [vmem:[#allocation13 + $0x430] ss:$24 sps:$4 sm:$0xff]  }
 0x2d8   :  { %3676 = vmatprep.subr.bf16.mxu0 %v14866_v45 }
 0x2da   :  { %3546 = vmatpush1.bf16.msra.mxu1 %v14789_v47 }
 0x2db   :  { %3547 = vmatprep.subr.bf16.mxu1 %v14797_v48  ;;  %3677 = vmatpush1.bf16.msra.mxu0 %v14864_v49  ;;  %v14869_v48 = vld [vmem:[#allocation13 + $0x464] ss:$24 sps:$4 sm:$0xff]   ;;  %v14936_v49 = vld [vmem:[#allocation16 + $0x1e8] ss:$24 sps:$4 sm:$0xff]  }
 0x2dc   :  { %3678 = vmatprep.subr.bf16.mxu0 %v14872_v46  ;;  %v14944_v46 = vld [vmem:[#allocation16 + $0x21c] ss:$24 sps:$4 sm:$0xff]  }
 0x2de   :  { %3548 = vmatpush1.bf16.msra.mxu1 %v14795_v50  ;;  %v14867_v50 = vld [vmem:[#allocation13 + $0x460] ss:$24 sps:$4 sm:$0xff]  }
 0x2df   :  { %3549 = vmatprep.subr.bf16.mxu1 %v14803_v32  ;;  %3679 = vmatpush1.bf16.msra.mxu0 %v14870_v51  ;;  %v14875_v32 = vld [vmem:[#allocation13 + $0x494] ss:$24 sps:$4 sm:$0xff]   ;;  %v14942_v51 = vld [vmem:[#allocation16 + $0x218] ss:$24 sps:$4 sm:$0xff]  }
 0x2e0   :  { %5606 = vmatprep.subr.bf16.mxu0 %v14878_v52  ;;  %v14950_v52 = vld [vmem:[#allocation16 + $0x24c] ss:$24 sps:$4 sm:$0xff]  }
 0x2e2   :  { %3550 = vmatpush1.bf16.msra.mxu1 %v14801_v55  ;;  %3681 = vmatmul.mubr.bf16.vlgmr.msra.gmra.mrb[32].mxu0 %v17296_v22  ;;  %v14873_v55 = vld [vmem:[#allocation13 + $0x490] ss:$24 sps:$4 sm:$0xff]  }
 0x2e3   :  { %3551 = vmatprep.subr.bf16.mxu1 %v14809_v56  ;;  %5607 = vmatpush1.bf16.msra.mxu0 %v14876_v57  ;;  %v14881_v56 = vld [vmem:[#allocation13 + $0x4c4] ss:$24 sps:$4 sm:$0xff]   ;;  %v14948_v57 = vld [vmem:[#allocation16 + $0x248] ss:$24 sps:$4 sm:$0xff]  }
 0x2e4   :  { %5608 = vmatprep.subr.bf16.mxu0 %v14884_v58  ;;  %v14956_v58 = vld [vmem:[#allocation16 + $0x27c] ss:$24 sps:$4 sm:$0xff]  }
 0x2e6   :  { %3552 = vmatpush1.bf16.msra.mxu1 %v14807_v62  ;;  %v14879_v62 = vld [vmem:[#allocation13 + $0x4c0] ss:$24 sps:$4 sm:$0xff]  }
 0x2e7   :  { %3553 = vmatprep.subr.bf16.mxu1 %v14815_v53  ;;  %5609 = vmatpush1.bf16.msra.mxu0 %v14882_v0  ;;  %v14887_v53 = vld [vmem:[#allocation13 + $0x4f4] ss:$24 sps:$4 sm:$0xff]   ;;  %v14954_v0 = vld [vmem:[#allocation16 + $0x278] ss:$24 sps:$4 sm:$0xff]  }
 0x2e8   :  { %5610 = vmatprep.subr.bf16.mxu0 %v14890_v1  ;;  %v14962_v1 = vld [vmem:[#allocation16 + $0x2ac] ss:$24 sps:$4 sm:$0xff]  }
 0x2ea   :  { %3554 = vmatpush1.bf16.msra.mxu1 %v14813_v2  ;;  %v14885_v2 = vld [vmem:[#allocation13 + $0x4f0] ss:$24 sps:$4 sm:$0xff]  }
 0x2eb   :  { %3555 = vmatprep.subr.bf16.mxu1 %v14821_v3  ;;  %5611 = vmatpush1.bf16.msra.mxu0 %v14888_v4  ;;  %v14893_v3 = vld [vmem:[#allocation13 + $0x524] ss:$24 sps:$4 sm:$0xff]   ;;  %v14960_v4 = vld [vmem:[#allocation16 + $0x2a8] ss:$24 sps:$4 sm:$0xff]  }
 0x2ec   :  { %5612 = vmatprep.subr.bf16.mxu0 %v14896_v5  ;;  %v14968_v5 = vld [vmem:[#allocation16 + $0x2dc] ss:$24 sps:$4 sm:$0xff]  }
 0x2ee   :  { %3556 = vmatpush1.bf16.msra.mxu1 %v14819_v41  ;;  %v14891_v41 = vld [vmem:[#allocation13 + $0x520] ss:$24 sps:$4 sm:$0xff]  }
 0x2ef   :  { %3607 = vmatprep.subr.bf16.mxu1 %v14827_v31  ;;  %5613 = vmatpush1.bf16.msra.mxu0 %v14894_v6  ;;  %v14899_v31 = vld [vmem:[#allocation13 + $0x554] ss:$24 sps:$4 sm:$0xff]   ;;  %v14966_v6 = vld [vmem:[#allocation16 + $0x2d8] ss:$24 sps:$4 sm:$0xff]  }
 0x2f0   :  { %5614 = vmatprep.subr.bf16.mxu0 %v14902_v7  ;;  %v14998_v7 = vld [vmem:[#allocation16 + $0x30c] ss:$24 sps:$4 sm:$0xff]  }
 0x2f1   :  { %3558 = vmatmul.mubr.bf16.vlgmr.msra.gmra.mrb[40].mxu1 %v17296_v22 }
 0x2f2   :  { %3608 = vmatpush1.bf16.msra.mxu1 %v14825_v44  ;;  %3639 = vmatprep.mubr.bf16.mxu1 %v17300_v30  ;;  %v14918_v30 = vld [vmem:[#allocation16 + $0x158] ss:$24 sps:$4 sm:$0xff]  }
 0x2f3   :  { %3609 = vmatprep.subr.bf16.mxu1 %v14833_v36  ;;  %5615 = vmatpush1.bf16.msra.mxu0 %v14900_v8  ;;  %v14897_v44 = vld [vmem:[#allocation13 + $0x550] ss:$24 sps:$4 sm:$0xff]   ;;  %v14905_v36 = vld [vmem:[#allocation13 + $0x584] ss:$24 sps:$4 sm:$0xff]   ;;  %v14903_v8 = vld [vmem:[#allocation13 + $0x580] ss:$24 sps:$4 sm:$0xff]  }
 0x2f4   :  { %5616 = vmatprep.subr.bf16.mxu0 %v14908_v9  ;;  %v14911_v9 = vld [vmem:[#allocation13 + $0x5b4] ss:$24 sps:$4 sm:$0xff]  }
 0x2f5   :  { %v17348_v20 = vpop.f32.mrb[20].mxu0 }
 0x2f6   :  { %3610 = vmatpush1.bf16.msra.mxu1 %v14831_v10  ;;  %v17350_v24 = vpop.f32.mrb[21].mxu0  ;;  %v14909_v10 = vld [vmem:[#allocation13 + $0x5b0] ss:$24 sps:$4 sm:$0xff]  }
 0x2f7   :  { %3611 = vmatprep.subr.bf16.mxu1 %v14839_v11  ;;  %5617 = vmatpush1.bf16.msra.mxu0 %v14906_v12  ;;  %v3440_v22 = vpop.f32.mrb[22].mxu0  ;;  %v14917_v11 = vld [vmem:[#allocation13 + $0x5e4] ss:$24 sps:$4 sm:$0xff]   ;;  %v14915_v12 = vld [vmem:[#allocation13 + $0x5e0] ss:$24 sps:$4 sm:$0xff]  }
 0x2f8   :  { %5618 = vmatprep.subr.bf16.mxu0 %v14914_v14  ;;  %v3441_v26 = vpop.f32.mrb[23].mxu0  ;;  %v14923_v14 = vld [vmem:[#allocation16 + $0x4] ss:$24 sps:$4 sm:$0xff]   ;;  %v14933_v22 = vld [vmem:[#allocation16 + $0x60] ss:$24 sps:$4 sm:$0xff]  }
 0x2fa   :  { %3612 = vmatpush1.bf16.msra.mxu1 %v14837_v16  ;;  %v14921_v16 = vld [vmem:[#allocation16] ss:$24 sps:$4 sm:$0xff]  }
 0x2fb   :  { %3613 = vmatprep.subr.bf16.mxu1 %v14845_v17  ;;  %5619 = vmatpush1.bf16.msra.mxu0 %v14912_v18  ;;  %v14929_v17 = vld [vmem:[#allocation16 + $0x34] ss:$24 sps:$4 sm:$0xff]   ;;  %v14927_v18 = vld [vmem:[#allocation16 + $0x30] ss:$24 sps:$4 sm:$0xff]  }
 0x2fc   :  { %5620 = vmatprep.subr.bf16.mxu0 %v14920_v21  ;;  %v14935_v21 = vld [vmem:[#allocation16 + $0x64] ss:$24 sps:$4 sm:$0xff]  }
 0x2fe   :  { %3614 = vmatpush1.bf16.msra.mxu1 %v14843_v25  ;;  %v14941_v25 = vld [vmem:[#allocation16 + $0x94] ss:$24 sps:$4 sm:$0xff]  }
 0x2ff   :  { %3615 = vmatprep.subr.bf16.mxu1 %v14851_v27  ;;  %5621 = vmatpush1.bf16.msra.mxu0 %v14918_v30 }
 0x300   :  { %5622 = vmatprep.subr.bf16.mxu0 %v14926_v28  ;;  %v14939_v28 = vld [vmem:[#allocation16 + $0x90] ss:$24 sps:$4 sm:$0xff]  }
 0x302   :  { %3616 = vmatpush1.bf16.msra.mxu1 %v14849_v29 }
 0x303   :  { %3617 = vmatprep.subr.bf16.mxu1 %v14857_v33  ;;  %5623 = vmatpush1.bf16.msra.mxu0 %v14924_v54  ;;  %v14947_v33 = vld [vmem:[#allocation16 + $0xc4] ss:$24 sps:$4 sm:$0xff]   ;;  %v3695_v54 = vlaneseq }
 0x304   :  { %v17352_v40 = vpop.f32.mrb[28].mxu1  ;;  %5624 = vmatprep.subr.bf16.mxu0 %v14932_v35  ;;  %v14945_v35 = vld [vmem:[#allocation16 + $0xc0] ss:$24 sps:$4 sm:$0xff]  }
 0x305   :  { %v17354_v43 = vpop.f32.mrb[29].mxu1 }
 0x306   :  { %v3358_v45 = vpop.f32.mrb[30].mxu1  ;;  %3618 = vmatpush1.bf16.msra.mxu1 %v14855_v37  ;;  %v17361_v37 = vshrl.u32 %v3695_v54, 7  ;;  %v14990_v54 = vld [vmem:[#allocation16 + $0x2d0] ss:$24 sps:$4 sm:$0xff]  }
 0x307   :  { %v3359_v47 = vpop.f32.mrb[31].mxu1  ;;  %3619 = vmatprep.subr.bf16.mxu1 %v14863_v59  ;;  %5625 = vmatpush1.bf16.msra.mxu0 %v14930_v38  ;;  %v14951_v59 = vld [vmem:[#allocation16 + $0xf0] ss:$24 sps:$4 sm:$0xff]   ;;  %v14959_v38 = vld [vmem:[#allocation16 + $0x124] ss:$24 sps:$4 sm:$0xff]  }
 0x308   :  { %5626 = vmatprep.subr.bf16.mxu0 %v14938_v39  ;;  %v203_v39 = vld [vmem:[#allocation20] sm:$0x1f] }
 0x30a   :  { %3620 = vmatpush1.bf16.msra.mxu1 %v14861_v42  ;;  %v17364_v42 = vsub.s32 0, %v17361_v37 }
 0x30b   :  { %3621 = vmatprep.subr.bf16.mxu1 %v14869_v48  ;;  %5627 = vmatpush1.bf16.msra.mxu0 %v14936_v49  ;;  %v204_v49 = vld [vmem:[#allocation20 + $0x8] sm:$0x1f] }
 0x30c   :  { %5628 = vmatprep.subr.bf16.mxu0 %v14944_v46 }
 0x30e   :  { %3622 = vmatpush1.bf16.msra.mxu1 %v14867_v50 }
 0x30f   :  { %3623 = vmatprep.subr.bf16.mxu1 %v14875_v32  ;;  %5629 = vmatpush1.bf16.msra.mxu0 %v14942_v51  ;;  %v14957_v32 = vld [vmem:[#allocation16 + $0x120] ss:$24 sps:$4 sm:$0xff]  }
 0x310   :  { %5630 = vmatprep.subr.bf16.mxu0 %v14950_v52  ;;  %v3698_v52 = vrot.slane %v203_v39, %v17364_v42  ;;  %v15001_v39 = vld [vmem:[#allocation16 + $0x334] ss:$24 sps:$4 sm:$0xff]  }
 0x312   :  { %3624 = vmatpush1.bf16.msra.mxu1 %v14873_v55 }
 0x313   :  { %3625 = vmatprep.subr.bf16.mxu1 %v14881_v56  ;;  %5631 = vmatpush1.bf16.msra.mxu0 %v14948_v57  ;;  %v14965_v56 = vld [vmem:[#allocation16 + $0x154] ss:$24 sps:$4 sm:$0xff]  }
 0x314   :  { %5632 = vmatprep.subr.bf16.mxu0 %v14956_v58  ;;  %v3702_v58 = vrot.slane %v204_v49, %v17364_v42  ;;  %v15007_v49 = vld [vmem:[#allocation16 + $0x364] ss:$24 sps:$4 sm:$0xff]  }
 0x316   :  { %3626 = vmatpush1.bf16.msra.mxu1 %v14879_v62 }
 0x317   :  { %3627 = vmatprep.subr.bf16.mxu1 %v14887_v53  ;;  %5633 = vmatpush1.bf16.msra.mxu0 %v14954_v0  ;;  %v14971_v53 = vld [vmem:[#allocation16 + $0x184] ss:$24 sps:$4 sm:$0xff]  }
 0x318   :  { %5634 = vmatprep.subr.bf16.mxu0 %v14962_v1 }
 0x31a   :  { %3628 = vmatpush1.bf16.msra.mxu1 %v14885_v2  ;;  %v14969_v2 = vld [vmem:[#allocation16 + $0x180] ss:$24 sps:$4 sm:$0xff]  }
 0x31b   :  { %3629 = vmatprep.subr.bf16.mxu1 %v14893_v3  ;;  %5635 = vmatpush1.bf16.msra.mxu0 %v14960_v4  ;;  %v14996_v3 = vld [vmem:[#allocation16 + $0x308] ss:$24 sps:$4 sm:$0xff]  }
 0x31c   :  { %5636 = vmatprep.subr.bf16.mxu0 %v14968_v5  ;;  %v15004_v5 = vld [vmem:[#allocation16 + $0x33c] ss:$24 sps:$4 sm:$0xff]  }
 0x31e   :  { %3630 = vmatpush1.bf16.msra.mxu1 %v14891_v41  ;;  %v15002_v41 = vld [vmem:[#allocation16 + $0x338] ss:$24 sps:$4 sm:$0xff]  }
 0x31f   :  { %3631 = vmatprep.subr.bf16.mxu1 %v14899_v31  ;;  %5637 = vmatpush1.bf16.msra.mxu0 %v14966_v6  ;;  %v15010_v31 = vld [vmem:[#allocation16 + $0x36c] ss:$24 sps:$4 sm:$0xff]   ;;  %v14975_v6 = vld [vmem:[#allocation16 + $0x1e0] ss:$24 sps:$4 sm:$0xff]  }
 0x320   :  { %5647 = vmatprep.subr.bf16.mxu0 %v14998_v7  ;;  %v14980_v7 = vld [vmem:[#allocation16 + $0x214] ss:$24 sps:$4 sm:$0xff]  }
 0x322   :  { %3632 = vmatpush1.bf16.msra.mxu1 %v14897_v44  ;;  %v15008_v44 = vld [vmem:[#allocation16 + $0x368] ss:$24 sps:$4 sm:$0xff]  }
 0x323   :  { %3633 = vmatprep.subr.bf16.mxu1 %v14905_v36  ;;  %v15016_v36 = vld [vmem:[#allocation16 + $0x39c] ss:$24 sps:$4 sm:$0xff]  }
 0x326   :  { %3634 = vmatpush1.bf16.msra.mxu1 %v14903_v8  ;;  %v14978_v8 = vld [vmem:[#allocation16 + $0x210] ss:$24 sps:$4 sm:$0xff]  }
 0x327   :  { %3635 = vmatprep.subr.bf16.mxu1 %v14911_v9  ;;  %v14983_v9 = vld [vmem:[#allocation16 + $0x244] ss:$24 sps:$4 sm:$0xff]  }
 0x32a   :  { %3636 = vmatpush1.bf16.msra.mxu1 %v14909_v10  ;;  %v15014_v10 = vld [vmem:[#allocation16 + $0x398] ss:$24 sps:$4 sm:$0xff]  }
 0x32b   :  { %3637 = vmatprep.subr.bf16.mxu1 %v14917_v11  ;;  %v15022_v11 = vld [vmem:[#allocation16 + $0x3cc] ss:$24 sps:$4 sm:$0xff]  }
 0x32e   :  { %3638 = vmatpush1.bf16.msra.mxu1 %v14915_v12  ;;  %v14981_v12 = vld [vmem:[#allocation16 + $0x240] ss:$24 sps:$4 sm:$0xff]  }
 0x32f   :  { %5483 = vmatprep.subr.bf16.mxu1 %v14923_v14  ;;  %v14986_v14 = vld [vmem:[#allocation16 + $0x274] ss:$24 sps:$4 sm:$0xff]  }
 0x331   :  { %3640 = vmatmul.mubr.bf16.vlgmr.msra.gmra.mrb[44].mxu1 %v17317_v15  ;;  %v14953_v15 = vld [vmem:[#allocation16 + $0xf4] ss:$24 sps:$4 sm:$0xff]  }
 0x332   :  { %5484 = vmatpush1.bf16.msra.mxu1 %v14921_v16  ;;  %v15020_v16 = vld [vmem:[#allocation16 + $0x3c8] ss:$24 sps:$4 sm:$0xff]  }
 0x333   :  { %5485 = vmatprep.subr.bf16.mxu1 %v14929_v17  ;;  %v15028_v17 = vld [vmem:[#allocation16 + $0x3fc] ss:$24 sps:$4 sm:$0xff]  }
 0x335   :  { %v17357_v26 = vpop.f32.mrb[24].mxu0 }
 0x336   :  { %5486 = vmatpush1.bf16.msra.mxu1 %v14927_v18  ;;  %v17359_v27 = vpop.f32.mrb[25].mxu0  ;;  %v14984_v18 = vld [vmem:[#allocation16 + $0x270] ss:$24 sps:$4 sm:$0xff]  }
 0x337   :  { %5487 = vmatprep.subr.bf16.mxu1 %v14935_v21  ;;  %v3522_v30 = vpop.f32.mrb[26].mxu0  ;;  %v14989_v21 = vld [vmem:[#allocation16 + $0x2a4] ss:$24 sps:$4 sm:$0xff]  }
 0x338   :  { %v3523_v29 = vpop.f32.mrb[27].mxu0  ;;  %v14987_v30 = vld [vmem:[#allocation16 + $0x2a0] ss:$24 sps:$4 sm:$0xff]  }
 0x339   :  { %v15032_v29 = vld [vmem:[#allocation16 + $0x428] ss:$24 sps:$4 sm:$0xff]  }
 0x33a   :  { %5488 = vmatpush1.bf16.msra.mxu1 %v14933_v22  ;;  %v15026_v22 = vld [vmem:[#allocation16 + $0x3f8] ss:$24 sps:$4 sm:$0xff]  }
 0x33b   :  { %5489 = vmatprep.subr.bf16.mxu1 %v14941_v25  ;;  %v15034_v25 = vld [vmem:[#allocation16 + $0x42c] ss:$24 sps:$4 sm:$0xff]  }
 0x33e   :  { %5490 = vmatpush1.bf16.msra.mxu1 %v14939_v28  ;;  %v14992_v28 = vld [vmem:[#allocation16 + $0x2d4] ss:$24 sps:$4 sm:$0xff]  }
 0x33f   :  { %5491 = vmatprep.subr.bf16.mxu1 %v14947_v33  ;;  %v15040_v33 = vld [vmem:[#allocation16 + $0x45c] ss:$24 sps:$4 sm:$0xff]  }
 0x342   :  { %5492 = vmatpush1.bf16.msra.mxu1 %v14945_v35  ;;  %v14995_v35 = vld [vmem:[#allocation16 + $0x304] ss:$24 sps:$4 sm:$0xff]  }
 0x343   :  { %5493 = vmatprep.subr.bf16.mxu1 %v14953_v15  ;;  %v15038_v15 = vld [vmem:[#allocation16 + $0x458] ss:$24 sps:$4 sm:$0xff]  }
 0x344   :  { %v3395_v45 = vpop.f32.mrb[32].mxu1 }
 0x345   :  { %v3396_v47 = vadd.f32 %v3395_v45, %v17352_v40  ;;  %v3397_v48 = vpop.f32.mrb[33].mxu1  ;;  %v15044_v45 = vld [vmem:[#allocation16 + $0x488] ss:$24 sps:$4 sm:$0xff]  }
 0x346   :  { %v3398_v46 = vadd.f32 %v3397_v48, %v17354_v43  ;;  %v3399_v50 = vpop.f32.mrb[34].mxu1  ;;  %5494 = vmatpush1.bf16.msra.mxu1 %v14951_v59  ;;  %v14963_v43 = vld [vmem:[#allocation16 + $0x150] ss:$24 sps:$4 sm:$0xff]   ;;  %v15046_v59 = vld [vmem:[#allocation16 + $0x48c] ss:$24 sps:$4 sm:$0xff]  }
 0x347   :  { %v3437_v51 = vadd.f32 %v17348_v20, %v3396_v47  ;;  %v3400_v55 = vpop.f32.mrb[35].mxu1  ;;  %5495 = vmatprep.subr.bf16.mxu1 %v14959_v38  ;;  %v14993_v38 = vld [vmem:[#allocation16 + $0x300] ss:$24 sps:$4 sm:$0xff]   ;;  %v15052_v47 = vld [vmem:[#allocation16 + $0x4bc] ss:$24 sps:$4 sm:$0xff]  }
 0x348   :  { %v3439_v57 = vadd.f32 %v17350_v24, %v3398_v46  ;;  %v14974_v24 = vld [vmem:[#allocation16 + $0x1b4] ss:$24 sps:$4 sm:$0xff]   ;;  %v14999_v48 = vld [vmem:[#allocation16 + $0x330] ss:$24 sps:$4 sm:$0xff]  }
 0x349   :  { %v3689_v40 = vadd.f32 %v3437_v51, %v17328_v60  ;;  %v14972_v60 = vld [vmem:[#allocation16 + $0x1b0] ss:$24 sps:$4 sm:$0xff]   ;;  %v15058_v50 = vld [vmem:[#allocation16 + $0x4ec] ss:$24 sps:$4 sm:$0xff]   ;;  %v15064_v55 = vld [vmem:[#allocation16 + $0x51c] ss:$24 sps:$4 sm:$0xff]  }
 0x34a   :  { %v3690_v62 = vadd.f32 %v3439_v57, %v17334_v63  ;;  %5496 = vmatpush1.bf16.msra.mxu1 %v14957_v32  ;;  %v14977_v63 = vld [vmem:[#allocation16 + $0x1e4] ss:$24 sps:$4 sm:$0xff]   ;;  %v15050_v46 = vld [vmem:[#allocation16 + $0x4b8] ss:$24 sps:$4 sm:$0xff]   ;;  %v15013_v51 = vld [vmem:[#allocation16 + $0x394] ss:$24 sps:$4 sm:$0xff]  }
 0x34b   :  { %v3719_v0 = vadd.f32 %v3698_v52, %v3689_v40  ;;  %5497 = vmatprep.subr.bf16.mxu1 %v14965_v56  ;;  %v15005_v32 = vld [vmem:[#allocation16 + $0x360] ss:$24 sps:$4 sm:$0xff]   ;;  %v15011_v40 = vld [vmem:[#allocation16 + $0x390] ss:$24 sps:$4 sm:$0xff]  }
 0x34c   :  { %v3720_v1 = vadd.f32 %v3702_v58, %v3690_v62  ;;  %v15056_v52 = vld [vmem:[#allocation16 + $0x4e8] ss:$24 sps:$4 sm:$0xff]  }
 0x34d   :  { %v17376_v4 = vpack.c.bf16 %v3719_v0, %v3719_v0  ;;  %v15070_v0 = vld [vmem:[#allocation16 + $0x54c] ss:$24 sps:$4 sm:$0xff]  }
 0x34e   :  { %5498 = vmatpush1.bf16.msra.mxu1 %v14963_v43  ;;  %v17374_v20 = vpack.c.bf16 %v3720_v1, %v3720_v1  ;;  %v15019_v43 = vld [vmem:[#allocation16 + $0x3c4] ss:$24 sps:$4 sm:$0xff]   ;;  %v15017_v1 = vld [vmem:[#allocation16 + $0x3c0] ss:$24 sps:$4 sm:$0xff]  }
 0x34f   :  { %5499 = vmatprep.subr.bf16.mxu1 %v14971_v53  ;;  %v15062_v53 = vld [vmem:[#allocation16 + $0x518] ss:$24 sps:$4 sm:$0xff]  }
 0x350   :  { %5515 = vmatprep.mubr.bf16.mxu1 %v17374_v20  ;;  %5638 = vmatprep.mubr.bf16.mxu0 %v17374_v20 }
 0x351   :  { %5639 = vmatmul.mubr.bf16.vlgmr.msra.gmra.mrb[36].mxu0 %v17376_v4 }
 0x352   :  { %5500 = vmatpush1.bf16.msra.mxu1 %v14969_v2  ;;  %5648 = vmatpush1.bf16.msra.mxu0 %v14996_v3  ;;  %v15025_v2 = vld [vmem:[#allocation16 + $0x3f4] ss:$24 sps:$4 sm:$0xff]   ;;  %v15068_v3 = vld [vmem:[#allocation16 + $0x548] ss:$24 sps:$4 sm:$0xff]  }
 0x353   :  { %5501 = vmatprep.subr.bf16.mxu1 %v14974_v24  ;;  %5649 = vmatprep.subr.bf16.mxu0 %v15004_v5  ;;  %v15076_v24 = vld [vmem:[#allocation16 + $0x57c] ss:$24 sps:$4 sm:$0xff]   ;;  %v15023_v5 = vld [vmem:[#allocation16 + $0x3f0] ss:$24 sps:$4 sm:$0xff]  }
 0x356   :  { %5502 = vmatpush1.bf16.msra.mxu1 %v14972_v60  ;;  %5650 = vmatpush1.bf16.msra.mxu0 %v15002_v41  ;;  %v15074_v60 = vld [vmem:[#allocation16 + $0x578] ss:$24 sps:$4 sm:$0xff]   ;;  %v15082_v41 = vld [vmem:[#allocation16 + $0x5ac] ss:$24 sps:$4 sm:$0xff]  }
 0x357   :  { %5503 = vmatprep.subr.bf16.mxu1 %v14977_v63  ;;  %5651 = vmatprep.subr.bf16.mxu0 %v15010_v31  ;;  %v15031_v63 = vld [vmem:[#allocation16 + $0x424] ss:$24 sps:$4 sm:$0xff]  }
 0x35a   :  { %5504 = vmatpush1.bf16.msra.mxu1 %v14975_v6  ;;  %5652 = vmatpush1.bf16.msra.mxu0 %v15008_v44 }
 0x35b   :  { %5505 = vmatprep.subr.bf16.mxu1 %v14980_v7  ;;  %5653 = vmatprep.subr.bf16.mxu0 %v15016_v36 }
 0x35e   :  { %5506 = vmatpush1.bf16.msra.mxu1 %v14978_v8  ;;  %5654 = vmatpush1.bf16.msra.mxu0 %v15014_v10  ;;  %v15029_v8 = vld [vmem:[#allocation16 + $0x420] ss:$24 sps:$4 sm:$0xff]  }
 0x35f   :  { %5507 = vmatprep.subr.bf16.mxu1 %v14983_v9  ;;  %5655 = vmatprep.subr.bf16.mxu0 %v15022_v11  ;;  %v15080_v9 = vld [vmem:[#allocation16 + $0x5a8] ss:$24 sps:$4 sm:$0xff]   ;;  %v15037_v11 = vld [vmem:[#allocation16 + $0x454] ss:$24 sps:$4 sm:$0xff]  }
 0x362   :  { %5508 = vmatpush1.bf16.msra.mxu1 %v14981_v12  ;;  %5656 = vmatpush1.bf16.msra.mxu0 %v15020_v16  ;;  %v15088_v12 = vld [vmem:[#allocation16 + $0x5dc] ss:$24 sps:$4 sm:$0xff]   ;;  %v15086_v16 = vld [vmem:[#allocation16 + $0x5d8] ss:$24 sps:$4 sm:$0xff]  }
 0x363   :  { %5509 = vmatprep.subr.bf16.mxu1 %v14986_v14  ;;  %5657 = vmatprep.subr.bf16.mxu0 %v15028_v17  ;;  %v15035_v14 = vld [vmem:[#allocation16 + $0x450] ss:$24 sps:$4 sm:$0xff]   ;;  %v15094_v17 = vld [vmem:[#allocation16 + $0x60c] ss:$24 sps:$4 sm:$0xff]  }
 0x366   :  { %5510 = vmatpush1.bf16.msra.mxu1 %v14984_v18  ;;  %5658 = vmatpush1.bf16.msra.mxu0 %v15026_v22  ;;  %v15049_v18 = vld [vmem:[#allocation16 + $0x4b4] ss:$24 sps:$4 sm:$0xff]   ;;  %v15055_v22 = vld [vmem:[#allocation16 + $0x4e4] ss:$24 sps:$4 sm:$0xff]  }
 0x367   :  { %5511 = vmatprep.subr.bf16.mxu1 %v14989_v21  ;;  %5659 = vmatprep.subr.bf16.mxu0 %v15034_v25  ;;  %v15047_v21 = vld [vmem:[#allocation16 + $0x4b0] ss:$24 sps:$4 sm:$0xff]   ;;  %v15053_v25 = vld [vmem:[#allocation16 + $0x4e0] ss:$24 sps:$4 sm:$0xff]  }
 0x36a   :  { %5512 = vmatpush1.bf16.msra.mxu1 %v14987_v30  ;;  %5660 = vmatpush1.bf16.msra.mxu0 %v15032_v29  ;;  %v15061_v30 = vld [vmem:[#allocation16 + $0x514] ss:$24 sps:$4 sm:$0xff]   ;;  %v15067_v29 = vld [vmem:[#allocation16 + $0x544] ss:$24 sps:$4 sm:$0xff]  }
 0x36b   :  { %5513 = vmatprep.subr.bf16.mxu1 %v14992_v28  ;;  %5661 = vmatprep.subr.bf16.mxu0 %v15040_v33  ;;  %v15059_v28 = vld [vmem:[#allocation16 + $0x510] ss:$24 sps:$4 sm:$0xff]   ;;  %v15065_v33 = vld [vmem:[#allocation16 + $0x540] ss:$24 sps:$4 sm:$0xff]  }
 0x36e   :  { %5514 = vmatpush1.bf16.msra.mxu1 %v14990_v54  ;;  %5662 = vmatpush1.bf16.msra.mxu0 %v15038_v15  ;;  %v15073_v54 = vld [vmem:[#allocation16 + $0x574] ss:$24 sps:$4 sm:$0xff]   ;;  %v15079_v15 = vld [vmem:[#allocation16 + $0x5a4] ss:$24 sps:$4 sm:$0xff]  }
 0x36f   :  { %5524 = vmatprep.subr.bf16.mxu1 %v14995_v35  ;;  %5663 = vmatprep.subr.bf16.mxu0 %v15046_v59  ;;  %v15071_v35 = vld [vmem:[#allocation16 + $0x570] ss:$24 sps:$4 sm:$0xff]   ;;  %v15077_v59 = vld [vmem:[#allocation16 + $0x5a0] ss:$24 sps:$4 sm:$0xff]  }
 0x371   :  { %5516 = vmatmul.mubr.bf16.vlgmr.msra.gmra.mrb[48].mxu1 %v17376_v4 }
 0x372   :  { %5525 = vmatpush1.bf16.msra.mxu1 %v14993_v38  ;;  %5664 = vmatpush1.bf16.msra.mxu0 %v15044_v45  ;;  %v15085_v38 = vld [vmem:[#allocation16 + $0x5d4] ss:$24 sps:$4 sm:$0xff]   ;;  %v15091_v45 = vld [vmem:[#allocation16 + $0x604] ss:$24 sps:$4 sm:$0xff]  }
 0x373   :  { %5526 = vmatprep.subr.bf16.mxu1 %v15001_v39  ;;  %5665 = vmatprep.subr.bf16.mxu0 %v15052_v47  ;;  %v15083_v39 = vld [vmem:[#allocation16 + $0x5d0] ss:$24 sps:$4 sm:$0xff]  }
 0x375   :  { %v17382_v56 = vpop.f32.mrb[28].mxu0 }
 0x376   :  { %5527 = vmatpush1.bf16.msra.mxu1 %v14999_v48  ;;  %5666 = vmatpush1.bf16.msra.mxu0 %v15050_v46  ;;  %v17384_v57 = vpop.f32.mrb[29].mxu0 }
 0x377   :  { %5528 = vmatprep.subr.bf16.mxu1 %v15007_v49  ;;  %5667 = vmatprep.subr.bf16.mxu0 %v15058_v50  ;;  %v3604_v58 = vpop.f32.mrb[30].mxu0  ;;  %v205_v50 = vld [vmem:[#allocation20 + $0x10] sm:$0x1f] }
 0x378   :  { %v3605_v62 = vpop.f32.mrb[31].mxu0 }
 0x37a   :  { %5529 = vmatpush1.bf16.msra.mxu1 %v15005_v32  ;;  %5668 = vmatpush1.bf16.msra.mxu0 %v15056_v52  ;;  %v206_v32 = vld [vmem:[#allocation20 + $0x18] sm:$0x1f] }
 0x37b   :  { %5530 = vmatprep.subr.bf16.mxu1 %v15013_v51  ;;  %5669 = vmatprep.subr.bf16.mxu0 %v15064_v55  ;;  %v3706_v55 = vrot.slane %v205_v50, %v17364_v42  ;;  %v15146_v50 = vld [vmem:[#allocation16 + $0x7b8] ss:$24 sps:$4 sm:$0xff]  }
 0x37e   :  { %5531 = vmatpush1.bf16.msra.mxu1 %v15011_v40  ;;  %5670 = vmatpush1.bf16.msra.mxu0 %v15062_v53 }
 0x37f   :  { %5532 = vmatprep.subr.bf16.mxu1 %v15019_v43  ;;  %5671 = vmatprep.subr.bf16.mxu0 %v15070_v0  ;;  %v3710_v43 = vrot.slane %v206_v32, %v17364_v42  ;;  %v15151_v32 = vld [vmem:[#allocation16 + $0x7e4] ss:$24 sps:$4 sm:$0xff]  }
 0x382   :  { %5533 = vmatpush1.bf16.msra.mxu1 %v15017_v1  ;;  %5672 = vmatpush1.bf16.msra.mxu0 %v15068_v3 }
 0x383   :  { %5534 = vmatprep.subr.bf16.mxu1 %v15025_v2  ;;  %5673 = vmatprep.subr.bf16.mxu0 %v15076_v24 }
 0x384   :  { %v3477_v31 = vpop.f32.mrb[36].mxu1 }
 0x385   :  { %v17387_v6 = vadd.f32 %v17357_v26, %v3477_v31  ;;  %v3479_v7 = vpop.f32.mrb[37].mxu1  ;;  %v15043_v26 = vld [vmem:[#allocation16 + $0x484] ss:$24 sps:$4 sm:$0xff]  }
 0x386   :  { %v17390_v44 = vadd.f32 %v17359_v27, %v3479_v7  ;;  %v3481_v36 = vpop.f32.mrb[38].mxu1  ;;  %5535 = vmatpush1.bf16.msra.mxu1 %v15023_v5  ;;  %5674 = vmatpush1.bf16.msra.mxu0 %v15074_v60  ;;  %v15041_v27 = vld [vmem:[#allocation16 + $0x480] ss:$24 sps:$4 sm:$0xff]   ;;  %v15100_v31 = vld [vmem:[#allocation16 + $0x63c] ss:$24 sps:$4 sm:$0xff]  }
 0x387   :  { %v3482_v10 = vpop.f32.mrb[39].mxu1  ;;  %5536 = vmatprep.subr.bf16.mxu1 %v15031_v63  ;;  %5675 = vmatprep.subr.bf16.mxu0 %v15082_v41  ;;  %v15089_v5 = vld [vmem:[#allocation16 + $0x600] ss:$24 sps:$4 sm:$0xff]   ;;  %v15097_v41 = vld [vmem:[#allocation16 + $0x634] ss:$24 sps:$4 sm:$0xff]  }
 0x388   :  { %v15092_v60 = vld [vmem:[#allocation16 + $0x608] ss:$24 sps:$4 sm:$0xff]   ;;  %v15106_v7 = vld [vmem:[#allocation16 + $0x66c] ss:$24 sps:$4 sm:$0xff]  }
 0x389   :  { %v15104_v36 = vld [vmem:[#allocation16 + $0x668] ss:$24 sps:$4 sm:$0xff]  }
 0x38a   :  { %5537 = vmatpush1.bf16.msra.mxu1 %v15029_v8  ;;  %5676 = vmatpush1.bf16.msra.mxu0 %v15080_v9  ;;  %v15109_v8 = vld [vmem:[#allocation16 + $0x694] ss:$24 sps:$4 sm:$0xff]   ;;  %v15107_v10 = vld [vmem:[#allocation16 + $0x690] ss:$24 sps:$4 sm:$0xff]  }
 0x38b   :  { %5538 = vmatprep.subr.bf16.mxu1 %v15037_v11  ;;  %5677 = vmatprep.subr.bf16.mxu0 %v15088_v12  ;;  %v15112_v9 = vld [vmem:[#allocation16 + $0x69c] ss:$24 sps:$4 sm:$0xff]   ;;  %v15110_v11 = vld [vmem:[#allocation16 + $0x698] ss:$24 sps:$4 sm:$0xff]  }
 0x38c   :  { %v15115_v12 = vld [vmem:[#allocation16 + $0x6c4] ss:$24 sps:$4 sm:$0xff]  }
 0x38e   :  { %5539 = vmatpush1.bf16.msra.mxu1 %v15035_v14  ;;  %5678 = vmatpush1.bf16.msra.mxu0 %v15086_v16  ;;  %v15118_v14 = vld [vmem:[#allocation16 + $0x6cc] ss:$24 sps:$4 sm:$0xff]   ;;  %v15113_v16 = vld [vmem:[#allocation16 + $0x6c0] ss:$24 sps:$4 sm:$0xff]  }
 0x38f   :  { %5540 = vmatprep.subr.bf16.mxu1 %v15043_v26  ;;  %5688 = vmatprep.subr.bf16.mxu0 %v15094_v17  ;;  %v15116_v26 = vld [vmem:[#allocation16 + $0x6c8] ss:$24 sps:$4 sm:$0xff]   ;;  %v15121_v17 = vld [vmem:[#allocation16 + $0x6f4] ss:$24 sps:$4 sm:$0xff]  }
 0x392   :  { %5541 = vmatpush1.bf16.msra.mxu1 %v15041_v27  ;;  %v15124_v27 = vld [vmem:[#allocation16 + $0x6fc] ss:$24 sps:$4 sm:$0xff]  }
 0x393   :  { %5542 = vmatprep.subr.bf16.mxu1 %v15049_v18  ;;  %v15119_v18 = vld [vmem:[#allocation16 + $0x6f0] ss:$24 sps:$4 sm:$0xff]  }
 0x396   :  { %5543 = vmatpush1.bf16.msra.mxu1 %v15047_v21  ;;  %v15122_v21 = vld [vmem:[#allocation16 + $0x6f8] ss:$24 sps:$4 sm:$0xff]  }
 0x397   :  { %5544 = vmatprep.subr.bf16.mxu1 %v15055_v22  ;;  %v15127_v22 = vld [vmem:[#allocation16 + $0x724] ss:$24 sps:$4 sm:$0xff]  }
 0x39a   :  { %5545 = vmatpush1.bf16.msra.mxu1 %v15053_v25  ;;  %v15130_v25 = vld [vmem:[#allocation16 + $0x72c] ss:$24 sps:$4 sm:$0xff]  }
 0x39b   :  { %5546 = vmatprep.subr.bf16.mxu1 %v15061_v30  ;;  %v15125_v30 = vld [vmem:[#allocation16 + $0x720] ss:$24 sps:$4 sm:$0xff]  }
 0x39e   :  { %5547 = vmatpush1.bf16.msra.mxu1 %v15059_v28  ;;  %v15128_v28 = vld [vmem:[#allocation16 + $0x728] ss:$24 sps:$4 sm:$0xff]  }
 0x39f   :  { %5548 = vmatprep.subr.bf16.mxu1 %v15067_v29  ;;  %v15133_v29 = vld [vmem:[#allocation16 + $0x754] ss:$24 sps:$4 sm:$0xff]  }
 0x3a2   :  { %5549 = vmatpush1.bf16.msra.mxu1 %v15065_v33  ;;  %v15136_v33 = vld [vmem:[#allocation16 + $0x75c] ss:$24 sps:$4 sm:$0xff]  }
 0x3a3   :  { %5550 = vmatprep.subr.bf16.mxu1 %v15073_v54  ;;  %v15131_v54 = vld [vmem:[#allocation16 + $0x750] ss:$24 sps:$4 sm:$0xff]  }
 0x3a6   :  { %5551 = vmatpush1.bf16.msra.mxu1 %v15071_v35  ;;  %v15134_v35 = vld [vmem:[#allocation16 + $0x758] ss:$24 sps:$4 sm:$0xff]  }
 0x3a7   :  { %5552 = vmatprep.subr.bf16.mxu1 %v15079_v15  ;;  %v15139_v15 = vld [vmem:[#allocation16 + $0x784] ss:$24 sps:$4 sm:$0xff]  }
 0x3aa   :  { %5553 = vmatpush1.bf16.msra.mxu1 %v15077_v59  ;;  %v15142_v59 = vld [vmem:[#allocation16 + $0x78c] ss:$24 sps:$4 sm:$0xff]  }
 0x3ab   :  { %5554 = vmatprep.subr.bf16.mxu1 %v15085_v38  ;;  %v15137_v38 = vld [vmem:[#allocation16 + $0x780] ss:$24 sps:$4 sm:$0xff]  }
 0x3ae   :  { %5555 = vmatpush1.bf16.msra.mxu1 %v15083_v39  ;;  %v15140_v39 = vld [vmem:[#allocation16 + $0x788] ss:$24 sps:$4 sm:$0xff]  }
 0x3af   :  { %5565 = vmatprep.subr.bf16.mxu1 %v15091_v45  ;;  %v15145_v45 = vld [vmem:[#allocation16 + $0x7b4] ss:$24 sps:$4 sm:$0xff]  }
 0x3b5   :  { %v17392_v47 = vpop.f32.mrb[32].mxu0 }
 0x3b6   :  { %v17394_v48 = vpop.f32.mrb[33].mxu0 }
 0x3b7   :  { %v3686_v49 = vpop.f32.mrb[34].mxu0 }
 0x3b8   :  { %v3687_v46 = vpop.f32.mrb[35].mxu0  ;;  %v15148_v49 = vld [vmem:[#allocation16 + $0x7bc] ss:$24 sps:$4 sm:$0xff]  }
 0x3b9   :  { %v15143_v46 = vld [vmem:[#allocation16 + $0x7b0] ss:$24 sps:$4 sm:$0xff]  }
 0x3c4   :  { %v3559_v51 = vpop.f32.mrb[40].mxu1 }
 0x3c5   :  { %v3560_v52 = vadd.f32 %v3559_v51, %v17387_v6  ;;  %v3561_v58 = vpop.f32.mrb[41].mxu1  ;;  %v15103_v6 = vld [vmem:[#allocation16 + $0x664] ss:$24 sps:$4 sm:$0xff]  }
 0x3c6   :  { %v3562_v40 = vadd.f32 %v3561_v58, %v17390_v44  ;;  %v3563_v62 = vpop.f32.mrb[42].mxu1  ;;  %v15101_v44 = vld [vmem:[#allocation16 + $0x660] ss:$24 sps:$4 sm:$0xff]   ;;  %v15154_v51 = vld [vmem:[#allocation16 + $0x7ec] ss:$24 sps:$4 sm:$0xff]  }
 0x3c7   :  { %v3691_v53 = vadd.f32 %v3560_v52, %v17331_v61  ;;  %v3564_v0 = vpop.f32.mrb[43].mxu1  ;;  %v15095_v61 = vld [vmem:[#allocation16 + $0x630] ss:$24 sps:$4 sm:$0xff]   ;;  %v15149_v52 = vld [vmem:[#allocation16 + $0x7e0] ss:$24 sps:$4 sm:$0xff]  }
 0x3c8   :  { %v3692_v1 = vadd.f32 %v3562_v40, %v17337_v13  ;;  %v15098_v13 = vld [vmem:[#allocation16 + $0x638] ss:$24 sps:$4 sm:$0xff]   ;;  %v15157_v58 = vld [vmem:[#allocation16 + $0x814] ss:$24 sps:$4 sm:$0xff]  }
 0x3c9   :  { %v3721_v2 = vadd.f32 %v3706_v55, %v3691_v53  ;;  %v15152_v55 = vld [vmem:[#allocation16 + $0x7e8] ss:$24 sps:$4 sm:$0xff]   ;;  %v15160_v40 = vld [vmem:[#allocation16 + $0x81c] ss:$24 sps:$4 sm:$0xff]   ;;  %v15166_v0 = vld [vmem:[#allocation16 + $0x84c] ss:$24 sps:$4 sm:$0xff]  }
 0x3ca   :  { %v3722_v3 = vadd.f32 %v3710_v43, %v3692_v1  ;;  %v15155_v62 = vld [vmem:[#allocation16 + $0x810] ss:$24 sps:$4 sm:$0xff]   ;;  %v15163_v53 = vld [vmem:[#allocation16 + $0x844] ss:$24 sps:$4 sm:$0xff]   ;;  %v15161_v1 = vld [vmem:[#allocation16 + $0x840] ss:$24 sps:$4 sm:$0xff]  }
 0x3cb   :  { %v17404_v63 = vpack.c.bf16 %v3721_v2, %v3721_v2  ;;  %v15158_v43 = vld [vmem:[#allocation16 + $0x818] ss:$24 sps:$4 sm:$0xff]   ;;  %v15164_v2 = vld [vmem:[#allocation16 + $0x848] ss:$24 sps:$4 sm:$0xff]  }
 0x3cc   :  { %v17402_v24 = vpack.c.bf16 %v3722_v3, %v3722_v3  ;;  %v15169_v3 = vld [vmem:[#allocation16 + $0x874] ss:$24 sps:$4 sm:$0xff]  }
 0x3ce   :  { %5556 = vmatprep.mubr.bf16.mxu1 %v17402_v24  ;;  %5679 = vmatprep.mubr.bf16.mxu0 %v17402_v24 }
 0x3cf   :  { %5557 = vmatmul.mubr.bf16.vlgmr.msra.gmra.mrb[48].mxu1 %v17404_v63  ;;  %5680 = vmatmul.mubr.bf16.vlgmr.msra.gmra.mrb[36].mxu0 %v17404_v63 }
 0x3d0   :  { %5566 = vmatpush1.bf16.msra.mxu1 %v15089_v5  ;;  %5689 = vmatpush1.bf16.msra.mxu0 %v15092_v60  ;;  %v15172_v5 = vld [vmem:[#allocation16 + $0x87c] ss:$24 sps:$4 sm:$0xff]   ;;  %v15167_v60 = vld [vmem:[#allocation16 + $0x870] ss:$24 sps:$4 sm:$0xff]  }
 0x3d1   :  { %5567 = vmatprep.subr.bf16.mxu1 %v15097_v41  ;;  %5690 = vmatprep.subr.bf16.mxu0 %v15100_v31  ;;  %v15170_v41 = vld [vmem:[#allocation16 + $0x878] ss:$24 sps:$4 sm:$0xff]   ;;  %v15175_v31 = vld [vmem:[#allocation16 + $0x8a4] ss:$24 sps:$4 sm:$0xff]  }
 0x3d4   :  { %5568 = vmatpush1.bf16.msra.mxu1 %v15095_v61  ;;  %5691 = vmatpush1.bf16.msra.mxu0 %v15098_v13  ;;  %v15178_v61 = vld [vmem:[#allocation16 + $0x8ac] ss:$24 sps:$4 sm:$0xff]  }
 0x3d5   :  { %5569 = vmatprep.subr.bf16.mxu1 %v15103_v6  ;;  %5692 = vmatprep.subr.bf16.mxu0 %v15106_v7  ;;  %v207_v13 = vld [vmem:[#allocation20 + $0x20] sm:$0x1f] }
 0x3d6   :  { %v15173_v6 = vld [vmem:[#allocation16 + $0x8a0] ss:$24 sps:$4 sm:$0xff]  }
 0x3d8   :  { %5570 = vmatpush1.bf16.msra.mxu1 %v15101_v44  ;;  %5693 = vmatpush1.bf16.msra.mxu0 %v15104_v36  ;;  %v15176_v44 = vld [vmem:[#allocation16 + $0x8a8] ss:$24 sps:$4 sm:$0xff]  }
 0x3d9   :  { %5571 = vmatprep.subr.bf16.mxu1 %v15109_v8  ;;  %5694 = vmatprep.subr.bf16.mxu0 %v15112_v9  ;;  %v208_v36 = vld [vmem:[#allocation20 + $0x28] sm:$0x1f] }
 0x3dc   :  { %5572 = vmatpush1.bf16.msra.mxu1 %v15107_v10  ;;  %5695 = vmatpush1.bf16.msra.mxu0 %v15110_v11  ;;  %v15181_v10 = vld [vmem:[#allocation16 + $0x8d4] ss:$24 sps:$4 sm:$0xff]  }
 0x3dd   :  { %5573 = vmatprep.subr.bf16.mxu1 %v15115_v12  ;;  %5696 = vmatprep.subr.bf16.mxu0 %v15118_v14  ;;  %v15184_v11 = vld [vmem:[#allocation16 + $0x8dc] ss:$24 sps:$4 sm:$0xff]  }
 0x3e0   :  { %5574 = vmatpush1.bf16.msra.mxu1 %v15113_v16  ;;  %5697 = vmatpush1.bf16.msra.mxu0 %v15116_v26  ;;  %v3714_v26 = vrot.slane %v207_v13, %v17364_v42  ;;  %v15238_v13 = vld [vmem:[#allocation17 + $0x304] ss:$48 sps:$4 sm:$0xff]  }
 0x3e1   :  { %5575 = vmatprep.subr.bf16.mxu1 %v15121_v17  ;;  %5698 = vmatprep.subr.bf16.mxu0 %v15124_v27 }
 0x3e4   :  { %5576 = vmatpush1.bf16.msra.mxu1 %v15119_v18  ;;  %5699 = vmatpush1.bf16.msra.mxu0 %v15122_v21  ;;  %v15179_v18 = vld [vmem:[#allocation16 + $0x8d0] ss:$24 sps:$4 sm:$0xff]  }
 0x3e5   :  { %5577 = vmatprep.subr.bf16.mxu1 %v15127_v22  ;;  %5700 = vmatprep.subr.bf16.mxu0 %v15130_v25  ;;  %v15182_v21 = vld [vmem:[#allocation16 + $0x8d8] ss:$24 sps:$4 sm:$0xff]   ;;  %v15187_v25 = vld [vmem:[#allocation16 + $0x14] ss:$24 sps:$4 sm:$0xff]  }
 0x3e8   :  { %5578 = vmatpush1.bf16.msra.mxu1 %v15125_v30  ;;  %5701 = vmatpush1.bf16.msra.mxu0 %v15128_v28 }
 0x3e9   :  { %5579 = vmatprep.subr.bf16.mxu1 %v15133_v29  ;;  %5702 = vmatprep.subr.bf16.mxu0 %v15136_v33  ;;  %v15185_v33 = vld [vmem:[#allocation16 + $0x10] ss:$24 sps:$4 sm:$0xff]  }
 0x3ec   :  { %5580 = vmatpush1.bf16.msra.mxu1 %v15131_v54  ;;  %5703 = vmatpush1.bf16.msra.mxu0 %v15134_v35 }
 0x3ed   :  { %5581 = vmatprep.subr.bf16.mxu1 %v15139_v15  ;;  %5704 = vmatprep.subr.bf16.mxu0 %v15142_v59  ;;  %v15191_v15 = vld [vmem:[#allocation16 + $0x40] ss:$24 sps:$4 sm:$0xff]  }
 0x3ee   :  { %v15194_v59 = vld [vmem:[#allocation17 + $0x60] ss:$48 sps:$4 sm:$0xff]  }
 0x3f0   :  { %5582 = vmatpush1.bf16.msra.mxu1 %v15137_v38  ;;  %5705 = vmatpush1.bf16.msra.mxu0 %v15140_v39  ;;  %v15199_v38 = vld [vmem:[#allocation16 + $0x74] ss:$24 sps:$4 sm:$0xff]  }
 0x3f1   :  { %5583 = vmatprep.subr.bf16.mxu1 %v15145_v45  ;;  %5706 = vmatprep.subr.bf16.mxu0 %v15148_v49  ;;  %v15202_v39 = vld [vmem:[#allocation17 + $0xc4] ss:$48 sps:$4 sm:$0xff]   ;;  %v15197_v45 = vld [vmem:[#allocation16 + $0x70] ss:$24 sps:$4 sm:$0xff]  }
 0x3f2   :  { %v15200_v49 = vld [vmem:[#allocation17 + $0xc0] ss:$48 sps:$4 sm:$0xff]  }
 0x3f4   :  { %5584 = vmatpush1.bf16.msra.mxu1 %v15143_v46  ;;  %5707 = vmatpush1.bf16.msra.mxu0 %v15146_v50  ;;  %v15205_v46 = vld [vmem:[#allocation16 + $0xa4] ss:$24 sps:$4 sm:$0xff]  }
 0x3f5   :  { %5585 = vmatprep.subr.bf16.mxu1 %v15151_v32  ;;  %5708 = vmatprep.subr.bf16.mxu0 %v15154_v51  ;;  %v15208_v50 = vld [vmem:[#allocation17 + $0x124] ss:$48 sps:$4 sm:$0xff]   ;;  %v15203_v32 = vld [vmem:[#allocation16 + $0xa0] ss:$24 sps:$4 sm:$0xff]  }
 0x3f6   :  { %v15206_v51 = vld [vmem:[#allocation17 + $0x120] ss:$48 sps:$4 sm:$0xff]  }
 0x3f8   :  { %5586 = vmatpush1.bf16.msra.mxu1 %v15149_v52  ;;  %5709 = vmatpush1.bf16.msra.mxu0 %v15152_v55  ;;  %v15214_v52 = vld [vmem:[#allocation17 + $0x184] ss:$48 sps:$4 sm:$0xff]   ;;  %v15209_v55 = vld [vmem:[#allocation16 + $0xd0] ss:$24 sps:$4 sm:$0xff]  }
 0x3f9   :  { %5587 = vmatprep.subr.bf16.mxu1 %v15157_v58  ;;  %5710 = vmatprep.subr.bf16.mxu0 %v15160_v40  ;;  %v15212_v58 = vld [vmem:[#allocation17 + $0x180] ss:$48 sps:$4 sm:$0xff]   ;;  %v15217_v40 = vld [vmem:[#allocation16 + $0x104] ss:$24 sps:$4 sm:$0xff]  }
 0x3fc   :  { %5588 = vmatpush1.bf16.msra.mxu1 %v15155_v62  ;;  %5711 = vmatpush1.bf16.msra.mxu0 %v15158_v43  ;;  %v15220_v62 = vld [vmem:[#allocation17 + $0x1e4] ss:$48 sps:$4 sm:$0xff]   ;;  %v15215_v43 = vld [vmem:[#allocation16 + $0x100] ss:$24 sps:$4 sm:$0xff]  }
 0x3fd   :  { %5589 = vmatprep.subr.bf16.mxu1 %v15163_v53  ;;  %5712 = vmatprep.subr.bf16.mxu0 %v15166_v0  ;;  %v15218_v53 = vld [vmem:[#allocation17 + $0x1e0] ss:$48 sps:$4 sm:$0xff]   ;;  %v15223_v0 = vld [vmem:[#allocation16 + $0x134] ss:$24 sps:$4 sm:$0xff]  }
 0x400   :  { %5590 = vmatpush1.bf16.msra.mxu1 %v15161_v1  ;;  %5713 = vmatpush1.bf16.msra.mxu0 %v15164_v2  ;;  %v15226_v1 = vld [vmem:[#allocation17 + $0x244] ss:$48 sps:$4 sm:$0xff]   ;;  %v15221_v2 = vld [vmem:[#allocation16 + $0x130] ss:$24 sps:$4 sm:$0xff]  }
 0x401   :  { %5591 = vmatprep.subr.bf16.mxu1 %v15169_v3  ;;  %5714 = vmatprep.subr.bf16.mxu0 %v15172_v5  ;;  %v15224_v3 = vld [vmem:[#allocation17 + $0x240] ss:$48 sps:$4 sm:$0xff]   ;;  %v15229_v5 = vld [vmem:[#allocation16 + $0x164] ss:$24 sps:$4 sm:$0xff]  }
 0x404   :  { %v3641_v7 = vpop.f32.mrb[44].mxu1  ;;  %5592 = vmatpush1.bf16.msra.mxu1 %v15167_v60  ;;  %5715 = vmatpush1.bf16.msra.mxu0 %v15170_v41  ;;  %v15232_v60 = vld [vmem:[#allocation17 + $0x2a4] ss:$48 sps:$4 sm:$0xff]   ;;  %v15227_v41 = vld [vmem:[#allocation16 + $0x160] ss:$24 sps:$4 sm:$0xff]  }
 0x405   :  { %v3642_v8 = vadd.f32 %v3641_v7, %v17382_v56  ;;  %v3643_v9 = vpop.f32.mrb[45].mxu1  ;;  %5593 = vmatprep.subr.bf16.mxu1 %v15175_v31  ;;  %5716 = vmatprep.subr.bf16.mxu0 %v15178_v61  ;;  %v3718_v56 = vrot.slane %v208_v36, %v17364_v42  ;;  %v15188_v42 = vld [vmem:[#allocation17] ss:$48 sps:$4 sm:$0xff]   ;;  %v15235_v61 = vld [vmem:[#allocation16 + $0x194] ss:$24 sps:$4 sm:$0xff]  }
 0x406   :  { %v3644_v12 = vadd.f32 %v3643_v9, %v17384_v57  ;;  %v3645_v14 = vpop.f32.mrb[46].mxu1  ;;  %v15190_v57 = vld [vmem:[#allocation17 + $0x4] ss:$48 sps:$4 sm:$0xff]   ;;  %v15230_v31 = vld [vmem:[#allocation17 + $0x2a0] ss:$48 sps:$4 sm:$0xff]  }
 0x407   :  { %v3683_v16 = vadd.f32 %v17392_v47, %v3642_v8  ;;  %v3646_v17 = vpop.f32.mrb[47].mxu1  ;;  %v15236_v7 = vld [vmem:[#allocation17 + $0x300] ss:$48 sps:$4 sm:$0xff]   ;;  %v15244_v36 = vld [vmem:[#allocation17 + $0x364] ss:$48 sps:$4 sm:$0xff]  }
 0x408   :  { %v3685_v27 = vadd.f32 %v17394_v48, %v3644_v12  ;;  %5594 = vmatpush1.bf16.msra.mxu1 %v15173_v6  ;;  %5717 = vmatpush1.bf16.msra.mxu0 %v15176_v44  ;;  %v17418_v48 = vld [vmem:[#allocation14] sm:$0xff]  ;;  %v15241_v44 = vld [vmem:[#allocation16 + $0x1c4] ss:$24 sps:$4 sm:$0xff]   ;;  %v15239_v8 = vld [vmem:[#allocation16 + $0x1c0] ss:$24 sps:$4 sm:$0xff]  }
 0x409   :  { %v3693_v22 = vadd.f32 %v3683_v16, %v17340_v19  ;;  %5595 = vmatprep.subr.bf16.mxu1 %v15181_v10  ;;  %5718 = vmatprep.subr.bf16.mxu0 %v15184_v11  ;;  %v15193_v19 = vld [vmem:[#allocation16 + $0x44] ss:$24 sps:$4 sm:$0xff]   ;;  %v17428_v35 = vcombine.high %v17418_v48, %v17418_v48  ;;  %v15233_v6 = vld [vmem:[#allocation16 + $0x190] ss:$24 sps:$4 sm:$0xff]   ;;  %v15247_v10 = vld [vmem:[#allocation16 + $0x1f4] ss:$24 sps:$4 sm:$0xff]  }
 0x40a   :  { %v3694_v30 = vadd.f32 %v3685_v27, %v17343_v23  ;;  %v15196_v23 = vld [vmem:[#allocation17 + $0x64] ss:$48 sps:$4 sm:$0xff]   ;;  %v15242_v9 = vld [vmem:[#allocation17 + $0x360] ss:$48 sps:$4 sm:$0xff]  }
 0x40b   :  { %v3723_v47 = vadd.f32 %v3714_v26, %v3693_v22  ;;  %v15250_v11 = vld [vmem:[#allocation17 + $0x3c4] ss:$48 sps:$4 sm:$0xff]   ;;  %v15245_v12 = vld [vmem:[#allocation16 + $0x1f0] ss:$24 sps:$4 sm:$0xff]   ;;  %v15251_v17 = vld [vmem:[#allocation16 + $0x220] ss:$24 sps:$4 sm:$0xff]  }
 0x40c   :  { %5596 = vmatpush1.bf16.msra.mxu1 %v15179_v18  ;;  %5719 = vmatpush1.bf16.msra.mxu0 %v15182_v21  ;;  %v3724_v28 = vadd.f32 %v3718_v56, %v3694_v30  ;;  %v15248_v14 = vld [vmem:[#allocation17 + $0x3c0] ss:$48 sps:$4 sm:$0xff]   ;;  %v15253_v16 = vld [vmem:[#allocation16 + $0x224] ss:$24 sps:$4 sm:$0xff]   ;;  %v15259_v18 = vld [vmem:[#allocation16 + $0x254] ss:$24 sps:$4 sm:$0xff]  }
 0x40d   :  { %5729 = vmatprep.subr.bf16.mxu1 %v15187_v25  ;;  %9332 = vmatprep.subr.bf16.mxu0 %v15190_v57  ;;  %v17422_v54 = vpack.c.bf16 %v3723_v47, %v3723_v47  ;;  %v15256_v26 = vld [vmem:[#allocation17 + $0x424] ss:$48 sps:$4 sm:$0xff]   ;;  %v15254_v27 = vld [vmem:[#allocation17 + $0x420] ss:$48 sps:$4 sm:$0xff]  }
 0x40e   :  { %v17420_v29 = vpack.c.bf16 %v3724_v28, %v3724_v28  ;;  %v15262_v21 = vld [vmem:[#allocation17 + $0x484] ss:$48 sps:$4 sm:$0xff]   ;;  %v15257_v56 = vld [vmem:[#allocation16 + $0x250] ss:$24 sps:$4 sm:$0xff]   ;;  %v15263_v30 = vld [vmem:[#allocation16 + $0x280] ss:$24 sps:$4 sm:$0xff]  }
 0x40f   :  { %v15260_v22 = vld [vmem:[#allocation17 + $0x480] ss:$48 sps:$4 sm:$0xff]   ;;  %v15265_v25 = vld [vmem:[#allocation16 + $0x284] ss:$24 sps:$4 sm:$0xff]   ;;  %v15271_v28 = vld [vmem:[#allocation16 + $0x2b4] ss:$24 sps:$4 sm:$0xff]  }
 0x410   :  { %5597 = vmatprep.mubr.bf16.mxu1 %v17420_v29  ;;  %5720 = vmatprep.mubr.bf16.mxu0 %v17420_v29  ;;  %v15268_v57 = vld [vmem:[#allocation17 + $0x4e4] ss:$48 sps:$4 sm:$0xff]   ;;  %v15266_v47 = vld [vmem:[#allocation17 + $0x4e0] ss:$48 sps:$4 sm:$0xff]  }
 0x411   :  { %5598 = vmatmul.mubr.bf16.vlgmr.msra.gmra.mrb[48].mxu1 %v17422_v54  ;;  %5721 = vmatmul.mubr.bf16.vlgmr.msra.gmra.mrb[36].mxu0 %v17422_v54 }
 0x412   :  { %5730 = vmatpush1.bf16.msra.mxu1 %v15185_v33  ;;  %9333 = vmatpush1.bf16.msra.mxu0 %v15188_v42  ;;  %v15274_v33 = vld [vmem:[#allocation17 + $0x544] ss:$48 sps:$4 sm:$0xff]   ;;  %v15269_v42 = vld [vmem:[#allocation16 + $0x2b0] ss:$24 sps:$4 sm:$0xff]  }
 0x413   :  { %5761 = vmatprep.mubr.bf16.mxu1 %v17374_v20  ;;  %5731 = vmatprep.subr.bf16.mxu1 %v15193_v19  ;;  %v15211_v20 = vld [vmem:[#allocation16 + $0xd4] ss:$24 sps:$4 sm:$0xff]   ;;  %v15272_v19 = vld [vmem:[#allocation17 + $0x540] ss:$48 sps:$4 sm:$0xff]  }
 0x414   :  { %9334 = vmatprep.subr.bf16.mxu0 %v15196_v23  ;;  %9364 = vmatprep.mubr.bf16.mxu0 %v17428_v35  ;;  %v15277_v23 = vld [vmem:[#allocation16 + $0x2e4] ss:$24 sps:$4 sm:$0xff]  }
 0x416   :  { %5732 = vmatpush1.bf16.msra.mxu1 %v15191_v15  ;;  %9335 = vmatpush1.bf16.msra.mxu0 %v15194_v59  ;;  %v15280_v15 = vld [vmem:[#allocation17 + $0x5a4] ss:$48 sps:$4 sm:$0xff]   ;;  %v15275_v59 = vld [vmem:[#allocation16 + $0x2e0] ss:$24 sps:$4 sm:$0xff]  }
 0x417   :  { %5733 = vmatprep.subr.bf16.mxu1 %v15199_v38  ;;  %9336 = vmatprep.subr.bf16.mxu0 %v15202_v39  ;;  %v15278_v38 = vld [vmem:[#allocation17 + $0x5a0] ss:$48 sps:$4 sm:$0xff]   ;;  %v15284_v39 = vld [vmem:[#allocation16 + $0x314] ss:$24 sps:$4 sm:$0xff]  }
 0x41a   :  { %5734 = vmatpush1.bf16.msra.mxu1 %v15197_v45  ;;  %9337 = vmatpush1.bf16.msra.mxu0 %v15200_v49  ;;  %v15288_v45 = vld [vmem:[#allocation17 + $0x604] ss:$48 sps:$4 sm:$0xff]   ;;  %v17436_v49 = vcombine.low %v17418_v48, %v17418_v48  ;;  %v15289_v48 = vld [vmem:[#allocation16 + $0x340] ss:$24 sps:$4 sm:$0xff]  }
 0x41b   :  { %5735 = vmatprep.subr.bf16.mxu1 %v15205_v46  ;;  %9338 = vmatprep.subr.bf16.mxu0 %v15208_v50  ;;  %v17438_v46 = vld [vmem:[#allocation14 + $0x8] sm:$0xff] }
 0x41c   :  { %v15282_v50 = vld [vmem:[#allocation16 + $0x310] ss:$24 sps:$4 sm:$0xff]  }
 0x41e   :  { %5736 = vmatpush1.bf16.msra.mxu1 %v15203_v32  ;;  %9339 = vmatpush1.bf16.msra.mxu0 %v15206_v51  ;;  %v15286_v32 = vld [vmem:[#allocation17 + $0x600] ss:$48 sps:$4 sm:$0xff]   ;;  %v15291_v51 = vld [vmem:[#allocation16 + $0x344] ss:$24 sps:$4 sm:$0xff]  }
 0x41f   :  { %5737 = vmatprep.subr.bf16.mxu1 %v15211_v20  ;;  %9340 = vmatprep.subr.bf16.mxu0 %v15214_v52  ;;  %v15294_v20 = vld [vmem:[#allocation17 + $0x664] ss:$48 sps:$4 sm:$0xff]   ;;  %v17442_v52 = vcombine.high %v17438_v46, %v17438_v46 }
 0x422   :  { %5738 = vmatpush1.bf16.msra.mxu1 %v15209_v55  ;;  %9341 = vmatpush1.bf16.msra.mxu0 %v15212_v58  ;;  %v15292_v55 = vld [vmem:[#allocation17 + $0x660] ss:$48 sps:$4 sm:$0xff]   ;;  %v15297_v58 = vld [vmem:[#allocation16 + $0x374] ss:$24 sps:$4 sm:$0xff]  }
 0x423   :  { %5739 = vmatprep.subr.bf16.mxu1 %v15217_v40  ;;  %9342 = vmatprep.subr.bf16.mxu0 %v15220_v62  ;;  %v15300_v40 = vld [vmem:[#allocation17 + $0x6c4] ss:$48 sps:$4 sm:$0xff]   ;;  %v15295_v62 = vld [vmem:[#allocation16 + $0x370] ss:$24 sps:$4 sm:$0xff]  }
 0x426   :  { %5740 = vmatpush1.bf16.msra.mxu1 %v15215_v43  ;;  %9343 = vmatpush1.bf16.msra.mxu0 %v15218_v53  ;;  %v15298_v43 = vld [vmem:[#allocation17 + $0x6c0] ss:$48 sps:$4 sm:$0xff]   ;;  %v15306_v53 = vld [vmem:[#allocation17 + $0x724] ss:$48 sps:$4 sm:$0xff]  }
 0x427   :  { %5741 = vmatprep.subr.bf16.mxu1 %v15223_v0  ;;  %9344 = vmatprep.subr.bf16.mxu0 %v15226_v1  ;;  %v15301_v0 = vld [vmem:[#allocation16 + $0x3a0] ss:$24 sps:$4 sm:$0xff]   ;;  %v15309_v1 = vld [vmem:[#allocation16 + $0x3d4] ss:$24 sps:$4 sm:$0xff]  }
 0x42a   :  { %5742 = vmatpush1.bf16.msra.mxu1 %v15221_v2  ;;  %9345 = vmatpush1.bf16.msra.mxu0 %v15224_v3  ;;  %v15312_v2 = vld [vmem:[#allocation17 + $0x784] ss:$48 sps:$4 sm:$0xff]   ;;  %v15307_v3 = vld [vmem:[#allocation16 + $0x3d0] ss:$24 sps:$4 sm:$0xff]  }
 0x42b   :  { %5743 = vmatprep.subr.bf16.mxu1 %v15229_v5  ;;  %9346 = vmatprep.subr.bf16.mxu0 %v15232_v60  ;;  %v15310_v5 = vld [vmem:[#allocation17 + $0x780] ss:$48 sps:$4 sm:$0xff]   ;;  %v15315_v60 = vld [vmem:[#allocation16 + $0x404] ss:$24 sps:$4 sm:$0xff]  }
 0x42e   :  { %5744 = vmatpush1.bf16.msra.mxu1 %v15227_v41  ;;  %9347 = vmatpush1.bf16.msra.mxu0 %v15230_v31  ;;  %v15318_v41 = vld [vmem:[#allocation17 + $0x7e4] ss:$48 sps:$4 sm:$0xff]   ;;  %v15313_v31 = vld [vmem:[#allocation16 + $0x400] ss:$24 sps:$4 sm:$0xff]  }
 0x42f   :  { %5745 = vmatprep.subr.bf16.mxu1 %v15235_v61  ;;  %9348 = vmatprep.subr.bf16.mxu0 %v15238_v13  ;;  %v15316_v61 = vld [vmem:[#allocation17 + $0x7e0] ss:$48 sps:$4 sm:$0xff]   ;;  %v15321_v13 = vld [vmem:[#allocation16 + $0x434] ss:$24 sps:$4 sm:$0xff]  }
 0x432   :  { %5746 = vmatpush1.bf16.msra.mxu1 %v15233_v6  ;;  %9349 = vmatpush1.bf16.msra.mxu0 %v15236_v7  ;;  %v15324_v6 = vld [vmem:[#allocation17 + $0x844] ss:$48 sps:$4 sm:$0xff]   ;;  %v15319_v7 = vld [vmem:[#allocation16 + $0x430] ss:$24 sps:$4 sm:$0xff]  }
 0x433   :  { %5747 = vmatprep.subr.bf16.mxu1 %v15241_v44  ;;  %9350 = vmatprep.subr.bf16.mxu0 %v15244_v36  ;;  %v15322_v44 = vld [vmem:[#allocation17 + $0x840] ss:$48 sps:$4 sm:$0xff]   ;;  %v15327_v36 = vld [vmem:[#allocation16 + $0x464] ss:$24 sps:$4 sm:$0xff]  }
 0x436   :  { %5748 = vmatpush1.bf16.msra.mxu1 %v15239_v8  ;;  %9351 = vmatpush1.bf16.msra.mxu0 %v15242_v9  ;;  %v15330_v8 = vld [vmem:[#allocation17 + $0x8a4] ss:$48 sps:$4 sm:$0xff]   ;;  %v15325_v9 = vld [vmem:[#allocation16 + $0x460] ss:$24 sps:$4 sm:$0xff]  }
 0x437   :  { %5749 = vmatprep.subr.bf16.mxu1 %v15247_v10  ;;  %9352 = vmatprep.subr.bf16.mxu0 %v15250_v11  ;;  %v15328_v10 = vld [vmem:[#allocation17 + $0x8a0] ss:$48 sps:$4 sm:$0xff]   ;;  %v15333_v11 = vld [vmem:[#allocation16 + $0x494] ss:$24 sps:$4 sm:$0xff]  }
 0x43a   :  { %5750 = vmatpush1.bf16.msra.mxu1 %v15245_v12  ;;  %9353 = vmatpush1.bf16.msra.mxu0 %v15248_v14  ;;  %v15336_v12 = vld [vmem:[#allocation17 + $0x904] ss:$48 sps:$4 sm:$0xff]   ;;  %v15331_v14 = vld [vmem:[#allocation16 + $0x490] ss:$24 sps:$4 sm:$0xff]  }
 0x43b   :  { %5751 = vmatprep.subr.bf16.mxu1 %v15253_v16  ;;  %9354 = vmatprep.subr.bf16.mxu0 %v15256_v26  ;;  %v15334_v16 = vld [vmem:[#allocation17 + $0x900] ss:$48 sps:$4 sm:$0xff]   ;;  %v15339_v26 = vld [vmem:[#allocation16 + $0x4c4] ss:$24 sps:$4 sm:$0xff]  }
 0x43e   :  { %5752 = vmatpush1.bf16.msra.mxu1 %v15251_v17  ;;  %9355 = vmatpush1.bf16.msra.mxu0 %v15254_v27  ;;  %v15342_v17 = vld [vmem:[#allocation17 + $0x964] ss:$48 sps:$4 sm:$0xff]   ;;  %v15337_v27 = vld [vmem:[#allocation16 + $0x4c0] ss:$24 sps:$4 sm:$0xff]  }
 0x43f   :  { %5753 = vmatprep.subr.bf16.mxu1 %v15259_v18  ;;  %9356 = vmatprep.subr.bf16.mxu0 %v15262_v21  ;;  %v15340_v18 = vld [vmem:[#allocation17 + $0x960] ss:$48 sps:$4 sm:$0xff]   ;;  %v15345_v21 = vld [vmem:[#allocation16 + $0x4f4] ss:$24 sps:$4 sm:$0xff]  }
 0x442   :  { %5754 = vmatpush1.bf16.msra.mxu1 %v15257_v56  ;;  %9357 = vmatpush1.bf16.msra.mxu0 %v15260_v22  ;;  %v15348_v56 = vld [vmem:[#allocation17 + $0x9c4] ss:$48 sps:$4 sm:$0xff]   ;;  %v15343_v22 = vld [vmem:[#allocation16 + $0x4f0] ss:$24 sps:$4 sm:$0xff]  }
 0x443   :  { %5755 = vmatprep.subr.bf16.mxu1 %v15265_v25  ;;  %9358 = vmatprep.subr.bf16.mxu0 %v15268_v57  ;;  %v15346_v25 = vld [vmem:[#allocation17 + $0x9c0] ss:$48 sps:$4 sm:$0xff]   ;;  %v15351_v57 = vld [vmem:[#allocation16 + $0x524] ss:$24 sps:$4 sm:$0xff]  }
 0x446   :  { %5756 = vmatpush1.bf16.msra.mxu1 %v15263_v30  ;;  %9359 = vmatpush1.bf16.msra.mxu0 %v15266_v47  ;;  %v15354_v30 = vld [vmem:[#allocation17 + $0xa24] ss:$48 sps:$4 sm:$0xff]   ;;  %v15349_v47 = vld [vmem:[#allocation16 + $0x520] ss:$24 sps:$4 sm:$0xff]  }
 0x447   :  { %5757 = vmatprep.subr.bf16.mxu1 %v15271_v28  ;;  %9360 = vmatprep.subr.bf16.mxu0 %v15274_v33  ;;  %v15352_v28 = vld [vmem:[#allocation17 + $0xa20] ss:$48 sps:$4 sm:$0xff]   ;;  %v15357_v33 = vld [vmem:[#allocation16 + $0x554] ss:$24 sps:$4 sm:$0xff]  }
 0x44a   :  { %5758 = vmatpush1.bf16.msra.mxu1 %v15269_v42  ;;  %9361 = vmatpush1.bf16.msra.mxu0 %v15272_v19  ;;  %v15360_v42 = vld [vmem:[#allocation17 + $0xa84] ss:$48 sps:$4 sm:$0xff]   ;;  %v15355_v19 = vld [vmem:[#allocation16 + $0x550] ss:$24 sps:$4 sm:$0xff]  }
 0x44b   :  { %5759 = vmatprep.subr.bf16.mxu1 %v15277_v23  ;;  %9362 = vmatprep.subr.bf16.mxu0 %v15280_v15  ;;  %v15358_v23 = vld [vmem:[#allocation17 + $0xa80] ss:$48 sps:$4 sm:$0xff]   ;;  %v15363_v15 = vld [vmem:[#allocation16 + $0x584] ss:$24 sps:$4 sm:$0xff]  }
 0x44e   :  { %5760 = vmatpush1.bf16.msra.mxu1 %v15275_v59  ;;  %9363 = vmatpush1.bf16.msra.mxu0 %v15278_v38  ;;  %v15366_v59 = vld [vmem:[#allocation17 + $0xae4] ss:$48 sps:$4 sm:$0xff]   ;;  %v15361_v38 = vld [vmem:[#allocation16 + $0x580] ss:$24 sps:$4 sm:$0xff]  }
 0x44f   :  { %5770 = vmatprep.subr.bf16.mxu1 %v15284_v39  ;;  %9373 = vmatprep.subr.bf16.mxu0 %v15288_v45  ;;  %v15364_v39 = vld [vmem:[#allocation17 + $0xae0] ss:$48 sps:$4 sm:$0xff]   ;;  %v15369_v45 = vld [vmem:[#allocation16 + $0x5b4] ss:$24 sps:$4 sm:$0xff]  }
 0x451   :  { %5762 = vmatmul.mubr.bf16.vlgmr.msra.gmra.mrb[52].mxu1 %v17376_v4  ;;  %9365 = vmatmul.mubr.bf16.vlgmr.msra.gmra.mrb[40].mxu0 %v17436_v49  ;;  %v15303_v4 = vld [vmem:[#allocation16 + $0x3a4] ss:$24 sps:$4 sm:$0xff]  }
 0x452   :  { %5771 = vmatpush1.bf16.msra.mxu1 %v15282_v50  ;;  %5802 = vmatprep.mubr.bf16.mxu1 %v17402_v24  ;;  %v15304_v24 = vld [vmem:[#allocation17 + $0x720] ss:$48 sps:$4 sm:$0xff]   ;;  %v15372_v50 = vld [vmem:[#allocation17 + $0xb44] ss:$48 sps:$4 sm:$0xff]  }
 0x453   :  { %9374 = vmatpush1.bf16.msra.mxu0 %v15286_v32  ;;  %5772 = vmatprep.subr.bf16.mxu1 %v15291_v51  ;;  %v15367_v32 = vld [vmem:[#allocation16 + $0x5b0] ss:$24 sps:$4 sm:$0xff]  }
 0x454   :  { %9375 = vmatprep.subr.bf16.mxu0 %v15294_v20  ;;  %9405 = vmatprep.mubr.bf16.mxu0 %v17442_v52  ;;  %v15370_v51 = vld [vmem:[#allocation17 + $0xb40] ss:$48 sps:$4 sm:$0xff]   ;;  %v15375_v20 = vld [vmem:[#allocation16 + $0x5e4] ss:$24 sps:$4 sm:$0xff]  }
 0x456   :  { %5773 = vmatpush1.bf16.msra.mxu1 %v15289_v48  ;;  %v15378_v48 = vld [vmem:[#allocation17 + $0xba4] ss:$48 sps:$4 sm:$0xff]  }
 0x457   :  { %9376 = vmatpush1.bf16.msra.mxu0 %v15292_v55  ;;  %5774 = vmatprep.subr.bf16.mxu1 %v15297_v58  ;;  %v15373_v55 = vld [vmem:[#allocation16 + $0x5e0] ss:$24 sps:$4 sm:$0xff]  }
 0x458   :  { %9377 = vmatprep.subr.bf16.mxu0 %v15300_v40  ;;  %v15376_v58 = vld [vmem:[#allocation17 + $0xba0] ss:$48 sps:$4 sm:$0xff]   ;;  %v15382_v40 = vld [vmem:[#allocation16 + $0x614] ss:$24 sps:$4 sm:$0xff]  }
 0x45a   :  { %5775 = vmatpush1.bf16.msra.mxu1 %v15295_v62  ;;  %v15386_v62 = vld [vmem:[#allocation17 + $0xc04] ss:$48 sps:$4 sm:$0xff]  }
 0x45b   :  { %9378 = vmatpush1.bf16.msra.mxu0 %v15298_v43  ;;  %5776 = vmatprep.subr.bf16.mxu1 %v15303_v4  ;;  %v15380_v43 = vld [vmem:[#allocation16 + $0x610] ss:$24 sps:$4 sm:$0xff]   ;;  %v17450_v4 = vcombine.low %v17438_v46, %v17438_v46 }
 0x45c   :  { %9379 = vmatprep.subr.bf16.mxu0 %v15306_v53  ;;  %v17452_v53 = vld [vmem:[#allocation14 + $0x10] sm:$0xff]  ;;  %v15390_v46 = vld [vmem:[#allocation17 + $0xc60] ss:$48 sps:$4 sm:$0xff]  }
 0x45e   :  { %5777 = vmatpush1.bf16.msra.mxu1 %v15301_v0  ;;  %v15384_v0 = vld [vmem:[#allocation17 + $0xc00] ss:$48 sps:$4 sm:$0xff]  }
 0x45f   :  { %9380 = vmatpush1.bf16.msra.mxu0 %v15304_v24  ;;  %5778 = vmatprep.subr.bf16.mxu1 %v15309_v1  ;;  %v15389_v24 = vld [vmem:[#allocation16 + $0x644] ss:$24 sps:$4 sm:$0xff]  }
 0x460   :  { %9381 = vmatprep.subr.bf16.mxu0 %v15312_v2  ;;  %v15392_v1 = vld [vmem:[#allocation17 + $0xc64] ss:$48 sps:$4 sm:$0xff]   ;;  %v17457_v2 = vcombine.high %v17452_v53, %v17452_v53 }
 0x462   :  { %5779 = vmatpush1.bf16.msra.mxu1 %v15307_v3  ;;  %v15387_v3 = vld [vmem:[#allocation16 + $0x640] ss:$24 sps:$4 sm:$0xff]  }
 0x463   :  { %9382 = vmatpush1.bf16.msra.mxu0 %v15310_v5  ;;  %5780 = vmatprep.subr.bf16.mxu1 %v15315_v60  ;;  %v15395_v5 = vld [vmem:[#allocation16 + $0x674] ss:$24 sps:$4 sm:$0xff]  }
 0x464   :  { %9383 = vmatprep.subr.bf16.mxu0 %v15318_v41  ;;  %v15398_v60 = vld [vmem:[#allocation17 + $0xcc4] ss:$48 sps:$4 sm:$0xff]   ;;  %v15396_v41 = vld [vmem:[#allocation17 + $0xcc0] ss:$48 sps:$4 sm:$0xff]  }
 0x466   :  { %5781 = vmatpush1.bf16.msra.mxu1 %v15313_v31  ;;  %v15401_v31 = vld [vmem:[#allocation16 + $0x6a4] ss:$24 sps:$4 sm:$0xff]  }
 0x467   :  { %9384 = vmatpush1.bf16.msra.mxu0 %v15316_v61  ;;  %5782 = vmatprep.subr.bf16.mxu1 %v15321_v13  ;;  %v15404_v61 = vld [vmem:[#allocation17 + $0xd24] ss:$48 sps:$4 sm:$0xff]   ;;  %v15399_v13 = vld [vmem:[#allocation16 + $0x6a0] ss:$24 sps:$4 sm:$0xff]  }
 0x468   :  { %9385 = vmatprep.subr.bf16.mxu0 %v15324_v6  ;;  %v15407_v6 = vld [vmem:[#allocation16 + $0x6d4] ss:$24 sps:$4 sm:$0xff]  }
 0x46a   :  { %5783 = vmatpush1.bf16.msra.mxu1 %v15319_v7  ;;  %v15410_v7 = vld [vmem:[#allocation17 + $0xd84] ss:$48 sps:$4 sm:$0xff]  }
 0x46b   :  { %9386 = vmatpush1.bf16.msra.mxu0 %v15322_v44  ;;  %5784 = vmatprep.subr.bf16.mxu1 %v15327_v36  ;;  %v15405_v44 = vld [vmem:[#allocation16 + $0x6d0] ss:$24 sps:$4 sm:$0xff]  }
 0x46c   :  { %9387 = vmatprep.subr.bf16.mxu0 %v15330_v8  ;;  %v15408_v36 = vld [vmem:[#allocation17 + $0xd80] ss:$48 sps:$4 sm:$0xff]   ;;  %v15413_v8 = vld [vmem:[#allocation16 + $0x704] ss:$24 sps:$4 sm:$0xff]  }
 0x46e   :  { %5785 = vmatpush1.bf16.msra.mxu1 %v15325_v9  ;;  %v15416_v9 = vld [vmem:[#allocation17 + $0xde4] ss:$48 sps:$4 sm:$0xff]  }
 0x46f   :  { %9388 = vmatpush1.bf16.msra.mxu0 %v15328_v10  ;;  %5786 = vmatprep.subr.bf16.mxu1 %v15333_v11  ;;  %v15411_v10 = vld [vmem:[#allocation16 + $0x700] ss:$24 sps:$4 sm:$0xff]  }
 0x470   :  { %9389 = vmatprep.subr.bf16.mxu0 %v15336_v12  ;;  %v15414_v11 = vld [vmem:[#allocation17 + $0xde0] ss:$48 sps:$4 sm:$0xff]   ;;  %v15419_v12 = vld [vmem:[#allocation16 + $0x734] ss:$24 sps:$4 sm:$0xff]  }
 0x472   :  { %5787 = vmatpush1.bf16.msra.mxu1 %v15331_v14  ;;  %v15422_v14 = vld [vmem:[#allocation17 + $0xe44] ss:$48 sps:$4 sm:$0xff]  }
 0x473   :  { %9390 = vmatpush1.bf16.msra.mxu0 %v15334_v16  ;;  %5788 = vmatprep.subr.bf16.mxu1 %v15339_v26  ;;  %v15417_v16 = vld [vmem:[#allocation16 + $0x730] ss:$24 sps:$4 sm:$0xff]  }
 0x474   :  { %9391 = vmatprep.subr.bf16.mxu0 %v15342_v17  ;;  %v15420_v26 = vld [vmem:[#allocation17 + $0xe40] ss:$48 sps:$4 sm:$0xff]   ;;  %v15425_v17 = vld [vmem:[#allocation16 + $0x764] ss:$24 sps:$4 sm:$0xff]  }
 0x476   :  { %5789 = vmatpush1.bf16.msra.mxu1 %v15337_v27  ;;  %v15428_v27 = vld [vmem:[#allocation17 + $0xea4] ss:$48 sps:$4 sm:$0xff]  }
 0x477   :  { %9392 = vmatpush1.bf16.msra.mxu0 %v15340_v18  ;;  %5790 = vmatprep.subr.bf16.mxu1 %v15345_v21  ;;  %v15423_v18 = vld [vmem:[#allocation16 + $0x760] ss:$24 sps:$4 sm:$0xff]  }
 0x478   :  { %9393 = vmatprep.subr.bf16.mxu0 %v15348_v56  ;;  %v15426_v21 = vld [vmem:[#allocation17 + $0xea0] ss:$48 sps:$4 sm:$0xff]   ;;  %v15431_v56 = vld [vmem:[#allocation16 + $0x794] ss:$24 sps:$4 sm:$0xff]  }
 0x47a   :  { %5791 = vmatpush1.bf16.msra.mxu1 %v15343_v22  ;;  %v15434_v22 = vld [vmem:[#allocation17 + $0xf04] ss:$48 sps:$4 sm:$0xff]  }
 0x47b   :  { %9394 = vmatpush1.bf16.msra.mxu0 %v15346_v25  ;;  %5792 = vmatprep.subr.bf16.mxu1 %v15351_v57  ;;  %v15429_v25 = vld [vmem:[#allocation16 + $0x790] ss:$24 sps:$4 sm:$0xff]  }
 0x47c   :  { %9395 = vmatprep.subr.bf16.mxu0 %v15354_v30  ;;  %v15432_v57 = vld [vmem:[#allocation17 + $0xf00] ss:$48 sps:$4 sm:$0xff]   ;;  %v15437_v30 = vld [vmem:[#allocation16 + $0x7c4] ss:$24 sps:$4 sm:$0xff]  }
 0x47e   :  { %5793 = vmatpush1.bf16.msra.mxu1 %v15349_v47  ;;  %v15440_v47 = vld [vmem:[#allocation17 + $0xf64] ss:$48 sps:$4 sm:$0xff]  }
 0x47f   :  { %9396 = vmatpush1.bf16.msra.mxu0 %v15352_v28  ;;  %5794 = vmatprep.subr.bf16.mxu1 %v15357_v33  ;;  %v15435_v28 = vld [vmem:[#allocation16 + $0x7c0] ss:$24 sps:$4 sm:$0xff]  }
 0x480   :  { %9397 = vmatprep.subr.bf16.mxu0 %v15360_v42  ;;  %v15438_v33 = vld [vmem:[#allocation17 + $0xf60] ss:$48 sps:$4 sm:$0xff]   ;;  %v15443_v42 = vld [vmem:[#allocation16 + $0x7f4] ss:$24 sps:$4 sm:$0xff]  }
 0x482   :  { %5795 = vmatpush1.bf16.msra.mxu1 %v15355_v19  ;;  %v15446_v19 = vld [vmem:[#allocation17 + $0xfc4] ss:$48 sps:$4 sm:$0xff]  }
 0x483   :  { %9398 = vmatpush1.bf16.msra.mxu0 %v15358_v23  ;;  %5796 = vmatprep.subr.bf16.mxu1 %v15363_v15  ;;  %v15441_v23 = vld [vmem:[#allocation16 + $0x7f0] ss:$24 sps:$4 sm:$0xff]  }
 0x484   :  { %9399 = vmatprep.subr.bf16.mxu0 %v15366_v59  ;;  %v15444_v15 = vld [vmem:[#allocation17 + $0xfc0] ss:$48 sps:$4 sm:$0xff]   ;;  %v15449_v59 = vld [vmem:[#allocation16 + $0x824] ss:$24 sps:$4 sm:$0xff]  }
 0x486   :  { %5797 = vmatpush1.bf16.msra.mxu1 %v15361_v38  ;;  %v15452_v38 = vld [vmem:[#allocation17 + $0x1024] ss:$48 sps:$4 sm:$0xff]  }
 0x487   :  { %9400 = vmatpush1.bf16.msra.mxu0 %v15364_v39  ;;  %5798 = vmatprep.subr.bf16.mxu1 %v15369_v45  ;;  %v15447_v39 = vld [vmem:[#allocation16 + $0x820] ss:$24 sps:$4 sm:$0xff]  }
 0x488   :  { %9401 = vmatprep.subr.bf16.mxu0 %v15372_v50  ;;  %v15450_v45 = vld [vmem:[#allocation17 + $0x1020] ss:$48 sps:$4 sm:$0xff]   ;;  %v15455_v50 = vld [vmem:[#allocation16 + $0x854] ss:$24 sps:$4 sm:$0xff]  }
 0x48a   :  { %5799 = vmatpush1.bf16.msra.mxu1 %v15367_v32  ;;  %v15458_v32 = vld [vmem:[#allocation17 + $0x1084] ss:$48 sps:$4 sm:$0xff]  }
 0x48b   :  { %9402 = vmatpush1.bf16.msra.mxu0 %v15370_v51  ;;  %5800 = vmatprep.subr.bf16.mxu1 %v15375_v20  ;;  %v15453_v51 = vld [vmem:[#allocation16 + $0x850] ss:$24 sps:$4 sm:$0xff]  }
 0x48c   :  { %9403 = vmatprep.subr.bf16.mxu0 %v15378_v48  ;;  %v15456_v20 = vld [vmem:[#allocation17 + $0x1080] ss:$48 sps:$4 sm:$0xff]   ;;  %v15461_v48 = vld [vmem:[#allocation16 + $0x884] ss:$24 sps:$4 sm:$0xff]  }
 0x48e   :  { %5801 = vmatpush1.bf16.msra.mxu1 %v15373_v55  ;;  %v15464_v55 = vld [vmem:[#allocation17 + $0x10e4] ss:$48 sps:$4 sm:$0xff]  }
 0x48f   :  { %9404 = vmatpush1.bf16.msra.mxu0 %v15376_v58  ;;  %5811 = vmatprep.subr.bf16.mxu1 %v15382_v40  ;;  %v15459_v58 = vld [vmem:[#allocation16 + $0x880] ss:$24 sps:$4 sm:$0xff]  }
 0x490   :  { %9414 = vmatprep.subr.bf16.mxu0 %v15386_v62  ;;  %v15462_v40 = vld [vmem:[#allocation17 + $0x10e0] ss:$48 sps:$4 sm:$0xff]   ;;  %v15467_v62 = vld [vmem:[#allocation16 + $0x8b4] ss:$24 sps:$4 sm:$0xff]  }
 0x491   :  { %5803 = vmatmul.mubr.bf16.vlgmr.msra.gmra.mrb[52].mxu1 %v17404_v63  ;;  %v15393_v63 = vld [vmem:[#allocation16 + $0x670] ss:$24 sps:$4 sm:$0xff]  }
 0x492   :  { %9406 = vmatmul.mubr.bf16.vlgmr.msra.gmra.mrb[44].mxu0 %v17450_v4  ;;  %5812 = vmatpush1.bf16.msra.mxu1 %v15380_v43  ;;  %v15470_v43 = vld [vmem:[#allocation17 + $0x1144] ss:$48 sps:$4 sm:$0xff]  }
 0x493   :  { %5843 = vmatprep.mubr.bf16.mxu1 %v17420_v29  ;;  %9415 = vmatpush1.bf16.msra.mxu0 %v15384_v0  ;;  %v15402_v29 = vld [vmem:[#allocation17 + $0xd20] ss:$48 sps:$4 sm:$0xff]  }
 0x494   :  { %5813 = vmatprep.subr.bf16.mxu1 %v15389_v24  ;;  %9416 = vmatprep.subr.bf16.mxu0 %v15392_v1  ;;  %v15465_v0 = vld [vmem:[#allocation16 + $0x8b0] ss:$24 sps:$4 sm:$0xff]   ;;  %v15473_v1 = vld [vmem:[#allocation16 + $0x8e4] ss:$24 sps:$4 sm:$0xff]  }
 0x495   :  { %9446 = vmatprep.mubr.bf16.mxu0 %v17457_v2  ;;  %v15468_v24 = vld [vmem:[#allocation17 + $0x1140] ss:$48 sps:$4 sm:$0xff]  }
 0x496   :  { %5814 = vmatpush1.bf16.msra.mxu1 %v15387_v3  ;;  %v15476_v3 = vld [vmem:[#allocation17 + $0x11a4] ss:$48 sps:$4 sm:$0xff]  }
 0x497   :  { %9417 = vmatpush1.bf16.msra.mxu0 %v15390_v46  ;;  %5815 = vmatprep.subr.bf16.mxu1 %v15395_v5  ;;  %v15471_v46 = vld [vmem:[#allocation16 + $0x8e0] ss:$24 sps:$4 sm:$0xff]  }
 0x498   :  { %9418 = vmatprep.subr.bf16.mxu0 %v15398_v60  ;;  %v15474_v5 = vld [vmem:[#allocation17 + $0x11a0] ss:$48 sps:$4 sm:$0xff]   ;;  %v15481_v60 = vld [vmem:[#allocation17 + $0xc] ss:$48 sps:$4 sm:$0xff]  }
 0x49a   :  { %5816 = vmatpush1.bf16.msra.mxu1 %v15393_v63  ;;  %v15484_v63 = vld [vmem:[#allocation17 + $0x60c] ss:$48 sps:$4 sm:$0xff]  }
 0x49b   :  { %9419 = vmatpush1.bf16.msra.mxu0 %v15396_v41  ;;  %5817 = vmatprep.subr.bf16.mxu1 %v15401_v31  ;;  %v17464_v41 = vcombine.low %v17452_v53, %v17452_v53  ;;  %v15479_v31 = vld [vmem:[#allocation17 + $0x8] ss:$48 sps:$4 sm:$0xff]   ;;  %v15496_v53 = vld [vmem:[#allocation17 + $0x6cc] ss:$48 sps:$4 sm:$0xff]  }
 0x49c   :  { %9420 = vmatprep.subr.bf16.mxu0 %v15404_v61  ;;  %v15482_v61 = vld [vmem:[#allocation17 + $0x608] ss:$48 sps:$4 sm:$0xff]  }
 0x49e   :  { %5818 = vmatpush1.bf16.msra.mxu1 %v15399_v13  ;;  %v15487_v13 = vld [vmem:[#allocation17 + $0x6c] ss:$48 sps:$4 sm:$0xff]  }
 0x49f   :  { %9421 = vmatpush1.bf16.msra.mxu0 %v15402_v29  ;;  %5819 = vmatprep.subr.bf16.mxu1 %v15407_v6  ;;  %v15490_v29 = vld [vmem:[#allocation17 + $0x66c] ss:$48 sps:$4 sm:$0xff]   ;;  %v15485_v6 = vld [vmem:[#allocation17 + $0x68] ss:$48 sps:$4 sm:$0xff]  }
 0x4a0   :  { %9422 = vmatprep.subr.bf16.mxu0 %v15410_v7  ;;  %v15488_v7 = vld [vmem:[#allocation17 + $0x668] ss:$48 sps:$4 sm:$0xff]  }
 0x4a2   :  { %5820 = vmatpush1.bf16.msra.mxu1 %v15405_v44  ;;  %v15493_v44 = vld [vmem:[#allocation17 + $0xcc] ss:$48 sps:$4 sm:$0xff]  }
 0x4a3   :  { %9423 = vmatpush1.bf16.msra.mxu0 %v15408_v36  ;;  %5821 = vmatprep.subr.bf16.mxu1 %v15413_v8  ;;  %v15491_v36 = vld [vmem:[#allocation17 + $0xc8] ss:$48 sps:$4 sm:$0xff]  }
 0x4a4   :  { %9424 = vmatprep.subr.bf16.mxu0 %v15416_v9  ;;  %v15494_v8 = vld [vmem:[#allocation17 + $0x6c8] ss:$48 sps:$4 sm:$0xff]   ;;  %v15502_v9 = vld [vmem:[#allocation17 + $0x72c] ss:$48 sps:$4 sm:$0xff]  }
 0x4a6   :  { %5822 = vmatpush1.bf16.msra.mxu1 %v15411_v10  ;;  %v15497_v10 = vld [vmem:[#allocation17 + $0x128] ss:$48 sps:$4 sm:$0xff]  }
 0x4a7   :  { %9425 = vmatpush1.bf16.msra.mxu0 %v15414_v11  ;;  %5823 = vmatprep.subr.bf16.mxu1 %v15419_v12  ;;  %v15500_v11 = vld [vmem:[#allocation17 + $0x728] ss:$48 sps:$4 sm:$0xff]   ;;  %v15505_v12 = vld [vmem:[#allocation17 + $0x18c] ss:$48 sps:$4 sm:$0xff]  }
 0x4a8   :  { %9426 = vmatprep.subr.bf16.mxu0 %v15422_v14  ;;  %v15508_v14 = vld [vmem:[#allocation17 + $0x78c] ss:$48 sps:$4 sm:$0xff]  }
 0x4aa   :  { %5824 = vmatpush1.bf16.msra.mxu1 %v15417_v16  ;;  %v15503_v16 = vld [vmem:[#allocation17 + $0x188] ss:$48 sps:$4 sm:$0xff]  }
 0x4ab   :  { %9427 = vmatpush1.bf16.msra.mxu0 %v15420_v26  ;;  %5825 = vmatprep.subr.bf16.mxu1 %v15425_v17  ;;  %v15506_v26 = vld [vmem:[#allocation17 + $0x788] ss:$48 sps:$4 sm:$0xff]   ;;  %v15511_v17 = vld [vmem:[#allocation17 + $0x1ec] ss:$48 sps:$4 sm:$0xff]  }
 0x4ac   :  { %9428 = vmatprep.subr.bf16.mxu0 %v15428_v27  ;;  %v15514_v27 = vld [vmem:[#allocation17 + $0x7ec] ss:$48 sps:$4 sm:$0xff]  }
 0x4ae   :  { %5826 = vmatpush1.bf16.msra.mxu1 %v15423_v18  ;;  %v15509_v18 = vld [vmem:[#allocation17 + $0x1e8] ss:$48 sps:$4 sm:$0xff]  }
 0x4af   :  { %9429 = vmatpush1.bf16.msra.mxu0 %v15426_v21  ;;  %5827 = vmatprep.subr.bf16.mxu1 %v15431_v56  ;;  %v15512_v21 = vld [vmem:[#allocation17 + $0x7e8] ss:$48 sps:$4 sm:$0xff]   ;;  %v15517_v56 = vld [vmem:[#allocation17 + $0x24c] ss:$48 sps:$4 sm:$0xff]  }
 0x4b0   :  { %9430 = vmatprep.subr.bf16.mxu0 %v15434_v22 }
 0x4b2   :  { %5828 = vmatpush1.bf16.msra.mxu1 %v15429_v25 }
 0x4b3   :  { %9431 = vmatpush1.bf16.msra.mxu0 %v15432_v57  ;;  %5829 = vmatprep.subr.bf16.mxu1 %v15437_v30  ;;  %v15520_v57 = vld [vmem:[#allocation17 + $0x84c] ss:$48 sps:$4 sm:$0xff]  }
 0x4b4   :  { %9432 = vmatprep.subr.bf16.mxu0 %v15440_v47 }
 0x4b6   :  { %5830 = vmatpush1.bf16.msra.mxu1 %v15435_v28 }
 0x4b7   :  { %9433 = vmatpush1.bf16.msra.mxu0 %v15438_v33  ;;  %5831 = vmatprep.subr.bf16.mxu1 %v15443_v42  ;;  %v15515_v42 = vld [vmem:[#allocation17 + $0x248] ss:$48 sps:$4 sm:$0xff]  }
 0x4b8   :  { %9434 = vmatprep.subr.bf16.mxu0 %v15446_v19 }
 0x4ba   :  { %5832 = vmatpush1.bf16.msra.mxu1 %v15441_v23 }
 0x4bb   :  { %9435 = vmatpush1.bf16.msra.mxu0 %v15444_v15  ;;  %5833 = vmatprep.subr.bf16.mxu1 %v15449_v59  ;;  %v15518_v15 = vld [vmem:[#allocation17 + $0x848] ss:$48 sps:$4 sm:$0xff]   ;;  %v15523_v59 = vld [vmem:[#allocation17 + $0x2ac] ss:$48 sps:$4 sm:$0xff]  }
 0x4bc   :  { %9436 = vmatprep.subr.bf16.mxu0 %v15452_v38  ;;  %v15526_v38 = vld [vmem:[#allocation17 + $0x8ac] ss:$48 sps:$4 sm:$0xff]  }
 0x4be   :  { %5834 = vmatpush1.bf16.msra.mxu1 %v15447_v39  ;;  %v15521_v39 = vld [vmem:[#allocation17 + $0x2a8] ss:$48 sps:$4 sm:$0xff]  }
 0x4bf   :  { %9437 = vmatpush1.bf16.msra.mxu0 %v15450_v45  ;;  %5835 = vmatprep.subr.bf16.mxu1 %v15455_v50  ;;  %v15524_v45 = vld [vmem:[#allocation17 + $0x8a8] ss:$48 sps:$4 sm:$0xff]   ;;  %v15529_v50 = vld [vmem:[#allocation17 + $0x30c] ss:$48 sps:$4 sm:$0xff]  }
 0x4c0   :  { %9438 = vmatprep.subr.bf16.mxu0 %v15458_v32  ;;  %v15532_v32 = vld [vmem:[#allocation17 + $0x90c] ss:$48 sps:$4 sm:$0xff]  }
 0x4c2   :  { %5836 = vmatpush1.bf16.msra.mxu1 %v15453_v51  ;;  %v15527_v51 = vld [vmem:[#allocation17 + $0x308] ss:$48 sps:$4 sm:$0xff]  }
 0x4c3   :  { %9439 = vmatpush1.bf16.msra.mxu0 %v15456_v20  ;;  %5837 = vmatprep.subr.bf16.mxu1 %v15461_v48  ;;  %v15530_v20 = vld [vmem:[#allocation17 + $0x908] ss:$48 sps:$4 sm:$0xff]   ;;  %v15535_v48 = vld [vmem:[#allocation17 + $0x36c] ss:$48 sps:$4 sm:$0xff]  }
 0x4c4   :  { %9440 = vmatprep.subr.bf16.mxu0 %v15464_v55  ;;  %v15538_v55 = vld [vmem:[#allocation17 + $0x96c] ss:$48 sps:$4 sm:$0xff]  }
 0x4c6   :  { %5838 = vmatpush1.bf16.msra.mxu1 %v15459_v58  ;;  %v15533_v58 = vld [vmem:[#allocation17 + $0x368] ss:$48 sps:$4 sm:$0xff]  }
 0x4c7   :  { %9441 = vmatpush1.bf16.msra.mxu0 %v15462_v40  ;;  %5839 = vmatprep.subr.bf16.mxu1 %v15467_v62  ;;  %v15536_v40 = vld [vmem:[#allocation17 + $0x968] ss:$48 sps:$4 sm:$0xff]   ;;  %v15541_v62 = vld [vmem:[#allocation17 + $0x3cc] ss:$48 sps:$4 sm:$0xff]  }
 0x4c8   :  { %9442 = vmatprep.subr.bf16.mxu0 %v15470_v43  ;;  %v15544_v43 = vld [vmem:[#allocation17 + $0x9cc] ss:$48 sps:$4 sm:$0xff]  }
 0x4ca   :  { %5840 = vmatpush1.bf16.msra.mxu1 %v15465_v0  ;;  %v15539_v0 = vld [vmem:[#allocation17 + $0x3c8] ss:$48 sps:$4 sm:$0xff]  }
 0x4cb   :  { %9443 = vmatpush1.bf16.msra.mxu0 %v15468_v24  ;;  %5841 = vmatprep.subr.bf16.mxu1 %v15473_v1  ;;  %v15542_v24 = vld [vmem:[#allocation17 + $0x9c8] ss:$48 sps:$4 sm:$0xff]   ;;  %v15547_v1 = vld [vmem:[#allocation17 + $0x42c] ss:$48 sps:$4 sm:$0xff]  }
 0x4cc   :  { %9444 = vmatprep.subr.bf16.mxu0 %v15476_v3  ;;  %v15550_v3 = vld [vmem:[#allocation17 + $0xa2c] ss:$48 sps:$4 sm:$0xff]  }
 0x4ce   :  { %5842 = vmatpush1.bf16.msra.mxu1 %v15471_v46  ;;  %v15545_v46 = vld [vmem:[#allocation17 + $0x428] ss:$48 sps:$4 sm:$0xff]  }
 0x4cf   :  { %9445 = vmatpush1.bf16.msra.mxu0 %v15474_v5  ;;  %9455 = vmatprep.subr.bf16.mxu1 %v15481_v60  ;;  %v15548_v5 = vld [vmem:[#allocation17 + $0xa28] ss:$48 sps:$4 sm:$0xff]   ;;  %v15553_v60 = vld [vmem:[#allocation17 + $0x48c] ss:$48 sps:$4 sm:$0xff]  }
 0x4d0   :  { %9496 = vmatprep.subr.bf16.mxu0 %v15484_v63  ;;  %v15556_v63 = vld [vmem:[#allocation17 + $0xa8c] ss:$48 sps:$4 sm:$0xff]  }
 0x4d1   :  { %5844 = vmatmul.mubr.bf16.vlgmr.msra.gmra.mrb[52].mxu1 %v17422_v54  ;;  %v15499_v54 = vld [vmem:[#allocation17 + $0x12c] ss:$48 sps:$4 sm:$0xff]  }
 0x4d2   :  { %9447 = vmatmul.mubr.bf16.vlgmr.msra.gmra.mrb[48].mxu0 %v17464_v41  ;;  %9456 = vmatpush1.bf16.msra.mxu1 %v15479_v31  ;;  %v15551_v31 = vld [vmem:[#allocation17 + $0x488] ss:$48 sps:$4 sm:$0xff]  }
 0x4d3   :  { %9497 = vmatpush1.bf16.msra.mxu0 %v15482_v61  ;;  %9457 = vmatprep.subr.bf16.mxu1 %v15487_v13  ;;  %v15554_v61 = vld [vmem:[#allocation17 + $0xa88] ss:$48 sps:$4 sm:$0xff]   ;;  %v15559_v13 = vld [vmem:[#allocation17 + $0x4ec] ss:$48 sps:$4 sm:$0xff]  }
 0x4d4   :  { %9498 = vmatprep.subr.bf16.mxu0 %v15490_v29  ;;  %9487 = vmatprep.mubr.bf16.mxu1 %v17428_v35  ;;  %v15562_v29 = vld [vmem:[#allocation17 + $0xaec] ss:$48 sps:$4 sm:$0xff]  }
 0x4d5   :  { %9528 = vmatprep.mubr.bf16.mxu0 %v17442_v52 }
 0x4d6   :  { %9458 = vmatpush1.bf16.msra.mxu1 %v15485_v6  ;;  %v15557_v6 = vld [vmem:[#allocation17 + $0x4e8] ss:$48 sps:$4 sm:$0xff]  }
 0x4d7   :  { %9499 = vmatpush1.bf16.msra.mxu0 %v15488_v7  ;;  %9459 = vmatprep.subr.bf16.mxu1 %v15493_v44  ;;  %v15560_v7 = vld [vmem:[#allocation17 + $0xae8] ss:$48 sps:$4 sm:$0xff]   ;;  %v15565_v44 = vld [vmem:[#allocation17 + $0x54c] ss:$48 sps:$4 sm:$0xff]  }
 0x4d8   :  { %9500 = vmatprep.subr.bf16.mxu0 %v15496_v53  ;;  %v15568_v53 = vld [vmem:[#allocation17 + $0xb4c] ss:$48 sps:$4 sm:$0xff]  }
 0x4da   :  { %9460 = vmatpush1.bf16.msra.mxu1 %v15491_v36  ;;  %v15563_v36 = vld [vmem:[#allocation17 + $0x548] ss:$48 sps:$4 sm:$0xff]  }
 0x4db   :  { %9501 = vmatpush1.bf16.msra.mxu0 %v15494_v8  ;;  %9461 = vmatprep.subr.bf16.mxu1 %v15499_v54  ;;  %v15566_v8 = vld [vmem:[#allocation17 + $0xb48] ss:$48 sps:$4 sm:$0xff]   ;;  %v15571_v54 = vld [vmem:[#allocation17 + $0x5ac] ss:$48 sps:$4 sm:$0xff]  }
 0x4dc   :  { %9502 = vmatprep.subr.bf16.mxu0 %v15502_v9  ;;  %v15574_v9 = vld [vmem:[#allocation17 + $0xbac] ss:$48 sps:$4 sm:$0xff]  }
 0x4de   :  { %9462 = vmatpush1.bf16.msra.mxu1 %v15497_v10  ;;  %v15569_v10 = vld [vmem:[#allocation17 + $0x5a8] ss:$48 sps:$4 sm:$0xff]  }
 0x4df   :  { %9503 = vmatpush1.bf16.msra.mxu0 %v15500_v11  ;;  %9463 = vmatprep.subr.bf16.mxu1 %v15505_v12  ;;  %v15572_v11 = vld [vmem:[#allocation17 + $0xba8] ss:$48 sps:$4 sm:$0xff]   ;;  %v15577_v12 = vld [vmem:[#allocation17 + $0xc0c] ss:$48 sps:$4 sm:$0xff]  }
 0x4e0   :  { %9504 = vmatprep.subr.bf16.mxu0 %v15508_v14  ;;  %v15580_v14 = vld [vmem:[#allocation17 + $0x14] ss:$48 sps:$4 sm:$0xff]  }
 0x4e2   :  { %9464 = vmatpush1.bf16.msra.mxu1 %v15503_v16  ;;  %v15575_v16 = vld [vmem:[#allocation17 + $0xc08] ss:$48 sps:$4 sm:$0xff]  }
 0x4e3   :  { %9505 = vmatpush1.bf16.msra.mxu0 %v15506_v26  ;;  %9465 = vmatprep.subr.bf16.mxu1 %v15511_v17  ;;  %v15578_v26 = vld [vmem:[#allocation17 + $0x10] ss:$48 sps:$4 sm:$0xff]   ;;  %v15583_v17 = vld [vmem:[#allocation17 + $0xc6c] ss:$48 sps:$4 sm:$0xff]  }
 0x4e4   :  { %v17470_v22 = vpop.f32.mrb[48].mxu1  ;;  %v17472_v25 = vpop.f32.mrb[36].mxu0  ;;  %9506 = vmatprep.subr.bf16.mxu0 %v15514_v27  ;;  %v15586_v27 = vld [vmem:[#allocation17 + $0x74] ss:$48 sps:$4 sm:$0xff]  }
 0x4e5   :  { %v17474_v30 = vpop.f32.mrb[49].mxu1  ;;  %v17476_v47 = vpop.f32.mrb[37].mxu0 }
 0x4e6   :  { %9466 = vmatpush1.bf16.msra.mxu1 %v15509_v18  ;;  %v5603_v28 = vpop.f32.mrb[50].mxu1  ;;  %v5726_v33 = vpop.f32.mrb[38].mxu0  ;;  %v15581_v18 = vld [vmem:[#allocation17 + $0xc68] ss:$48 sps:$4 sm:$0xff]  }
 0x4e7   :  { %9507 = vmatpush1.bf16.msra.mxu0 %v15512_v21  ;;  %v5604_v19 = vpop.f32.mrb[51].mxu1  ;;  %v5727_v23 = vpop.f32.mrb[39].mxu0  ;;  %9467 = vmatprep.subr.bf16.mxu1 %v15517_v56  ;;  %v15584_v21 = vld [vmem:[#allocation17 + $0x70] ss:$48 sps:$4 sm:$0xff]   ;;  %v15589_v56 = vld [vmem:[#allocation17 + $0xccc] ss:$48 sps:$4 sm:$0xff]  }
 0x4e8   :  { %9508 = vmatprep.subr.bf16.mxu0 %v15520_v57  ;;  %v15592_v57 = vld [vmem:[#allocation17 + $0xd4] ss:$48 sps:$4 sm:$0xff]   ;;  %v15587_v28 = vld [vmem:[#allocation17 + $0xcc8] ss:$48 sps:$4 sm:$0xff]   ;;  %v15590_v33 = vld [vmem:[#allocation17 + $0xd0] ss:$48 sps:$4 sm:$0xff]  }
 0x4e9   :  { %v15598_v19 = vld [vmem:[#allocation17 + $0x134] ss:$48 sps:$4 sm:$0xff]   ;;  %v15593_v23 = vld [vmem:[#allocation17 + $0xd28] ss:$48 sps:$4 sm:$0xff]  }
 0x4ea   :  { %9468 = vmatpush1.bf16.msra.mxu1 %v15515_v42  ;;  %v15595_v42 = vld [vmem:[#allocation17 + $0xd2c] ss:$48 sps:$4 sm:$0xff]  }
 0x4eb   :  { %9509 = vmatpush1.bf16.msra.mxu0 %v15518_v15  ;;  %9469 = vmatprep.subr.bf16.mxu1 %v15523_v59  ;;  %v15596_v15 = vld [vmem:[#allocation17 + $0x130] ss:$48 sps:$4 sm:$0xff]   ;;  %v15601_v59 = vld [vmem:[#allocation17 + $0xd8c] ss:$48 sps:$4 sm:$0xff]  }
 0x4ec   :  { %9510 = vmatprep.subr.bf16.mxu0 %v15526_v38  ;;  %v15604_v38 = vld [vmem:[#allocation17 + $0x194] ss:$48 sps:$4 sm:$0xff]  }
 0x4ee   :  { %9470 = vmatpush1.bf16.msra.mxu1 %v15521_v39  ;;  %v15599_v39 = vld [vmem:[#allocation17 + $0xd88] ss:$48 sps:$4 sm:$0xff]  }
 0x4ef   :  { %9511 = vmatpush1.bf16.msra.mxu0 %v15524_v45  ;;  %9471 = vmatprep.subr.bf16.mxu1 %v15529_v50  ;;  %v15602_v45 = vld [vmem:[#allocation17 + $0x190] ss:$48 sps:$4 sm:$0xff]   ;;  %v15607_v50 = vld [vmem:[#allocation17 + $0xdec] ss:$48 sps:$4 sm:$0xff]  }
 0x4f0   :  { %9512 = vmatprep.subr.bf16.mxu0 %v15532_v32  ;;  %v15610_v32 = vld [vmem:[#allocation17 + $0x1f4] ss:$48 sps:$4 sm:$0xff]  }
 0x4f2   :  { %9472 = vmatpush1.bf16.msra.mxu1 %v15527_v51  ;;  %v15605_v51 = vld [vmem:[#allocation17 + $0xde8] ss:$48 sps:$4 sm:$0xff]  }
 0x4f3   :  { %9513 = vmatpush1.bf16.msra.mxu0 %v15530_v20  ;;  %9473 = vmatprep.subr.bf16.mxu1 %v15535_v48  ;;  %v15608_v20 = vld [vmem:[#allocation17 + $0x1f0] ss:$48 sps:$4 sm:$0xff]   ;;  %v15613_v48 = vld [vmem:[#allocation17 + $0xe4c] ss:$48 sps:$4 sm:$0xff]  }
 0x4f4   :  { %9514 = vmatprep.subr.bf16.mxu0 %v15538_v55 }
 0x4f6   :  { %9474 = vmatpush1.bf16.msra.mxu1 %v15533_v58  ;;  %v15616_v58 = vld [vmem:[#allocation17 + $0x254] ss:$48 sps:$4 sm:$0xff]  }
 0x4f7   :  { %9515 = vmatpush1.bf16.msra.mxu0 %v15536_v40  ;;  %9475 = vmatprep.subr.bf16.mxu1 %v15541_v62 }
 0x4f8   :  { %9516 = vmatprep.subr.bf16.mxu0 %v15544_v43  ;;  %v15611_v43 = vld [vmem:[#allocation17 + $0xe48] ss:$48 sps:$4 sm:$0xff]  }
 0x4fa   :  { %9476 = vmatpush1.bf16.msra.mxu1 %v15539_v0 }
 0x4fb   :  { %9517 = vmatpush1.bf16.msra.mxu0 %v15542_v24  ;;  %9477 = vmatprep.subr.bf16.mxu1 %v15547_v1  ;;  %v15614_v24 = vld [vmem:[#allocation17 + $0x250] ss:$48 sps:$4 sm:$0xff]   ;;  %v15619_v1 = vld [vmem:[#allocation17 + $0xeac] ss:$48 sps:$4 sm:$0xff]  }
 0x4fc   :  { %9518 = vmatprep.subr.bf16.mxu0 %v15550_v3  ;;  %v15622_v3 = vld [vmem:[#allocation17 + $0x2b4] ss:$48 sps:$4 sm:$0xff]  }
 0x4fe   :  { %9478 = vmatpush1.bf16.msra.mxu1 %v15545_v46  ;;  %v15617_v46 = vld [vmem:[#allocation17 + $0xea8] ss:$48 sps:$4 sm:$0xff]  }
 0x4ff   :  { %9519 = vmatpush1.bf16.msra.mxu0 %v15548_v5  ;;  %9479 = vmatprep.subr.bf16.mxu1 %v15553_v60  ;;  %v15620_v5 = vld [vmem:[#allocation17 + $0x2b0] ss:$48 sps:$4 sm:$0xff]   ;;  %v15625_v60 = vld [vmem:[#allocation17 + $0xf0c] ss:$48 sps:$4 sm:$0xff]  }
 0x500   :  { %9520 = vmatprep.subr.bf16.mxu0 %v15556_v63  ;;  %v15628_v63 = vld [vmem:[#allocation17 + $0x314] ss:$48 sps:$4 sm:$0xff]  }
 0x502   :  { %9480 = vmatpush1.bf16.msra.mxu1 %v15551_v31  ;;  %v15623_v31 = vld [vmem:[#allocation17 + $0xf08] ss:$48 sps:$4 sm:$0xff]  }
 0x503   :  { %9521 = vmatpush1.bf16.msra.mxu0 %v15554_v61  ;;  %9481 = vmatprep.subr.bf16.mxu1 %v15559_v13  ;;  %v15626_v61 = vld [vmem:[#allocation17 + $0x310] ss:$48 sps:$4 sm:$0xff]   ;;  %v15631_v13 = vld [vmem:[#allocation17 + $0xf6c] ss:$48 sps:$4 sm:$0xff]  }
 0x504   :  { %9522 = vmatprep.subr.bf16.mxu0 %v15562_v29  ;;  %v15634_v29 = vld [vmem:[#allocation17 + $0x374] ss:$48 sps:$4 sm:$0xff]  }
 0x506   :  { %9482 = vmatpush1.bf16.msra.mxu1 %v15557_v6  ;;  %v15629_v6 = vld [vmem:[#allocation17 + $0xf68] ss:$48 sps:$4 sm:$0xff]  }
 0x507   :  { %9523 = vmatpush1.bf16.msra.mxu0 %v15560_v7  ;;  %9483 = vmatprep.subr.bf16.mxu1 %v15565_v44  ;;  %v15632_v7 = vld [vmem:[#allocation17 + $0x370] ss:$48 sps:$4 sm:$0xff]   ;;  %v15637_v44 = vld [vmem:[#allocation17 + $0xfcc] ss:$48 sps:$4 sm:$0xff]  }
 0x508   :  { %9524 = vmatprep.subr.bf16.mxu0 %v15568_v53  ;;  %v15640_v53 = vld [vmem:[#allocation17 + $0x3d4] ss:$48 sps:$4 sm:$0xff]  }
 0x50a   :  { %9484 = vmatpush1.bf16.msra.mxu1 %v15563_v36  ;;  %v15635_v36 = vld [vmem:[#allocation17 + $0xfc8] ss:$48 sps:$4 sm:$0xff]  }
 0x50b   :  { %9525 = vmatpush1.bf16.msra.mxu0 %v15566_v8  ;;  %9485 = vmatprep.subr.bf16.mxu1 %v15571_v54  ;;  %v15638_v8 = vld [vmem:[#allocation17 + $0x3d0] ss:$48 sps:$4 sm:$0xff]   ;;  %v15643_v54 = vld [vmem:[#allocation17 + $0x102c] ss:$48 sps:$4 sm:$0xff]  }
 0x50c   :  { %9526 = vmatprep.subr.bf16.mxu0 %v15574_v9  ;;  %v15646_v9 = vld [vmem:[#allocation17 + $0x434] ss:$48 sps:$4 sm:$0xff]  }
 0x50e   :  { %9486 = vmatpush1.bf16.msra.mxu1 %v15569_v10  ;;  %v15641_v10 = vld [vmem:[#allocation17 + $0x1028] ss:$48 sps:$4 sm:$0xff]  }
 0x50f   :  { %9527 = vmatpush1.bf16.msra.mxu0 %v15572_v11  ;;  %9537 = vmatprep.subr.bf16.mxu1 %v15577_v12  ;;  %v15644_v11 = vld [vmem:[#allocation17 + $0x430] ss:$48 sps:$4 sm:$0xff]   ;;  %v15649_v12 = vld [vmem:[#allocation17 + $0x108c] ss:$48 sps:$4 sm:$0xff]  }
 0x510   :  { %9578 = vmatprep.subr.bf16.mxu0 %v15580_v14  ;;  %v15652_v14 = vld [vmem:[#allocation17 + $0x494] ss:$48 sps:$4 sm:$0xff]  }
 0x511   :  { %9488 = vmatmul.mubr.bf16.vlgmr.msra.gmra.mrb[56].mxu1 %v17436_v49 }
 0x512   :  { %9529 = vmatmul.mubr.bf16.vlgmr.msra.gmra.mrb[52].mxu0 %v17450_v4  ;;  %9538 = vmatpush1.bf16.msra.mxu1 %v15575_v16  ;;  %v15647_v16 = vld [vmem:[#allocation17 + $0x1088] ss:$48 sps:$4 sm:$0xff]  }
 0x513   :  { %9579 = vmatpush1.bf16.msra.mxu0 %v15578_v26  ;;  %9539 = vmatprep.subr.bf16.mxu1 %v15583_v17  ;;  %v15650_v26 = vld [vmem:[#allocation17 + $0x490] ss:$48 sps:$4 sm:$0xff]   ;;  %v15655_v17 = vld [vmem:[#allocation17 + $0x10ec] ss:$48 sps:$4 sm:$0xff]  }
 0x514   :  { %9580 = vmatprep.subr.bf16.mxu0 %v15586_v27  ;;  %9569 = vmatprep.mubr.bf16.mxu1 %v17457_v2  ;;  %v15658_v27 = vld [vmem:[#allocation17 + $0x4f4] ss:$48 sps:$4 sm:$0xff]  }
 0x515   :  { %9610 = vmatprep.mubr.bf16.mxu0 %v17428_v35 }
 0x516   :  { %9540 = vmatpush1.bf16.msra.mxu1 %v15581_v18  ;;  %v15653_v18 = vld [vmem:[#allocation17 + $0x10e8] ss:$48 sps:$4 sm:$0xff]  }
 0x517   :  { %9581 = vmatpush1.bf16.msra.mxu0 %v15584_v21  ;;  %9541 = vmatprep.subr.bf16.mxu1 %v15589_v56  ;;  %v15656_v21 = vld [vmem:[#allocation17 + $0x4f0] ss:$48 sps:$4 sm:$0xff]   ;;  %v15661_v56 = vld [vmem:[#allocation17 + $0x114c] ss:$48 sps:$4 sm:$0xff]  }
 0x518   :  { %9582 = vmatprep.subr.bf16.mxu0 %v15592_v57  ;;  %v15664_v57 = vld [vmem:[#allocation17 + $0x554] ss:$48 sps:$4 sm:$0xff]  }
 0x51a   :  { %9542 = vmatpush1.bf16.msra.mxu1 %v15587_v28  ;;  %v15659_v28 = vld [vmem:[#allocation17 + $0x1148] ss:$48 sps:$4 sm:$0xff]  }
 0x51b   :  { %9583 = vmatpush1.bf16.msra.mxu0 %v15590_v33  ;;  %9543 = vmatprep.subr.bf16.mxu1 %v15595_v42  ;;  %v15662_v33 = vld [vmem:[#allocation17 + $0x550] ss:$48 sps:$4 sm:$0xff]   ;;  %v15667_v42 = vld [vmem:[#allocation17 + $0x11ac] ss:$48 sps:$4 sm:$0xff]  }
 0x51c   :  { %9584 = vmatprep.subr.bf16.mxu0 %v15598_v19  ;;  %v15670_v19 = vld [vmem:[#allocation17 + $0x5b4] ss:$48 sps:$4 sm:$0xff]  }
 0x51e   :  { %9544 = vmatpush1.bf16.msra.mxu1 %v15593_v23  ;;  %v15665_v23 = vld [vmem:[#allocation17 + $0x11a8] ss:$48 sps:$4 sm:$0xff]  }
 0x51f   :  { %9585 = vmatpush1.bf16.msra.mxu0 %v15596_v15  ;;  %9545 = vmatprep.subr.bf16.mxu1 %v15601_v59  ;;  %v15668_v15 = vld [vmem:[#allocation17 + $0x5b0] ss:$48 sps:$4 sm:$0xff]   ;;  %v15673_v59 = vld [vmem:[#allocation17 + $0x614] ss:$48 sps:$4 sm:$0xff]  }
 0x520   :  { %9586 = vmatprep.subr.bf16.mxu0 %v15604_v38  ;;  %v15676_v38 = vld [vmem:[#allocation17 + $0xc14] ss:$48 sps:$4 sm:$0xff]  }
 0x522   :  { %9546 = vmatpush1.bf16.msra.mxu1 %v15599_v39  ;;  %v15671_v39 = vld [vmem:[#allocation17 + $0x610] ss:$48 sps:$4 sm:$0xff]  }
 0x523   :  { %9587 = vmatpush1.bf16.msra.mxu0 %v15602_v45  ;;  %9547 = vmatprep.subr.bf16.mxu1 %v15607_v50  ;;  %v15674_v45 = vld [vmem:[#allocation17 + $0xc10] ss:$48 sps:$4 sm:$0xff]   ;;  %v15679_v50 = vld [vmem:[#allocation17 + $0x674] ss:$48 sps:$4 sm:$0xff]  }
 0x524   :  { %v17482_v55 = vpop.f32.mrb[40].mxu0  ;;  %9588 = vmatprep.subr.bf16.mxu0 %v15610_v32  ;;  %v15682_v32 = vld [vmem:[#allocation17 + $0xc74] ss:$48 sps:$4 sm:$0xff]  }
 0x525   :  { %v17484_v40 = vpop.f32.mrb[41].mxu0 }
 0x526   :  { %v9370_v62 = vpop.f32.mrb[42].mxu0  ;;  %9548 = vmatpush1.bf16.msra.mxu1 %v15605_v51  ;;  %v15677_v51 = vld [vmem:[#allocation17 + $0x670] ss:$48 sps:$4 sm:$0xff]  }
 0x527   :  { %9589 = vmatpush1.bf16.msra.mxu0 %v15608_v20  ;;  %v9371_v0 = vpop.f32.mrb[43].mxu0  ;;  %9549 = vmatprep.subr.bf16.mxu1 %v15613_v48  ;;  %v15680_v20 = vld [vmem:[#allocation17 + $0xc70] ss:$48 sps:$4 sm:$0xff]   ;;  %v15685_v48 = vld [vmem:[#allocation17 + $0x6d4] ss:$48 sps:$4 sm:$0xff]  }
 0x528   :  { %9590 = vmatprep.subr.bf16.mxu0 %v15616_v58  ;;  %v15688_v58 = vld [vmem:[#allocation17 + $0xcd4] ss:$48 sps:$4 sm:$0xff]   ;;  %v15683_v62 = vld [vmem:[#allocation17 + $0x6d0] ss:$48 sps:$4 sm:$0xff]  }
 0x529   :  { %v15691_v0 = vld [vmem:[#allocation17 + $0x734] ss:$48 sps:$4 sm:$0xff]  }
 0x52a   :  { %9550 = vmatpush1.bf16.msra.mxu1 %v15611_v43  ;;  %v15686_v43 = vld [vmem:[#allocation17 + $0xcd0] ss:$48 sps:$4 sm:$0xff]  }
 0x52b   :  { %9591 = vmatpush1.bf16.msra.mxu0 %v15614_v24  ;;  %9551 = vmatprep.subr.bf16.mxu1 %v15619_v1  ;;  %v15694_v24 = vld [vmem:[#allocation17 + $0xd34] ss:$48 sps:$4 sm:$0xff]   ;;  %v15689_v1 = vld [vmem:[#allocation17 + $0x730] ss:$48 sps:$4 sm:$0xff]  }
 0x52c   :  { %9592 = vmatprep.subr.bf16.mxu0 %v15622_v3  ;;  %v15692_v3 = vld [vmem:[#allocation17 + $0xd30] ss:$48 sps:$4 sm:$0xff]  }
 0x52e   :  { %9552 = vmatpush1.bf16.msra.mxu1 %v15617_v46  ;;  %v15697_v46 = vld [vmem:[#allocation17 + $0x794] ss:$48 sps:$4 sm:$0xff]  }
 0x52f   :  { %9593 = vmatpush1.bf16.msra.mxu0 %v15620_v5  ;;  %9553 = vmatprep.subr.bf16.mxu1 %v15625_v60  ;;  %v15700_v5 = vld [vmem:[#allocation17 + $0xd94] ss:$48 sps:$4 sm:$0xff]   ;;  %v15695_v60 = vld [vmem:[#allocation17 + $0x790] ss:$48 sps:$4 sm:$0xff]  }
 0x530   :  { %9594 = vmatprep.subr.bf16.mxu0 %v15628_v63  ;;  %v15698_v63 = vld [vmem:[#allocation17 + $0xd90] ss:$48 sps:$4 sm:$0xff]  }
 0x532   :  { %9554 = vmatpush1.bf16.msra.mxu1 %v15623_v31  ;;  %v15703_v31 = vld [vmem:[#allocation17 + $0x7f4] ss:$48 sps:$4 sm:$0xff]  }
 0x533   :  { %9595 = vmatpush1.bf16.msra.mxu0 %v15626_v61  ;;  %9555 = vmatprep.subr.bf16.mxu1 %v15631_v13  ;;  %v15706_v61 = vld [vmem:[#allocation17 + $0xdf4] ss:$48 sps:$4 sm:$0xff]   ;;  %v15701_v13 = vld [vmem:[#allocation17 + $0x7f0] ss:$48 sps:$4 sm:$0xff]  }
 0x534   :  { %9596 = vmatprep.subr.bf16.mxu0 %v15634_v29  ;;  %v15704_v29 = vld [vmem:[#allocation17 + $0xdf0] ss:$48 sps:$4 sm:$0xff]  }
 0x536   :  { %9556 = vmatpush1.bf16.msra.mxu1 %v15629_v6  ;;  %v15709_v6 = vld [vmem:[#allocation17 + $0x854] ss:$48 sps:$4 sm:$0xff]  }
 0x537   :  { %9597 = vmatpush1.bf16.msra.mxu0 %v15632_v7  ;;  %9557 = vmatprep.subr.bf16.mxu1 %v15637_v44  ;;  %v15712_v7 = vld [vmem:[#allocation17 + $0xe54] ss:$48 sps:$4 sm:$0xff]  }
 0x538   :  { %9598 = vmatprep.subr.bf16.mxu0 %v15640_v53 }
 0x53a   :  { %9558 = vmatpush1.bf16.msra.mxu1 %v15635_v36 }
 0x53b   :  { %9599 = vmatpush1.bf16.msra.mxu0 %v15638_v8  ;;  %9559 = vmatprep.subr.bf16.mxu1 %v15643_v54  ;;  %v15707_v8 = vld [vmem:[#allocation17 + $0x850] ss:$48 sps:$4 sm:$0xff]  }
 0x53c   :  { %9600 = vmatprep.subr.bf16.mxu0 %v15646_v9 }
 0x53e   :  { %9560 = vmatpush1.bf16.msra.mxu1 %v15641_v10  ;;  %v15710_v10 = vld [vmem:[#allocation17 + $0xe50] ss:$48 sps:$4 sm:$0xff]  }
 0x53f   :  { %9601 = vmatpush1.bf16.msra.mxu0 %v15644_v11  ;;  %9561 = vmatprep.subr.bf16.mxu1 %v15649_v12  ;;  %v15715_v11 = vld [vmem:[#allocation17 + $0x8b4] ss:$48 sps:$4 sm:$0xff]  }
 0x540   :  { %9602 = vmatprep.subr.bf16.mxu0 %v15652_v14  ;;  %v15718_v14 = vld [vmem:[#allocation17 + $0xeb4] ss:$48 sps:$4 sm:$0xff]  }
 0x542   :  { %9562 = vmatpush1.bf16.msra.mxu1 %v15647_v16  ;;  %v15713_v16 = vld [vmem:[#allocation17 + $0x8b0] ss:$48 sps:$4 sm:$0xff]  }
 0x543   :  { %9603 = vmatpush1.bf16.msra.mxu0 %v15650_v26  ;;  %9563 = vmatprep.subr.bf16.mxu1 %v15655_v17  ;;  %v15721_v26 = vld [vmem:[#allocation17 + $0x914] ss:$48 sps:$4 sm:$0xff]  }
 0x544   :  { %9604 = vmatprep.subr.bf16.mxu0 %v15658_v27  ;;  %v15724_v17 = vld [vmem:[#allocation17 + $0xf14] ss:$48 sps:$4 sm:$0xff]   ;;  %v15719_v27 = vld [vmem:[#allocation17 + $0x910] ss:$48 sps:$4 sm:$0xff]  }
 0x546   :  { %9564 = vmatpush1.bf16.msra.mxu1 %v15653_v18  ;;  %v15727_v18 = vld [vmem:[#allocation17 + $0x974] ss:$48 sps:$4 sm:$0xff]  }
 0x547   :  { %9605 = vmatpush1.bf16.msra.mxu0 %v15656_v21  ;;  %9565 = vmatprep.subr.bf16.mxu1 %v15661_v56  ;;  %v15730_v21 = vld [vmem:[#allocation17 + $0xf74] ss:$48 sps:$4 sm:$0xff]   ;;  %v15725_v56 = vld [vmem:[#allocation17 + $0x970] ss:$48 sps:$4 sm:$0xff]  }
 0x548   :  { %9606 = vmatprep.subr.bf16.mxu0 %v15664_v57  ;;  %v15728_v57 = vld [vmem:[#allocation17 + $0xf70] ss:$48 sps:$4 sm:$0xff]  }
 0x54a   :  { %9566 = vmatpush1.bf16.msra.mxu1 %v15659_v28  ;;  %v15733_v28 = vld [vmem:[#allocation17 + $0x9d4] ss:$48 sps:$4 sm:$0xff]  }
 0x54b   :  { %9607 = vmatpush1.bf16.msra.mxu0 %v15662_v33  ;;  %9567 = vmatprep.subr.bf16.mxu1 %v15667_v42  ;;  %v15736_v33 = vld [vmem:[#allocation17 + $0xfd4] ss:$48 sps:$4 sm:$0xff]   ;;  %v15731_v42 = vld [vmem:[#allocation17 + $0x9d0] ss:$48 sps:$4 sm:$0xff]  }
 0x54c   :  { %9608 = vmatprep.subr.bf16.mxu0 %v15670_v19  ;;  %v15734_v19 = vld [vmem:[#allocation17 + $0xfd0] ss:$48 sps:$4 sm:$0xff]  }
 0x54e   :  { %9568 = vmatpush1.bf16.msra.mxu1 %v15665_v23  ;;  %v15739_v23 = vld [vmem:[#allocation17 + $0xa34] ss:$48 sps:$4 sm:$0xff]  }
 0x54f   :  { %9609 = vmatpush1.bf16.msra.mxu0 %v15668_v15  ;;  %9619 = vmatprep.subr.bf16.mxu1 %v15673_v59  ;;  %v15742_v15 = vld [vmem:[#allocation17 + $0x1034] ss:$48 sps:$4 sm:$0xff]   ;;  %v15737_v59 = vld [vmem:[#allocation17 + $0xa30] ss:$48 sps:$4 sm:$0xff]  }
 0x550   :  { %9660 = vmatprep.subr.bf16.mxu0 %v15676_v38  ;;  %v15740_v38 = vld [vmem:[#allocation17 + $0x1030] ss:$48 sps:$4 sm:$0xff]  }
 0x551   :  { %9570 = vmatmul.mubr.bf16.vlgmr.msra.gmra.mrb[60].mxu1 %v17464_v41 }
 0x552   :  { %9611 = vmatmul.mubr.bf16.vlgmr.msra.gmra.mrb[56].mxu0 %v17436_v49  ;;  %9620 = vmatpush1.bf16.msra.mxu1 %v15671_v39  ;;  %v15745_v39 = vld [vmem:[#allocation17 + $0xa94] ss:$48 sps:$4 sm:$0xff]  }
 0x553   :  { %9661 = vmatpush1.bf16.msra.mxu0 %v15674_v45  ;;  %9621 = vmatprep.subr.bf16.mxu1 %v15679_v50  ;;  %v15748_v45 = vld [vmem:[#allocation17 + $0x1094] ss:$48 sps:$4 sm:$0xff]   ;;  %v15743_v50 = vld [vmem:[#allocation17 + $0xa90] ss:$48 sps:$4 sm:$0xff]  }
 0x554   :  { %9662 = vmatprep.subr.bf16.mxu0 %v15682_v32  ;;  %9651 = vmatprep.mubr.bf16.mxu1 %v17442_v52  ;;  %v15746_v32 = vld [vmem:[#allocation17 + $0x1090] ss:$48 sps:$4 sm:$0xff]  }
 0x555   :  { %9692 = vmatprep.mubr.bf16.mxu0 %v17457_v2 }
 0x556   :  { %9622 = vmatpush1.bf16.msra.mxu1 %v15677_v51  ;;  %v15751_v51 = vld [vmem:[#allocation17 + $0xaf4] ss:$48 sps:$4 sm:$0xff]  }
 0x557   :  { %9663 = vmatpush1.bf16.msra.mxu0 %v15680_v20  ;;  %9623 = vmatprep.subr.bf16.mxu1 %v15685_v48  ;;  %v15754_v20 = vld [vmem:[#allocation17 + $0x10f4] ss:$48 sps:$4 sm:$0xff]   ;;  %v15749_v48 = vld [vmem:[#allocation17 + $0xaf0] ss:$48 sps:$4 sm:$0xff]  }
 0x558   :  { %9664 = vmatprep.subr.bf16.mxu0 %v15688_v58  ;;  %v15752_v58 = vld [vmem:[#allocation17 + $0x10f0] ss:$48 sps:$4 sm:$0xff]  }
 0x55a   :  { %9624 = vmatpush1.bf16.msra.mxu1 %v15683_v62  ;;  %v15757_v62 = vld [vmem:[#allocation17 + $0xb54] ss:$48 sps:$4 sm:$0xff]  }
 0x55b   :  { %9665 = vmatpush1.bf16.msra.mxu0 %v15686_v43  ;;  %9625 = vmatprep.subr.bf16.mxu1 %v15691_v0  ;;  %v15760_v43 = vld [vmem:[#allocation17 + $0x1154] ss:$48 sps:$4 sm:$0xff]   ;;  %v15755_v0 = vld [vmem:[#allocation17 + $0xb50] ss:$48 sps:$4 sm:$0xff]  }
 0x55c   :  { %9666 = vmatprep.subr.bf16.mxu0 %v15694_v24  ;;  %v15758_v24 = vld [vmem:[#allocation17 + $0x1150] ss:$48 sps:$4 sm:$0xff]  }
 0x55e   :  { %9626 = vmatpush1.bf16.msra.mxu1 %v15689_v1  ;;  %v15763_v1 = vld [vmem:[#allocation17 + $0xbb4] ss:$48 sps:$4 sm:$0xff]  }
 0x55f   :  { %9667 = vmatpush1.bf16.msra.mxu0 %v15692_v3  ;;  %9627 = vmatprep.subr.bf16.mxu1 %v15697_v46  ;;  %v15766_v3 = vld [vmem:[#allocation17 + $0x11b4] ss:$48 sps:$4 sm:$0xff]   ;;  %v15761_v46 = vld [vmem:[#allocation17 + $0xbb0] ss:$48 sps:$4 sm:$0xff]  }
 0x560   :  { %9668 = vmatprep.subr.bf16.mxu0 %v15700_v5  ;;  %v15764_v5 = vld [vmem:[#allocation17 + $0x11b0] ss:$48 sps:$4 sm:$0xff]  }
 0x562   :  { %9628 = vmatpush1.bf16.msra.mxu1 %v15695_v60  ;;  %v15769_v60 = vld [vmem:[#allocation17 + $0x1c] ss:$48 sps:$4 sm:$0xff]  }
 0x563   :  { %9669 = vmatpush1.bf16.msra.mxu0 %v15698_v63  ;;  %9629 = vmatprep.subr.bf16.mxu1 %v15703_v31  ;;  %v15772_v63 = vld [vmem:[#allocation17 + $0x61c] ss:$48 sps:$4 sm:$0xff]   ;;  %v15767_v31 = vld [vmem:[#allocation17 + $0x18] ss:$48 sps:$4 sm:$0xff]  }
 0x564   :  { %9670 = vmatprep.subr.bf16.mxu0 %v15706_v61  ;;  %v15770_v61 = vld [vmem:[#allocation17 + $0x618] ss:$48 sps:$4 sm:$0xff]  }
 0x565   :  { %v9407_v44 = vpop.f32.mrb[44].mxu0 }
 0x566   :  { %v17491_v53 = vadd.f32 %v9407_v44, %v17482_v55  ;;  %v9409_v36 = vpop.f32.mrb[45].mxu0  ;;  %9630 = vmatpush1.bf16.msra.mxu1 %v15701_v13  ;;  %v15716_v55 = vld [vmem:[#allocation17 + $0xeb0] ss:$48 sps:$4 sm:$0xff]   ;;  %v15775_v13 = vld [vmem:[#allocation17 + $0x7c] ss:$48 sps:$4 sm:$0xff]  }
 0x567   :  { %v17494_v54 = vadd.f32 %v9409_v36, %v17484_v40  ;;  %v9411_v9 = vpop.f32.mrb[46].mxu0  ;;  %9671 = vmatpush1.bf16.msra.mxu0 %v15704_v29  ;;  %9631 = vmatprep.subr.bf16.mxu1 %v15709_v6  ;;  %v15722_v40 = vld [vmem:[#allocation17 + $0xf10] ss:$48 sps:$4 sm:$0xff]   ;;  %v15778_v29 = vld [vmem:[#allocation17 + $0x67c] ss:$48 sps:$4 sm:$0xff]  }
 0x568   :  { %v9412_v12 = vpop.f32.mrb[47].mxu0  ;;  %9672 = vmatprep.subr.bf16.mxu0 %v15712_v7  ;;  %v15773_v6 = vld [vmem:[#allocation17 + $0x78] ss:$48 sps:$4 sm:$0xff]   ;;  %v15781_v44 = vld [vmem:[#allocation17 + $0xdc] ss:$48 sps:$4 sm:$0xff]  }
 0x569   :  { %v15776_v7 = vld [vmem:[#allocation17 + $0x678] ss:$48 sps:$4 sm:$0xff]   ;;  %v15784_v36 = vld [vmem:[#allocation17 + $0x6dc] ss:$48 sps:$4 sm:$0xff]  }
 0x56a   :  { %9632 = vmatpush1.bf16.msra.mxu1 %v15707_v8  ;;  %v15779_v8 = vld [vmem:[#allocation17 + $0xd8] ss:$48 sps:$4 sm:$0xff]  }
 0x56b   :  { %9673 = vmatpush1.bf16.msra.mxu0 %v15710_v10  ;;  %9633 = vmatprep.subr.bf16.mxu1 %v15715_v11  ;;  %v15782_v9 = vld [vmem:[#allocation17 + $0x6d8] ss:$48 sps:$4 sm:$0xff]   ;;  %v15787_v10 = vld [vmem:[#allocation17 + $0x13c] ss:$48 sps:$4 sm:$0xff]  }
 0x56c   :  { %9674 = vmatprep.subr.bf16.mxu0 %v15718_v14  ;;  %v15790_v11 = vld [vmem:[#allocation17 + $0x73c] ss:$48 sps:$4 sm:$0xff]   ;;  %v15785_v12 = vld [vmem:[#allocation17 + $0x138] ss:$48 sps:$4 sm:$0xff]  }
 0x56d   :  { %v15788_v14 = vld [vmem:[#allocation17 + $0x738] ss:$48 sps:$4 sm:$0xff]  }
 0x56e   :  { %9634 = vmatpush1.bf16.msra.mxu1 %v15713_v16  ;;  %v15793_v16 = vld [vmem:[#allocation17 + $0x19c] ss:$48 sps:$4 sm:$0xff]  }
 0x56f   :  { %9675 = vmatpush1.bf16.msra.mxu0 %v15716_v55  ;;  %9635 = vmatprep.subr.bf16.mxu1 %v15721_v26  ;;  %v15796_v55 = vld [vmem:[#allocation17 + $0x79c] ss:$48 sps:$4 sm:$0xff]   ;;  %v15791_v26 = vld [vmem:[#allocation17 + $0x198] ss:$48 sps:$4 sm:$0xff]  }
 0x570   :  { %9676 = vmatprep.subr.bf16.mxu0 %v15724_v17  ;;  %v15794_v17 = vld [vmem:[#allocation17 + $0x798] ss:$48 sps:$4 sm:$0xff]  }
 0x572   :  { %9636 = vmatpush1.bf16.msra.mxu1 %v15719_v27  ;;  %v15799_v27 = vld [vmem:[#allocation17 + $0x1fc] ss:$48 sps:$4 sm:$0xff]  }
 0x573   :  { %9677 = vmatpush1.bf16.msra.mxu0 %v15722_v40  ;;  %9637 = vmatprep.subr.bf16.mxu1 %v15727_v18  ;;  %v15802_v40 = vld [vmem:[#allocation17 + $0x7fc] ss:$48 sps:$4 sm:$0xff]   ;;  %v15797_v18 = vld [vmem:[#allocation17 + $0x1f8] ss:$48 sps:$4 sm:$0xff]  }
 0x574   :  { %9678 = vmatprep.subr.bf16.mxu0 %v15730_v21  ;;  %v15800_v21 = vld [vmem:[#allocation17 + $0x7f8] ss:$48 sps:$4 sm:$0xff]  }
 0x576   :  { %9638 = vmatpush1.bf16.msra.mxu1 %v15725_v56  ;;  %v15805_v56 = vld [vmem:[#allocation17 + $0x25c] ss:$48 sps:$4 sm:$0xff]  }
 0x577   :  { %9679 = vmatpush1.bf16.msra.mxu0 %v15728_v57  ;;  %9639 = vmatprep.subr.bf16.mxu1 %v15733_v28  ;;  %v15808_v28 = vld [vmem:[#allocation17 + $0x85c] ss:$48 sps:$4 sm:$0xff]  }
 0x578   :  { %9680 = vmatprep.subr.bf16.mxu0 %v15736_v33 }
 0x57a   :  { %9640 = vmatpush1.bf16.msra.mxu1 %v15731_v42 }
 0x57b   :  { %9681 = vmatpush1.bf16.msra.mxu0 %v15734_v19  ;;  %9641 = vmatprep.subr.bf16.mxu1 %v15739_v23 }
 0x57c   :  { %9682 = vmatprep.subr.bf16.mxu0 %v15742_v15 }
 0x57e   :  { %9642 = vmatpush1.bf16.msra.mxu1 %v15737_v59  ;;  %v15803_v59 = vld [vmem:[#allocation17 + $0x258] ss:$48 sps:$4 sm:$0xff]  }
 0x57f   :  { %9683 = vmatpush1.bf16.msra.mxu0 %v15740_v38  ;;  %9643 = vmatprep.subr.bf16.mxu1 %v15745_v39 }
 0x580   :  { %9684 = vmatprep.subr.bf16.mxu0 %v15748_v45 }
 0x582   :  { %9644 = vmatpush1.bf16.msra.mxu1 %v15743_v50  ;;  %v15806_v50 = vld [vmem:[#allocation17 + $0x858] ss:$48 sps:$4 sm:$0xff]  }
 0x583   :  { %9685 = vmatpush1.bf16.msra.mxu0 %v15746_v32  ;;  %9645 = vmatprep.subr.bf16.mxu1 %v15751_v51  ;;  %v15811_v32 = vld [vmem:[#allocation17 + $0x2bc] ss:$48 sps:$4 sm:$0xff]  }
 0x584   :  { %9686 = vmatprep.subr.bf16.mxu0 %v15754_v20  ;;  %v15814_v20 = vld [vmem:[#allocation17 + $0x8bc] ss:$48 sps:$4 sm:$0xff]  }
 0x586   :  { %9646 = vmatpush1.bf16.msra.mxu1 %v15749_v48  ;;  %v15809_v48 = vld [vmem:[#allocation17 + $0x2b8] ss:$48 sps:$4 sm:$0xff]  }
 0x587   :  { %9687 = vmatpush1.bf16.msra.mxu0 %v15752_v58  ;;  %9647 = vmatprep.subr.bf16.mxu1 %v15757_v62  ;;  %v15817_v58 = vld [vmem:[#allocation17 + $0x31c] ss:$48 sps:$4 sm:$0xff]  }
 0x588   :  { %9688 = vmatprep.subr.bf16.mxu0 %v15760_v43  ;;  %v15820_v62 = vld [vmem:[#allocation17 + $0x91c] ss:$48 sps:$4 sm:$0xff]   ;;  %v15818_v43 = vld [vmem:[#allocation17 + $0x918] ss:$48 sps:$4 sm:$0xff]  }
 0x58a   :  { %9648 = vmatpush1.bf16.msra.mxu1 %v15755_v0  ;;  %v15823_v0 = vld [vmem:[#allocation17 + $0x37c] ss:$48 sps:$4 sm:$0xff]  }
 0x58b   :  { %9689 = vmatpush1.bf16.msra.mxu0 %v15758_v24  ;;  %9649 = vmatprep.subr.bf16.mxu1 %v15763_v1  ;;  %v15826_v24 = vld [vmem:[#allocation17 + $0x97c] ss:$48 sps:$4 sm:$0xff]   ;;  %v15821_v1 = vld [vmem:[#allocation17 + $0x378] ss:$48 sps:$4 sm:$0xff]  }
 0x58c   :  { %9690 = vmatprep.subr.bf16.mxu0 %v15766_v3  ;;  %v15824_v3 = vld [vmem:[#allocation17 + $0x978] ss:$48 sps:$4 sm:$0xff]  }
 0x58e   :  { %9650 = vmatpush1.bf16.msra.mxu1 %v15761_v46  ;;  %v15829_v46 = vld [vmem:[#allocation17 + $0x3dc] ss:$48 sps:$4 sm:$0xff]  }
 0x58f   :  { %9691 = vmatpush1.bf16.msra.mxu0 %v15764_v5  ;;  %9701 = vmatprep.subr.bf16.mxu1 %v15769_v60  ;;  %v15832_v5 = vld [vmem:[#allocation17 + $0x9dc] ss:$48 sps:$4 sm:$0xff]   ;;  %v15827_v60 = vld [vmem:[#allocation17 + $0x3d8] ss:$48 sps:$4 sm:$0xff]  }
 0x590   :  { %9742 = vmatprep.subr.bf16.mxu0 %v15772_v63  ;;  %v15830_v63 = vld [vmem:[#allocation17 + $0x9d8] ss:$48 sps:$4 sm:$0xff]  }
 0x591   :  { %9652 = vmatmul.mubr.bf16.vlgmr.msra.gmra.mrb[64].mxu1 %v17450_v4 }
 0x592   :  { %9693 = vmatmul.mubr.bf16.vlgmr.msra.gmra.mrb[60].mxu0 %v17464_v41  ;;  %9702 = vmatpush1.bf16.msra.mxu1 %v15767_v31  ;;  %v15835_v31 = vld [vmem:[#allocation17 + $0x43c] ss:$48 sps:$4 sm:$0xff]  }
 0x593   :  { %9743 = vmatpush1.bf16.msra.mxu0 %v15770_v61  ;;  %9703 = vmatprep.subr.bf16.mxu1 %v15775_v13  ;;  %v15838_v61 = vld [vmem:[#allocation17 + $0xa3c] ss:$48 sps:$4 sm:$0xff]   ;;  %v15833_v13 = vld [vmem:[#allocation17 + $0x438] ss:$48 sps:$4 sm:$0xff]  }
 0x594   :  { %9744 = vmatprep.subr.bf16.mxu0 %v15778_v29  ;;  %9733 = vmatprep.mubr.bf16.mxu1 %v17428_v35  ;;  %v15836_v29 = vld [vmem:[#allocation17 + $0xa38] ss:$48 sps:$4 sm:$0xff]  }
 0x595   :  { %9774 = vmatprep.mubr.bf16.mxu0 %v17442_v52 }
 0x596   :  { %9704 = vmatpush1.bf16.msra.mxu1 %v15773_v6  ;;  %v15841_v6 = vld [vmem:[#allocation17 + $0x49c] ss:$48 sps:$4 sm:$0xff]  }
 0x597   :  { %9745 = vmatpush1.bf16.msra.mxu0 %v15776_v7  ;;  %9705 = vmatprep.subr.bf16.mxu1 %v15781_v44  ;;  %v15844_v7 = vld [vmem:[#allocation17 + $0xa9c] ss:$48 sps:$4 sm:$0xff]   ;;  %v15839_v44 = vld [vmem:[#allocation17 + $0x498] ss:$48 sps:$4 sm:$0xff]  }
 0x598   :  { %9746 = vmatprep.subr.bf16.mxu0 %v15784_v36  ;;  %v15842_v36 = vld [vmem:[#allocation17 + $0xa98] ss:$48 sps:$4 sm:$0xff]  }
 0x59a   :  { %9706 = vmatpush1.bf16.msra.mxu1 %v15779_v8  ;;  %v15847_v8 = vld [vmem:[#allocation17 + $0x4fc] ss:$48 sps:$4 sm:$0xff]  }
 0x59b   :  { %9747 = vmatpush1.bf16.msra.mxu0 %v15782_v9  ;;  %9707 = vmatprep.subr.bf16.mxu1 %v15787_v10  ;;  %v15850_v9 = vld [vmem:[#allocation17 + $0xafc] ss:$48 sps:$4 sm:$0xff]   ;;  %v15845_v10 = vld [vmem:[#allocation17 + $0x4f8] ss:$48 sps:$4 sm:$0xff]  }
 0x59c   :  { %9748 = vmatprep.subr.bf16.mxu0 %v15790_v11  ;;  %v15848_v11 = vld [vmem:[#allocation17 + $0xaf8] ss:$48 sps:$4 sm:$0xff]  }
 0x59e   :  { %9708 = vmatpush1.bf16.msra.mxu1 %v15785_v12  ;;  %v15853_v12 = vld [vmem:[#allocation17 + $0x55c] ss:$48 sps:$4 sm:$0xff]  }
 0x59f   :  { %9749 = vmatpush1.bf16.msra.mxu0 %v15788_v14  ;;  %9709 = vmatprep.subr.bf16.mxu1 %v15793_v16  ;;  %v15856_v14 = vld [vmem:[#allocation17 + $0xb5c] ss:$48 sps:$4 sm:$0xff]   ;;  %v15851_v16 = vld [vmem:[#allocation17 + $0x558] ss:$48 sps:$4 sm:$0xff]  }
 0x5a0   :  { %9750 = vmatprep.subr.bf16.mxu0 %v15796_v55  ;;  %v15854_v55 = vld [vmem:[#allocation17 + $0xb58] ss:$48 sps:$4 sm:$0xff]  }
 0x5a2   :  { %9710 = vmatpush1.bf16.msra.mxu1 %v15791_v26  ;;  %v15859_v26 = vld [vmem:[#allocation17 + $0x5bc] ss:$48 sps:$4 sm:$0xff]  }
 0x5a3   :  { %9751 = vmatpush1.bf16.msra.mxu0 %v15794_v17  ;;  %9711 = vmatprep.subr.bf16.mxu1 %v15799_v27  ;;  %v15862_v17 = vld [vmem:[#allocation17 + $0xbbc] ss:$48 sps:$4 sm:$0xff]   ;;  %v15857_v27 = vld [vmem:[#allocation17 + $0x5b8] ss:$48 sps:$4 sm:$0xff]  }
 0x5a4   :  { %v17500_v57 = vpop.f32.mrb[52].mxu1  ;;  %9752 = vmatprep.subr.bf16.mxu0 %v15802_v40  ;;  %v15860_v40 = vld [vmem:[#allocation17 + $0xbb8] ss:$48 sps:$4 sm:$0xff]  }
 0x5a5   :  { %v9448_v33 = vpop.f32.mrb[48].mxu0  ;;  %v17502_v42 = vpop.f32.mrb[53].mxu1 }
 0x5a6   :  { %v17505_v19 = vadd.f32 %v9448_v33, %v17491_v53  ;;  %v9450_v23 = vpop.f32.mrb[49].mxu0  ;;  %v5849_v15 = vpop.f32.mrb[54].mxu1  ;;  %9712 = vmatpush1.bf16.msra.mxu1 %v15797_v18  ;;  %v15812_v53 = vld [vmem:[#allocation17 + $0x8b8] ss:$48 sps:$4 sm:$0xff]   ;;  %v15865_v18 = vld [vmem:[#allocation17 + $0xc1c] ss:$48 sps:$4 sm:$0xff]  }
 0x5a7   :  { %v17508_v38 = vadd.f32 %v9450_v23, %v17494_v54  ;;  %v9452_v39 = vpop.f32.mrb[50].mxu0  ;;  %9753 = vmatpush1.bf16.msra.mxu0 %v15800_v21  ;;  %v5850_v45 = vpop.f32.mrb[55].mxu1  ;;  %9713 = vmatprep.subr.bf16.mxu1 %v15805_v56  ;;  %v15815_v54 = vld [vmem:[#allocation17 + $0x318] ss:$48 sps:$4 sm:$0xff]   ;;  %v15868_v21 = vld [vmem:[#allocation17 + $0x24] ss:$48 sps:$4 sm:$0xff]  }
 0x5a8   :  { %v9453_v51 = vpop.f32.mrb[51].mxu0  ;;  %9754 = vmatprep.subr.bf16.mxu0 %v15808_v28  ;;  %v15863_v56 = vld [vmem:[#allocation17 + $0xc18] ss:$48 sps:$4 sm:$0xff]   ;;  %v15866_v28 = vld [vmem:[#allocation17 + $0x20] ss:$48 sps:$4 sm:$0xff]  }
 0x5a9   :  { %v15871_v33 = vld [vmem:[#allocation17 + $0xc7c] ss:$48 sps:$4 sm:$0xff]   ;;  %v15874_v23 = vld [vmem:[#allocation17 + $0x84] ss:$48 sps:$4 sm:$0xff]   ;;  %v15869_v15 = vld [vmem:[#allocation17 + $0xc78] ss:$48 sps:$4 sm:$0xff]  }
 0x5aa   :  { %9714 = vmatpush1.bf16.msra.mxu1 %v15803_v59  ;;  %v15872_v59 = vld [vmem:[#allocation17 + $0x80] ss:$48 sps:$4 sm:$0xff]   ;;  %v15877_v39 = vld [vmem:[#allocation17 + $0xcdc] ss:$48 sps:$4 sm:$0xff]   ;;  %v15880_v45 = vld [vmem:[#allocation17 + $0xe4] ss:$48 sps:$4 sm:$0xff]  }
 0x5ab   :  { %9755 = vmatpush1.bf16.msra.mxu0 %v15806_v50  ;;  %9715 = vmatprep.subr.bf16.mxu1 %v15811_v32  ;;  %v15875_v50 = vld [vmem:[#allocation17 + $0xcd8] ss:$48 sps:$4 sm:$0xff]   ;;  %v15878_v32 = vld [vmem:[#allocation17 + $0xe0] ss:$48 sps:$4 sm:$0xff]   ;;  %v15883_v51 = vld [vmem:[#allocation17 + $0xd3c] ss:$48 sps:$4 sm:$0xff]  }
 0x5ac   :  { %9756 = vmatprep.subr.bf16.mxu0 %v15814_v20  ;;  %v15886_v20 = vld [vmem:[#allocation17 + $0x144] ss:$48 sps:$4 sm:$0xff]  }
 0x5ae   :  { %9716 = vmatpush1.bf16.msra.mxu1 %v15809_v48  ;;  %v15881_v48 = vld [vmem:[#allocation17 + $0xd38] ss:$48 sps:$4 sm:$0xff]  }
 0x5af   :  { %9757 = vmatpush1.bf16.msra.mxu0 %v15812_v53  ;;  %9717 = vmatprep.subr.bf16.mxu1 %v15817_v58  ;;  %v15884_v53 = vld [vmem:[#allocation17 + $0x140] ss:$48 sps:$4 sm:$0xff]   ;;  %v15889_v58 = vld [vmem:[#allocation17 + $0xd9c] ss:$48 sps:$4 sm:$0xff]  }
 0x5b0   :  { %9758 = vmatprep.subr.bf16.mxu0 %v15820_v62  ;;  %v15892_v62 = vld [vmem:[#allocation17 + $0x1a4] ss:$48 sps:$4 sm:$0xff]  }
 0x5b2   :  { %9718 = vmatpush1.bf16.msra.mxu1 %v15815_v54  ;;  %v15887_v54 = vld [vmem:[#allocation17 + $0xd98] ss:$48 sps:$4 sm:$0xff]  }
 0x5b3   :  { %9759 = vmatpush1.bf16.msra.mxu0 %v15818_v43  ;;  %9719 = vmatprep.subr.bf16.mxu1 %v15823_v0  ;;  %v15890_v43 = vld [vmem:[#allocation17 + $0x1a0] ss:$48 sps:$4 sm:$0xff]   ;;  %v15895_v0 = vld [vmem:[#allocation17 + $0xdfc] ss:$48 sps:$4 sm:$0xff]  }
 0x5b4   :  { %9760 = vmatprep.subr.bf16.mxu0 %v15826_v24  ;;  %v15898_v24 = vld [vmem:[#allocation17 + $0x204] ss:$48 sps:$4 sm:$0xff]  }
 0x5b6   :  { %9720 = vmatpush1.bf16.msra.mxu1 %v15821_v1  ;;  %v15893_v1 = vld [vmem:[#allocation17 + $0xdf8] ss:$48 sps:$4 sm:$0xff]  }
 0x5b7   :  { %9761 = vmatpush1.bf16.msra.mxu0 %v15824_v3  ;;  %9721 = vmatprep.subr.bf16.mxu1 %v15829_v46  ;;  %v15896_v3 = vld [vmem:[#allocation17 + $0x200] ss:$48 sps:$4 sm:$0xff]   ;;  %v15901_v46 = vld [vmem:[#allocation17 + $0xe5c] ss:$48 sps:$4 sm:$0xff]  }
 0x5b8   :  { %9762 = vmatprep.subr.bf16.mxu0 %v15832_v5 }
 0x5ba   :  { %9722 = vmatpush1.bf16.msra.mxu1 %v15827_v60  ;;  %v15904_v60 = vld [vmem:[#allocation17 + $0x264] ss:$48 sps:$4 sm:$0xff]  }
 0x5bb   :  { %9763 = vmatpush1.bf16.msra.mxu0 %v15830_v63  ;;  %9723 = vmatprep.subr.bf16.mxu1 %v15835_v31 }
 0x5bc   :  { %9764 = vmatprep.subr.bf16.mxu0 %v15838_v61 }
 0x5be   :  { %9724 = vmatpush1.bf16.msra.mxu1 %v15833_v13 }
 0x5bf   :  { %9765 = vmatpush1.bf16.msra.mxu0 %v15836_v29  ;;  %9725 = vmatprep.subr.bf16.mxu1 %v15841_v6  ;;  %v15899_v29 = vld [vmem:[#allocation17 + $0xe58] ss:$48 sps:$4 sm:$0xff]  }
 0x5c0   :  { %9766 = vmatprep.subr.bf16.mxu0 %v15844_v7 }
 0x5c2   :  { %9726 = vmatpush1.bf16.msra.mxu1 %v15839_v44 }
 0x5c3   :  { %9767 = vmatpush1.bf16.msra.mxu0 %v15842_v36  ;;  %9727 = vmatprep.subr.bf16.mxu1 %v15847_v8  ;;  %v15902_v36 = vld [vmem:[#allocation17 + $0x260] ss:$48 sps:$4 sm:$0xff]   ;;  %v15907_v8 = vld [vmem:[#allocation17 + $0xebc] ss:$48 sps:$4 sm:$0xff]  }
 0x5c4   :  { %9768 = vmatprep.subr.bf16.mxu0 %v15850_v9 }
 0x5c6   :  { %9728 = vmatpush1.bf16.msra.mxu1 %v15845_v10 }
 0x5c7   :  { %9769 = vmatpush1.bf16.msra.mxu0 %v15848_v11  ;;  %9729 = vmatprep.subr.bf16.mxu1 %v15853_v12  ;;  %v15910_v11 = vld [vmem:[#allocation17 + $0x2c4] ss:$48 sps:$4 sm:$0xff]   ;;  %v15905_v12 = vld [vmem:[#allocation17 + $0xeb8] ss:$48 sps:$4 sm:$0xff]  }
 0x5c8   :  { %9770 = vmatprep.subr.bf16.mxu0 %v15856_v14  ;;  %v15908_v14 = vld [vmem:[#allocation17 + $0x2c0] ss:$48 sps:$4 sm:$0xff]  }
 0x5ca   :  { %9730 = vmatpush1.bf16.msra.mxu1 %v15851_v16  ;;  %v15913_v16 = vld [vmem:[#allocation17 + $0xf1c] ss:$48 sps:$4 sm:$0xff]  }
 0x5cb   :  { %9771 = vmatpush1.bf16.msra.mxu0 %v15854_v55  ;;  %9731 = vmatprep.subr.bf16.mxu1 %v15859_v26  ;;  %v15916_v55 = vld [vmem:[#allocation17 + $0x324] ss:$48 sps:$4 sm:$0xff]   ;;  %v15911_v26 = vld [vmem:[#allocation17 + $0xf18] ss:$48 sps:$4 sm:$0xff]  }
 0x5cc   :  { %9772 = vmatprep.subr.bf16.mxu0 %v15862_v17  ;;  %v15914_v17 = vld [vmem:[#allocation17 + $0x320] ss:$48 sps:$4 sm:$0xff]  }
 0x5ce   :  { %9732 = vmatpush1.bf16.msra.mxu1 %v15857_v27  ;;  %v15919_v27 = vld [vmem:[#allocation17 + $0xf7c] ss:$48 sps:$4 sm:$0xff]  }
 0x5cf   :  { %9773 = vmatpush1.bf16.msra.mxu0 %v15860_v40  ;;  %9783 = vmatprep.subr.bf16.mxu1 %v15865_v18  ;;  %v15922_v40 = vld [vmem:[#allocation17 + $0x384] ss:$48 sps:$4 sm:$0xff]   ;;  %v15917_v18 = vld [vmem:[#allocation17 + $0xf78] ss:$48 sps:$4 sm:$0xff]  }
 0x5d0   :  { %9824 = vmatprep.subr.bf16.mxu0 %v15868_v21  ;;  %v15920_v21 = vld [vmem:[#allocation17 + $0x380] ss:$48 sps:$4 sm:$0xff]  }
 0x5d1   :  { %9734 = vmatmul.mubr.bf16.vlgmr.msra.gmra.mrb[68].mxu1 %v17436_v49 }
 0x5d2   :  { %9775 = vmatmul.mubr.bf16.vlgmr.msra.gmra.mrb[64].mxu0 %v17450_v4  ;;  %9784 = vmatpush1.bf16.msra.mxu1 %v15863_v56  ;;  %v15925_v56 = vld [vmem:[#allocation17 + $0xfdc] ss:$48 sps:$4 sm:$0xff]  }
 0x5d3   :  { %9825 = vmatpush1.bf16.msra.mxu0 %v15866_v28  ;;  %9785 = vmatprep.subr.bf16.mxu1 %v15871_v33  ;;  %v15928_v28 = vld [vmem:[#allocation17 + $0x3e4] ss:$48 sps:$4 sm:$0xff]   ;;  %v15923_v33 = vld [vmem:[#allocation17 + $0xfd8] ss:$48 sps:$4 sm:$0xff]  }
 0x5d4   :  { %9826 = vmatprep.subr.bf16.mxu0 %v15874_v23  ;;  %9815 = vmatprep.mubr.bf16.mxu1 %v17457_v2  ;;  %v15926_v23 = vld [vmem:[#allocation17 + $0x3e0] ss:$48 sps:$4 sm:$0xff]  }
 0x5d5   :  { %9856 = vmatprep.mubr.bf16.mxu0 %v17428_v35 }
 0x5d6   :  { %9786 = vmatpush1.bf16.msra.mxu1 %v15869_v15  ;;  %v15931_v15 = vld [vmem:[#allocation17 + $0x103c] ss:$48 sps:$4 sm:$0xff]  }
 0x5d7   :  { %9827 = vmatpush1.bf16.msra.mxu0 %v15872_v59  ;;  %9787 = vmatprep.subr.bf16.mxu1 %v15877_v39  ;;  %v15934_v59 = vld [vmem:[#allocation17 + $0x444] ss:$48 sps:$4 sm:$0xff]   ;;  %v15929_v39 = vld [vmem:[#allocation17 + $0x1038] ss:$48 sps:$4 sm:$0xff]  }
 0x5d8   :  { %9828 = vmatprep.subr.bf16.mxu0 %v15880_v45  ;;  %v15932_v45 = vld [vmem:[#allocation17 + $0x440] ss:$48 sps:$4 sm:$0xff]  }
 0x5da   :  { %9788 = vmatpush1.bf16.msra.mxu1 %v15875_v50  ;;  %v15937_v50 = vld [vmem:[#allocation17 + $0x109c] ss:$48 sps:$4 sm:$0xff]  }
 0x5db   :  { %9829 = vmatpush1.bf16.msra.mxu0 %v15878_v32  ;;  %9789 = vmatprep.subr.bf16.mxu1 %v15883_v51  ;;  %v15940_v32 = vld [vmem:[#allocation17 + $0x4a4] ss:$48 sps:$4 sm:$0xff]   ;;  %v15935_v51 = vld [vmem:[#allocation17 + $0x1098] ss:$48 sps:$4 sm:$0xff]  }
 0x5dc   :  { %9830 = vmatprep.subr.bf16.mxu0 %v15886_v20  ;;  %v15938_v20 = vld [vmem:[#allocation17 + $0x4a0] ss:$48 sps:$4 sm:$0xff]  }
 0x5de   :  { %9790 = vmatpush1.bf16.msra.mxu1 %v15881_v48  ;;  %v15943_v48 = vld [vmem:[#allocation17 + $0x10fc] ss:$48 sps:$4 sm:$0xff]  }
 0x5df   :  { %9831 = vmatpush1.bf16.msra.mxu0 %v15884_v53  ;;  %9791 = vmatprep.subr.bf16.mxu1 %v15889_v58  ;;  %v15946_v53 = vld [vmem:[#allocation17 + $0x504] ss:$48 sps:$4 sm:$0xff]   ;;  %v15941_v58 = vld [vmem:[#allocation17 + $0x10f8] ss:$48 sps:$4 sm:$0xff]  }
 0x5e0   :  { %9832 = vmatprep.subr.bf16.mxu0 %v15892_v62  ;;  %v15944_v62 = vld [vmem:[#allocation17 + $0x500] ss:$48 sps:$4 sm:$0xff]  }
 0x5e2   :  { %9792 = vmatpush1.bf16.msra.mxu1 %v15887_v54  ;;  %v15949_v54 = vld [vmem:[#allocation17 + $0x115c] ss:$48 sps:$4 sm:$0xff]  }
 0x5e3   :  { %9833 = vmatpush1.bf16.msra.mxu0 %v15890_v43  ;;  %9793 = vmatprep.subr.bf16.mxu1 %v15895_v0  ;;  %v15952_v43 = vld [vmem:[#allocation17 + $0x564] ss:$48 sps:$4 sm:$0xff]   ;;  %v15947_v0 = vld [vmem:[#allocation17 + $0x1158] ss:$48 sps:$4 sm:$0xff]  }
 0x5e4   :  { %v9489_v5 = vpop.f32.mrb[56].mxu1  ;;  %9834 = vmatprep.subr.bf16.mxu0 %v15898_v24  ;;  %v15950_v24 = vld [vmem:[#allocation17 + $0x560] ss:$48 sps:$4 sm:$0xff]  }
 0x5e5   :  { %v9530_v63 = vpop.f32.mrb[52].mxu0  ;;  %v9491_v31 = vpop.f32.mrb[57].mxu1 }
 0x5e6   :  { %v17514_v61 = vadd.f32 %v9530_v63, %v9489_v5  ;;  %v9532_v13 = vpop.f32.mrb[53].mxu0  ;;  %9794 = vmatpush1.bf16.msra.mxu1 %v15893_v1  ;;  %v9493_v6 = vpop.f32.mrb[58].mxu1  ;;  %v15955_v1 = vld [vmem:[#allocation17 + $0x11bc] ss:$48 sps:$4 sm:$0xff]   ;;  %v15956_v5 = vld [vmem:[#allocation17 + $0x5c0] ss:$48 sps:$4 sm:$0xff]  }
 0x5e7   :  { %v17516_v7 = vadd.f32 %v9532_v13, %v9491_v31  ;;  %v9534_v44 = vpop.f32.mrb[54].mxu0  ;;  %9835 = vmatpush1.bf16.msra.mxu0 %v15896_v3  ;;  %9795 = vmatprep.subr.bf16.mxu1 %v15901_v46  ;;  %v9494_v9 = vpop.f32.mrb[59].mxu1  ;;  %v15958_v3 = vld [vmem:[#allocation17 + $0x5c4] ss:$48 sps:$4 sm:$0xff]   ;;  %v15953_v46 = vld [vmem:[#allocation17 + $0x11b8] ss:$48 sps:$4 sm:$0xff]  }
 0x5e8   :  { %v9535_v10 = vpop.f32.mrb[55].mxu0  ;;  %9836 = vmatprep.subr.bf16.mxu0 %v15904_v60  ;;  %v15961_v60 = vld [vmem:[#allocation17 + $0x624] ss:$48 sps:$4 sm:$0xff]   ;;  %v15959_v31 = vld [vmem:[#allocation17 + $0x620] ss:$48 sps:$4 sm:$0xff]  }
 0x5e9   :  { %v15964_v63 = vld [vmem:[#allocation17 + $0xc24] ss:$48 sps:$4 sm:$0xff]   ;;  %v15962_v13 = vld [vmem:[#allocation17 + $0xc20] ss:$48 sps:$4 sm:$0xff]  }
 0x5ea   :  { %9796 = vmatpush1.bf16.msra.mxu1 %v15899_v29  ;;  %v15967_v29 = vld [vmem:[#allocation17 + $0x684] ss:$48 sps:$4 sm:$0xff]   ;;  %v15965_v44 = vld [vmem:[#allocation17 + $0x680] ss:$48 sps:$4 sm:$0xff]  }
 0x5eb   :  { %9837 = vmatpush1.bf16.msra.mxu0 %v15902_v36  ;;  %9797 = vmatprep.subr.bf16.mxu1 %v15907_v8  ;;  %v15970_v6 = vld [vmem:[#allocation17 + $0xc84] ss:$48 sps:$4 sm:$0xff]   ;;  %v15968_v36 = vld [vmem:[#allocation17 + $0xc80] ss:$48 sps:$4 sm:$0xff]  }
 0x5ec   :  { %9838 = vmatprep.subr.bf16.mxu0 %v15910_v11  ;;  %v15973_v8 = vld [vmem:[#allocation17 + $0x6e4] ss:$48 sps:$4 sm:$0xff]   ;;  %v15971_v10 = vld [vmem:[#allocation17 + $0x6e0] ss:$48 sps:$4 sm:$0xff]  }
 0x5ed   :  { %v15976_v9 = vld [vmem:[#allocation17 + $0xce4] ss:$48 sps:$4 sm:$0xff]   ;;  %v15974_v11 = vld [vmem:[#allocation17 + $0xce0] ss:$48 sps:$4 sm:$0xff]  }
 0x5ee   :  { %9798 = vmatpush1.bf16.msra.mxu1 %v15905_v12  ;;  %v15979_v12 = vld [vmem:[#allocation17 + $0x744] ss:$48 sps:$4 sm:$0xff]  }
 0x5ef   :  { %9839 = vmatpush1.bf16.msra.mxu0 %v15908_v14  ;;  %9799 = vmatprep.subr.bf16.mxu1 %v15913_v16  ;;  %v15982_v14 = vld [vmem:[#allocation17 + $0xd44] ss:$48 sps:$4 sm:$0xff]   ;;  %v15977_v16 = vld [vmem:[#allocation17 + $0x740] ss:$48 sps:$4 sm:$0xff]  }
 0x5f0   :  { %9840 = vmatprep.subr.bf16.mxu0 %v15916_v55  ;;  %v15980_v55 = vld [vmem:[#allocation17 + $0xd40] ss:$48 sps:$4 sm:$0xff]  }
 0x5f2   :  { %9800 = vmatpush1.bf16.msra.mxu1 %v15911_v26  ;;  %v15985_v26 = vld [vmem:[#allocation17 + $0x7a4] ss:$48 sps:$4 sm:$0xff]  }
 0x5f3   :  { %9841 = vmatpush1.bf16.msra.mxu0 %v15914_v17  ;;  %9801 = vmatprep.subr.bf16.mxu1 %v15919_v27  ;;  %v15988_v17 = vld [vmem:[#allocation17 + $0xda4] ss:$48 sps:$4 sm:$0xff]   ;;  %v15983_v27 = vld [vmem:[#allocation17 + $0x7a0] ss:$48 sps:$4 sm:$0xff]  }
 0x5f4   :  { %9842 = vmatprep.subr.bf16.mxu0 %v15922_v40  ;;  %v15986_v40 = vld [vmem:[#allocation17 + $0xda0] ss:$48 sps:$4 sm:$0xff]  }
 0x5f6   :  { %9802 = vmatpush1.bf16.msra.mxu1 %v15917_v18  ;;  %v15991_v18 = vld [vmem:[#allocation17 + $0x804] ss:$48 sps:$4 sm:$0xff]  }
 0x5f7   :  { %9843 = vmatpush1.bf16.msra.mxu0 %v15920_v21  ;;  %9803 = vmatprep.subr.bf16.mxu1 %v15925_v56  ;;  %v15994_v21 = vld [vmem:[#allocation17 + $0xe04] ss:$48 sps:$4 sm:$0xff]   ;;  %v15989_v56 = vld [vmem:[#allocation17 + $0x800] ss:$48 sps:$4 sm:$0xff]  }
 0x5f8   :  { %9844 = vmatprep.subr.bf16.mxu0 %v15928_v28  ;;  %v15992_v28 = vld [vmem:[#allocation17 + $0xe00] ss:$48 sps:$4 sm:$0xff]  }
 0x5fa   :  { %9804 = vmatpush1.bf16.msra.mxu1 %v15923_v33  ;;  %v15997_v33 = vld [vmem:[#allocation17 + $0x864] ss:$48 sps:$4 sm:$0xff]  }
 0x5fb   :  { %9845 = vmatpush1.bf16.msra.mxu0 %v15926_v23  ;;  %9805 = vmatprep.subr.bf16.mxu1 %v15931_v15  ;;  %v16000_v15 = vld [vmem:[#allocation17 + $0xe64] ss:$48 sps:$4 sm:$0xff]  }
 0x5fc   :  { %9846 = vmatprep.subr.bf16.mxu0 %v15934_v59 }
 0x5fe   :  { %9806 = vmatpush1.bf16.msra.mxu1 %v15929_v39 }
 0x5ff   :  { %9847 = vmatpush1.bf16.msra.mxu0 %v15932_v45  ;;  %9807 = vmatprep.subr.bf16.mxu1 %v15937_v50 }
 0x600   :  { %9848 = vmatprep.subr.bf16.mxu0 %v15940_v32 }
 0x602   :  { %9808 = vmatpush1.bf16.msra.mxu1 %v15935_v51  ;;  %v15995_v51 = vld [vmem:[#allocation17 + $0x860] ss:$48 sps:$4 sm:$0xff]  }
 0x603   :  { %9849 = vmatpush1.bf16.msra.mxu0 %v15938_v20  ;;  %9809 = vmatprep.subr.bf16.mxu1 %v15943_v48 }
 0x604   :  { %9850 = vmatprep.subr.bf16.mxu0 %v15946_v53  ;;  %v15998_v53 = vld [vmem:[#allocation17 + $0xe60] ss:$48 sps:$4 sm:$0xff]  }
 0x606   :  { %9810 = vmatpush1.bf16.msra.mxu1 %v15941_v58  ;;  %v16003_v58 = vld [vmem:[#allocation17 + $0x8c4] ss:$48 sps:$4 sm:$0xff]  }
 0x607   :  { %9851 = vmatpush1.bf16.msra.mxu0 %v15944_v62  ;;  %9811 = vmatprep.subr.bf16.mxu1 %v15949_v54 }
 0x608   :  { %9852 = vmatprep.subr.bf16.mxu0 %v15952_v43  ;;  %v16001_v43 = vld [vmem:[#allocation17 + $0x8c0] ss:$48 sps:$4 sm:$0xff]  }
 0x60a   :  { %9812 = vmatpush1.bf16.msra.mxu1 %v15947_v0  ;;  %v16009_v0 = vld [vmem:[#allocation17 + $0x924] ss:$48 sps:$4 sm:$0xff]  }
 0x60b   :  { %9853 = vmatpush1.bf16.msra.mxu0 %v15950_v24  ;;  %9813 = vmatprep.subr.bf16.mxu1 %v15955_v1  ;;  %v16012_v24 = vld [vmem:[#allocation17 + $0xf24] ss:$48 sps:$4 sm:$0xff]   ;;  %v16007_v1 = vld [vmem:[#allocation17 + $0x920] ss:$48 sps:$4 sm:$0xff]  }
 0x60c   :  { %9854 = vmatprep.subr.bf16.mxu0 %v15958_v3  ;;  %v16010_v3 = vld [vmem:[#allocation17 + $0xf20] ss:$48 sps:$4 sm:$0xff]  }
 0x60e   :  { %9814 = vmatpush1.bf16.msra.mxu1 %v15953_v46  ;;  %v16015_v46 = vld [vmem:[#allocation17 + $0x984] ss:$48 sps:$4 sm:$0xff]  }
 0x60f   :  { %9855 = vmatpush1.bf16.msra.mxu0 %v15956_v5  ;;  %9865 = vmatprep.subr.bf16.mxu1 %v15961_v60  ;;  %v16018_v5 = vld [vmem:[#allocation17 + $0xf84] ss:$48 sps:$4 sm:$0xff]   ;;  %v16013_v60 = vld [vmem:[#allocation17 + $0x980] ss:$48 sps:$4 sm:$0xff]  }
 0x610   :  { %9906 = vmatprep.subr.bf16.mxu0 %v15964_v63  ;;  %v16016_v63 = vld [vmem:[#allocation17 + $0xf80] ss:$48 sps:$4 sm:$0xff]  }
 0x611   :  { %9816 = vmatmul.mubr.bf16.vlgmr.msra.gmra.mrb[72].mxu1 %v17464_v41 }
 0x612   :  { %9857 = vmatmul.mubr.bf16.vlgmr.msra.gmra.mrb[68].mxu0 %v17436_v49  ;;  %9866 = vmatpush1.bf16.msra.mxu1 %v15959_v31  ;;  %v16021_v31 = vld [vmem:[#allocation17 + $0x9e4] ss:$48 sps:$4 sm:$0xff]  }
 0x613   :  { %9907 = vmatpush1.bf16.msra.mxu0 %v15962_v13  ;;  %9867 = vmatprep.subr.bf16.mxu1 %v15967_v29  ;;  %v16024_v13 = vld [vmem:[#allocation17 + $0xfe4] ss:$48 sps:$4 sm:$0xff]   ;;  %v16019_v29 = vld [vmem:[#allocation17 + $0x9e0] ss:$48 sps:$4 sm:$0xff]  }
 0x614   :  { %9908 = vmatprep.subr.bf16.mxu0 %v15970_v6  ;;  %9897 = vmatprep.mubr.bf16.mxu1 %v17442_v52  ;;  %v16022_v6 = vld [vmem:[#allocation17 + $0xfe0] ss:$48 sps:$4 sm:$0xff]  }
 0x615   :  { %9938 = vmatprep.mubr.bf16.mxu0 %v17457_v2 }
 0x616   :  { %9868 = vmatpush1.bf16.msra.mxu1 %v15965_v44  ;;  %v16027_v44 = vld [vmem:[#allocation17 + $0xa44] ss:$48 sps:$4 sm:$0xff]  }
 0x617   :  { %9909 = vmatpush1.bf16.msra.mxu0 %v15968_v36  ;;  %9869 = vmatprep.subr.bf16.mxu1 %v15973_v8  ;;  %v16030_v36 = vld [vmem:[#allocation17 + $0x1044] ss:$48 sps:$4 sm:$0xff]   ;;  %v16025_v8 = vld [vmem:[#allocation17 + $0xa40] ss:$48 sps:$4 sm:$0xff]  }
 0x618   :  { %9910 = vmatprep.subr.bf16.mxu0 %v15976_v9  ;;  %v16028_v9 = vld [vmem:[#allocation17 + $0x1040] ss:$48 sps:$4 sm:$0xff]  }
 0x61a   :  { %9870 = vmatpush1.bf16.msra.mxu1 %v15971_v10  ;;  %v16033_v10 = vld [vmem:[#allocation17 + $0xaa4] ss:$48 sps:$4 sm:$0xff]  }
 0x61b   :  { %9911 = vmatpush1.bf16.msra.mxu0 %v15974_v11  ;;  %9871 = vmatprep.subr.bf16.mxu1 %v15979_v12  ;;  %v16036_v11 = vld [vmem:[#allocation17 + $0x10a4] ss:$48 sps:$4 sm:$0xff]   ;;  %v16031_v12 = vld [vmem:[#allocation17 + $0xaa0] ss:$48 sps:$4 sm:$0xff]  }
 0x61c   :  { %9912 = vmatprep.subr.bf16.mxu0 %v15982_v14  ;;  %v16034_v14 = vld [vmem:[#allocation17 + $0x10a0] ss:$48 sps:$4 sm:$0xff]  }
 0x61e   :  { %9872 = vmatpush1.bf16.msra.mxu1 %v15977_v16  ;;  %v16039_v16 = vld [vmem:[#allocation17 + $0xb04] ss:$48 sps:$4 sm:$0xff]  }
 0x61f   :  { %9913 = vmatpush1.bf16.msra.mxu0 %v15980_v55  ;;  %9873 = vmatprep.subr.bf16.mxu1 %v15985_v26  ;;  %v16042_v55 = vld [vmem:[#allocation17 + $0x1104] ss:$48 sps:$4 sm:$0xff]   ;;  %v16037_v26 = vld [vmem:[#allocation17 + $0xb00] ss:$48 sps:$4 sm:$0xff]  }
 0x620   :  { %9914 = vmatprep.subr.bf16.mxu0 %v15988_v17  ;;  %v16040_v17 = vld [vmem:[#allocation17 + $0x1100] ss:$48 sps:$4 sm:$0xff]  }
 0x622   :  { %9874 = vmatpush1.bf16.msra.mxu1 %v15983_v27  ;;  %v16045_v27 = vld [vmem:[#allocation17 + $0xb64] ss:$48 sps:$4 sm:$0xff]  }
 0x623   :  { %9915 = vmatpush1.bf16.msra.mxu0 %v15986_v40  ;;  %9875 = vmatprep.subr.bf16.mxu1 %v15991_v18  ;;  %v16048_v40 = vld [vmem:[#allocation17 + $0x1164] ss:$48 sps:$4 sm:$0xff]   ;;  %v16043_v18 = vld [vmem:[#allocation17 + $0xb60] ss:$48 sps:$4 sm:$0xff]  }
 0x624   :  { %v9571_v23 = vpop.f32.mrb[60].mxu1  ;;  %9916 = vmatprep.subr.bf16.mxu0 %v15994_v21  ;;  %v16046_v21 = vld [vmem:[#allocation17 + $0x1160] ss:$48 sps:$4 sm:$0xff]  }
 0x625   :  { %v17523_v59 = vadd.f32 %v9571_v23, %v17514_v61  ;;  %v17525_v39 = vpop.f32.mrb[56].mxu0  ;;  %v9573_v45 = vpop.f32.mrb[61].mxu1  ;;  %v16006_v61 = vld [vmem:[#allocation17 + $0xec4] ss:$48 sps:$4 sm:$0xff]   ;;  %v16052_v23 = vld [vmem:[#allocation17 + $0x11c0] ss:$48 sps:$4 sm:$0xff]  }
 0x626   :  { %v17528_v50 = vadd.f32 %v9573_v45, %v17516_v7  ;;  %v17530_v32 = vpop.f32.mrb[57].mxu0  ;;  %9876 = vmatpush1.bf16.msra.mxu1 %v15989_v56  ;;  %v9575_v20 = vpop.f32.mrb[62].mxu1  ;;  %v16004_v7 = vld [vmem:[#allocation17 + $0xec0] ss:$48 sps:$4 sm:$0xff]   ;;  %v16051_v56 = vld [vmem:[#allocation17 + $0xbc4] ss:$48 sps:$4 sm:$0xff]  }
 0x627   :  { %v9616_v48 = vpop.f32.mrb[58].mxu0  ;;  %9917 = vmatpush1.bf16.msra.mxu0 %v15992_v28  ;;  %9877 = vmatprep.subr.bf16.mxu1 %v15997_v33  ;;  %v9576_v62 = vpop.f32.mrb[63].mxu1  ;;  %v16054_v28 = vld [vmem:[#allocation17 + $0x11c4] ss:$48 sps:$4 sm:$0xff]   ;;  %v16049_v33 = vld [vmem:[#allocation17 + $0xbc0] ss:$48 sps:$4 sm:$0xff]  }
 0x628   :  { %v9617_v54 = vpop.f32.mrb[59].mxu0  ;;  %9918 = vmatprep.subr.bf16.mxu0 %v16000_v15  ;;  %v16057_v15 = vld [vmem:[#allocation17 + $0x2c] ss:$48 sps:$4 sm:$0xff]   ;;  %v16058_v20 = vld [vmem:[#allocation17 + $0x628] ss:$48 sps:$4 sm:$0xff]  }
 0x629   :  { %v16060_v45 = vld [vmem:[#allocation17 + $0x62c] ss:$48 sps:$4 sm:$0xff]   ;;  %v16064_v62 = vld [vmem:[#allocation17 + $0x688] ss:$48 sps:$4 sm:$0xff]  }
 0x62a   :  { %9878 = vmatpush1.bf16.msra.mxu1 %v15995_v51  ;;  %v16055_v51 = vld [vmem:[#allocation17 + $0x28] ss:$48 sps:$4 sm:$0xff]   ;;  %v16063_v48 = vld [vmem:[#allocation17 + $0x8c] ss:$48 sps:$4 sm:$0xff]  }
 0x62b   :  { %9919 = vmatpush1.bf16.msra.mxu0 %v15998_v53  ;;  %9879 = vmatprep.subr.bf16.mxu1 %v16003_v58  ;;  %v16066_v53 = vld [vmem:[#allocation17 + $0x68c] ss:$48 sps:$4 sm:$0xff]   ;;  %v16061_v58 = vld [vmem:[#allocation17 + $0x88] ss:$48 sps:$4 sm:$0xff]  }
 0x62c   :  { %9920 = vmatprep.subr.bf16.mxu0 %v16006_v61  ;;  %v16069_v54 = vld [vmem:[#allocation17 + $0xec] ss:$48 sps:$4 sm:$0xff]  }
 0x62d   :  { %v16072_v61 = vld [vmem:[#allocation17 + $0x6ec] ss:$48 sps:$4 sm:$0xff]  }
 0x62e   :  { %9880 = vmatpush1.bf16.msra.mxu1 %v16001_v43  ;;  %v16067_v43 = vld [vmem:[#allocation17 + $0xe8] ss:$48 sps:$4 sm:$0xff]  }
 0x62f   :  { %9921 = vmatpush1.bf16.msra.mxu0 %v16004_v7  ;;  %9881 = vmatprep.subr.bf16.mxu1 %v16009_v0  ;;  %v16070_v7 = vld [vmem:[#allocation17 + $0x6e8] ss:$48 sps:$4 sm:$0xff]   ;;  %v16075_v0 = vld [vmem:[#allocation17 + $0x14c] ss:$48 sps:$4 sm:$0xff]  }
 0x630   :  { %9922 = vmatprep.subr.bf16.mxu0 %v16012_v24  ;;  %v16078_v24 = vld [vmem:[#allocation17 + $0x74c] ss:$48 sps:$4 sm:$0xff]  }
 0x632   :  { %9882 = vmatpush1.bf16.msra.mxu1 %v16007_v1  ;;  %v16073_v1 = vld [vmem:[#allocation17 + $0x148] ss:$48 sps:$4 sm:$0xff]  }
 0x633   :  { %9923 = vmatpush1.bf16.msra.mxu0 %v16010_v3  ;;  %9883 = vmatprep.subr.bf16.mxu1 %v16015_v46  ;;  %v16076_v3 = vld [vmem:[#allocation17 + $0x748] ss:$48 sps:$4 sm:$0xff]   ;;  %v16081_v46 = vld [vmem:[#allocation17 + $0x1ac] ss:$48 sps:$4 sm:$0xff]  }
 0x634   :  { %9924 = vmatprep.subr.bf16.mxu0 %v16018_v5  ;;  %v16084_v5 = vld [vmem:[#allocation17 + $0x7ac] ss:$48 sps:$4 sm:$0xff]  }
 0x636   :  { %9884 = vmatpush1.bf16.msra.mxu1 %v16013_v60  ;;  %v16087_v60 = vld [vmem:[#allocation17 + $0x20c] ss:$48 sps:$4 sm:$0xff]  }
 0x637   :  { %9925 = vmatpush1.bf16.msra.mxu0 %v16016_v63  ;;  %9885 = vmatprep.subr.bf16.mxu1 %v16021_v31  ;;  %v16090_v63 = vld [vmem:[#allocation17 + $0x80c] ss:$48 sps:$4 sm:$0xff]   ;;  %v16085_v31 = vld [vmem:[#allocation17 + $0x208] ss:$48 sps:$4 sm:$0xff]  }
 0x638   :  { %9926 = vmatprep.subr.bf16.mxu0 %v16024_v13  ;;  %v16088_v13 = vld [vmem:[#allocation17 + $0x808] ss:$48 sps:$4 sm:$0xff]  }
 0x63a   :  { %9886 = vmatpush1.bf16.msra.mxu1 %v16019_v29  ;;  %v16093_v29 = vld [vmem:[#allocation17 + $0x26c] ss:$48 sps:$4 sm:$0xff]  }
 0x63b   :  { %9927 = vmatpush1.bf16.msra.mxu0 %v16022_v6  ;;  %9887 = vmatprep.subr.bf16.mxu1 %v16027_v44  ;;  %v16096_v44 = vld [vmem:[#allocation17 + $0x86c] ss:$48 sps:$4 sm:$0xff]  }
 0x63c   :  { %9928 = vmatprep.subr.bf16.mxu0 %v16030_v36 }
 0x63e   :  { %9888 = vmatpush1.bf16.msra.mxu1 %v16025_v8 }
 0x63f   :  { %9929 = vmatpush1.bf16.msra.mxu0 %v16028_v9  ;;  %9889 = vmatprep.subr.bf16.mxu1 %v16033_v10 }
 0x640   :  { %9930 = vmatprep.subr.bf16.mxu0 %v16036_v11 }
 0x642   :  { %9890 = vmatpush1.bf16.msra.mxu1 %v16031_v12  ;;  %v16091_v12 = vld [vmem:[#allocation17 + $0x268] ss:$48 sps:$4 sm:$0xff]  }
 0x643   :  { %9931 = vmatpush1.bf16.msra.mxu0 %v16034_v14  ;;  %9891 = vmatprep.subr.bf16.mxu1 %v16039_v16 }
 0x644   :  { %9932 = vmatprep.subr.bf16.mxu0 %v16042_v55 }
 0x646   :  { %9892 = vmatpush1.bf16.msra.mxu1 %v16037_v26  ;;  %v16094_v26 = vld [vmem:[#allocation17 + $0x868] ss:$48 sps:$4 sm:$0xff]  }
 0x647   :  { %9933 = vmatpush1.bf16.msra.mxu0 %v16040_v17  ;;  %9893 = vmatprep.subr.bf16.mxu1 %v16045_v27  ;;  %v16099_v17 = vld [vmem:[#allocation17 + $0x2cc] ss:$48 sps:$4 sm:$0xff]  }
 0x648   :  { %9934 = vmatprep.subr.bf16.mxu0 %v16048_v40 }
 0x64a   :  { %9894 = vmatpush1.bf16.msra.mxu1 %v16043_v18 }
 0x64b   :  { %9935 = vmatpush1.bf16.msra.mxu0 %v16046_v21  ;;  %9895 = vmatprep.subr.bf16.mxu1 %v16051_v56  ;;  %v16097_v21 = vld [vmem:[#allocation17 + $0x2c8] ss:$48 sps:$4 sm:$0xff]   ;;  %v16105_v56 = vld [vmem:[#allocation17 + $0x32c] ss:$48 sps:$4 sm:$0xff]  }
 0x64c   :  { %9936 = vmatprep.subr.bf16.mxu0 %v16054_v28  ;;  %v16108_v28 = vld [vmem:[#allocation17 + $0x92c] ss:$48 sps:$4 sm:$0xff]  }
 0x64e   :  { %9896 = vmatpush1.bf16.msra.mxu1 %v16049_v33  ;;  %v16103_v33 = vld [vmem:[#allocation17 + $0x328] ss:$48 sps:$4 sm:$0xff]  }
 0x64f   :  { %9937 = vmatpush1.bf16.msra.mxu0 %v16052_v23  ;;  %9947 = vmatprep.subr.bf16.mxu1 %v16057_v15  ;;  %v16106_v23 = vld [vmem:[#allocation17 + $0x928] ss:$48 sps:$4 sm:$0xff]   ;;  %v16111_v15 = vld [vmem:[#allocation17 + $0x38c] ss:$48 sps:$4 sm:$0xff]  }
 0x650   :  { %9988 = vmatprep.subr.bf16.mxu0 %v16060_v45  ;;  %v16114_v45 = vld [vmem:[#allocation17 + $0x98c] ss:$48 sps:$4 sm:$0xff]  }
 0x651   :  { %9898 = vmatmul.mubr.bf16.vlgmr.msra.gmra.mrb[76].mxu1 %v17450_v4 }
 0x652   :  { %9939 = vmatmul.mubr.bf16.vlgmr.msra.gmra.mrb[72].mxu0 %v17464_v41  ;;  %9948 = vmatpush1.bf16.msra.mxu1 %v16055_v51  ;;  %v16109_v51 = vld [vmem:[#allocation17 + $0x388] ss:$48 sps:$4 sm:$0xff]  }
 0x653   :  { %9989 = vmatpush1.bf16.msra.mxu0 %v16058_v20  ;;  %9949 = vmatprep.subr.bf16.mxu1 %v16063_v48  ;;  %v16112_v20 = vld [vmem:[#allocation17 + $0x988] ss:$48 sps:$4 sm:$0xff]   ;;  %v16117_v48 = vld [vmem:[#allocation17 + $0x3ec] ss:$48 sps:$4 sm:$0xff]  }
 0x654   :  { %9990 = vmatprep.subr.bf16.mxu0 %v16066_v53  ;;  %10020 = vmatprep.mubr.bf16.mxu0 %v17442_v52  ;;  %v16079_v52 = vld [vmem:[#allocation17 + $0x1a8] ss:$48 sps:$4 sm:$0xff]   ;;  %v16120_v53 = vld [vmem:[#allocation17 + $0x9ec] ss:$48 sps:$4 sm:$0xff]  }
 0x655   :  { %9979 = vmatprep.mubr.bf16.mxu1 %v17428_v35  ;;  %v16082_v35 = vld [vmem:[#allocation17 + $0x7a8] ss:$48 sps:$4 sm:$0xff]  }
 0x656   :  { %9950 = vmatpush1.bf16.msra.mxu1 %v16061_v58  ;;  %v16115_v58 = vld [vmem:[#allocation17 + $0x3e8] ss:$48 sps:$4 sm:$0xff]  }
 0x657   :  { %9991 = vmatpush1.bf16.msra.mxu0 %v16064_v62  ;;  %9951 = vmatprep.subr.bf16.mxu1 %v16069_v54  ;;  %v16118_v62 = vld [vmem:[#allocation17 + $0x9e8] ss:$48 sps:$4 sm:$0xff]   ;;  %v16123_v54 = vld [vmem:[#allocation17 + $0x44c] ss:$48 sps:$4 sm:$0xff]  }
 0x658   :  { %9992 = vmatprep.subr.bf16.mxu0 %v16072_v61  ;;  %v16126_v61 = vld [vmem:[#allocation17 + $0xa4c] ss:$48 sps:$4 sm:$0xff]  }
 0x65a   :  { %9952 = vmatpush1.bf16.msra.mxu1 %v16067_v43  ;;  %v16121_v43 = vld [vmem:[#allocation17 + $0x448] ss:$48 sps:$4 sm:$0xff]  }
 0x65b   :  { %9993 = vmatpush1.bf16.msra.mxu0 %v16070_v7  ;;  %9953 = vmatprep.subr.bf16.mxu1 %v16075_v0  ;;  %v16124_v7 = vld [vmem:[#allocation17 + $0xa48] ss:$48 sps:$4 sm:$0xff]   ;;  %v16129_v0 = vld [vmem:[#allocation17 + $0x4ac] ss:$48 sps:$4 sm:$0xff]  }
 0x65c   :  { %9994 = vmatprep.subr.bf16.mxu0 %v16078_v24  ;;  %v16132_v24 = vld [vmem:[#allocation17 + $0xaac] ss:$48 sps:$4 sm:$0xff]  }
 0x65e   :  { %9954 = vmatpush1.bf16.msra.mxu1 %v16073_v1  ;;  %v16127_v1 = vld [vmem:[#allocation17 + $0x4a8] ss:$48 sps:$4 sm:$0xff]  }
 0x65f   :  { %9995 = vmatpush1.bf16.msra.mxu0 %v16076_v3  ;;  %9955 = vmatprep.subr.bf16.mxu1 %v16081_v46  ;;  %v16130_v3 = vld [vmem:[#allocation17 + $0xaa8] ss:$48 sps:$4 sm:$0xff]   ;;  %v16135_v46 = vld [vmem:[#allocation17 + $0x50c] ss:$48 sps:$4 sm:$0xff]  }
 0x660   :  { %9996 = vmatprep.subr.bf16.mxu0 %v16084_v5  ;;  %v16138_v5 = vld [vmem:[#allocation17 + $0xb0c] ss:$48 sps:$4 sm:$0xff]  }
 0x662   :  { %9956 = vmatpush1.bf16.msra.mxu1 %v16079_v52  ;;  %v17543_v52 = vsub.s32 2, %v17361_v37 }
 0x663   :  { %9997 = vmatpush1.bf16.msra.mxu0 %v16082_v35  ;;  %9957 = vmatprep.subr.bf16.mxu1 %v16087_v60  ;;  %v16133_v35 = vld [vmem:[#allocation17 + $0x508] ss:$48 sps:$4 sm:$0xff]  }
 0x664   :  { %v9653_v6 = vpop.f32.mrb[64].mxu1  ;;  %9998 = vmatprep.subr.bf16.mxu0 %v16090_v63  ;;  %v16136_v60 = vld [vmem:[#allocation17 + $0xb08] ss:$48 sps:$4 sm:$0xff]   ;;  %v16141_v63 = vld [vmem:[#allocation17 + $0x56c] ss:$48 sps:$4 sm:$0xff]  }
 0x665   :  { %v9654_v36 = vadd.f32 %v9653_v6, %v17525_v39  ;;  %v9694_v8 = vpop.f32.mrb[60].mxu0  ;;  %v9655_v9 = vpop.f32.mrb[65].mxu1  ;;  %v16102_v39 = vld [vmem:[#allocation17 + $0x8cc] ss:$48 sps:$4 sm:$0xff]  }
 0x666   :  { %v9656_v10 = vadd.f32 %v9655_v9, %v17530_v32  ;;  %v9696_v11 = vpop.f32.mrb[61].mxu0  ;;  %9958 = vmatpush1.bf16.msra.mxu1 %v16085_v31  ;;  %v9657_v14 = vpop.f32.mrb[66].mxu1  ;;  %v16100_v32 = vld [vmem:[#allocation17 + $0x8c8] ss:$48 sps:$4 sm:$0xff]   ;;  %v16144_v31 = vld [vmem:[#allocation17 + $0xb6c] ss:$48 sps:$4 sm:$0xff]  }
 0x667   :  { %v17538_v16 = vadd.f32 %v9694_v8, %v9654_v36  ;;  %v9698_v55 = vpop.f32.mrb[62].mxu0  ;;  %9999 = vmatpush1.bf16.msra.mxu0 %v16088_v13  ;;  %9959 = vmatprep.subr.bf16.mxu1 %v16093_v29  ;;  %v9658_v27 = vpop.f32.mrb[67].mxu1  ;;  %v17546_v13 = vsub.s32 1, %v17361_v37  ;;  %v17548_v29 = vld [vmem:[#allocation20 + $0x8] sm:$0x1f] }
 0x668   :  { %v17540_v40 = vadd.f32 %v9696_v11, %v9656_v10  ;;  %v9699_v18 = vpop.f32.mrb[63].mxu0  ;;  %10000 = vmatprep.subr.bf16.mxu0 %v16096_v44  ;;  %v10077_v6 = vrot.slane %v17548_v29, %v17543_v52  ;;  %v16139_v44 = vld [vmem:[#allocation17 + $0x568] ss:$48 sps:$4 sm:$0xff]   ;;  %v16147_v8 = vld [vmem:[#allocation17 + $0x5cc] ss:$48 sps:$4 sm:$0xff]  }
 0x669   :  { %v16142_v36 = vld [vmem:[#allocation17 + $0xb68] ss:$48 sps:$4 sm:$0xff]   ;;  %v16150_v9 = vld [vmem:[#allocation17 + $0xbcc] ss:$48 sps:$4 sm:$0xff]   ;;  %v4026_v10 = vrot.slane %v17548_v29, %v17546_v13 }
 0x66a   :  { %9960 = vmatpush1.bf16.msra.mxu1 %v16091_v12  ;;  %v10095_v11 = vadd.f32 %v10077_v6, %v17508_v38  ;;  %v16145_v12 = vld [vmem:[#allocation17 + $0x5c8] ss:$48 sps:$4 sm:$0xff]   ;;  %v16153_v55 = vld [vmem:[#allocation17 + $0xc2c] ss:$48 sps:$4 sm:$0xff]  }
 0x66b   :  { %10001 = vmatpush1.bf16.msra.mxu0 %v16094_v26  ;;  %9961 = vmatprep.subr.bf16.mxu1 %v16099_v17  ;;  %v16148_v14 = vld [vmem:[#allocation17 + $0xbc8] ss:$48 sps:$4 sm:$0xff]   ;;  %v14227_v26 = vadd.f32 %v17474_v30, %v4026_v10  ;;  %v17556_v17 = vld [vmem:[#allocation20] sm:$0x1f] }
 0x66c   :  { %10002 = vmatprep.subr.bf16.mxu0 %v16102_v39  ;;  %v10073_v27 = vrot.slane %v17556_v17, %v17543_v52  ;;  %v10137_v18 = vpack.c.bf16 %v10095_v11, %v10095_v11  ;;  %v16151_v39 = vld [vmem:[#allocation17 + $0xc28] ss:$48 sps:$4 sm:$0xff]  }
 0x66d   :  { %v16169_v10 = vld [vmem:[#allocation17 + $0xe68] ss:$48 sps:$4 sm:$0xff]  }
 0x66e   :  { %9962 = vmatpush1.bf16.msra.mxu1 %v16097_v21  ;;  %v17560_v21 = vld [vmem:[#allocation20 + $0x18] sm:$0x1f]  ;;  %v10094_v30 = vadd.f32 %v10073_v27, %v17505_v19 }
 0x66f   :  { %10003 = vmatpush1.bf16.msra.mxu0 %v16100_v32  ;;  %9963 = vmatprep.subr.bf16.mxu1 %v16105_v56  ;;  %v10085_v38 = vrot.slane %v17560_v21, %v17543_v52  ;;  %v16156_v32 = vld [vmem:[#allocation17 + $0xc8c] ss:$48 sps:$4 sm:$0xff]   ;;  %v10131_v56 = vpack.c.bf16 %v14227_v26, %v14227_v26  ;;  %v16157_v19 = vld [vmem:[#allocation17 + $0xce8] ss:$48 sps:$4 sm:$0xff]  }
 0x670   :  { %10004 = vmatprep.subr.bf16.mxu0 %v16108_v28  ;;  %v16154_v28 = vld [vmem:[#allocation17 + $0xc88] ss:$48 sps:$4 sm:$0xff]  }
 0x672   :  { %9964 = vmatpush1.bf16.msra.mxu1 %v16103_v33  ;;  %v10097_v33 = vadd.f32 %v10085_v38, %v17528_v50  ;;  %v16175_v38 = vld [vmem:[#allocation17 + $0xf28] ss:$48 sps:$4 sm:$0xff]  }
 0x673   :  { %10005 = vmatpush1.bf16.msra.mxu0 %v16106_v23  ;;  %9965 = vmatprep.subr.bf16.mxu1 %v16111_v15  ;;  %v16159_v23 = vld [vmem:[#allocation17 + $0xcec] ss:$48 sps:$4 sm:$0xff]   ;;  %v4022_v15 = vrot.slane %v17556_v17, %v17546_v13 }
 0x674   :  { %10006 = vmatprep.subr.bf16.mxu0 %v16114_v45  ;;  %v4034_v45 = vrot.slane %v17560_v21, %v17546_v13  ;;  %v10139_v50 = vpack.c.bf16 %v10097_v33, %v10097_v33 }
 0x676   :  { %9966 = vmatpush1.bf16.msra.mxu1 %v16109_v51  ;;  %v17573_v51 = vld [vmem:[#allocation20 + $0x10] sm:$0x1f] }
 0x677   :  { %10007 = vmatpush1.bf16.msra.mxu0 %v16112_v20  ;;  %9967 = vmatprep.subr.bf16.mxu1 %v16117_v48  ;;  %v17577_v20 = vld [vmem:[#allocation20 + $0x28] sm:$0x1f] }
 0x678   :  { %10008 = vmatprep.subr.bf16.mxu0 %v16120_v53  ;;  %v16162_v48 = vld [vmem:[#allocation17 + $0xd4c] ss:$48 sps:$4 sm:$0xff]   ;;  %v14226_v53 = vadd.f32 %v17470_v22, %v4022_v15 }
 0x679   :  { %v16168_v22 = vld [vmem:[#allocation17 + $0xe0c] ss:$48 sps:$4 sm:$0xff]  }
 0x67a   :  { %9968 = vmatpush1.bf16.msra.mxu1 %v16115_v58  ;;  %v14229_v58 = vadd.f32 %v17476_v47, %v4034_v45  ;;  %v4030_v47 = vrot.slane %v17573_v51, %v17546_v13  ;;  %v16186_v15 = vld [vmem:[#allocation17 + $0x104c] ss:$48 sps:$4 sm:$0xff]   ;;  %v16184_v45 = vld [vmem:[#allocation17 + $0x1048] ss:$48 sps:$4 sm:$0xff]  }
 0x67b   :  { %10009 = vmatpush1.bf16.msra.mxu0 %v16118_v62  ;;  %9969 = vmatprep.subr.bf16.mxu1 %v16123_v54  ;;  %v16160_v54 = vld [vmem:[#allocation17 + $0xd48] ss:$48 sps:$4 sm:$0xff]  }
 0x67c   :  { %10010 = vmatprep.subr.bf16.mxu0 %v16126_v61 }
 0x67e   :  { %9970 = vmatpush1.bf16.msra.mxu1 %v16121_v43  ;;  %v16165_v43 = vld [vmem:[#allocation17 + $0xdac] ss:$48 sps:$4 sm:$0xff]  }
 0x67f   :  { %10011 = vmatpush1.bf16.msra.mxu0 %v16124_v7  ;;  %9971 = vmatprep.subr.bf16.mxu1 %v16129_v0  ;;  %v10130_v7 = vpack.c.bf16 %v14226_v53, %v14226_v53  ;;  %v10133_v0 = vpack.c.bf16 %v14229_v58, %v14229_v58  ;;  %v17604_v53 = vsub.s32 3, %v17361_v37 }
 0x680   :  { %10012 = vmatprep.subr.bf16.mxu0 %v16132_v24 }
 0x681   :  { %v10103_v58 = vrot.slane %v17556_v17, %v17604_v53 }
 0x682   :  { %9972 = vmatpush1.bf16.msra.mxu1 %v16127_v1  ;;  %v16163_v1 = vld [vmem:[#allocation17 + $0xda8] ss:$48 sps:$4 sm:$0xff]  }
 0x683   :  { %10013 = vmatpush1.bf16.msra.mxu0 %v16130_v3  ;;  %9973 = vmatprep.subr.bf16.mxu1 %v16135_v46 }
 0x684   :  { %10014 = vmatprep.subr.bf16.mxu0 %v16138_v5  ;;  %v16166_v5 = vld [vmem:[#allocation17 + $0xe08] ss:$48 sps:$4 sm:$0xff]  }
 0x686   :  { %9974 = vmatpush1.bf16.msra.mxu1 %v16133_v35  ;;  %v16171_v35 = vld [vmem:[#allocation17 + $0xe6c] ss:$48 sps:$4 sm:$0xff]  }
 0x687   :  { %10015 = vmatpush1.bf16.msra.mxu0 %v16136_v60  ;;  %9975 = vmatprep.subr.bf16.mxu1 %v16141_v63  ;;  %v14228_v63 = vadd.f32 %v17472_v25, %v4030_v47 }
 0x688   :  { %10016 = vmatprep.subr.bf16.mxu0 %v16144_v31 }
 0x689   :  { %v10132_v27 = vpack.c.bf16 %v14228_v63, %v14228_v63 }
 0x68a   :  { %9976 = vmatpush1.bf16.msra.mxu1 %v16139_v44 }
 0x68b   :  { %10017 = vmatpush1.bf16.msra.mxu0 %v16142_v36  ;;  %9977 = vmatprep.subr.bf16.mxu1 %v16147_v8 }
 0x68c   :  { %10018 = vmatprep.subr.bf16.mxu0 %v16150_v9 }
 0x68e   :  { %9978 = vmatpush1.bf16.msra.mxu1 %v16145_v12 }
 0x68f   :  { %10019 = vmatpush1.bf16.msra.mxu0 %v16148_v14  ;;  %10029 = vmatprep.subr.bf16.mxu1 %v16153_v55  ;;  %v16174_v14 = vld [vmem:[#allocation17 + $0xecc] ss:$48 sps:$4 sm:$0xff]  }
 0x690   :  { %10142 = vmatprep.subr.bf16.mxu0 %v10137_v18 }
 0x691   :  { %9980 = vmatmul.mubr.bf16.vlgmr.msra.gmra.mrb[80].mxu1 %v17436_v49  ;;  %v10136_v49 = vpack.c.bf16 %v10094_v30, %v10094_v30  ;;  %v16178_v30 = vld [vmem:[#allocation17 + $0xf88] ss:$48 sps:$4 sm:$0xff]  }
 0x692   :  { %10021 = vmatmul.mubr.bf16.vlgmr.msra.gmra.mrb[76].mxu0 %v17450_v4  ;;  %10030 = vmatpush1.bf16.msra.mxu1 %v16151_v39  ;;  %v10081_v4 = vrot.slane %v17573_v51, %v17543_v52  ;;  %v16172_v39 = vld [vmem:[#allocation17 + $0xec8] ss:$48 sps:$4 sm:$0xff]  }
 0x693   :  { %10174 = vmatprep.mubr.bf16.mxu0 %v10131_v56  ;;  %10031 = vmatprep.subr.bf16.mxu1 %v16156_v32  ;;  %v16180_v32 = vld [vmem:[#allocation17 + $0xf8c] ss:$48 sps:$4 sm:$0xff]  }
 0x694   :  { %10061 = vmatprep.mubr.bf16.mxu1 %v17457_v2  ;;  %v10093_v2 = vrot.slane %v17577_v20, %v17543_v52  ;;  %v10096_v62 = vadd.f32 %v10081_v4, %v17523_v59  ;;  %v4042_v59 = vrot.slane %v17577_v20, %v17546_v13  ;;  %v16192_v4 = vld [vmem:[#allocation17 + $0x110c] ss:$48 sps:$4 sm:$0xff]  }
 0x696   :  { %10032 = vmatpush1.bf16.msra.mxu1 %v16154_v28  ;;  %v10099_v61 = vadd.f32 %v10093_v2, %v17540_v40  ;;  %v10138_v24 = vpack.c.bf16 %v10096_v62, %v10096_v62  ;;  %v17589_v40 = vld [vmem:[#allocation20 + $0x20] sm:$0x1f]  ;;  %v14231_v44 = vadd.f32 %v17502_v42, %v4042_v59  ;;  %v16177_v42 = vld [vmem:[#allocation17 + $0xf2c] ss:$48 sps:$4 sm:$0xff]  }
 0x697   :  { %10033 = vmatprep.subr.bf16.mxu1 %v16159_v23  ;;  %v10089_v46 = vrot.slane %v17589_v40, %v17543_v52  ;;  %v16183_v28 = vld [vmem:[#allocation17 + $0xfec] ss:$48 sps:$4 sm:$0xff]   ;;  %v16181_v23 = vld [vmem:[#allocation17 + $0xfe8] ss:$48 sps:$4 sm:$0xff]  }
 0x698   :  { %10143 = vmatpush1.bf16.xpose.msra.mxu0 %v10136_v49  ;;  %v10141_v3 = vpack.c.bf16 %v10099_v61, %v10099_v61  ;;  %v10135_v25 = vpack.c.bf16 %v14231_v44, %v14231_v44  ;;  %v16187_v49 = vld [vmem:[#allocation17 + $0x10a8] ss:$48 sps:$4 sm:$0xff]   ;;  %v16198_v2 = vld [vmem:[#allocation17 + $0x11cc] ss:$48 sps:$4 sm:$0xff]   ;;  %v10115_v44 = vrot.slane %v17560_v21, %v17604_v53 }
 0x699   :  { %10182 = vmatprep.subr.bf16.mxu0 %v10139_v50  ;;  %v10098_v36 = vadd.f32 %v10089_v46, %v17538_v16  ;;  %v4038_v16 = vrot.slane %v17589_v40, %v17546_v13  ;;  %v16189_v13 = vld [vmem:[#allocation17 + $0x10ac] ss:$48 sps:$4 sm:$0xff]   ;;  %v16193_v50 = vld [vmem:[#allocation17 + $0x1168] ss:$48 sps:$4 sm:$0xff]  }
 0x69a   :  { %10034 = vmatpush1.bf16.msra.mxu1 %v16157_v19  ;;  %v16195_v19 = vld [vmem:[#allocation17 + $0x116c] ss:$48 sps:$4 sm:$0xff]  }
 0x69b   :  { %10035 = vmatprep.subr.bf16.mxu1 %v16162_v48  ;;  %v10140_v18 = vpack.c.bf16 %v10098_v36, %v10098_v36  ;;  %v14230_v56 = vadd.f32 %v17500_v57, %v4038_v16  ;;  %v16190_v57 = vld [vmem:[#allocation17 + $0x1108] ss:$48 sps:$4 sm:$0xff]  }
 0x69c   :  { %v16196_v48 = vld [vmem:[#allocation17 + $0x11c8] ss:$48 sps:$4 sm:$0xff]  }
 0x69d   :  { %v10134_v33 = vpack.c.bf16 %v14230_v56, %v14230_v56 }
 0x69e   :  { %10036 = vmatpush1.bf16.msra.mxu1 %v16160_v54  ;;  %v10107_v54 = vrot.slane %v17548_v29, %v17604_v53 }
 0x69f   :  { %10175 = vmatmul.mubr.bf16.vlgmr.msra.gmra.mrb[80].mxu0 %v10130_v7  ;;  %10037 = vmatprep.subr.bf16.mxu1 %v16165_v43 }
 0x6a0   :  { %10183 = vmatpush1.bf16.xpose.msra.mxu0 %v10138_v24  ;;  %10214 = vmatprep.mubr.bf16.mxu0 %v10133_v0 }
 0x6a1   :  { %10222 = vmatprep.subr.bf16.mxu0 %v10141_v3 }
 0x6a2   :  { %10038 = vmatpush1.bf16.msra.mxu1 %v16163_v1 }
 0x6a3   :  { %10039 = vmatprep.subr.bf16.mxu1 %v16168_v22 }
 0x6a4   :  { %v9735_v60 = vpop.f32.mrb[68].mxu1 }
 0x6a5   :  { %v9776_v31 = vpop.f32.mrb[64].mxu0  ;;  %v9737_v6 = vpop.f32.mrb[69].mxu1 }
 0x6a6   :  { %v17596_v8 = vadd.f32 %v9776_v31, %v9735_v60  ;;  %v9778_v9 = vpop.f32.mrb[65].mxu0  ;;  %10040 = vmatpush1.bf16.msra.mxu1 %v16166_v5  ;;  %v9739_v11 = vpop.f32.mrb[70].mxu1 }
 0x6a7   :  { %v9779_v52 = vadd.f32 %v9778_v9, %v9737_v6  ;;  %v9780_v12 = vpop.f32.mrb[66].mxu0  ;;  %10041 = vmatprep.subr.bf16.mxu1 %v16171_v35  ;;  %v9740_v55 = vpop.f32.mrb[71].mxu1 }
 0x6a8   :  { %v9781_v26 = vpop.f32.mrb[67].mxu0 }
 0x6aa   :  { %10042 = vmatpush1.bf16.msra.mxu1 %v16169_v10 }
 0x6ab   :  { %10215 = vmatmul.mubr.bf16.vlgmr.msra.gmra.mrb[80].mxu0 %v10132_v27  ;;  %10043 = vmatprep.subr.bf16.mxu1 %v16174_v14 }
 0x6ac   :  { %10223 = vmatpush1.bf16.xpose.msra.mxu0 %v10140_v18  ;;  %10254 = vmatprep.mubr.bf16.mxu0 %v10135_v25 }
 0x6ae   :  { %10044 = vmatpush1.bf16.msra.mxu1 %v16172_v39 }
 0x6af   :  { %10045 = vmatprep.subr.bf16.mxu1 %v16177_v42 }
 0x6b2   :  { %10046 = vmatpush1.bf16.msra.mxu1 %v16175_v38 }
 0x6b3   :  { %10047 = vmatprep.subr.bf16.mxu1 %v16180_v32 }
 0x6b6   :  { %10048 = vmatpush1.bf16.msra.mxu1 %v16178_v30 }
 0x6b7   :  { %10255 = vmatmul.mubr.bf16.vlgmr.msra.gmra.mrb[80].mxu0 %v10134_v33  ;;  %10049 = vmatprep.subr.bf16.mxu1 %v16183_v28 }
 0x6ba   :  { %10050 = vmatpush1.bf16.msra.mxu1 %v16181_v23 }
 0x6bb   :  { %10051 = vmatprep.subr.bf16.mxu1 %v16186_v15 }
 0x6be   :  { %10052 = vmatpush1.bf16.msra.mxu1 %v16184_v45 }
 0x6bf   :  { %10053 = vmatprep.subr.bf16.mxu1 %v16189_v13 }
 0x6c2   :  { %10054 = vmatpush1.bf16.msra.mxu1 %v16187_v49 }
 0x6c3   :  { %10055 = vmatprep.subr.bf16.mxu1 %v16192_v4 }
 0x6c6   :  { %10056 = vmatpush1.bf16.msra.mxu1 %v16190_v57 }
 0x6c7   :  { %10057 = vmatprep.subr.bf16.mxu1 %v16195_v19 }
 0x6ca   :  { %10058 = vmatpush1.bf16.msra.mxu1 %v16193_v50 }
 0x6cb   :  { %10059 = vmatprep.subr.bf16.mxu1 %v16198_v2 }
 0x6ce   :  { %10060 = vmatpush1.bf16.msra.mxu1 %v16196_v48 }
 0x6d1   :  { %10062 = vmatmul.mubr.bf16.vlgmr.msra.gmra.mrb[84].mxu1 %v17464_v41 }
 0x6d2   :  { %10336 = vmatprep.mubr.bf16.mxu1 %v16971_v34 }
 0x6e4   :  { %v9817_v62 = vpop.f32.mrb[72].mxu1 }
 0x6e5   :  { %v9818_v61 = vadd.f32 %v9817_v62, %v17596_v8  ;;  %v9858_v43 = vpop.f32.mrb[68].mxu0  ;;  %v9819_v7 = vpop.f32.mrb[73].mxu1  ;;  %v16199_v62 = vld [vmem:[#allocation19] ss:$24 sps:$4 sm:$0xff]  }
 0x6e6   :  { %v9820_v0 = vadd.f32 %v9819_v7, %v9779_v52  ;;  %v9860_v24 = vpop.f32.mrb[69].mxu0  ;;  %v9821_v1 = vpop.f32.mrb[74].mxu1  ;;  %v16213_v7 = vld [vmem:[#allocation19 + $0x64] ss:$24 sps:$4 sm:$0xff]  }
 0x6e7   :  { %v10124_v41 = vadd.f32 %v10103_v58, %v9818_v61  ;;  %v9862_v3 = vpop.f32.mrb[70].mxu0  ;;  %v9822_v22 = vpop.f32.mrb[75].mxu1  ;;  %v16207_v61 = vld [vmem:[#allocation19 + $0x34] ss:$24 sps:$4 sm:$0xff]   ;;  %v16217_v1 = vld [vmem:[#allocation19 + $0x90] ss:$24 sps:$4 sm:$0xff]  }
 0x6e8   :  { %v10125_v47 = vadd.f32 %v10107_v54, %v9820_v0  ;;  %v9863_v59 = vpop.f32.mrb[71].mxu0  ;;  %v16201_v54 = vld [vmem:[#allocation19 + $0x4] ss:$24 sps:$4 sm:$0xff]   ;;  %v16211_v0 = vld [vmem:[#allocation19 + $0x60] ss:$24 sps:$4 sm:$0xff]  }
 0x6e9   :  { %v10276_v46 = vpack.c.bf16 %v10124_v41, %v10124_v41  ;;  %12185 = vmatprep.subr.bf16.mxu0 %v16201_v54  ;;  %v16225_v41 = vld [vmem:[#allocation19 + $0xc4] ss:$24 sps:$4 sm:$0xff]   ;;  %v16223_v3 = vld [vmem:[#allocation19 + $0xc0] ss:$24 sps:$4 sm:$0xff]   ;;  %v16231_v22 = vld [vmem:[#allocation19 + $0xf4] ss:$24 sps:$4 sm:$0xff]  }
 0x6ea   :  { %v10277_v5 = vpack.c.bf16 %v10125_v47, %v10125_v47  ;;  %12186 = vmatpush1.bf16.msra.mxu0 %v16199_v62  ;;  %v16229_v47 = vld [vmem:[#allocation19 + $0xf0] ss:$24 sps:$4 sm:$0xff]   ;;  %v16237_v59 = vld [vmem:[#allocation19 + $0x124] ss:$24 sps:$4 sm:$0xff]  }
 0x6eb   :  { %v10287_v17 = vsel %vm656_vm3, %v10276_v46, 0  ;;  %12187 = vmatprep.subr.bf16.mxu0 %v16207_v61  ;;  %v16235_v46 = vld [vmem:[#allocation19 + $0x120] ss:$24 sps:$4 sm:$0xff]   ;;  %v16258_v62 = vld [vmem:[#allocation19 + $0x1bc] ss:$24 sps:$4 sm:$0xff]  }
 0x6ec   :  { %13883 = vmatprep.subr.msk.bf16.mxu1 %vm656_vm3, %v10277_v5  ;;  %v16243_v5 = vld [vmem:[#allocation19 + $0x154] ss:$24 sps:$4 sm:$0xff]   ;;  %v16256_v54 = vld [vmem:[#allocation19 + $0x1b8] ss:$24 sps:$4 sm:$0xff]  }
 0x6ed   :  { %10305 = vmatpush1.bf16.msra.mxu1 %v10287_v17  ;;  %v16241_v17 = vld [vmem:[#allocation19 + $0x150] ss:$24 sps:$4 sm:$0xff]   ;;  %v16264_v61 = vld [vmem:[#allocation19 + $0x1ec] ss:$24 sps:$4 sm:$0xff]  }
 0x724   :  { %v9899_v29 = vpop.f32.mrb[76].mxu1 }
 0x725   :  { %v9900_v35 = vadd.f32 %v9899_v29, %v9858_v43  ;;  %v9940_v60 = vpop.f32.mrb[72].mxu0  ;;  %v9901_v63 = vpop.f32.mrb[77].mxu1  ;;  %v16205_v43 = vld [vmem:[#allocation19 + $0x30] ss:$24 sps:$4 sm:$0xff]   ;;  %v16249_v29 = vld [vmem:[#allocation19 + $0x184] ss:$24 sps:$4 sm:$0xff]  }
 0x726   :  { %v9902_v31 = vadd.f32 %v9901_v63, %v9860_v24  ;;  %v9942_v6 = vpop.f32.mrb[73].mxu0  ;;  %v9903_v36 = vpop.f32.mrb[78].mxu1  ;;  %12188 = vmatpush1.bf16.msra.mxu0 %v16205_v43  ;;  %v16219_v24 = vld [vmem:[#allocation19 + $0x94] ss:$24 sps:$4 sm:$0xff]   ;;  %v16253_v63 = vld [vmem:[#allocation19 + $0x1b0] ss:$24 sps:$4 sm:$0xff]  }
 0x727   :  { %v17615_v8 = vadd.f32 %v9940_v60, %v9900_v35  ;;  %v9944_v9 = vpop.f32.mrb[74].mxu0  ;;  %v9904_v10 = vpop.f32.mrb[79].mxu1  ;;  %12189 = vmatprep.subr.bf16.mxu0 %v16213_v7  ;;  %v16247_v35 = vld [vmem:[#allocation19 + $0x180] ss:$24 sps:$4 sm:$0xff]   ;;  %v16255_v60 = vld [vmem:[#allocation19 + $0x1b4] ss:$24 sps:$4 sm:$0xff]  }
 0x728   :  { %v9943_v11 = vadd.f32 %v9942_v6, %v9902_v31  ;;  %v9945_v52 = vpop.f32.mrb[75].mxu0  ;;  %v16261_v31 = vld [vmem:[#allocation19 + $0x1e4] ss:$24 sps:$4 sm:$0xff]   ;;  %v16259_v6 = vld [vmem:[#allocation19 + $0x1e0] ss:$24 sps:$4 sm:$0xff]  }
 0x729   :  { %v16265_v36 = vld [vmem:[#allocation19 + $0x210] ss:$24 sps:$4 sm:$0xff]   ;;  %v16273_v9 = vld [vmem:[#allocation19 + $0x244] ss:$24 sps:$4 sm:$0xff]   ;;  %v16271_v10 = vld [vmem:[#allocation19 + $0x240] ss:$24 sps:$4 sm:$0xff]  }
 0x72a   :  { %v10127_v12 = vadd.f32 %v10115_v44, %v9943_v11  ;;  %12190 = vmatpush1.bf16.msra.mxu0 %v16211_v0  ;;  %v16267_v44 = vld [vmem:[#allocation19 + $0x214] ss:$24 sps:$4 sm:$0xff]   ;;  %v16277_v52 = vld [vmem:[#allocation19 + $0x270] ss:$24 sps:$4 sm:$0xff]  }
 0x72b   :  { %12191 = vmatprep.subr.bf16.mxu0 %v16219_v24  ;;  %v16279_v11 = vld [vmem:[#allocation19 + $0x274] ss:$24 sps:$4 sm:$0xff]   ;;  %v16262_v43 = vld [vmem:[#allocation19 + $0x1e8] ss:$24 sps:$4 sm:$0xff]   ;;  %v16268_v0 = vld [vmem:[#allocation19 + $0x218] ss:$24 sps:$4 sm:$0xff]  }
 0x72c   :  { %v10279_v14 = vpack.c.bf16 %v10127_v12, %v10127_v12  ;;  %v16285_v12 = vld [vmem:[#allocation19 + $0x2a4] ss:$24 sps:$4 sm:$0xff]  }
 0x72d   :  { %v16270_v7 = vld [vmem:[#allocation19 + $0x21c] ss:$24 sps:$4 sm:$0xff]   ;;  %v16276_v24 = vld [vmem:[#allocation19 + $0x24c] ss:$24 sps:$4 sm:$0xff]  }
 0x72e   :  { %13885 = vmatprep.subr.msk.bf16.mxu1 %vm656_vm3, %v10279_v14  ;;  %12192 = vmatpush1.bf16.msra.mxu0 %v16217_v1  ;;  %v16283_v14 = vld [vmem:[#allocation19 + $0x2a0] ss:$24 sps:$4 sm:$0xff]  }
 0x72f   :  { %12193 = vmatprep.subr.bf16.mxu0 %v16225_v41  ;;  %v16274_v1 = vld [vmem:[#allocation19 + $0x248] ss:$24 sps:$4 sm:$0xff]   ;;  %v16282_v41 = vld [vmem:[#allocation19 + $0x27c] ss:$24 sps:$4 sm:$0xff]  }
 0x732   :  { %12194 = vmatpush1.bf16.msra.mxu0 %v16223_v3  ;;  %v16280_v3 = vld [vmem:[#allocation19 + $0x278] ss:$24 sps:$4 sm:$0xff]  }
 0x733   :  { %12195 = vmatprep.subr.bf16.mxu0 %v16231_v22  ;;  %v16288_v22 = vld [vmem:[#allocation19 + $0x2ac] ss:$24 sps:$4 sm:$0xff]  }
 0x736   :  { %12196 = vmatpush1.bf16.msra.mxu0 %v16229_v47  ;;  %v16286_v47 = vld [vmem:[#allocation19 + $0x2a8] ss:$24 sps:$4 sm:$0xff]  }
 0x737   :  { %12197 = vmatprep.subr.bf16.mxu0 %v16237_v59  ;;  %v16291_v59 = vld [vmem:[#allocation19 + $0x2d4] ss:$24 sps:$4 sm:$0xff]  }
 0x73a   :  { %12198 = vmatpush1.bf16.msra.mxu0 %v16235_v46  ;;  %v16294_v46 = vld [vmem:[#allocation19 + $0x2dc] ss:$24 sps:$4 sm:$0xff]  }
 0x73b   :  { %12199 = vmatprep.subr.bf16.mxu0 %v16243_v5  ;;  %v16289_v5 = vld [vmem:[#allocation19 + $0x2d0] ss:$24 sps:$4 sm:$0xff]  }
 0x73e   :  { %12200 = vmatpush1.bf16.msra.mxu0 %v16241_v17  ;;  %v16292_v17 = vld [vmem:[#allocation19 + $0x2d8] ss:$24 sps:$4 sm:$0xff]  }
 0x73f   :  { %12201 = vmatprep.subr.bf16.mxu0 %v16249_v29  ;;  %v16297_v29 = vld [vmem:[#allocation19 + $0x304] ss:$24 sps:$4 sm:$0xff]  }
 0x742   :  { %12202 = vmatpush1.bf16.msra.mxu0 %v16247_v35  ;;  %v16300_v35 = vld [vmem:[#allocation19 + $0x30c] ss:$24 sps:$4 sm:$0xff]  }
 0x743   :  { %12203 = vmatprep.subr.bf16.mxu0 %v16255_v60 }
 0x746   :  { %12204 = vmatpush1.bf16.msra.mxu0 %v16253_v63 }
 0x747   :  { %12205 = vmatprep.subr.bf16.mxu0 %v16261_v31 }
 0x74a   :  { %12206 = vmatpush1.bf16.msra.mxu0 %v16259_v6 }
 0x74b   :  { %12207 = vmatprep.subr.bf16.mxu0 %v16267_v44  ;;  %v16295_v44 = vld [vmem:[#allocation19 + $0x300] ss:$24 sps:$4 sm:$0xff]  }
 0x74e   :  { %12208 = vmatpush1.bf16.msra.mxu0 %v16265_v36  ;;  %v16298_v36 = vld [vmem:[#allocation19 + $0x308] ss:$24 sps:$4 sm:$0xff]  }
 0x74f   :  { %12209 = vmatprep.subr.bf16.mxu0 %v16273_v9 }
 0x752   :  { %12210 = vmatpush1.bf16.msra.mxu0 %v16271_v10 }
 0x753   :  { %12211 = vmatprep.subr.bf16.mxu0 %v16279_v11  ;;  %v16303_v11 = vld [vmem:[#allocation19 + $0x334] ss:$24 sps:$4 sm:$0xff]  }
 0x756   :  { %12212 = vmatpush1.bf16.msra.mxu0 %v16277_v52  ;;  %v16306_v52 = vld [vmem:[#allocation19 + $0x33c] ss:$24 sps:$4 sm:$0xff]  }
 0x757   :  { %12213 = vmatprep.subr.bf16.mxu0 %v16285_v12  ;;  %v16301_v12 = vld [vmem:[#allocation19 + $0x330] ss:$24 sps:$4 sm:$0xff]  }
 0x75a   :  { %12214 = vmatpush1.bf16.msra.mxu0 %v16283_v14  ;;  %v16304_v14 = vld [vmem:[#allocation19 + $0x338] ss:$24 sps:$4 sm:$0xff]  }
 0x75b   :  { %12215 = vmatprep.subr.bf16.mxu0 %v16291_v59  ;;  %v16363_v59 = vld [vmem:[#allocation19 + $0x514] ss:$24 sps:$4 sm:$0xff]  }
 0x75e   :  { %12216 = vmatpush1.bf16.msra.mxu0 %v16289_v5  ;;  %v16361_v5 = vld [vmem:[#allocation19 + $0x510] ss:$24 sps:$4 sm:$0xff]  }
 0x75f   :  { %12226 = vmatprep.subr.bf16.mxu0 %v16297_v29  ;;  %v16369_v29 = vld [vmem:[#allocation19 + $0x544] ss:$24 sps:$4 sm:$0xff]  }
 0x764   :  { %v9981_v55 = vpop.f32.mrb[80].mxu1 }
 0x765   :  { %v10022_v26 = vpop.f32.mrb[76].mxu0  ;;  %v9983_v27 = vpop.f32.mrb[81].mxu1 }
 0x766   :  { %v10024_v25 = vpop.f32.mrb[77].mxu0  ;;  %v10023_v18 = vadd.f32 %v10022_v26, %v9981_v55  ;;  %v9985_v39 = vpop.f32.mrb[82].mxu1  ;;  %v10111_v26 = vrot.slane %v17573_v51, %v17604_v53 }
 0x767   :  { %v10026_v42 = vpop.f32.mrb[78].mxu0  ;;  %v10025_v16 = vadd.f32 %v10024_v25, %v9983_v27  ;;  %v9986_v21 = vpop.f32.mrb[83].mxu1  ;;  %v10123_v25 = vrot.slane %v17577_v20, %v17604_v53 }
 0x768   :  { %v10027_v38 = vpop.f32.mrb[79].mxu0  ;;  %v10126_v27 = vadd.f32 %v10111_v26, %v17615_v8  ;;  %v10119_v42 = vrot.slane %v17589_v40, %v17604_v53  ;;  %v16204_v40 = vld [vmem:[#allocation19 + $0xc] ss:$24 sps:$4 sm:$0xff]   ;;  %v16202_v8 = vld [vmem:[#allocation19 + $0x8] ss:$24 sps:$4 sm:$0xff]  }
 0x769   :  { %v16312_v26 = vld [vmem:[#allocation19 + $0x36c] ss:$24 sps:$4 sm:$0xff]  }
 0x76a   :  { %v10278_v39 = vpack.c.bf16 %v10126_v27, %v10126_v27 }
 0x76c   :  { %v10293_v51 = vsel %vm656_vm3, %v10278_v39, 0 }
 0x78a   :  { %v10256_v32 = vpop.f32.mrb[80].mxu0 }
 0x78b   :  { %v10262_v56 = vmul.f32 0.03608439, %v10256_v32  ;;  %v10258_v30 = vpop.f32.mrb[81].mxu0 }
 0x78c   :  { %v10259_v28 = vpop.f32.mrb[82].mxu0  ;;  %v16210_v30 = vld [vmem:[#allocation19 + $0x3c] ss:$24 sps:$4 sm:$0xff]  }
 0x78d   :  { %v10260_v33 = vpop.f32.mrb[83].mxu0  ;;  %v10264_v23 = vsel %vm10263_vm8, %v10262_v56, -inf  ;;  %v16208_v28 = vld [vmem:[#allocation19 + $0x38] ss:$24 sps:$4 sm:$0xff]  }
 0x78e   :  { %10265 = vmax.xlane.f32.xlu0 %v10264_v23  ;;  %v16216_v33 = vld [vmem:[#allocation19 + $0x6c] ss:$24 sps:$4 sm:$0xff]   ;;  %v16214_v23 = vld [vmem:[#allocation19 + $0x68] ss:$24 sps:$4 sm:$0xff]  }
 0x7a4   :  { %v10063_v15 = vpop.f32.mrb[84].mxu1 }
 0x7a5   :  { %v17619_v45 = vadd.f32 %v10063_v15, %v10023_v18  ;;  %v10065_v13 = vpop.f32.mrb[85].mxu1  ;;  %v16222_v15 = vld [vmem:[#allocation19 + $0x9c] ss:$24 sps:$4 sm:$0xff]  }
 0x7a6   :  { %v17621_v49 = vadd.f32 %v10065_v13, %v10025_v16  ;;  %v10067_v4 = vpop.f32.mrb[86].mxu1  ;;  %v16228_v13 = vld [vmem:[#allocation19 + $0xcc] ss:$24 sps:$4 sm:$0xff]  }
 0x7a7   :  { %v10068_v57 = vpop.f32.mrb[87].mxu1  ;;  %v10128_v32 = vadd.f32 %v10119_v42, %v17619_v45  ;;  %v16220_v45 = vld [vmem:[#allocation19 + $0x98] ss:$24 sps:$4 sm:$0xff]  }
 0x7a8   :  { %v10129_v16 = vadd.f32 %v10123_v25, %v17621_v49  ;;  %v16226_v49 = vld [vmem:[#allocation19 + $0xc8] ss:$24 sps:$4 sm:$0xff]   ;;  %v16232_v4 = vld [vmem:[#allocation19 + $0xf8] ss:$24 sps:$4 sm:$0xff]   ;;  %v16240_v57 = vld [vmem:[#allocation19 + $0x12c] ss:$24 sps:$4 sm:$0xff]  }
 0x7a9   :  { %v10280_v20 = vpack.c.bf16 %v10128_v32, %v10128_v32  ;;  %v16307_v42 = vld [vmem:[#allocation19 + $0x360] ss:$24 sps:$4 sm:$0xff]   ;;  %v16318_v32 = vld [vmem:[#allocation19 + $0x39c] ss:$24 sps:$4 sm:$0xff]  }
 0x7ab   :  { %v10299_v53 = vsel %vm656_vm3, %v10280_v20, 0  ;;  %v16321_v20 = vld [vmem:[#allocation19 + $0x3c4] ss:$24 sps:$4 sm:$0xff]  }
 0x81b   :  { %v10266_v19 = vpop.xlane.xlu0 %10265 }
 0x81c   :  { %v10267_v50 = vsub.f32 %v10262_v56, %v10266_v19  ;;  %v10281_v56 = vpack.c.bf16 %v10129_v16, %v10129_v16  ;;  %v16238_v19 = vld [vmem:[#allocation19 + $0x128] ss:$24 sps:$4 sm:$0xff]  }
 0x81d   :  { %v16310_v16 = vld [vmem:[#allocation19 + $0x368] ss:$24 sps:$4 sm:$0xff]  }
 0x81e   :  { %v10268_v2 = vmul.f32 1.442695, %v10267_v50  ;;  %v16246_v50 = vld [vmem:[#allocation19 + $0x15c] ss:$24 sps:$4 sm:$0xff]  }
 0x820   :  { %16631 = vpow2.f32 %v10268_v2  ;;  %v16244_v2 = vld [vmem:[#allocation19 + $0x158] ss:$24 sps:$4 sm:$0xff]  }
 0x82a   :  { %v17623_v48 = vpop.eup %16631 }
 0x82b   :  { %v10270_v58 = vsel %vm10263_vm8, %v17623_v48, 0.0 }
 0x82c   :  { %10271 = vadd.xlane.f32.xlu0 %v10270_v58  ;;  %v16250_v58 = vld [vmem:[#allocation19 + $0x188] ss:$24 sps:$4 sm:$0xff]  }
 0x8b9   :  { %v10272_v55 = vpop.xlane.xlu0 %10271 }
 0x8ba   :  { %16633 = vrcp.f32 %v10272_v55  ;;  %v16309_v55 = vld [vmem:[#allocation19 + $0x364] ss:$24 sps:$4 sm:$0xff]  }
 0x8c4   :  { %v16634_v18 = vpop.eup %16633 }
 0x8c5   :  { %v10274_v21 = vmul.f32 %v16634_v18, %v17623_v48  ;;  %v16252_v48 = vld [vmem:[#allocation19 + $0x18c] ss:$24 sps:$4 sm:$0xff]  }
 0x8c7   :  { %v10275_v38 = vpack.c.bf16 %v10274_v21, %v10274_v21 }
 0x8c9   :  { %13884 = vmatmul.mubr.msk.bf16.vlgmr.msra.gmra.mrb[88].mxu1 %vm10282_vm9, %v10275_v38 }
 0x8ca   :  { %10346 = vmatpush1.bf16.msra.mxu1 %v10293_v51  ;;  %10377 = vmatprep.mubr.bf16.mxu1 %v16971_v34  ;;  %v16316_v51 = vld [vmem:[#allocation19 + $0x398] ss:$24 sps:$4 sm:$0xff]  }
 0x8cb   :  { %13887 = vmatprep.subr.msk.bf16.mxu1 %vm656_vm3, %v10281_v56  ;;  %v16313_v56 = vld [vmem:[#allocation19 + $0x390] ss:$24 sps:$4 sm:$0xff]  }
 0x8d1   :  { %13886 = vmatmul.mubr.msk.bf16.vlgmr.msra.gmra.mrb[92].mxu1 %vm10282_vm9, %v10275_v38 }
 0x8d2   :  { %10387 = vmatpush1.bf16.msra.mxu1 %v10299_v53  ;;  %10418 = vmatprep.mubr.bf16.mxu1 %v16971_v34  ;;  %v16234_v34 = vld [vmem:[#allocation19 + $0xfc] ss:$24 sps:$4 sm:$0xff]  }
 0x8d3   :  { %12308 = vmatprep.subr.bf16.mxu1 %v16204_v40  ;;  %v16324_v40 = vld [vmem:[#allocation19 + $0x3cc] ss:$24 sps:$4 sm:$0xff]  }
 0x8d9   :  { %13888 = vmatmul.mubr.msk.bf16.vlgmr.msra.gmra.mrb[96].mxu1 %vm10282_vm9, %v10275_v38  ;;  %v16315_v38 = vld [vmem:[#allocation19 + $0x394] ss:$24 sps:$4 sm:$0xff]  }
 0x8da   :  { %12309 = vmatpush1.bf16.msra.mxu1 %v16202_v8 }
 0x8db   :  { %12310 = vmatprep.subr.bf16.mxu1 %v16210_v30 }
 0x8de   :  { %12311 = vmatpush1.bf16.msra.mxu1 %v16208_v28  ;;  %v16319_v28 = vld [vmem:[#allocation19 + $0x3c0] ss:$24 sps:$4 sm:$0xff]  }
 0x8df   :  { %12312 = vmatprep.subr.bf16.mxu1 %v16216_v33  ;;  %v16322_v33 = vld [vmem:[#allocation19 + $0x3c8] ss:$24 sps:$4 sm:$0xff]  }
 0x8e2   :  { %12313 = vmatpush1.bf16.msra.mxu1 %v16214_v23 }
 0x8e3   :  { %12314 = vmatprep.subr.bf16.mxu1 %v16222_v15  ;;  %v16327_v15 = vld [vmem:[#allocation19 + $0x3f4] ss:$24 sps:$4 sm:$0xff]  }
 0x8e6   :  { %12315 = vmatpush1.bf16.msra.mxu1 %v16220_v45  ;;  %v16330_v45 = vld [vmem:[#allocation19 + $0x3fc] ss:$24 sps:$4 sm:$0xff]  }
 0x8e7   :  { %12316 = vmatprep.subr.bf16.mxu1 %v16228_v13  ;;  %v16325_v13 = vld [vmem:[#allocation19 + $0x3f0] ss:$24 sps:$4 sm:$0xff]  }
 0x8ea   :  { %12317 = vmatpush1.bf16.msra.mxu1 %v16226_v49  ;;  %v16328_v49 = vld [vmem:[#allocation19 + $0x3f8] ss:$24 sps:$4 sm:$0xff]  }
 0x8eb   :  { %12318 = vmatprep.subr.bf16.mxu1 %v16234_v34  ;;  %v16333_v34 = vld [vmem:[#allocation19 + $0x424] ss:$24 sps:$4 sm:$0xff]  }
 0x8ee   :  { %12319 = vmatpush1.bf16.msra.mxu1 %v16232_v4  ;;  %v16336_v4 = vld [vmem:[#allocation19 + $0x42c] ss:$24 sps:$4 sm:$0xff]  }
 0x8ef   :  { %12320 = vmatprep.subr.bf16.mxu1 %v16240_v57  ;;  %v16331_v57 = vld [vmem:[#allocation19 + $0x420] ss:$24 sps:$4 sm:$0xff]  }
 0x8f2   :  { %12321 = vmatpush1.bf16.msra.mxu1 %v16238_v19  ;;  %v16334_v19 = vld [vmem:[#allocation19 + $0x428] ss:$24 sps:$4 sm:$0xff]  }
 0x8f3   :  { %12322 = vmatprep.subr.bf16.mxu1 %v16246_v50  ;;  %v16339_v50 = vld [vmem:[#allocation19 + $0x454] ss:$24 sps:$4 sm:$0xff]  }
 0x8f6   :  { %12323 = vmatpush1.bf16.msra.mxu1 %v16244_v2  ;;  %v16342_v2 = vld [vmem:[#allocation19 + $0x45c] ss:$24 sps:$4 sm:$0xff]  }
 0x8f7   :  { %12324 = vmatprep.subr.bf16.mxu1 %v16252_v48  ;;  %v16337_v48 = vld [vmem:[#allocation19 + $0x450] ss:$24 sps:$4 sm:$0xff]  }
 0x8fa   :  { %12325 = vmatpush1.bf16.msra.mxu1 %v16250_v58  ;;  %v16340_v58 = vld [vmem:[#allocation19 + $0x458] ss:$24 sps:$4 sm:$0xff]  }
 0x8fb   :  { %12326 = vmatprep.subr.bf16.mxu1 %v16258_v62  ;;  %v16345_v62 = vld [vmem:[#allocation19 + $0x484] ss:$24 sps:$4 sm:$0xff]  }
 0x8fe   :  { %12327 = vmatpush1.bf16.msra.mxu1 %v16256_v54  ;;  %v16348_v54 = vld [vmem:[#allocation19 + $0x48c] ss:$24 sps:$4 sm:$0xff]  }
 0x8ff   :  { %12328 = vmatprep.subr.bf16.mxu1 %v16264_v61  ;;  %v16343_v61 = vld [vmem:[#allocation19 + $0x480] ss:$24 sps:$4 sm:$0xff]  }
 0x902   :  { %12329 = vmatpush1.bf16.msra.mxu1 %v16262_v43  ;;  %v16346_v43 = vld [vmem:[#allocation19 + $0x488] ss:$24 sps:$4 sm:$0xff]  }
 0x903   :  { %12330 = vmatprep.subr.bf16.mxu1 %v16270_v7  ;;  %v16351_v7 = vld [vmem:[#allocation19 + $0x4b4] ss:$24 sps:$4 sm:$0xff]  }
 0x906   :  { %12331 = vmatpush1.bf16.msra.mxu1 %v16268_v0  ;;  %v16354_v0 = vld [vmem:[#allocation19 + $0x4bc] ss:$24 sps:$4 sm:$0xff]  }
 0x907   :  { %12332 = vmatprep.subr.bf16.mxu1 %v16276_v24  ;;  %v16349_v24 = vld [vmem:[#allocation19 + $0x4b0] ss:$24 sps:$4 sm:$0xff]  }
 0x90a   :  { %12333 = vmatpush1.bf16.msra.mxu1 %v16274_v1  ;;  %v16352_v1 = vld [vmem:[#allocation19 + $0x4b8] ss:$24 sps:$4 sm:$0xff]  }
 0x90b   :  { %12334 = vmatprep.subr.bf16.mxu1 %v16282_v41  ;;  %v16357_v41 = vld [vmem:[#allocation19 + $0x4e4] ss:$24 sps:$4 sm:$0xff]  }
 0x90e   :  { %12335 = vmatpush1.bf16.msra.mxu1 %v16280_v3  ;;  %v16360_v3 = vld [vmem:[#allocation19 + $0x4ec] ss:$24 sps:$4 sm:$0xff]  }
 0x90f   :  { %12336 = vmatprep.subr.bf16.mxu1 %v16288_v22  ;;  %v16355_v22 = vld [vmem:[#allocation19 + $0x4e0] ss:$24 sps:$4 sm:$0xff]  }
 0x912   :  { %12337 = vmatpush1.bf16.msra.mxu1 %v16286_v47  ;;  %v16358_v47 = vld [vmem:[#allocation19 + $0x4e8] ss:$24 sps:$4 sm:$0xff]  }
 0x913   :  { %12338 = vmatprep.subr.bf16.mxu1 %v16294_v46  ;;  %v16366_v46 = vld [vmem:[#allocation19 + $0x51c] ss:$24 sps:$4 sm:$0xff]  }
 0x916   :  { %12339 = vmatpush1.bf16.msra.mxu1 %v16292_v17  ;;  %v16364_v17 = vld [vmem:[#allocation19 + $0x518] ss:$24 sps:$4 sm:$0xff]  }
 0x917   :  { %12349 = vmatprep.subr.bf16.mxu1 %v16300_v35  ;;  %v16372_v35 = vld [vmem:[#allocation19 + $0x54c] ss:$24 sps:$4 sm:$0xff]  }
 0x99c   :  { %v10338_v60 = vpop.f32.mrb[88].mxu1 }
 0x99d   :  { %v10340_v63 = vpop.f32.mrb[89].mxu1  ;;  %v17647_v9 = vpack.c.bf16 %v10338_v60, %v10338_v60  ;;  %v16367_v60 = vld [vmem:[#allocation19 + $0x540] ss:$24 sps:$4 sm:$0xff]  }
 0x99e   :  { %v17645_v31 = vpack.c.bf16 %v10340_v63, %v10340_v63  ;;  %v10342_v6 = vpop.f32.mrb[90].mxu1  ;;  %v16370_v63 = vld [vmem:[#allocation19 + $0x548] ss:$24 sps:$4 sm:$0xff]  }
 0x99f   :  { %v10343_v10 = vpop.f32.mrb[91].mxu1  ;;  %v16375_v6 = vld [vmem:[#allocation19 + $0x574] ss:$24 sps:$4 sm:$0xff]  }
 0x9a0   :  { %12217 = vmatprep.mubr.bf16.mxu0 %v17645_v31  ;;  %12340 = vmatprep.mubr.bf16.mxu1 %v17645_v31  ;;  %v16376_v10 = vld [vmem:[#allocation19 + $0x578] ss:$24 sps:$4 sm:$0xff]  }
 0x9a1   :  { %12218 = vmatmul.mubr.bf16.vlgmr.msra.gmra.mrb[84].mxu0 %v17647_v9  ;;  %12341 = vmatmul.mubr.bf16.vlgmr.msra.gmra.mrb[100].mxu1 %v17647_v9 }
 0x9a2   :  { %12227 = vmatpush1.bf16.msra.mxu0 %v16295_v44  ;;  %12350 = vmatpush1.bf16.msra.mxu1 %v16298_v36  ;;  %v16378_v44 = vld [vmem:[#allocation19 + $0x57c] ss:$24 sps:$4 sm:$0xff]   ;;  %v16373_v36 = vld [vmem:[#allocation19 + $0x570] ss:$24 sps:$4 sm:$0xff]  }
 0x9a3   :  { %12228 = vmatprep.subr.bf16.mxu0 %v16303_v11  ;;  %12351 = vmatprep.subr.bf16.mxu1 %v16306_v52  ;;  %v16381_v11 = vld [vmem:[#allocation19 + $0x5a4] ss:$24 sps:$4 sm:$0xff]  }
 0x9a4   :  { %v17653_v27 = vpop.f32.mrb[92].mxu1  ;;  %v16384_v52 = vld [vmem:[#allocation19 + $0x5ac] ss:$24 sps:$4 sm:$0xff]  }
 0x9a5   :  { %v10381_v25 = vpop.f32.mrb[93].mxu1 }
 0x9a6   :  { %v17655_v18 = vpack.c.bf16 %v10381_v25, %v10381_v25  ;;  %12229 = vmatpush1.bf16.msra.mxu0 %v16301_v12  ;;  %12352 = vmatpush1.bf16.msra.mxu1 %v16304_v14  ;;  %v10383_v39 = vpop.f32.mrb[94].mxu1  ;;  %v16379_v12 = vld [vmem:[#allocation19 + $0x5a0] ss:$24 sps:$4 sm:$0xff]   ;;  %v16385_v25 = vld [vmem:[#allocation19 + $0x5d0] ss:$24 sps:$4 sm:$0xff]  }
 0x9a7   :  { %v10384_v21 = vpop.f32.mrb[95].mxu1  ;;  %12230 = vmatprep.subr.bf16.mxu0 %v16309_v55  ;;  %12353 = vmatprep.subr.bf16.mxu1 %v16312_v26  ;;  %v16382_v14 = vld [vmem:[#allocation19 + $0x5a8] ss:$24 sps:$4 sm:$0xff]   ;;  %v16387_v55 = vld [vmem:[#allocation19 + $0x5d4] ss:$24 sps:$4 sm:$0xff]  }
 0x9a8   :  { %12258 = vmatprep.mubr.bf16.mxu0 %v17655_v18  ;;  %12381 = vmatprep.mubr.bf16.mxu1 %v17655_v18  ;;  %v16390_v26 = vld [vmem:[#allocation19 + $0x5dc] ss:$24 sps:$4 sm:$0xff]   ;;  %v16388_v39 = vld [vmem:[#allocation19 + $0x5d8] ss:$24 sps:$4 sm:$0xff]  }
 0x9a9   :  { %v16391_v21 = vld [vmem:[#allocation19 + $0x600] ss:$24 sps:$4 sm:$0xff]  }
 0x9aa   :  { %12231 = vmatpush1.bf16.msra.mxu0 %v16307_v42  ;;  %12354 = vmatpush1.bf16.msra.mxu1 %v16310_v16  ;;  %v16393_v42 = vld [vmem:[#allocation19 + $0x604] ss:$24 sps:$4 sm:$0xff]  }
 0x9ab   :  { %12232 = vmatprep.subr.bf16.mxu0 %v16315_v38  ;;  %12355 = vmatprep.subr.bf16.mxu1 %v16318_v32  ;;  %v16396_v16 = vld [vmem:[#allocation19 + $0x60c] ss:$24 sps:$4 sm:$0xff]   ;;  %v17665_v38 = vpack.c.bf16 %v17653_v27, %v17653_v27  ;;  %v16394_v32 = vld [vmem:[#allocation19 + $0x608] ss:$24 sps:$4 sm:$0xff]   ;;  %v16400_v27 = vld [vmem:[#allocation19 + $0x638] ss:$24 sps:$4 sm:$0xff]  }
 0x9ac   :  { %v17659_v53 = vpop.f32.mrb[96].mxu1 }
 0x9ad   :  { %v17661_v8 = vpop.f32.mrb[97].mxu1 }
 0x9ae   :  { %12233 = vmatpush1.bf16.msra.mxu0 %v16313_v56  ;;  %12356 = vmatpush1.bf16.msra.mxu1 %v16316_v51  ;;  %v10424_v30 = vpop.f32.mrb[98].mxu1  ;;  %v17669_v56 = vpack.c.bf16 %v17661_v8, %v17661_v8  ;;  %v16399_v51 = vld [vmem:[#allocation19 + $0x634] ss:$24 sps:$4 sm:$0xff]   ;;  %v16403_v8 = vld [vmem:[#allocation19 + $0x660] ss:$24 sps:$4 sm:$0xff]  }
 0x9af   :  { %v10425_v23 = vpop.f32.mrb[99].mxu1  ;;  %12234 = vmatprep.subr.bf16.mxu0 %v16321_v20  ;;  %12357 = vmatprep.subr.bf16.mxu1 %v16324_v40  ;;  %v16402_v20 = vld [vmem:[#allocation19 + $0x63c] ss:$24 sps:$4 sm:$0xff]   ;;  %v16397_v40 = vld [vmem:[#allocation19 + $0x630] ss:$24 sps:$4 sm:$0xff]  }
 0x9b0   :  { %v16405_v30 = vld [vmem:[#allocation19 + $0x664] ss:$24 sps:$4 sm:$0xff]   ;;  %v16411_v23 = vld [vmem:[#allocation19 + $0x694] ss:$24 sps:$4 sm:$0xff]  }
 0x9b2   :  { %12235 = vmatpush1.bf16.msra.mxu0 %v16319_v28  ;;  %12358 = vmatpush1.bf16.msra.mxu1 %v16322_v33  ;;  %v16408_v28 = vld [vmem:[#allocation19 + $0x66c] ss:$24 sps:$4 sm:$0xff]   ;;  %v16406_v33 = vld [vmem:[#allocation19 + $0x668] ss:$24 sps:$4 sm:$0xff]  }
 0x9b3   :  { %12236 = vmatprep.subr.bf16.mxu0 %v16327_v15  ;;  %12359 = vmatprep.subr.bf16.mxu1 %v16330_v45  ;;  %v16414_v15 = vld [vmem:[#allocation19 + $0x69c] ss:$24 sps:$4 sm:$0xff]   ;;  %v16409_v45 = vld [vmem:[#allocation19 + $0x690] ss:$24 sps:$4 sm:$0xff]  }
 0x9b6   :  { %12237 = vmatpush1.bf16.msra.mxu0 %v16325_v13  ;;  %12360 = vmatpush1.bf16.msra.mxu1 %v16328_v49  ;;  %v16412_v13 = vld [vmem:[#allocation19 + $0x698] ss:$24 sps:$4 sm:$0xff]   ;;  %v16417_v49 = vld [vmem:[#allocation19 + $0x6c4] ss:$24 sps:$4 sm:$0xff]  }
 0x9b7   :  { %12238 = vmatprep.subr.bf16.mxu0 %v16333_v34  ;;  %12361 = vmatprep.subr.bf16.mxu1 %v16336_v4  ;;  %v16420_v34 = vld [vmem:[#allocation19 + $0x6cc] ss:$24 sps:$4 sm:$0xff]   ;;  %v16415_v4 = vld [vmem:[#allocation19 + $0x6c0] ss:$24 sps:$4 sm:$0xff]  }
 0x9ba   :  { %12239 = vmatpush1.bf16.msra.mxu0 %v16331_v57  ;;  %12362 = vmatpush1.bf16.msra.mxu1 %v16334_v19  ;;  %v16418_v57 = vld [vmem:[#allocation19 + $0x6c8] ss:$24 sps:$4 sm:$0xff]   ;;  %v16423_v19 = vld [vmem:[#allocation19 + $0x6f4] ss:$24 sps:$4 sm:$0xff]  }
 0x9bb   :  { %12240 = vmatprep.subr.bf16.mxu0 %v16339_v50  ;;  %12363 = vmatprep.subr.bf16.mxu1 %v16342_v2  ;;  %v16426_v50 = vld [vmem:[#allocation19 + $0x6fc] ss:$24 sps:$4 sm:$0xff]   ;;  %v16421_v2 = vld [vmem:[#allocation19 + $0x6f0] ss:$24 sps:$4 sm:$0xff]  }
 0x9be   :  { %12241 = vmatpush1.bf16.msra.mxu0 %v16337_v48  ;;  %12364 = vmatpush1.bf16.msra.mxu1 %v16340_v58  ;;  %v16424_v48 = vld [vmem:[#allocation19 + $0x6f8] ss:$24 sps:$4 sm:$0xff]   ;;  %v16429_v58 = vld [vmem:[#allocation19 + $0x724] ss:$24 sps:$4 sm:$0xff]  }
 0x9bf   :  { %12242 = vmatprep.subr.bf16.mxu0 %v16345_v62  ;;  %12365 = vmatprep.subr.bf16.mxu1 %v16348_v54  ;;  %v16432_v62 = vld [vmem:[#allocation19 + $0x72c] ss:$24 sps:$4 sm:$0xff]   ;;  %v16427_v54 = vld [vmem:[#allocation19 + $0x720] ss:$24 sps:$4 sm:$0xff]  }
 0x9c2   :  { %12243 = vmatpush1.bf16.msra.mxu0 %v16343_v61  ;;  %12366 = vmatpush1.bf16.msra.mxu1 %v16346_v43  ;;  %v16430_v61 = vld [vmem:[#allocation19 + $0x728] ss:$24 sps:$4 sm:$0xff]   ;;  %v16435_v43 = vld [vmem:[#allocation19 + $0x754] ss:$24 sps:$4 sm:$0xff]  }
 0x9c3   :  { %12244 = vmatprep.subr.bf16.mxu0 %v16351_v7  ;;  %12367 = vmatprep.subr.bf16.mxu1 %v16354_v0  ;;  %v16438_v7 = vld [vmem:[#allocation19 + $0x75c] ss:$24 sps:$4 sm:$0xff]   ;;  %v16433_v0 = vld [vmem:[#allocation19 + $0x750] ss:$24 sps:$4 sm:$0xff]  }
 0x9c6   :  { %12245 = vmatpush1.bf16.msra.mxu0 %v16349_v24  ;;  %12368 = vmatpush1.bf16.msra.mxu1 %v16352_v1  ;;  %v16436_v24 = vld [vmem:[#allocation19 + $0x758] ss:$24 sps:$4 sm:$0xff]   ;;  %v16441_v1 = vld [vmem:[#allocation19 + $0x784] ss:$24 sps:$4 sm:$0xff]  }
 0x9c7   :  { %12246 = vmatprep.subr.bf16.mxu0 %v16357_v41  ;;  %12369 = vmatprep.subr.bf16.mxu1 %v16360_v3  ;;  %v16444_v41 = vld [vmem:[#allocation19 + $0x78c] ss:$24 sps:$4 sm:$0xff]   ;;  %v16439_v3 = vld [vmem:[#allocation19 + $0x780] ss:$24 sps:$4 sm:$0xff]  }
 0x9ca   :  { %12247 = vmatpush1.bf16.msra.mxu0 %v16355_v22  ;;  %12370 = vmatpush1.bf16.msra.mxu1 %v16358_v47  ;;  %v16442_v22 = vld [vmem:[#allocation19 + $0x788] ss:$24 sps:$4 sm:$0xff]   ;;  %v16447_v47 = vld [vmem:[#allocation19 + $0x7b4] ss:$24 sps:$4 sm:$0xff]  }
 0x9cb   :  { %12248 = vmatprep.subr.bf16.mxu0 %v16363_v59  ;;  %12371 = vmatprep.subr.bf16.mxu1 %v16366_v46  ;;  %v16450_v59 = vld [vmem:[#allocation19 + $0x7bc] ss:$24 sps:$4 sm:$0xff]   ;;  %v16445_v46 = vld [vmem:[#allocation19 + $0x7b0] ss:$24 sps:$4 sm:$0xff]  }
 0x9ce   :  { %12249 = vmatpush1.bf16.msra.mxu0 %v16361_v5  ;;  %12372 = vmatpush1.bf16.msra.mxu1 %v16364_v17  ;;  %v16448_v5 = vld [vmem:[#allocation19 + $0x7b8] ss:$24 sps:$4 sm:$0xff]   ;;  %v16453_v17 = vld [vmem:[#allocation19 + $0x7e4] ss:$24 sps:$4 sm:$0xff]  }
 0x9cf   :  { %12250 = vmatprep.subr.bf16.mxu0 %v16369_v29  ;;  %12373 = vmatprep.subr.bf16.mxu1 %v16372_v35  ;;  %v16456_v29 = vld [vmem:[#allocation19 + $0x7ec] ss:$24 sps:$4 sm:$0xff]   ;;  %v16451_v35 = vld [vmem:[#allocation19 + $0x7e0] ss:$24 sps:$4 sm:$0xff]  }
 0x9d2   :  { %12251 = vmatpush1.bf16.msra.mxu0 %v16367_v60  ;;  %12374 = vmatpush1.bf16.msra.mxu1 %v16370_v63  ;;  %v16454_v60 = vld [vmem:[#allocation19 + $0x7e8] ss:$24 sps:$4 sm:$0xff]   ;;  %v16459_v63 = vld [vmem:[#allocation19 + $0x814] ss:$24 sps:$4 sm:$0xff]  }
 0x9d3   :  { %12252 = vmatprep.subr.bf16.mxu0 %v16375_v6  ;;  %12375 = vmatprep.subr.bf16.mxu1 %v16378_v44  ;;  %v16462_v6 = vld [vmem:[#allocation19 + $0x81c] ss:$24 sps:$4 sm:$0xff]   ;;  %v16457_v44 = vld [vmem:[#allocation19 + $0x810] ss:$24 sps:$4 sm:$0xff]  }
 0x9d6   :  { %12253 = vmatpush1.bf16.msra.mxu0 %v16373_v36  ;;  %12376 = vmatpush1.bf16.msra.mxu1 %v16376_v10  ;;  %v16460_v36 = vld [vmem:[#allocation19 + $0x818] ss:$24 sps:$4 sm:$0xff]   ;;  %v16465_v10 = vld [vmem:[#allocation19 + $0x844] ss:$24 sps:$4 sm:$0xff]  }
 0x9d7   :  { %12254 = vmatprep.subr.bf16.mxu0 %v16381_v11  ;;  %12377 = vmatprep.subr.bf16.mxu1 %v16384_v52  ;;  %v16468_v11 = vld [vmem:[#allocation19 + $0x84c] ss:$24 sps:$4 sm:$0xff]   ;;  %v16463_v52 = vld [vmem:[#allocation19 + $0x840] ss:$24 sps:$4 sm:$0xff]  }
 0x9da   :  { %12255 = vmatpush1.bf16.msra.mxu0 %v16379_v12  ;;  %12378 = vmatpush1.bf16.msra.mxu1 %v16382_v14  ;;  %v16466_v12 = vld [vmem:[#allocation19 + $0x848] ss:$24 sps:$4 sm:$0xff]   ;;  %v16471_v14 = vld [vmem:[#allocation19 + $0x874] ss:$24 sps:$4 sm:$0xff]  }
 0x9db   :  { %12256 = vmatprep.subr.bf16.mxu0 %v16387_v55  ;;  %12379 = vmatprep.subr.bf16.mxu1 %v16390_v26  ;;  %v16474_v55 = vld [vmem:[#allocation19 + $0x87c] ss:$24 sps:$4 sm:$0xff]   ;;  %v16469_v26 = vld [vmem:[#allocation19 + $0x870] ss:$24 sps:$4 sm:$0xff]  }
 0x9de   :  { %12257 = vmatpush1.bf16.msra.mxu0 %v16385_v25  ;;  %12380 = vmatpush1.bf16.msra.mxu1 %v16388_v39  ;;  %v16472_v25 = vld [vmem:[#allocation19 + $0x878] ss:$24 sps:$4 sm:$0xff]   ;;  %v16477_v39 = vld [vmem:[#allocation19 + $0x8a4] ss:$24 sps:$4 sm:$0xff]  }
 0x9df   :  { %12267 = vmatprep.subr.bf16.mxu0 %v16393_v42  ;;  %12390 = vmatprep.subr.bf16.mxu1 %v16396_v16  ;;  %v16480_v42 = vld [vmem:[#allocation19 + $0x8ac] ss:$24 sps:$4 sm:$0xff]   ;;  %v16475_v16 = vld [vmem:[#allocation19 + $0x8a0] ss:$24 sps:$4 sm:$0xff]  }
 0x9e1   :  { %12259 = vmatmul.mubr.bf16.vlgmr.msra.gmra.mrb[84].mxu0 %v17665_v38  ;;  %12382 = vmatmul.mubr.bf16.vlgmr.msra.gmra.mrb[100].mxu1 %v17665_v38 }
 0x9e2   :  { %12268 = vmatpush1.bf16.msra.mxu0 %v16391_v21  ;;  %12299 = vmatprep.mubr.bf16.mxu0 %v17669_v56  ;;  %v16478_v21 = vld [vmem:[#allocation19 + $0x8a8] ss:$24 sps:$4 sm:$0xff]  }
 0x9e3   :  { %12391 = vmatpush1.bf16.msra.mxu1 %v16394_v32  ;;  %12422 = vmatprep.mubr.bf16.mxu1 %v17669_v56  ;;  %v16483_v32 = vld [vmem:[#allocation19 + $0x8d4] ss:$24 sps:$4 sm:$0xff]  }
 0x9e4   :  { %12269 = vmatprep.subr.bf16.mxu0 %v16399_v51  ;;  %12392 = vmatprep.subr.bf16.mxu1 %v16402_v20  ;;  %v16486_v51 = vld [vmem:[#allocation19 + $0x8dc] ss:$24 sps:$4 sm:$0xff]   ;;  %v16481_v20 = vld [vmem:[#allocation19 + $0x8d0] ss:$24 sps:$4 sm:$0xff]  }
 0x9e6   :  { %12270 = vmatpush1.bf16.msra.mxu0 %v16397_v40  ;;  %v16484_v40 = vld [vmem:[#allocation19 + $0x8d8] ss:$24 sps:$4 sm:$0xff]  }
 0x9e7   :  { %12393 = vmatpush1.bf16.msra.mxu1 %v16400_v27  ;;  %12271 = vmatprep.subr.bf16.mxu0 %v16405_v30  ;;  %v16489_v27 = vld [vmem:[#allocation19 + $0x14] ss:$24 sps:$4 sm:$0xff]   ;;  %v16487_v30 = vld [vmem:[#allocation19 + $0x10] ss:$24 sps:$4 sm:$0xff]  }
 0x9e8   :  { %12394 = vmatprep.subr.bf16.mxu1 %v16408_v28  ;;  %v17677_v28 = vpack.c.bf16 %v17659_v53, %v17659_v53  ;;  %v16496_v53 = vld [vmem:[#allocation19 + $0xa0] ss:$24 sps:$4 sm:$0xff]  }
 0x9ea   :  { %12272 = vmatpush1.bf16.msra.mxu0 %v16403_v8  ;;  %v16492_v8 = vld [vmem:[#allocation19 + $0x44] ss:$24 sps:$4 sm:$0xff]  }
 0x9eb   :  { %12395 = vmatpush1.bf16.msra.mxu1 %v16406_v33  ;;  %12273 = vmatprep.subr.bf16.mxu0 %v16411_v23  ;;  %v16490_v33 = vld [vmem:[#allocation19 + $0x40] ss:$24 sps:$4 sm:$0xff]   ;;  %v16495_v23 = vld [vmem:[#allocation19 + $0x74] ss:$24 sps:$4 sm:$0xff]  }
 0x9ec   :  { %12396 = vmatprep.subr.bf16.mxu1 %v16414_v15  ;;  %v16493_v15 = vld [vmem:[#allocation19 + $0x70] ss:$24 sps:$4 sm:$0xff]  }
 0x9ee   :  { %12274 = vmatpush1.bf16.msra.mxu0 %v16409_v45  ;;  %v16498_v45 = vld [vmem:[#allocation19 + $0xa4] ss:$24 sps:$4 sm:$0xff]  }
 0x9ef   :  { %12397 = vmatpush1.bf16.msra.mxu1 %v16412_v13  ;;  %12275 = vmatprep.subr.bf16.mxu0 %v16417_v49  ;;  %v16501_v13 = vld [vmem:[#allocation19 + $0xd4] ss:$24 sps:$4 sm:$0xff]   ;;  %v16499_v49 = vld [vmem:[#allocation19 + $0xd0] ss:$24 sps:$4 sm:$0xff]  }
 0x9f0   :  { %12398 = vmatprep.subr.bf16.mxu1 %v16420_v34  ;;  %v16504_v34 = vld [vmem:[#allocation19 + $0x104] ss:$24 sps:$4 sm:$0xff]  }
 0x9f2   :  { %12276 = vmatpush1.bf16.msra.mxu0 %v16415_v4  ;;  %v16502_v4 = vld [vmem:[#allocation19 + $0x100] ss:$24 sps:$4 sm:$0xff]  }
 0x9f3   :  { %12399 = vmatpush1.bf16.msra.mxu1 %v16418_v57  ;;  %12277 = vmatprep.subr.bf16.mxu0 %v16423_v19  ;;  %v16507_v57 = vld [vmem:[#allocation19 + $0x134] ss:$24 sps:$4 sm:$0xff]   ;;  %v16510_v19 = vld [vmem:[#allocation19 + $0x164] ss:$24 sps:$4 sm:$0xff]  }
 0x9f4   :  { %12400 = vmatprep.subr.bf16.mxu1 %v16426_v50  ;;  %v16508_v50 = vld [vmem:[#allocation19 + $0x160] ss:$24 sps:$4 sm:$0xff]  }
 0x9f6   :  { %12278 = vmatpush1.bf16.msra.mxu0 %v16421_v2  ;;  %v16513_v2 = vld [vmem:[#allocation19 + $0x194] ss:$24 sps:$4 sm:$0xff]  }
 0x9f7   :  { %12401 = vmatpush1.bf16.msra.mxu1 %v16424_v48  ;;  %12279 = vmatprep.subr.bf16.mxu0 %v16429_v58  ;;  %v16511_v48 = vld [vmem:[#allocation19 + $0x190] ss:$24 sps:$4 sm:$0xff]   ;;  %v16516_v58 = vld [vmem:[#allocation19 + $0x1c4] ss:$24 sps:$4 sm:$0xff]  }
 0x9f8   :  { %12402 = vmatprep.subr.bf16.mxu1 %v16432_v62  ;;  %v16514_v62 = vld [vmem:[#allocation19 + $0x1c0] ss:$24 sps:$4 sm:$0xff]  }
 0x9fa   :  { %12280 = vmatpush1.bf16.msra.mxu0 %v16427_v54  ;;  %v16519_v54 = vld [vmem:[#allocation19 + $0x1f4] ss:$24 sps:$4 sm:$0xff]  }
 0x9fb   :  { %12403 = vmatpush1.bf16.msra.mxu1 %v16430_v61  ;;  %12281 = vmatprep.subr.bf16.mxu0 %v16435_v43  ;;  %v16517_v61 = vld [vmem:[#allocation19 + $0x1f0] ss:$24 sps:$4 sm:$0xff]   ;;  %v16522_v43 = vld [vmem:[#allocation19 + $0x224] ss:$24 sps:$4 sm:$0xff]  }
 0x9fc   :  { %12404 = vmatprep.subr.bf16.mxu1 %v16438_v7  ;;  %v16520_v7 = vld [vmem:[#allocation19 + $0x220] ss:$24 sps:$4 sm:$0xff]  }
 0x9fe   :  { %12282 = vmatpush1.bf16.msra.mxu0 %v16433_v0  ;;  %v16525_v0 = vld [vmem:[#allocation19 + $0x254] ss:$24 sps:$4 sm:$0xff]  }
 0x9ff   :  { %12405 = vmatpush1.bf16.msra.mxu1 %v16436_v24  ;;  %12283 = vmatprep.subr.bf16.mxu0 %v16441_v1  ;;  %v16523_v24 = vld [vmem:[#allocation19 + $0x250] ss:$24 sps:$4 sm:$0xff]   ;;  %v16528_v1 = vld [vmem:[#allocation19 + $0x284] ss:$24 sps:$4 sm:$0xff]  }
 0xa00   :  { %12406 = vmatprep.subr.bf16.mxu1 %v16444_v41  ;;  %v16526_v41 = vld [vmem:[#allocation19 + $0x280] ss:$24 sps:$4 sm:$0xff]  }
 0xa02   :  { %12284 = vmatpush1.bf16.msra.mxu0 %v16439_v3  ;;  %v16531_v3 = vld [vmem:[#allocation19 + $0x2b4] ss:$24 sps:$4 sm:$0xff]  }
 0xa03   :  { %12407 = vmatpush1.bf16.msra.mxu1 %v16442_v22  ;;  %12285 = vmatprep.subr.bf16.mxu0 %v16447_v47  ;;  %v16529_v22 = vld [vmem:[#allocation19 + $0x2b0] ss:$24 sps:$4 sm:$0xff]   ;;  %v16534_v47 = vld [vmem:[#allocation19 + $0x2e4] ss:$24 sps:$4 sm:$0xff]  }
 0xa04   :  { %12408 = vmatprep.subr.bf16.mxu1 %v16450_v59  ;;  %v16532_v59 = vld [vmem:[#allocation19 + $0x2e0] ss:$24 sps:$4 sm:$0xff]  }
 0xa06   :  { %12286 = vmatpush1.bf16.msra.mxu0 %v16445_v46  ;;  %v16537_v46 = vld [vmem:[#allocation19 + $0x314] ss:$24 sps:$4 sm:$0xff]  }
 0xa07   :  { %12409 = vmatpush1.bf16.msra.mxu1 %v16448_v5  ;;  %12287 = vmatprep.subr.bf16.mxu0 %v16453_v17  ;;  %v16535_v5 = vld [vmem:[#allocation19 + $0x310] ss:$24 sps:$4 sm:$0xff]   ;;  %v16540_v17 = vld [vmem:[#allocation19 + $0x344] ss:$24 sps:$4 sm:$0xff]  }
 0xa08   :  { %12410 = vmatprep.subr.bf16.mxu1 %v16456_v29  ;;  %v16538_v29 = vld [vmem:[#allocation19 + $0x340] ss:$24 sps:$4 sm:$0xff]  }
 0xa0a   :  { %12288 = vmatpush1.bf16.msra.mxu0 %v16451_v35  ;;  %v16543_v35 = vld [vmem:[#allocation19 + $0x374] ss:$24 sps:$4 sm:$0xff]  }
 0xa0b   :  { %12411 = vmatpush1.bf16.msra.mxu1 %v16454_v60  ;;  %12289 = vmatprep.subr.bf16.mxu0 %v16459_v63  ;;  %v16541_v60 = vld [vmem:[#allocation19 + $0x370] ss:$24 sps:$4 sm:$0xff]   ;;  %v16546_v63 = vld [vmem:[#allocation19 + $0x3a4] ss:$24 sps:$4 sm:$0xff]  }
 0xa0c   :  { %12412 = vmatprep.subr.bf16.mxu1 %v16462_v6  ;;  %v16544_v6 = vld [vmem:[#allocation19 + $0x3a0] ss:$24 sps:$4 sm:$0xff]  }
 0xa0e   :  { %12290 = vmatpush1.bf16.msra.mxu0 %v16457_v44  ;;  %v16549_v44 = vld [vmem:[#allocation19 + $0x3d4] ss:$24 sps:$4 sm:$0xff]  }
 0xa0f   :  { %12413 = vmatpush1.bf16.msra.mxu1 %v16460_v36  ;;  %12291 = vmatprep.subr.bf16.mxu0 %v16465_v10  ;;  %v16547_v36 = vld [vmem:[#allocation19 + $0x3d0] ss:$24 sps:$4 sm:$0xff]   ;;  %v16552_v10 = vld [vmem:[#allocation19 + $0x404] ss:$24 sps:$4 sm:$0xff]  }
 0xa10   :  { %12414 = vmatprep.subr.bf16.mxu1 %v16468_v11  ;;  %v16555_v11 = vld [vmem:[#allocation19 + $0x434] ss:$24 sps:$4 sm:$0xff]  }
 0xa12   :  { %12292 = vmatpush1.bf16.msra.mxu0 %v16463_v52  ;;  %v16558_v52 = vld [vmem:[#allocation19 + $0x464] ss:$24 sps:$4 sm:$0xff]  }
 0xa13   :  { %12415 = vmatpush1.bf16.msra.mxu1 %v16466_v12  ;;  %12293 = vmatprep.subr.bf16.mxu0 %v16471_v14  ;;  %v16556_v12 = vld [vmem:[#allocation19 + $0x460] ss:$24 sps:$4 sm:$0xff]   ;;  %v16561_v14 = vld [vmem:[#allocation19 + $0x494] ss:$24 sps:$4 sm:$0xff]  }
 0xa14   :  { %12416 = vmatprep.subr.bf16.mxu1 %v16474_v55  ;;  %v16559_v55 = vld [vmem:[#allocation19 + $0x490] ss:$24 sps:$4 sm:$0xff]  }
 0xa16   :  { %12294 = vmatpush1.bf16.msra.mxu0 %v16469_v26  ;;  %v16564_v26 = vld [vmem:[#allocation19 + $0x4c4] ss:$24 sps:$4 sm:$0xff]  }
 0xa17   :  { %12417 = vmatpush1.bf16.msra.mxu1 %v16472_v25  ;;  %12295 = vmatprep.subr.bf16.mxu0 %v16477_v39  ;;  %v16562_v25 = vld [vmem:[#allocation19 + $0x4c0] ss:$24 sps:$4 sm:$0xff]   ;;  %v16567_v39 = vld [vmem:[#allocation19 + $0x4f4] ss:$24 sps:$4 sm:$0xff]  }
 0xa18   :  { %12418 = vmatprep.subr.bf16.mxu1 %v16480_v42  ;;  %v16565_v42 = vld [vmem:[#allocation19 + $0x4f0] ss:$24 sps:$4 sm:$0xff]  }
 0xa1a   :  { %12296 = vmatpush1.bf16.msra.mxu0 %v16475_v16  ;;  %v16570_v16 = vld [vmem:[#allocation19 + $0x524] ss:$24 sps:$4 sm:$0xff]  }
 0xa1b   :  { %12419 = vmatpush1.bf16.msra.mxu1 %v16478_v21  ;;  %12297 = vmatprep.subr.bf16.mxu0 %v16483_v32  ;;  %v16568_v21 = vld [vmem:[#allocation19 + $0x520] ss:$24 sps:$4 sm:$0xff]   ;;  %v16573_v32 = vld [vmem:[#allocation19 + $0x554] ss:$24 sps:$4 sm:$0xff]  }
 0xa1c   :  { %12420 = vmatprep.subr.bf16.mxu1 %v16486_v51  ;;  %v16571_v51 = vld [vmem:[#allocation19 + $0x550] ss:$24 sps:$4 sm:$0xff]  }
 0xa1e   :  { %12298 = vmatpush1.bf16.msra.mxu0 %v16481_v20  ;;  %v16576_v20 = vld [vmem:[#allocation19 + $0x584] ss:$24 sps:$4 sm:$0xff]  }
 0xa1f   :  { %12421 = vmatpush1.bf16.msra.mxu1 %v16484_v40  ;;  %12431 = vmatprep.subr.bf16.mxu0 %v16489_v27  ;;  %v16574_v40 = vld [vmem:[#allocation19 + $0x580] ss:$24 sps:$4 sm:$0xff]   ;;  %v16579_v27 = vld [vmem:[#allocation19 + $0x5b4] ss:$24 sps:$4 sm:$0xff]  }
 0xa21   :  { %12300 = vmatmul.mubr.bf16.vlgmr.msra.gmra.mrb[84].mxu0 %v17677_v28 }
 0xa22   :  { %12423 = vmatmul.mubr.bf16.vlgmr.msra.gmra.mrb[100].mxu1 %v17677_v28  ;;  %12432 = vmatpush1.bf16.msra.mxu0 %v16487_v30  ;;  %v16577_v30 = vld [vmem:[#allocation19 + $0x5b0] ss:$24 sps:$4 sm:$0xff]  }
 0xa23   :  { %12463 = vmatprep.mubr.bf16.mxu0 %v17645_v31  ;;  %12433 = vmatprep.subr.bf16.mxu0 %v16492_v8  ;;  %v16505_v31 = vld [vmem:[#allocation19 + $0x130] ss:$24 sps:$4 sm:$0xff]   ;;  %v16582_v8 = vld [vmem:[#allocation19 + $0x5e4] ss:$24 sps:$4 sm:$0xff]  }
 0xa26   :  { %12434 = vmatpush1.bf16.msra.mxu0 %v16490_v33  ;;  %v16580_v33 = vld [vmem:[#allocation19 + $0x5e0] ss:$24 sps:$4 sm:$0xff]  }
 0xa27   :  { %12435 = vmatprep.subr.bf16.mxu0 %v16495_v23  ;;  %v16585_v23 = vld [vmem:[#allocation19 + $0x614] ss:$24 sps:$4 sm:$0xff]  }
 0xa2a   :  { %12436 = vmatpush1.bf16.msra.mxu0 %v16493_v15  ;;  %v16583_v15 = vld [vmem:[#allocation19 + $0x610] ss:$24 sps:$4 sm:$0xff]  }
 0xa2b   :  { %12437 = vmatprep.subr.bf16.mxu0 %v16498_v45  ;;  %v16588_v45 = vld [vmem:[#allocation19 + $0x644] ss:$24 sps:$4 sm:$0xff]  }
 0xa2e   :  { %12438 = vmatpush1.bf16.msra.mxu0 %v16496_v53  ;;  %v16586_v53 = vld [vmem:[#allocation19 + $0x640] ss:$24 sps:$4 sm:$0xff]  }
 0xa2f   :  { %12439 = vmatprep.subr.bf16.mxu0 %v16501_v13  ;;  %v16591_v13 = vld [vmem:[#allocation19 + $0x674] ss:$24 sps:$4 sm:$0xff]  }
 0xa32   :  { %12440 = vmatpush1.bf16.msra.mxu0 %v16499_v49  ;;  %v16589_v49 = vld [vmem:[#allocation19 + $0x670] ss:$24 sps:$4 sm:$0xff]  }
 0xa33   :  { %12441 = vmatprep.subr.bf16.mxu0 %v16504_v34  ;;  %v16594_v34 = vld [vmem:[#allocation19 + $0x6a4] ss:$24 sps:$4 sm:$0xff]  }
 0xa36   :  { %12442 = vmatpush1.bf16.msra.mxu0 %v16502_v4  ;;  %v16592_v4 = vld [vmem:[#allocation19 + $0x6a0] ss:$24 sps:$4 sm:$0xff]  }
 0xa37   :  { %12443 = vmatprep.subr.bf16.mxu0 %v16507_v57  ;;  %v16597_v57 = vld [vmem:[#allocation19 + $0x6d4] ss:$24 sps:$4 sm:$0xff]  }
 0xa3a   :  { %12444 = vmatpush1.bf16.msra.mxu0 %v16505_v31  ;;  %v16595_v31 = vld [vmem:[#allocation19 + $0x6d0] ss:$24 sps:$4 sm:$0xff]  }
 0xa3b   :  { %12445 = vmatprep.subr.bf16.mxu0 %v16510_v19  ;;  %v16600_v19 = vld [vmem:[#allocation19 + $0x704] ss:$24 sps:$4 sm:$0xff]  }
 0xa3e   :  { %12446 = vmatpush1.bf16.msra.mxu0 %v16508_v50  ;;  %v16603_v50 = vld [vmem:[#allocation19 + $0x734] ss:$24 sps:$4 sm:$0xff]  }
 0xa3f   :  { %12447 = vmatprep.subr.bf16.mxu0 %v16513_v2  ;;  %v16606_v2 = vld [vmem:[#allocation19 + $0x764] ss:$24 sps:$4 sm:$0xff]  }
 0xa42   :  { %12448 = vmatpush1.bf16.msra.mxu0 %v16511_v48  ;;  %v16604_v48 = vld [vmem:[#allocation19 + $0x760] ss:$24 sps:$4 sm:$0xff]  }
 0xa43   :  { %12449 = vmatprep.subr.bf16.mxu0 %v16516_v58  ;;  %v16609_v58 = vld [vmem:[#allocation19 + $0x794] ss:$24 sps:$4 sm:$0xff]  }
 0xa46   :  { %12450 = vmatpush1.bf16.msra.mxu0 %v16514_v62  ;;  %v16607_v62 = vld [vmem:[#allocation19 + $0x790] ss:$24 sps:$4 sm:$0xff]  }
 0xa47   :  { %12451 = vmatprep.subr.bf16.mxu0 %v16519_v54  ;;  %v16612_v54 = vld [vmem:[#allocation19 + $0x7c4] ss:$24 sps:$4 sm:$0xff]  }
 0xa4a   :  { %12452 = vmatpush1.bf16.msra.mxu0 %v16517_v61  ;;  %v16610_v61 = vld [vmem:[#allocation19 + $0x7c0] ss:$24 sps:$4 sm:$0xff]  }
 0xa4b   :  { %12453 = vmatprep.subr.bf16.mxu0 %v16522_v43  ;;  %v16615_v43 = vld [vmem:[#allocation19 + $0x7f4] ss:$24 sps:$4 sm:$0xff]  }
 0xa4e   :  { %12454 = vmatpush1.bf16.msra.mxu0 %v16520_v7  ;;  %v16613_v7 = vld [vmem:[#allocation19 + $0x7f0] ss:$24 sps:$4 sm:$0xff]  }
 0xa4f   :  { %12455 = vmatprep.subr.bf16.mxu0 %v16525_v0  ;;  %v16618_v0 = vld [vmem:[#allocation19 + $0x824] ss:$24 sps:$4 sm:$0xff]  }
 0xa52   :  { %12456 = vmatpush1.bf16.msra.mxu0 %v16523_v24  ;;  %v16616_v24 = vld [vmem:[#allocation19 + $0x820] ss:$24 sps:$4 sm:$0xff]  }
 0xa53   :  { %12457 = vmatprep.subr.bf16.mxu0 %v16528_v1  ;;  %v16621_v1 = vld [vmem:[#allocation19 + $0x854] ss:$24 sps:$4 sm:$0xff]  }
 0xa56   :  { %12458 = vmatpush1.bf16.msra.mxu0 %v16526_v41  ;;  %v16619_v41 = vld [vmem:[#allocation19 + $0x850] ss:$24 sps:$4 sm:$0xff]  }
 0xa57   :  { %12459 = vmatprep.subr.bf16.mxu0 %v16531_v3  ;;  %v16624_v3 = vld [vmem:[#allocation19 + $0x884] ss:$24 sps:$4 sm:$0xff]  }
 0xa5a   :  { %12460 = vmatpush1.bf16.msra.mxu0 %v16529_v22  ;;  %v16622_v22 = vld [vmem:[#allocation19 + $0x880] ss:$24 sps:$4 sm:$0xff]  }
 0xa5b   :  { %12461 = vmatprep.subr.bf16.mxu0 %v16534_v47  ;;  %v16627_v47 = vld [vmem:[#allocation19 + $0x8b4] ss:$24 sps:$4 sm:$0xff]  }
 0xa5e   :  { %12462 = vmatpush1.bf16.msra.mxu0 %v16532_v59  ;;  %v16625_v59 = vld [vmem:[#allocation19 + $0x8b0] ss:$24 sps:$4 sm:$0xff]  }
 0xa5f   :  { %12472 = vmatprep.subr.bf16.mxu0 %v16537_v46  ;;  %v16630_v46 = vld [vmem:[#allocation19 + $0x8e4] ss:$24 sps:$4 sm:$0xff]  }
 0xa61   :  { %12464 = vmatmul.mubr.bf16.vlgmr.msra.gmra.mrb[88].mxu0 %v17647_v9  ;;  %v16550_v9 = vld [vmem:[#allocation19 + $0x400] ss:$24 sps:$4 sm:$0xff]  }
 0xa62   :  { %12473 = vmatpush1.bf16.msra.mxu0 %v16535_v5  ;;  %12504 = vmatprep.mubr.bf16.mxu0 %v17655_v18  ;;  %v16553_v18 = vld [vmem:[#allocation19 + $0x430] ss:$24 sps:$4 sm:$0xff]   ;;  %v16628_v5 = vld [vmem:[#allocation19 + $0x8e0] ss:$24 sps:$4 sm:$0xff]  }
 0xa63   :  { %12474 = vmatprep.subr.bf16.mxu0 %v16540_v17  ;;  %v10723_v17 = vsub.s32 4, %v17361_v37 }
 0xa66   :  { %12475 = vmatpush1.bf16.msra.mxu0 %v16538_v29  ;;  %v16972_v29 = vmov 1983009808  }
 0xa67   :  { %12476 = vmatprep.subr.bf16.mxu0 %v16543_v35  ;;  %v12563_v35 = vunpack.c.l.s4 %v16972_v29 }
 0xa6a   :  { %12477 = vmatpush1.bf16.msra.mxu0 %v16541_v60  ;;  %v16641_v60 = vld [vmem:[#allocation20] sm:$0x1f] }
 0xa6b   :  { %12478 = vmatprep.subr.bf16.mxu0 %v16546_v63  ;;  %v10724_v63 = vrot.slane %v16641_v60, %v10723_v17 }
 0xa6e   :  { %12479 = vmatpush1.bf16.msra.mxu0 %v16544_v6  ;;  %v16642_v6 = vld [vmem:[#allocation20 + $0x10] sm:$0x1f] }
 0xa6f   :  { %12480 = vmatprep.subr.bf16.mxu0 %v16549_v44  ;;  %v10732_v44 = vrot.slane %v16642_v6, %v10723_v17 }
 0xa72   :  { %12481 = vmatpush1.bf16.msra.mxu0 %v16547_v36  ;;  %v16643_v36 = vld [vmem:[#allocation20 + $0x8] sm:$0x1f] }
 0xa73   :  { %12482 = vmatprep.subr.bf16.mxu0 %v16552_v10  ;;  %v10728_v10 = vrot.slane %v16643_v36, %v10723_v17 }
 0xa76   :  { %12483 = vmatpush1.bf16.msra.mxu0 %v16550_v9  ;;  %v12564_v9 = vunpack.c.0.s8 %v12563_v35 }
 0xa77   :  { %12484 = vmatprep.subr.bf16.mxu0 %v16555_v11  ;;  %v16644_v11 = vld [vmem:[#allocation20 + $0x18] sm:$0x1f] }
 0xa7a   :  { %12485 = vmatpush1.bf16.msra.mxu0 %v16553_v18  ;;  %v10736_v18 = vrot.slane %v16644_v11, %v10723_v17 }
 0xa7b   :  { %12486 = vmatprep.subr.bf16.mxu0 %v16558_v52 }
 0xa7e   :  { %12487 = vmatpush1.bf16.msra.mxu0 %v16556_v12 }
 0xa7f   :  { %12488 = vmatprep.subr.bf16.mxu0 %v16561_v14 }
 0xa82   :  { %12489 = vmatpush1.bf16.msra.mxu0 %v16559_v55 }
 0xa83   :  { %12490 = vmatprep.subr.bf16.mxu0 %v16564_v26 }
 0xa86   :  { %12491 = vmatpush1.bf16.msra.mxu0 %v16562_v25 }
 0xa87   :  { %12492 = vmatprep.subr.bf16.mxu0 %v16567_v39 }
 0xa8a   :  { %12493 = vmatpush1.bf16.msra.mxu0 %v16565_v42 }
 0xa8b   :  { %12494 = vmatprep.subr.bf16.mxu0 %v16570_v16 }
 0xa8e   :  { %12495 = vmatpush1.bf16.msra.mxu0 %v16568_v21 }
 0xa8f   :  { %12496 = vmatprep.subr.bf16.mxu0 %v16573_v32 }
 0xa92   :  { %12497 = vmatpush1.bf16.msra.mxu0 %v16571_v51 }
 0xa93   :  { %12498 = vmatprep.subr.bf16.mxu0 %v16576_v20 }
 0xa96   :  { %12499 = vmatpush1.bf16.msra.mxu0 %v16574_v40 }
 0xa97   :  { %12500 = vmatprep.subr.bf16.mxu0 %v16579_v27 }
 0xa9a   :  { %12501 = vmatpush1.bf16.msra.mxu0 %v16577_v30 }
 0xa9b   :  { %12502 = vmatprep.subr.bf16.mxu0 %v16582_v8 }
 0xa9e   :  { %12503 = vmatpush1.bf16.msra.mxu0 %v16580_v33  ;;  %v16645_v33 = vld [vmem:[#allocation20 + $0x20] sm:$0x1f] }
 0xa9f   :  { %12513 = vmatprep.subr.bf16.mxu0 %v16585_v23  ;;  %v10740_v23 = vrot.slane %v16645_v33, %v10723_v17 }
 0xaa1   :  { %12505 = vmatmul.mubr.bf16.vlgmr.msra.gmra.mrb[88].mxu0 %v17665_v38  ;;  %v16598_v38 = vld [vmem:[#allocation19 + $0x700] ss:$24 sps:$4 sm:$0xff]  }
 0xaa2   :  { %12514 = vmatpush1.bf16.msra.mxu0 %v16583_v15  ;;  %12545 = vmatprep.mubr.bf16.mxu0 %v17669_v56  ;;  %v16601_v56 = vld [vmem:[#allocation19 + $0x730] ss:$24 sps:$4 sm:$0xff]  }
 0xaa3   :  { %12515 = vmatprep.subr.bf16.mxu0 %v16588_v45  ;;  %v16646_v15 = vld [vmem:[#allocation20 + $0x28] sm:$0x1f] }
 0xaa4   :  { %v10744_v45 = vrot.slane %v16646_v15, %v10723_v17 }
 0xaa6   :  { %12516 = vmatpush1.bf16.msra.mxu0 %v16586_v53 }
 0xaa7   :  { %12517 = vmatprep.subr.bf16.mxu0 %v16591_v13 }
 0xaaa   :  { %12518 = vmatpush1.bf16.msra.mxu0 %v16589_v49 }
 0xaab   :  { %12519 = vmatprep.subr.bf16.mxu0 %v16594_v34 }
 0xaae   :  { %12520 = vmatpush1.bf16.msra.mxu0 %v16592_v4 }
 0xaaf   :  { %12521 = vmatprep.subr.bf16.mxu0 %v16597_v57 }
 0xab2   :  { %12522 = vmatpush1.bf16.msra.mxu0 %v16595_v31 }
 0xab3   :  { %12523 = vmatprep.subr.bf16.mxu0 %v16600_v19 }
 0xab6   :  { %12524 = vmatpush1.bf16.msra.mxu0 %v16598_v38 }
 0xab7   :  { %12525 = vmatprep.subr.bf16.mxu0 %v16603_v50 }
 0xaba   :  { %12526 = vmatpush1.bf16.msra.mxu0 %v16601_v56 }
 0xabb   :  { %12527 = vmatprep.subr.bf16.mxu0 %v16606_v2 }
 0xabe   :  { %12528 = vmatpush1.bf16.msra.mxu0 %v16604_v48 }
 0xabf   :  { %12529 = vmatprep.subr.bf16.mxu0 %v16609_v58 }
 0xac2   :  { %12530 = vmatpush1.bf16.msra.mxu0 %v16607_v62 }
 0xac3   :  { %12531 = vmatprep.subr.bf16.mxu0 %v16612_v54 }
 0xac6   :  { %12532 = vmatpush1.bf16.msra.mxu0 %v16610_v61 }
 0xac7   :  { %12533 = vmatprep.subr.bf16.mxu0 %v16615_v43 }
 0xaca   :  { %12534 = vmatpush1.bf16.msra.mxu0 %v16613_v7 }
 0xacb   :  { %12535 = vmatprep.subr.bf16.mxu0 %v16618_v0 }
 0xace   :  { %12536 = vmatpush1.bf16.msra.mxu0 %v16616_v24 }
 0xacf   :  { %12537 = vmatprep.subr.bf16.mxu0 %v16621_v1 }
 0xad2   :  { %12538 = vmatpush1.bf16.msra.mxu0 %v16619_v41 }
 0xad3   :  { %12539 = vmatprep.subr.bf16.mxu0 %v16624_v3 }
 0xad6   :  { %12540 = vmatpush1.bf16.msra.mxu0 %v16622_v22 }
 0xad7   :  { %12541 = vmatprep.subr.bf16.mxu0 %v16627_v47 }
 0xada   :  { %12542 = vmatpush1.bf16.msra.mxu0 %v16625_v59 }
 0xadb   :  { %12543 = vmatprep.subr.bf16.mxu0 %v16630_v46 }
 0xade   :  { %12544 = vmatpush1.bf16.msra.mxu0 %v16628_v5 }
 0xae1   :  { %12546 = vmatmul.mubr.bf16.vlgmr.msra.gmra.mrb[88].mxu0 %v17677_v28  ;;  %v12567_v28 = vsub.s32 %v12564_v9, %v17361_v37 }
 0xaf4   :  { %v12301_v52 = vpop.f32.mrb[84].mxu0 }
 0xaf5   :  { %v14232_v12 = vadd.f32 %v12301_v52, %v10724_v63  ;;  %v12424_v14 = vpop.f32.mrb[100].mxu1  ;;  %v12303_v55 = vpop.f32.mrb[85].mxu0 }
 0xaf6   :  { %v14234_v26 = vadd.f32 %v12424_v14, %v10732_v44  ;;  %v14233_v25 = vadd.f32 %v12303_v55, %v10728_v10  ;;  %v12426_v39 = vpop.f32.mrb[101].mxu1  ;;  %v12305_v42 = vpop.f32.mrb[86].mxu0 }
 0xaf7   :  { %v14235_v16 = vadd.f32 %v12426_v39, %v10736_v18  ;;  %v12428_v21 = vpop.f32.mrb[102].mxu1  ;;  %v12306_v32 = vpop.f32.mrb[87].mxu0 }
 0xaf8   :  { %v12560_v51 = vcombine.low %v14232_v12, %v14233_v25  ;;  %v12429_v20 = vpop.f32.mrb[103].mxu1 }
 0xaf9   :  { %v12561_v40 = vcombine.low %v14234_v26, %v14235_v16 }
 0xafa   :  { %v12568_v27 = vrot.slane %v12560_v51, %v12567_v28 }
 0xafb   :  { %v12575_v30 = vrot.slane %v12561_v40, %v12567_v28 }
 0xafd   :  { %v12576_v8 = vcombine.low %v12568_v27, %v12575_v30 }
 0xaff   :  { %12587 = vst [vmem:[#allocation22] sm:$0xff] %v12576_v8 }
 0xbb4   :  { %v12547_v53 = vpop.f32.mrb[88].mxu0 }
 0xbb5   :  { %v14236_v13 = vadd.f32 %v12547_v53, %v10740_v23  ;;  %v12549_v49 = vpop.f32.mrb[89].mxu0 }
 0xbb6   :  { %v14237_v37 = vadd.f32 %v12549_v49, %v10744_v45  ;;  %v12551_v34 = vpop.f32.mrb[90].mxu0 }
 0xbb7   :  { %v12552_v4 = vpop.f32.mrb[91].mxu0 }
 0xbb8   :  { %v12577_v57 = vcombine.low %v14236_v13, %v14237_v37 }
 0xbba   :  { %14177 = vst.sshfl [vmem:[#allocation22 + $0x8] sm:$0x33 pattern:$0x76325410] %v12577_v57 }
 0xbbb   :  { %16922 = shalt.err (!%p16919_p2)
}
 0xbbc   :  { %s16923_s23 = scalar_lea.hbm %s17714_s13, 192 }
 0xbbd   :  { %p16924_p3 = scmp.ne.s32.totalorder %s17714_s13, %s16923_s23  ;;  %p16927_p4 = scmp.lt.u32.totalorder %s16923_s23, %s17714_s13 }
 0xbbf   :  { %p16929_p5 = pnand %p16927_p4, %p16924_p3 }
 0xbc1   :  { %16932 = shalt.err (!%p16929_p5)
}
 0xbc2   :  { %12598 = dma.vmem_to_hbm [thread:$0]  %s12596_s17, 192, %s17714_s13, [#allocation4]  }
 0xbc3   :  { %16947 = dma.done.wait [#allocation4], 192  }
 0xbc4   :  { %16948 = vsyncadd [#allocation4], 4294967104 }
 0xbc5   :  { %12602 = vsyncpa [#allocation3], 1 }
 0xbc6   :  { %12603 = vsyncpa [#allocation6], 1 }
 0xbc7   :  { %12604 = vsyncpa [#allocation9], 1 }
 0xbc8   :  { %12605 = vsyncpa [#allocation12], 1 }
 0xbc9   :  { %12606 = vsyncpa [#allocation15], 1 }
 0xbca   :  { %12607 = vsyncpa [#allocation18], 1 }
 0xbcb   :  { %12608 = vsyncpa [#allocation21], 1 }
 0xbcc   :  { %12609 = vsyncpa [#allocation4], 1 }

</bundles_post_ra>
